<compile_context>
chip_gen: v6e
topology: v6e:2x2x1
jax: 0.10.0
libtpu: 0.0.40
codegen_flags: <defaults>
</compile_context>

<pallas_src>
import functools

import jax
import jax.numpy as jnp
from jax.experimental import pallas as pl
from jax.experimental.pallas import tpu as pltpu


def _round_up(x, m):
    return (x + m - 1) // m * m


def _sigmoid_via_tanh(x):
    # sigmoid(x) == 0.5 * (1 + tanh(0.5 * x)): one EUP op instead of exp + recip.
    return 0.5 * jnp.tanh(0.5 * x) + 0.5


# ---------------------------------------------------------------------------
# Recurrent Pallas kernel: one grid step == up to t_blk timesteps of one
# batch block.  Grid = (batch_blocks [parallel], time_blocks [arbitrary]).
# ---------------------------------------------------------------------------
def _lstm_recurrence_kernel(xp_ref, wh_ref, b_ref, y_ref, hT_ref, cT_ref,
                            h_sc, c_sc, *, t_blk, hidden_p, rem):
    tb = pl.program_id(1)                 # time-block index (innermost, serial)
    nt = pl.num_programs(1)
    Hp = hidden_p
    b_blk = h_sc.shape[0]

    # zero-initialize carry at the first time block (initial_state=None)
    @pl.when(tb == 0)
    def _():
        h_sc[...] = jnp.zeros_like(h_sc)
        c_sc[...] = jnp.zeros_like(c_sc)

    # bias broadcast hoisted out of the unrolled loop (broadcast_in_dim not CSE'd)
    bias = jnp.broadcast_to(b_ref[...], (b_blk, 4 * Hp)).astype(jnp.float32)

    def run_steps(n_steps):
        def body(t, carry):
            h, c = carry                                      # (b_blk, Hp) f32
            xp_t = xp_ref[t].astype(jnp.float32)              # bf16 in HBM -> f32
            proj = xp_t + bias + jnp.dot(h, wh_ref[...],
                                         preferred_element_type=jnp.float32)
            # AugmentedLstm gate order: input, forget, memory, output
            # (lane-aligned slices; Hp is a multiple of 128)
            i_g = _sigmoid_via_tanh(proj[:, 0 * Hp:1 * Hp])
            f_g = _sigmoid_via_tanh(proj[:, 1 * Hp:2 * Hp])
            g_g = jnp.tanh(proj[:, 2 * Hp:3 * Hp])
            o_g = _sigmoid_via_tanh(proj[:, 3 * Hp:4 * Hp])
            c_new = i_g * g_g + f_g * c
            h_new = o_g * jnp.tanh(c_new)
            y_ref[t] = h_new.astype(y_ref.dtype)
            return h_new, c_new

        h_fin, c_fin = jax.lax.fori_loop(0, n_steps, body,
                                         (h_sc[...], c_sc[...]), unroll=True)
        h_sc[...] = h_fin
        c_sc[...] = c_fin
        return h_fin

    if rem == 0:
        # seq_len divides t_blk: no per-timestep masking anywhere.
        run_steps(t_blk)
    else:
        @pl.when(tb != nt - 1)
        def _():
            run_steps(t_blk)                # full blocks: unmasked fast path

        @pl.when(tb == nt - 1)
        def _():
            h_fin = run_steps(rem)          # only valid timesteps advance state
            h_pad = h_fin.astype(y_ref.dtype)
            for t in range(rem, t_blk):     # fill trailing padded rows (trimmed later)
                y_ref[t] = h_pad

    # final (h, c) of this layer; bb-constant-in-time out_spec -> single writeback
    @pl.when(tb == nt - 1)
    def _():
        hT_ref[...] = h_sc[...]
        cT_ref[...] = c_sc[...]


def _lstm_recurrence(xp, w_hh_t, bias, *, seq_len, t_blk, b_blk, hidden_p):
    """xp: (S_pad, Bp, 4Hp) bf16 (x-projection, bias NOT folded in),
    w_hh_t: (Hp, 4Hp) f32, bias: (1, 4Hp) f32."""
    S_pad, Bp, _ = xp.shape
    Hp = hidden_p
    rem = seq_len % t_blk
    kernel = functools.partial(_lstm_recurrence_kernel, t_blk=t_blk,
                               hidden_p=Hp, rem=rem)

    y, hT, cT = pl.pallas_call(
        kernel,
        out_shape=(jax.ShapeDtypeStruct((S_pad, Bp, Hp), jnp.bfloat16),
                   jax.ShapeDtypeStruct((Bp, Hp), jnp.float32),
                   jax.ShapeDtypeStruct((Bp, Hp), jnp.float32)),
        grid_spec=pltpu.PrefetchScalarGridSpec(
            num_scalar_prefetch=0,
            grid=(Bp // b_blk, S_pad // t_blk),
            in_specs=[
                pl.BlockSpec((t_blk, b_blk, 4 * Hp), lambda bb, tb: (tb, bb, 0)),
                pl.BlockSpec((Hp, 4 * Hp), lambda bb, tb: (0, 0)),
                pl.BlockSpec((1, 4 * Hp), lambda bb, tb: (0, 0)),
            ],
            out_specs=(
                pl.BlockSpec((t_blk, b_blk, Hp), lambda bb, tb: (tb, bb, 0)),
                pl.BlockSpec((b_blk, Hp), lambda bb, tb: (bb, 0)),
                pl.BlockSpec((b_blk, Hp), lambda bb, tb: (bb, 0)),
            ),
            scratch_shapes=[pltpu.VMEM((b_blk, Hp), jnp.float32),
                            pltpu.VMEM((b_blk, Hp), jnp.float32)]),
        compiler_params=pltpu.CompilerParams(
            dimension_semantics=("parallel", "arbitrary")),   # time is serial
    )(xp, w_hh_t, bias)
    return y, hT, cT


# ---------------------------------------------------------------------------
# Parameters (PyTorch AugmentedLstm layout), plus one-time padding/prepacking.
# ---------------------------------------------------------------------------
def init_lstm_decoder_params(key, input_dim, hidden_dim, num_layers):
    """Synthetic params with AugmentedLstm shapes: W_ih (4H, D) no bias,
    W_hh (4H, H) with bias (4H,)."""
    params = []
    in_dim = input_dim
    for _ in range(num_layers):
        key, k1, k2, k3 = jax.random.split(key, 4)
        w_ih = jax.random.normal(k1, (4 * hidden_dim, in_dim), jnp.float32) * 0.1
        w_hh = jax.random.normal(k2, (4 * hidden_dim, hidden_dim), jnp.float32) * 0.1
        b_hh = jax.random.normal(k3, (4 * hidden_dim,), jnp.float32) * 0.1
        params.append((w_ih, w_hh, b_hh))
        in_dim = hidden_dim
    return params


def prepare_params(raw_params, hidden_dim, hidden_p):
    """Transpose and gate-wise pad H -> Hp with zeros (lane-dense gate slices).
    Padded gate columns have zero weights/bias, so padded h/c stay exactly 0."""
    prepared = []
    for li, (w_ih, w_hh, b_hh) in enumerate(raw_params):
        in_dim = w_ih.shape[1]

        def pad_gate_cols(w_t):                       # (in, 4H) -> (in, 4Hp)
            d = w_t.shape[0]
            w4 = w_t.reshape(d, 4, hidden_dim)
            w4 = jnp.pad(w4, ((0, 0), (0, 0), (0, hidden_p - hidden_dim)))
            return w4.reshape(d, 4 * hidden_p)

        w_ih_t = pad_gate_cols(w_ih.T)                # (in_dim, 4Hp)
        if li > 0:                                    # upstream h is Hp-wide
            w_ih_t = jnp.pad(w_ih_t, ((0, hidden_p - in_dim), (0, 0)))
        w_hh_t = pad_gate_cols(w_hh.T)                # (H, 4Hp)
        w_hh_t = jnp.pad(w_hh_t, ((0, hidden_p - hidden_dim), (0, 0)))   # (Hp, 4Hp)
        bias = jnp.pad(b_hh.reshape(4, hidden_dim),
                       ((0, 0), (0, hidden_p - hidden_dim))).reshape(1, 4 * hidden_p)
        prepared.append((w_ih_t.astype(jnp.float32),
                         w_hh_t.astype(jnp.float32),
                         bias.astype(jnp.float32)))
    return prepared


# ---------------------------------------------------------------------------
# Forward pass (matches LSTMDecoder.forward with initial_state=None).
# ---------------------------------------------------------------------------
def lstm_decoder_forward(x_bsd, prepared_params, hidden_dim, t_blk=32, b_blk=None):
    """x_bsd: [batch, seq, input_dim]
    returns (output [batch, seq, hidden],
             (final_h [num_layers*batch, hidden], final_c [num_layers*batch, hidden]))."""
    B, S, _ = x_bsd.shape
    Hp = prepared_params[0][1].shape[0]               # rows of W_hh_t = padded hidden
    Bp = _round_up(B, 8)
    if b_blk is None:
        # Expose >=2 "parallel" batch blocks for megacore (v7x) only when the
        # batch is big enough; otherwise keep a single block (single-TC v5e/v6e,
        # tiny batches) to avoid extra grid-step overhead.
        b_blk = Bp // 2 if (Bp % 32 == 0) else Bp
    S_pad = _round_up(S, t_blk)
    x_p = jnp.pad(x_bsd, ((0, Bp - B), (0, S_pad - S), (0, 0)))

    final_h, final_c = [], []
    cur = None                                        # time-major (S_pad, Bp, Hp) bf16
    for li, (w_ih_t, w_hh_t, bias) in enumerate(prepared_params):
        if li == 0:
            # hoisted input projection; batch-first -> time-major folded into the matmul
            xp = jnp.einsum('bsd,dh->sbh', x_p, w_ih_t,
                            preferred_element_type=jnp.float32)
        else:
            xp = jnp.einsum('sbd,dh->sbh', cur.astype(jnp.float32), w_ih_t,
                            preferred_element_type=jnp.float32)
        xp = xp.astype(jnp.bfloat16)                  # bf16 HBM stream; f32 bias added in-kernel
        cur, hT, cT = _lstm_recurrence(xp, w_hh_t, bias, seq_len=S,
                                       t_blk=t_blk, b_blk=b_blk, hidden_p=Hp)
        # layer_dropout with p=0.0 is identity -> nothing to apply
        final_h.append(hT[:B, :hidden_dim])
        final_c.append(cT[:B, :hidden_dim])

    y = jnp.transpose(cur[:S, :B, :hidden_dim], (1, 0, 2)).astype(jnp.float32)
    return y, (jnp.concatenate(final_h, axis=0), jnp.concatenate(final_c, axis=0))


# ---------------------------------------------------------------------------
# Pure-JAX reference (f32), for a tolerance check of the padded/blocked kernel.
# ---------------------------------------------------------------------------
def _reference_forward(x_bsd, raw_params):
    x = jnp.transpose(x_bsd, (1, 0, 2))
    Bref = x.shape[1]
    outs = x
    fh, fc = [], []
    for (w_ih, w_hh, b) in raw_params:
        H = w_hh.shape[1]

        def step(carry, x_t):
            h, c = carry
            proj = x_t @ w_ih.T + h @ w_hh.T + b
            i = jax.nn.sigmoid(proj[:, 0 * H:1 * H])
            f = jax.nn.sigmoid(proj[:, 1 * H:2 * H])
            g = jnp.tanh(proj[:, 2 * H:3 * H])
            o = jax.nn.sigmoid(proj[:, 3 * H:4 * H])
            c = i * g + f * c
            h = o * jnp.tanh(c)
            return (h, c), h

        (hT, cT), ys = jax.lax.scan(
            step, (jnp.zeros((Bref, H), jnp.float32),
                   jnp.zeros((Bref, H), jnp.float32)), outs)
        outs = ys
        fh.append(hT)
        fc.append(cT)
    return (jnp.transpose(outs, (1, 0, 2)),
            (jnp.concatenate(fh, 0), jnp.concatenate(fc, 0)))


if __name__ == "__main__":
    # seq=24 with t_blk=16 exercises both the carry across time blocks and the
    # pl.when-gated partial final block.
    batch, seq, input_dim, hidden_dim, num_layers = 2, 24, 16, 32, 2
    t_blk = 16

    key = jax.random.PRNGKey(0)
    key, kx = jax.random.split(key)
    x = jax.random.normal(kx, (batch, seq, input_dim), jnp.float32)

    raw_params = init_lstm_decoder_params(key, input_dim, hidden_dim, num_layers)
    hidden_p = _round_up(hidden_dim, 128)             # lane-dense gate width
    params = prepare_params(raw_params, hidden_dim, hidden_p)

    fwd = jax.jit(lstm_decoder_forward,
                  static_argnames=("hidden_dim", "t_blk", "b_blk"))
    y, (final_h, final_c) = fwd(x, params, hidden_dim=hidden_dim, t_blk=t_blk)
    jax.block_until_ready((y, final_h, final_c))

    assert y.shape == (batch, seq, hidden_dim)
    assert final_h.shape == (num_layers * batch, hidden_dim)
    assert final_c.shape == (num_layers * batch, hidden_dim)

    # correctness vs pure-JAX f32 reference (kernel stores xp/y in bf16 -> tolerance)
    y_ref, (fh_ref, fc_ref) = _reference_forward(x, raw_params)
    assert bool(jnp.allclose(y, y_ref, rtol=5e-2, atol=5e-2))
    assert bool(jnp.allclose(final_h, fh_ref, rtol=5e-2, atol=5e-2))
    assert bool(jnp.allclose(final_c, fc_ref, rtol=5e-2, atol=5e-2))

    print("KERNEL_OK")
</pallas_src>

<mosaic_0001>
module attributes {stable_mosaic.version = 11 : i64} {
  func.func @_lstm_recurrence_kernel(%arg0: i32, %arg1: i32, %arg2: memref<16x8x512xbf16, #tpu.memory_space<vmem>>, %arg3: memref<128x512xf32, #tpu.memory_space<vmem>>, %arg4: memref<1x512xf32, #tpu.memory_space<vmem>>, %arg5: memref<16x8x128xbf16, #tpu.memory_space<vmem>>, %arg6: memref<8x128xf32, #tpu.memory_space<vmem>>, %arg7: memref<8x128xf32, #tpu.memory_space<vmem>>, %arg8: memref<8x128xf32, #tpu.memory_space<vmem>>, %arg9: memref<8x128xf32, #tpu.memory_space<vmem>>) attributes {dimension_semantics = [#tpu.dimension_semantics<parallel>, #tpu.dimension_semantics<arbitrary>], iteration_bounds = array<i64: 1, 2>, scalar_prefetch = 0 : i64, scratch_operands = 2 : i64, tpu.core_type = #tpu.core_type<tc>, window_params = [{transform_indices = @transform_0, window_bounds = array<i64: 16, 8, 512>}, {pipeline_mode = #tpu.pipeline_mode<synchronous>, transform_indices = @transform_1, window_bounds = array<i64: 128, 512>}, {pipeline_mode = #tpu.pipeline_mode<synchronous>, transform_indices = @transform_2, window_bounds = array<i64: 1, 512>}, {transform_indices = @transform_3, window_bounds = array<i64: 16, 8, 128>}, {transform_indices = @transform_4, window_bounds = array<i64: 8, 128>}, {transform_indices = @transform_5, window_bounds = array<i64: 8, 128>}]} {
    %c0_i32 = arith.constant 0 : i32
    %0 = arith.cmpi eq, %arg1, %c0_i32 : i32
    %1 = arith.extui %0 : i1 to i32
    %c0_i32_0 = arith.constant 0 : i32
    %2 = arith.cmpi ne, %1, %c0_i32_0 : i32
    scf.if %2 {
      %cst = arith.constant 0.000000e+00 : f32
      %15 = vector.broadcast %cst : f32 to vector<8x128xf32>
      %c0_7 = arith.constant 0 : index
      %c0_8 = arith.constant 0 : index
      %16 = vector.load %arg8[%c0_7, %c0_8] : memref<8x128xf32, #tpu.memory_space<vmem>>, vector<8x128xf32>
      tpu.vector_store %arg8[%c0_7, %c0_8], %15 {strides = array<i32>} : memref<8x128xf32, #tpu.memory_space<vmem>>, vector<8x128xf32>,
      %cst_9 = arith.constant 0.000000e+00 : f32
      %17 = vector.broadcast %cst_9 : f32 to vector<8x128xf32>
      %c0_10 = arith.constant 0 : index
      %c0_11 = arith.constant 0 : index
      %18 = vector.load %arg9[%c0_10, %c0_11] : memref<8x128xf32, #tpu.memory_space<vmem>>, vector<8x128xf32>
      tpu.vector_store %arg9[%c0_10, %c0_11], %17 {strides = array<i32>} : memref<8x128xf32, #tpu.memory_space<vmem>>, vector<8x128xf32>,
    } else {
    }
    %c0 = arith.constant 0 : index
    %c0_1 = arith.constant 0 : index
    %3 = vector.load %arg4[%c0, %c0_1] : memref<1x512xf32, #tpu.memory_space<vmem>>, vector<1x512xf32>
    %4 = vector.shape_cast %3 : vector<1x512xf32> to vector<1x512xf32>
    %5 = vector.broadcast %4 : vector<1x512xf32> to vector<8x512xf32>
    %c1_i32 = arith.constant 1 : i32
    %6 = arith.cmpi ne, %arg1, %c1_i32 : i32
    %7 = arith.extui %6 : i1 to i32
    %c0_i32_2 = arith.constant 0 : i32
    %8 = arith.cmpi ne, %7, %c0_i32_2 : i32
    scf.if %8 {
      %c0_7 = arith.constant 0 : index
      %c0_8 = arith.constant 0 : index
      %15 = vector.load %arg8[%c0_7, %c0_8] : memref<8x128xf32, #tpu.memory_space<vmem>>, vector<8x128xf32>
      %c0_9 = arith.constant 0 : index
      %c0_10 = arith.constant 0 : index
      %16 = vector.load %arg9[%c0_9, %c0_10] : memref<8x128xf32, #tpu.memory_space<vmem>>, vector<8x128xf32>
      %c0_i32_11 = arith.constant 0 : i32
      %17 = arith.index_cast %c0_i32_11 : i32 to index
      %c0_12 = arith.constant 0 : index
      %c0_13 = arith.constant 0 : index
      %18 = vector.load %arg2[%17, %c0_12, %c0_13] : memref<16x8x512xbf16, #tpu.memory_space<vmem>>, vector<1x8x512xbf16>
      %19 = vector.shape_cast %18 : vector<1x8x512xbf16> to vector<8x512xbf16>
      %20 = arith.extf %19 : vector<8x512xbf16> to vector<8x512xf32>
      %21 = arith.addf %20, %5 : vector<8x512xf32>
      %c0_14 = arith.constant 0 : index
      %c0_15 = arith.constant 0 : index
      %22 = vector.load %arg3[%c0_14, %c0_15] : memref<128x512xf32, #tpu.memory_space<vmem>>, vector<128x512xf32>
      %cst = arith.constant dense<0.000000e+00> : vector<8x512xf32>
      %23 = tpu.matmul %15, %22, %cst {dimension_numbers = #tpu.dot_dimension_numbers<[1], [0], [0], [1], [0, 0, 1, 1], [], []>} : vector<8x128xf32>, vector<128x512xf32>, vector<8x512xf32> -> vector<8x512xf32>
      %24 = arith.addf %21, %23 : vector<8x512xf32>
      %25 = vector.extract_strided_slice %24 {offsets = [0, 0], sizes = [8, 128], strides = [1, 1]} : vector<8x512xf32> to vector<8x128xf32>
      %cst_16 = arith.constant 5.000000e-01 : f32
      %26 = vector.broadcast %cst_16 : f32 to vector<8x128xf32>
      %27 = arith.mulf %26, %25 : vector<8x128xf32>
      %28 = math.tanh %27 : vector<8x128xf32>
      %cst_17 = arith.constant 5.000000e-01 : f32
      %29 = vector.broadcast %cst_17 : f32 to vector<8x128xf32>
      %30 = arith.mulf %29, %28 : vector<8x128xf32>
      %cst_18 = arith.constant 5.000000e-01 : f32
      %31 = vector.broadcast %cst_18 : f32 to vector<8x128xf32>
      %32 = arith.addf %30, %31 : vector<8x128xf32>
      %33 = vector.extract_strided_slice %24 {offsets = [0, 128], sizes = [8, 128], strides = [1, 1]} : vector<8x512xf32> to vector<8x128xf32>
      %cst_19 = arith.constant 5.000000e-01 : f32
      %34 = vector.broadcast %cst_19 : f32 to vector<8x128xf32>
      %35 = arith.mulf %34, %33 : vector<8x128xf32>
      %36 = math.tanh %35 : vector<8x128xf32>
      %cst_20 = arith.constant 5.000000e-01 : f32
      %37 = vector.broadcast %cst_20 : f32 to vector<8x128xf32>
      %38 = arith.mulf %37, %36 : vector<8x128xf32>
      %cst_21 = arith.constant 5.000000e-01 : f32
      %39 = vector.broadcast %cst_21 : f32 to vector<8x128xf32>
      %40 = arith.addf %38, %39 : vector<8x128xf32>
      %41 = vector.extract_strided_slice %24 {offsets = [0, 256], sizes = [8, 128], strides = [1, 1]} : vector<8x512xf32> to vector<8x128xf32>
      %42 = math.tanh %41 : vector<8x128xf32>
      %43 = vector.extract_strided_slice %24 {offsets = [0, 384], sizes = [8, 128], strides = [1, 1]} : vector<8x512xf32> to vector<8x128xf32>
      %cst_22 = arith.constant 5.000000e-01 : f32
      %44 = vector.broadcast %cst_22 : f32 to vector<8x128xf32>
      %45 = arith.mulf %44, %43 : vector<8x128xf32>
      %46 = math.tanh %45 : vector<8x128xf32>
      %cst_23 = arith.constant 5.000000e-01 : f32
      %47 = vector.broadcast %cst_23 : f32 to vector<8x128xf32>
      %48 = arith.mulf %47, %46 : vector<8x128xf32>
      %cst_24 = arith.constant 5.000000e-01 : f32
      %49 = vector.broadcast %cst_24 : f32 to vector<8x128xf32>
      %50 = arith.addf %48, %49 : vector<8x128xf32>
      %51 = arith.mulf %32, %42 : vector<8x128xf32>
      %52 = arith.mulf %40, %16 : vector<8x128xf32>
      %53 = arith.addf %51, %52 : vector<8x128xf32>
      %54 = math.tanh %53 : vector<8x128xf32>
      %55 = arith.mulf %50, %54 : vector<8x128xf32>
      %56 = arith.truncf %55 : vector<8x128xf32> to vector<8x128xbf16>
      %57 = arith.index_cast %c0_i32_11 : i32 to index
      %c0_25 = arith.constant 0 : index
      %c0_26 = arith.constant 0 : index
      %58 = vector.load %arg5[%57, %c0_25, %c0_26] : memref<16x8x128xbf16, #tpu.memory_space<vmem>>, vector<1x8x128xbf16>
      %59 = vector.shape_cast %58 : vector<1x8x128xbf16> to vector<8x128xbf16>
      %60 = vector.shape_cast %56 : vector<8x128xbf16> to vector<1x8x128xbf16>
      tpu.vector_store %arg5[%57, %c0_25, %c0_26], %60 {strides = array<i32>} : memref<16x8x128xbf16, #tpu.memory_space<vmem>>, vector<1x8x128xbf16>,
      %c1_i32_27 = arith.constant 1 : i32
      %61 = arith.index_cast %c1_i32_27 : i32 to index
      %c0_28 = arith.constant 0 : index
      %c0_29 = arith.constant 0 : index
      %62 = vector.load %arg2[%61, %c0_28, %c0_29] : memref<16x8x512xbf16, #tpu.memory_space<vmem>>, vector<1x8x512xbf16>
      %63 = vector.shape_cast %62 : vector<1x8x512xbf16> to vector<8x512xbf16>
      %64 = arith.extf %63 : vector<8x512xbf16> to vector<8x512xf32>
      %65 = arith.addf %64, %5 : vector<8x512xf32>
      %c0_30 = arith.constant 0 : index
      %c0_31 = arith.constant 0 : index
      %66 = vector.load %arg3[%c0_30, %c0_31] : memref<128x512xf32, #tpu.memory_space<vmem>>, vector<128x512xf32>
      %cst_32 = arith.constant dense<0.000000e+00> : vector<8x512xf32>
      %67 = tpu.matmul %55, %66, %cst_32 {dimension_numbers = #tpu.dot_dimension_numbers<[1], [0], [0], [1], [0, 0, 1, 1], [], []>} : vector<8x128xf32>, vector<128x512xf32>, vector<8x512xf32> -> vector<8x512xf32>
      %68 = arith.addf %65, %67 : vector<8x512xf32>
      %69 = vector.extract_strided_slice %68 {offsets = [0, 0], sizes = [8, 128], strides = [1, 1]} : vector<8x512xf32> to vector<8x128xf32>
      %cst_33 = arith.constant 5.000000e-01 : f32
      %70 = vector.broadcast %cst_33 : f32 to vector<8x128xf32>
      %71 = arith.mulf %70, %69 : vector<8x128xf32>
      %72 = math.tanh %71 : vector<8x128xf32>
      %cst_34 = arith.constant 5.000000e-01 : f32
      %73 = vector.broadcast %cst_34 : f32 to vector<8x128xf32>
      %74 = arith.mulf %73, %72 : vector<8x128xf32>
      %cst_35 = arith.constant 5.000000e-01 : f32
      %75 = vector.broadcast %cst_35 : f32 to vector<8x128xf32>
      %76 = arith.addf %74, %75 : vector<8x128xf32>
      %77 = vector.extract_strided_slice %68 {offsets = [0, 128], sizes = [8, 128], strides = [1, 1]} : vector<8x512xf32> to vector<8x128xf32>
      %cst_36 = arith.constant 5.000000e-01 : f32
      %78 = vector.broadcast %cst_36 : f32 to vector<8x128xf32>
      %79 = arith.mulf %78, %77 : vector<8x128xf32>
      %80 = math.tanh %79 : vector<8x128xf32>
      %cst_37 = arith.constant 5.000000e-01 : f32
      %81 = vector.broadcast %cst_37 : f32 to vector<8x128xf32>
      %82 = arith.mulf %81, %80 : vector<8x128xf32>
      %cst_38 = arith.constant 5.000000e-01 : f32
      %83 = vector.broadcast %cst_38 : f32 to vector<8x128xf32>
      %84 = arith.addf %82, %83 : vector<8x128xf32>
      %85 = vector.extract_strided_slice %68 {offsets = [0, 256], sizes = [8, 128], strides = [1, 1]} : vector<8x512xf32> to vector<8x128xf32>
      %86 = math.tanh %85 : vector<8x128xf32>
      %87 = vector.extract_strided_slice %68 {offsets = [0, 384], sizes = [8, 128], strides = [1, 1]} : vector<8x512xf32> to vector<8x128xf32>
      %cst_39 = arith.constant 5.000000e-01 : f32
      %88 = vector.broadcast %cst_39 : f32 to vector<8x128xf32>
      %89 = arith.mulf %88, %87 : vector<8x128xf32>
      %90 = math.tanh %89 : vector<8x128xf32>
      %cst_40 = arith.constant 5.000000e-01 : f32
      %91 = vector.broadcast %cst_40 : f32 to vector<8x128xf32>
      %92 = arith.mulf %91, %90 : vector<8x128xf32>
      %cst_41 = arith.constant 5.000000e-01 : f32
      %93 = vector.broadcast %cst_41 : f32 to vector<8x128xf32>
      %94 = arith.addf %92, %93 : vector<8x128xf32>
      %95 = arith.mulf %76, %86 : vector<8x128xf32>
      %96 = arith.mulf %84, %53 : vector<8x128xf32>
      %97 = arith.addf %95, %96 : vector<8x128xf32>
      %98 = math.tanh %97 : vector<8x128xf32>
      %99 = arith.mulf %94, %98 : vector<8x128xf32>
      %100 = arith.truncf %99 : vector<8x128xf32> to vector<8x128xbf16>
      %101 = arith.index_cast %c1_i32_27 : i32 to index
      %c0_42 = arith.constant 0 : index
      %c0_43 = arith.constant 0 : index
      %102 = vector.load %arg5[%101, %c0_42, %c0_43] : memref<16x8x128xbf16, #tpu.memory_space<vmem>>, vector<1x8x128xbf16>
      %103 = vector.shape_cast %102 : vector<1x8x128xbf16> to vector<8x128xbf16>
      %104 = vector.shape_cast %100 : vector<8x128xbf16> to vector<1x8x128xbf16>
      tpu.vector_store %arg5[%101, %c0_42, %c0_43], %104 {strides = array<i32>} : memref<16x8x128xbf16, #tpu.memory_space<vmem>>, vector<1x8x128xbf16>,
      %c2_i32 = arith.constant 2 : i32
      %105 = arith.index_cast %c2_i32 : i32 to index
      %c0_44 = arith.constant 0 : index
      %c0_45 = arith.constant 0 : index
      %106 = vector.load %arg2[%105, %c0_44, %c0_45] : memref<16x8x512xbf16, #tpu.memory_space<vmem>>, vector<1x8x512xbf16>
      %107 = vector.shape_cast %106 : vector<1x8x512xbf16> to vector<8x512xbf16>
      %108 = arith.extf %107 : vector<8x512xbf16> to vector<8x512xf32>
      %109 = arith.addf %108, %5 : vector<8x512xf32>
      %c0_46 = arith.constant 0 : index
      %c0_47 = arith.constant 0 : index
      %110 = vector.load %arg3[%c0_46, %c0_47] : memref<128x512xf32, #tpu.memory_space<vmem>>, vector<128x512xf32>
      %cst_48 = arith.constant dense<0.000000e+00> : vector<8x512xf32>
      %111 = tpu.matmul %99, %110, %cst_48 {dimension_numbers = #tpu.dot_dimension_numbers<[1], [0], [0], [1], [0, 0, 1, 1], [], []>} : vector<8x128xf32>, vector<128x512xf32>, vector<8x512xf32> -> vector<8x512xf32>
      %112 = arith.addf %109, %111 : vector<8x512xf32>
      %113 = vector.extract_strided_slice %112 {offsets = [0, 0], sizes = [8, 128], strides = [1, 1]} : vector<8x512xf32> to vector<8x128xf32>
      %cst_49 = arith.constant 5.000000e-01 : f32
      %114 = vector.broadcast %cst_49 : f32 to vector<8x128xf32>
      %115 = arith.mulf %114, %113 : vector<8x128xf32>
      %116 = math.tanh %115 : vector<8x128xf32>
      %cst_50 = arith.constant 5.000000e-01 : f32
      %117 = vector.broadcast %cst_50 : f32 to vector<8x128xf32>
      %118 = arith.mulf %117, %116 : vector<8x128xf32>
      %cst_51 = arith.constant 5.000000e-01 : f32
      %119 = vector.broadcast %cst_51 : f32 to vector<8x128xf32>
      %120 = arith.addf %118, %119 : vector<8x128xf32>
      %121 = vector.extract_strided_slice %112 {offsets = [0, 128], sizes = [8, 128], strides = [1, 1]} : vector<8x512xf32> to vector<8x128xf32>
      %cst_52 = arith.constant 5.000000e-01 : f32
      %122 = vector.broadcast %cst_52 : f32 to vector<8x128xf32>
      %123 = arith.mulf %122, %121 : vector<8x128xf32>
      %124 = math.tanh %123 : vector<8x128xf32>
      %cst_53 = arith.constant 5.000000e-01 : f32
      %125 = vector.broadcast %cst_53 : f32 to vector<8x128xf32>
      %126 = arith.mulf %125, %124 : vector<8x128xf32>
      %cst_54 = arith.constant 5.000000e-01 : f32
      %127 = vector.broadcast %cst_54 : f32 to vector<8x128xf32>
      %128 = arith.addf %126, %127 : vector<8x128xf32>
      %129 = vector.extract_strided_slice %112 {offsets = [0, 256], sizes = [8, 128], strides = [1, 1]} : vector<8x512xf32> to vector<8x128xf32>
      %130 = math.tanh %129 : vector<8x128xf32>
      %131 = vector.extract_strided_slice %112 {offsets = [0, 384], sizes = [8, 128], strides = [1, 1]} : vector<8x512xf32> to vector<8x128xf32>
      %cst_55 = arith.constant 5.000000e-01 : f32
      %132 = vector.broadcast %cst_55 : f32 to vector<8x128xf32>
      %133 = arith.mulf %132, %131 : vector<8x128xf32>
      %134 = math.tanh %133 : vector<8x128xf32>
      %cst_56 = arith.constant 5.000000e-01 : f32
      %135 = vector.broadcast %cst_56 : f32 to vector<8x128xf32>
      %136 = arith.mulf %135, %134 : vector<8x128xf32>
      %cst_57 = arith.constant 5.000000e-01 : f32
      %137 = vector.broadcast %cst_57 : f32 to vector<8x128xf32>
      %138 = arith.addf %136, %137 : vector<8x128xf32>
      %139 = arith.mulf %120, %130 : vector<8x128xf32>
      %140 = arith.mulf %128, %97 : vector<8x128xf32>
      %141 = arith.addf %139, %140 : vector<8x128xf32>
      %142 = math.tanh %141 : vector<8x128xf32>
      %143 = arith.mulf %138, %142 : vector<8x128xf32>
      %144 = arith.truncf %143 : vector<8x128xf32> to vector<8x128xbf16>
      %145 = arith.index_cast %c2_i32 : i32 to index
      %c0_58 = arith.constant 0 : index
      %c0_59 = arith.constant 0 : index
      %146 = vector.load %arg5[%145, %c0_58, %c0_59] : memref<16x8x128xbf16, #tpu.memory_space<vmem>>, vector<1x8x128xbf16>
      %147 = vector.shape_cast %146 : vector<1x8x128xbf16> to vector<8x128xbf16>
      %148 = vector.shape_cast %144 : vector<8x128xbf16> to vector<1x8x128xbf16>
      tpu.vector_store %arg5[%145, %c0_58, %c0_59], %148 {strides = array<i32>} : memref<16x8x128xbf16, #tpu.memory_space<vmem>>, vector<1x8x128xbf16>,
      %c3_i32 = arith.constant 3 : i32
      %149 = arith.index_cast %c3_i32 : i32 to index
      %c0_60 = arith.constant 0 : index
      %c0_61 = arith.constant 0 : index
      %150 = vector.load %arg2[%149, %c0_60, %c0_61] : memref<16x8x512xbf16, #tpu.memory_space<vmem>>, vector<1x8x512xbf16>
      %151 = vector.shape_cast %150 : vector<1x8x512xbf16> to vector<8x512xbf16>
      %152 = arith.extf %151 : vector<8x512xbf16> to vector<8x512xf32>
      %153 = arith.addf %152, %5 : vector<8x512xf32>
      %c0_62 = arith.constant 0 : index
      %c0_63 = arith.constant 0 : index
      %154 = vector.load %arg3[%c0_62, %c0_63] : memref<128x512xf32, #tpu.memory_space<vmem>>, vector<128x512xf32>
      %cst_64 = arith.constant dense<0.000000e+00> : vector<8x512xf32>
      %155 = tpu.matmul %143, %154, %cst_64 {dimension_numbers = #tpu.dot_dimension_numbers<[1], [0], [0], [1], [0, 0, 1, 1], [], []>} : vector<8x128xf32>, vector<128x512xf32>, vector<8x512xf32> -> vector<8x512xf32>
      %156 = arith.addf %153, %155 : vector<8x512xf32>
      %157 = vector.extract_strided_slice %156 {offsets = [0, 0], sizes = [8, 128], strides = [1, 1]} : vector<8x512xf32> to vector<8x128xf32>
      %cst_65 = arith.constant 5.000000e-01 : f32
      %158 = vector.broadcast %cst_65 : f32 to vector<8x128xf32>
      %159 = arith.mulf %158, %157 : vector<8x128xf32>
      %160 = math.tanh %159 : vector<8x128xf32>
      %cst_66 = arith.constant 5.000000e-01 : f32
      %161 = vector.broadcast %cst_66 : f32 to vector<8x128xf32>
      %162 = arith.mulf %161, %160 : vector<8x128xf32>
      %cst_67 = arith.constant 5.000000e-01 : f32
      %163 = vector.broadcast %cst_67 : f32 to vector<8x128xf32>
      %164 = arith.addf %162, %163 : vector<8x128xf32>
      %165 = vector.extract_strided_slice %156 {offsets = [0, 128], sizes = [8, 128], strides = [1, 1]} : vector<8x512xf32> to vector<8x128xf32>
      %cst_68 = arith.constant 5.000000e-01 : f32
      %166 = vector.broadcast %cst_68 : f32 to vector<8x128xf32>
      %167 = arith.mulf %166, %165 : vector<8x128xf32>
      %168 = math.tanh %167 : vector<8x128xf32>
      %cst_69 = arith.constant 5.000000e-01 : f32
      %169 = vector.broadcast %cst_69 : f32 to vector<8x128xf32>
      %170 = arith.mulf %169, %168 : vector<8x128xf32>
      %cst_70 = arith.constant 5.000000e-01 : f32
      %171 = vector.broadcast %cst_70 : f32 to vector<8x128xf32>
      %172 = arith.addf %170, %171 : vector<8x128xf32>
      %173 = vector.extract_strided_slice %156 {offsets = [0, 256], sizes = [8, 128], strides = [1, 1]} : vector<8x512xf32> to vector<8x128xf32>
      %174 = math.tanh %173 : vector<8x128xf32>
      %175 = vector.extract_strided_slice %156 {offsets = [0, 384], sizes = [8, 128], strides = [1, 1]} : vector<8x512xf32> to vector<8x128xf32>
      %cst_71 = arith.constant 5.000000e-01 : f32
      %176 = vector.broadcast %cst_71 : f32 to vector<8x128xf32>
      %177 = arith.mulf %176, %175 : vector<8x128xf32>
      %178 = math.tanh %177 : vector<8x128xf32>
      %cst_72 = arith.constant 5.000000e-01 : f32
      %179 = vector.broadcast %cst_72 : f32 to vector<8x128xf32>
      %180 = arith.mulf %179, %178 : vector<8x128xf32>
      %cst_73 = arith.constant 5.000000e-01 : f32
      %181 = vector.broadcast %cst_73 : f32 to vector<8x128xf32>
      %182 = arith.addf %180, %181 : vector<8x128xf32>
      %183 = arith.mulf %164, %174 : vector<8x128xf32>
      %184 = arith.mulf %172, %141 : vector<8x128xf32>
      %185 = arith.addf %183, %184 : vector<8x128xf32>
      %186 = math.tanh %185 : vector<8x128xf32>
      %187 = arith.mulf %182, %186 : vector<8x128xf32>
      %188 = arith.truncf %187 : vector<8x128xf32> to vector<8x128xbf16>
      %189 = arith.index_cast %c3_i32 : i32 to index
      %c0_74 = arith.constant 0 : index
      %c0_75 = arith.constant 0 : index
      %190 = vector.load %arg5[%189, %c0_74, %c0_75] : memref<16x8x128xbf16, #tpu.memory_space<vmem>>, vector<1x8x128xbf16>
      %191 = vector.shape_cast %190 : vector<1x8x128xbf16> to vector<8x128xbf16>
      %192 = vector.shape_cast %188 : vector<8x128xbf16> to vector<1x8x128xbf16>
      tpu.vector_store %arg5[%189, %c0_74, %c0_75], %192 {strides = array<i32>} : memref<16x8x128xbf16, #tpu.memory_space<vmem>>, vector<1x8x128xbf16>,
      %c4_i32 = arith.constant 4 : i32
      %193 = arith.index_cast %c4_i32 : i32 to index
      %c0_76 = arith.constant 0 : index
      %c0_77 = arith.constant 0 : index
      %194 = vector.load %arg2[%193, %c0_76, %c0_77] : memref<16x8x512xbf16, #tpu.memory_space<vmem>>, vector<1x8x512xbf16>
      %195 = vector.shape_cast %194 : vector<1x8x512xbf16> to vector<8x512xbf16>
      %196 = arith.extf %195 : vector<8x512xbf16> to vector<8x512xf32>
      %197 = arith.addf %196, %5 : vector<8x512xf32>
      %c0_78 = arith.constant 0 : index
      %c0_79 = arith.constant 0 : index
      %198 = vector.load %arg3[%c0_78, %c0_79] : memref<128x512xf32, #tpu.memory_space<vmem>>, vector<128x512xf32>
      %cst_80 = arith.constant dense<0.000000e+00> : vector<8x512xf32>
      %199 = tpu.matmul %187, %198, %cst_80 {dimension_numbers = #tpu.dot_dimension_numbers<[1], [0], [0], [1], [0, 0, 1, 1], [], []>} : vector<8x128xf32>, vector<128x512xf32>, vector<8x512xf32> -> vector<8x512xf32>
      %200 = arith.addf %197, %199 : vector<8x512xf32>
      %201 = vector.extract_strided_slice %200 {offsets = [0, 0], sizes = [8, 128], strides = [1, 1]} : vector<8x512xf32> to vector<8x128xf32>
      %cst_81 = arith.constant 5.000000e-01 : f32
      %202 = vector.broadcast %cst_81 : f32 to vector<8x128xf32>
      %203 = arith.mulf %202, %201 : vector<8x128xf32>
      %204 = math.tanh %203 : vector<8x128xf32>
      %cst_82 = arith.constant 5.000000e-01 : f32
      %205 = vector.broadcast %cst_82 : f32 to vector<8x128xf32>
      %206 = arith.mulf %205, %204 : vector<8x128xf32>
      %cst_83 = arith.constant 5.000000e-01 : f32
      %207 = vector.broadcast %cst_83 : f32 to vector<8x128xf32>
      %208 = arith.addf %206, %207 : vector<8x128xf32>
      %209 = vector.extract_strided_slice %200 {offsets = [0, 128], sizes = [8, 128], strides = [1, 1]} : vector<8x512xf32> to vector<8x128xf32>
      %cst_84 = arith.constant 5.000000e-01 : f32
      %210 = vector.broadcast %cst_84 : f32 to vector<8x128xf32>
      %211 = arith.mulf %210, %209 : vector<8x128xf32>
      %212 = math.tanh %211 : vector<8x128xf32>
      %cst_85 = arith.constant 5.000000e-01 : f32
      %213 = vector.broadcast %cst_85 : f32 to vector<8x128xf32>
      %214 = arith.mulf %213, %212 : vector<8x128xf32>
      %cst_86 = arith.constant 5.000000e-01 : f32
      %215 = vector.broadcast %cst_86 : f32 to vector<8x128xf32>
      %216 = arith.addf %214, %215 : vector<8x128xf32>
      %217 = vector.extract_strided_slice %200 {offsets = [0, 256], sizes = [8, 128], strides = [1, 1]} : vector<8x512xf32> to vector<8x128xf32>
      %218 = math.tanh %217 : vector<8x128xf32>
      %219 = vector.extract_strided_slice %200 {offsets = [0, 384], sizes = [8, 128], strides = [1, 1]} : vector<8x512xf32> to vector<8x128xf32>
      %cst_87 = arith.constant 5.000000e-01 : f32
      %220 = vector.broadcast %cst_87 : f32 to vector<8x128xf32>
      %221 = arith.mulf %220, %219 : vector<8x128xf32>
      %222 = math.tanh %221 : vector<8x128xf32>
      %cst_88 = arith.constant 5.000000e-01 : f32
      %223 = vector.broadcast %cst_88 : f32 to vector<8x128xf32>
      %224 = arith.mulf %223, %222 : vector<8x128xf32>
      %cst_89 = arith.constant 5.000000e-01 : f32
      %225 = vector.broadcast %cst_89 : f32 to vector<8x128xf32>
      %226 = arith.addf %224, %225 : vector<8x128xf32>
      %227 = arith.mulf %208, %218 : vector<8x128xf32>
      %228 = arith.mulf %216, %185 : vector<8x128xf32>
      %229 = arith.addf %227, %228 : vector<8x128xf32>
      %230 = math.tanh %229 : vector<8x128xf32>
      %231 = arith.mulf %226, %230 : vector<8x128xf32>
      %232 = arith.truncf %231 : vector<8x128xf32> to vector<8x128xbf16>
      %233 = arith.index_cast %c4_i32 : i32 to index
      %c0_90 = arith.constant 0 : index
      %c0_91 = arith.constant 0 : index
      %234 = vector.load %arg5[%233, %c0_90, %c0_91] : memref<16x8x128xbf16, #tpu.memory_space<vmem>>, vector<1x8x128xbf16>
      %235 = vector.shape_cast %234 : vector<1x8x128xbf16> to vector<8x128xbf16>
      %236 = vector.shape_cast %232 : vector<8x128xbf16> to vector<1x8x128xbf16>
      tpu.vector_store %arg5[%233, %c0_90, %c0_91], %236 {strides = array<i32>} : memref<16x8x128xbf16, #tpu.memory_space<vmem>>, vector<1x8x128xbf16>,
      %c5_i32 = arith.constant 5 : i32
      %237 = arith.index_cast %c5_i32 : i32 to index
      %c0_92 = arith.constant 0 : index
      %c0_93 = arith.constant 0 : index
      %238 = vector.load %arg2[%237, %c0_92, %c0_93] : memref<16x8x512xbf16, #tpu.memory_space<vmem>>, vector<1x8x512xbf16>
      %239 = vector.shape_cast %238 : vector<1x8x512xbf16> to vector<8x512xbf16>
      %240 = arith.extf %239 : vector<8x512xbf16> to vector<8x512xf32>
      %241 = arith.addf %240, %5 : vector<8x512xf32>
      %c0_94 = arith.constant 0 : index
      %c0_95 = arith.constant 0 : index
      %242 = vector.load %arg3[%c0_94, %c0_95] : memref<128x512xf32, #tpu.memory_space<vmem>>, vector<128x512xf32>
      %cst_96 = arith.constant dense<0.000000e+00> : vector<8x512xf32>
      %243 = tpu.matmul %231, %242, %cst_96 {dimension_numbers = #tpu.dot_dimension_numbers<[1], [0], [0], [1], [0, 0, 1, 1], [], []>} : vector<8x128xf32>, vector<128x512xf32>, vector<8x512xf32> -> vector<8x512xf32>
      %244 = arith.addf %241, %243 : vector<8x512xf32>
      %245 = vector.extract_strided_slice %244 {offsets = [0, 0], sizes = [8, 128], strides = [1, 1]} : vector<8x512xf32> to vector<8x128xf32>
      %cst_97 = arith.constant 5.000000e-01 : f32
      %246 = vector.broadcast %cst_97 : f32 to vector<8x128xf32>
      %247 = arith.mulf %246, %245 : vector<8x128xf32>
      %248 = math.tanh %247 : vector<8x128xf32>
      %cst_98 = arith.constant 5.000000e-01 : f32
      %249 = vector.broadcast %cst_98 : f32 to vector<8x128xf32>
      %250 = arith.mulf %249, %248 : vector<8x128xf32>
      %cst_99 = arith.constant 5.000000e-01 : f32
      %251 = vector.broadcast %cst_99 : f32 to vector<8x128xf32>
      %252 = arith.addf %250, %251 : vector<8x128xf32>
      %253 = vector.extract_strided_slice %244 {offsets = [0, 128], sizes = [8, 128], strides = [1, 1]} : vector<8x512xf32> to vector<8x128xf32>
      %cst_100 = arith.constant 5.000000e-01 : f32
      %254 = vector.broadcast %cst_100 : f32 to vector<8x128xf32>
      %255 = arith.mulf %254, %253 : vector<8x128xf32>
      %256 = math.tanh %255 : vector<8x128xf32>
      %cst_101 = arith.constant 5.000000e-01 : f32
      %257 = vector.broadcast %cst_101 : f32 to vector<8x128xf32>
      %258 = arith.mulf %257, %256 : vector<8x128xf32>
      %cst_102 = arith.constant 5.000000e-01 : f32
      %259 = vector.broadcast %cst_102 : f32 to vector<8x128xf32>
      %260 = arith.addf %258, %259 : vector<8x128xf32>
      %261 = vector.extract_strided_slice %244 {offsets = [0, 256], sizes = [8, 128], strides = [1, 1]} : vector<8x512xf32> to vector<8x128xf32>
      %262 = math.tanh %261 : vector<8x128xf32>
      %263 = vector.extract_strided_slice %244 {offsets = [0, 384], sizes = [8, 128], strides = [1, 1]} : vector<8x512xf32> to vector<8x128xf32>
      %cst_103 = arith.constant 5.000000e-01 : f32
      %264 = vector.broadcast %cst_103 : f32 to vector<8x128xf32>
      %265 = arith.mulf %264, %263 : vector<8x128xf32>
      %266 = math.tanh %265 : vector<8x128xf32>
      %cst_104 = arith.constant 5.000000e-01 : f32
      %267 = vector.broadcast %cst_104 : f32 to vector<8x128xf32>
      %268 = arith.mulf %267, %266 : vector<8x128xf32>
      %cst_105 = arith.constant 5.000000e-01 : f32
      %269 = vector.broadcast %cst_105 : f32 to vector<8x128xf32>
      %270 = arith.addf %268, %269 : vector<8x128xf32>
      %271 = arith.mulf %252, %262 : vector<8x128xf32>
      %272 = arith.mulf %260, %229 : vector<8x128xf32>
      %273 = arith.addf %271, %272 : vector<8x128xf32>
      %274 = math.tanh %273 : vector<8x128xf32>
      %275 = arith.mulf %270, %274 : vector<8x128xf32>
      %276 = arith.truncf %275 : vector<8x128xf32> to vector<8x128xbf16>
      %277 = arith.index_cast %c5_i32 : i32 to index
      %c0_106 = arith.constant 0 : index
      %c0_107 = arith.constant 0 : index
      %278 = vector.load %arg5[%277, %c0_106, %c0_107] : memref<16x8x128xbf16, #tpu.memory_space<vmem>>, vector<1x8x128xbf16>
      %279 = vector.shape_cast %278 : vector<1x8x128xbf16> to vector<8x128xbf16>
      %280 = vector.shape_cast %276 : vector<8x128xbf16> to vector<1x8x128xbf16>
      tpu.vector_store %arg5[%277, %c0_106, %c0_107], %280 {strides = array<i32>} : memref<16x8x128xbf16, #tpu.memory_space<vmem>>, vector<1x8x128xbf16>,
      %c6_i32 = arith.constant 6 : i32
      %281 = arith.index_cast %c6_i32 : i32 to index
      %c0_108 = arith.constant 0 : index
      %c0_109 = arith.constant 0 : index
      %282 = vector.load %arg2[%281, %c0_108, %c0_109] : memref<16x8x512xbf16, #tpu.memory_space<vmem>>, vector<1x8x512xbf16>
      %283 = vector.shape_cast %282 : vector<1x8x512xbf16> to vector<8x512xbf16>
      %284 = arith.extf %283 : vector<8x512xbf16> to vector<8x512xf32>
      %285 = arith.addf %284, %5 : vector<8x512xf32>
      %c0_110 = arith.constant 0 : index
      %c0_111 = arith.constant 0 : index
      %286 = vector.load %arg3[%c0_110, %c0_111] : memref<128x512xf32, #tpu.memory_space<vmem>>, vector<128x512xf32>
      %cst_112 = arith.constant dense<0.000000e+00> : vector<8x512xf32>
      %287 = tpu.matmul %275, %286, %cst_112 {dimension_numbers = #tpu.dot_dimension_numbers<[1], [0], [0], [1], [0, 0, 1, 1], [], []>} : vector<8x128xf32>, vector<128x512xf32>, vector<8x512xf32> -> vector<8x512xf32>
      %288 = arith.addf %285, %287 : vector<8x512xf32>
      %289 = vector.extract_strided_slice %288 {offsets = [0, 0], sizes = [8, 128], strides = [1, 1]} : vector<8x512xf32> to vector<8x128xf32>
      %cst_113 = arith.constant 5.000000e-01 : f32
      %290 = vector.broadcast %cst_113 : f32 to vector<8x128xf32>
      %291 = arith.mulf %290, %289 : vector<8x128xf32>
      %292 = math.tanh %291 : vector<8x128xf32>
      %cst_114 = arith.constant 5.000000e-01 : f32
      %293 = vector.broadcast %cst_114 : f32 to vector<8x128xf32>
      %294 = arith.mulf %293, %292 : vector<8x128xf32>
      %cst_115 = arith.constant 5.000000e-01 : f32
      %295 = vector.broadcast %cst_115 : f32 to vector<8x128xf32>
      %296 = arith.addf %294, %295 : vector<8x128xf32>
      %297 = vector.extract_strided_slice %288 {offsets = [0, 128], sizes = [8, 128], strides = [1, 1]} : vector<8x512xf32> to vector<8x128xf32>
      %cst_116 = arith.constant 5.000000e-01 : f32
      %298 = vector.broadcast %cst_116 : f32 to vector<8x128xf32>
      %299 = arith.mulf %298, %297 : vector<8x128xf32>
      %300 = math.tanh %299 : vector<8x128xf32>
      %cst_117 = arith.constant 5.000000e-01 : f32
      %301 = vector.broadcast %cst_117 : f32 to vector<8x128xf32>
      %302 = arith.mulf %301, %300 : vector<8x128xf32>
      %cst_118 = arith.constant 5.000000e-01 : f32
      %303 = vector.broadcast %cst_118 : f32 to vector<8x128xf32>
      %304 = arith.addf %302, %303 : vector<8x128xf32>
      %305 = vector.extract_strided_slice %288 {offsets = [0, 256], sizes = [8, 128], strides = [1, 1]} : vector<8x512xf32> to vector<8x128xf32>
      %306 = math.tanh %305 : vector<8x128xf32>
      %307 = vector.extract_strided_slice %288 {offsets = [0, 384], sizes = [8, 128], strides = [1, 1]} : vector<8x512xf32> to vector<8x128xf32>
      %cst_119 = arith.constant 5.000000e-01 : f32
      %308 = vector.broadcast %cst_119 : f32 to vector<8x128xf32>
      %309 = arith.mulf %308, %307 : vector<8x128xf32>
      %310 = math.tanh %309 : vector<8x128xf32>
      %cst_120 = arith.constant 5.000000e-01 : f32
      %311 = vector.broadcast %cst_120 : f32 to vector<8x128xf32>
      %312 = arith.mulf %311, %310 : vector<8x128xf32>
      %cst_121 = arith.constant 5.000000e-01 : f32
      %313 = vector.broadcast %cst_121 : f32 to vector<8x128xf32>
      %314 = arith.addf %312, %313 : vector<8x128xf32>
      %315 = arith.mulf %296, %306 : vector<8x128xf32>
      %316 = arith.mulf %304, %273 : vector<8x128xf32>
      %317 = arith.addf %315, %316 : vector<8x128xf32>
      %318 = math.tanh %317 : vector<8x128xf32>
      %319 = arith.mulf %314, %318 : vector<8x128xf32>
      %320 = arith.truncf %319 : vector<8x128xf32> to vector<8x128xbf16>
      %321 = arith.index_cast %c6_i32 : i32 to index
      %c0_122 = arith.constant 0 : index
      %c0_123 = arith.constant 0 : index
      %322 = vector.load %arg5[%321, %c0_122, %c0_123] : memref<16x8x128xbf16, #tpu.memory_space<vmem>>, vector<1x8x128xbf16>
      %323 = vector.shape_cast %322 : vector<1x8x128xbf16> to vector<8x128xbf16>
      %324 = vector.shape_cast %320 : vector<8x128xbf16> to vector<1x8x128xbf16>
      tpu.vector_store %arg5[%321, %c0_122, %c0_123], %324 {strides = array<i32>} : memref<16x8x128xbf16, #tpu.memory_space<vmem>>, vector<1x8x128xbf16>,
      %c7_i32 = arith.constant 7 : i32
      %325 = arith.index_cast %c7_i32 : i32 to index
      %c0_124 = arith.constant 0 : index
      %c0_125 = arith.constant 0 : index
      %326 = vector.load %arg2[%325, %c0_124, %c0_125] : memref<16x8x512xbf16, #tpu.memory_space<vmem>>, vector<1x8x512xbf16>
      %327 = vector.shape_cast %326 : vector<1x8x512xbf16> to vector<8x512xbf16>
      %328 = arith.extf %327 : vector<8x512xbf16> to vector<8x512xf32>
      %329 = arith.addf %328, %5 : vector<8x512xf32>
      %c0_126 = arith.constant 0 : index
      %c0_127 = arith.constant 0 : index
      %330 = vector.load %arg3[%c0_126, %c0_127] : memref<128x512xf32, #tpu.memory_space<vmem>>, vector<128x512xf32>
      %cst_128 = arith.constant dense<0.000000e+00> : vector<8x512xf32>
      %331 = tpu.matmul %319, %330, %cst_128 {dimension_numbers = #tpu.dot_dimension_numbers<[1], [0], [0], [1], [0, 0, 1, 1], [], []>} : vector<8x128xf32>, vector<128x512xf32>, vector<8x512xf32> -> vector<8x512xf32>
      %332 = arith.addf %329, %331 : vector<8x512xf32>
      %333 = vector.extract_strided_slice %332 {offsets = [0, 0], sizes = [8, 128], strides = [1, 1]} : vector<8x512xf32> to vector<8x128xf32>
      %cst_129 = arith.constant 5.000000e-01 : f32
      %334 = vector.broadcast %cst_129 : f32 to vector<8x128xf32>
      %335 = arith.mulf %334, %333 : vector<8x128xf32>
      %336 = math.tanh %335 : vector<8x128xf32>
      %cst_130 = arith.constant 5.000000e-01 : f32
      %337 = vector.broadcast %cst_130 : f32 to vector<8x128xf32>
      %338 = arith.mulf %337, %336 : vector<8x128xf32>
      %cst_131 = arith.constant 5.000000e-01 : f32
      %339 = vector.broadcast %cst_131 : f32 to vector<8x128xf32>
      %340 = arith.addf %338, %339 : vector<8x128xf32>
      %341 = vector.extract_strided_slice %332 {offsets = [0, 128], sizes = [8, 128], strides = [1, 1]} : vector<8x512xf32> to vector<8x128xf32>
      %cst_132 = arith.constant 5.000000e-01 : f32
      %342 = vector.broadcast %cst_132 : f32 to vector<8x128xf32>
      %343 = arith.mulf %342, %341 : vector<8x128xf32>
      %344 = math.tanh %343 : vector<8x128xf32>
      %cst_133 = arith.constant 5.000000e-01 : f32
      %345 = vector.broadcast %cst_133 : f32 to vector<8x128xf32>
      %346 = arith.mulf %345, %344 : vector<8x128xf32>
      %cst_134 = arith.constant 5.000000e-01 : f32
      %347 = vector.broadcast %cst_134 : f32 to vector<8x128xf32>
      %348 = arith.addf %346, %347 : vector<8x128xf32>
      %349 = vector.extract_strided_slice %332 {offsets = [0, 256], sizes = [8, 128], strides = [1, 1]} : vector<8x512xf32> to vector<8x128xf32>
      %350 = math.tanh %349 : vector<8x128xf32>
      %351 = vector.extract_strided_slice %332 {offsets = [0, 384], sizes = [8, 128], strides = [1, 1]} : vector<8x512xf32> to vector<8x128xf32>
      %cst_135 = arith.constant 5.000000e-01 : f32
      %352 = vector.broadcast %cst_135 : f32 to vector<8x128xf32>
      %353 = arith.mulf %352, %351 : vector<8x128xf32>
      %354 = math.tanh %353 : vector<8x128xf32>
      %cst_136 = arith.constant 5.000000e-01 : f32
      %355 = vector.broadcast %cst_136 : f32 to vector<8x128xf32>
      %356 = arith.mulf %355, %354 : vector<8x128xf32>
      %cst_137 = arith.constant 5.000000e-01 : f32
      %357 = vector.broadcast %cst_137 : f32 to vector<8x128xf32>
      %358 = arith.addf %356, %357 : vector<8x128xf32>
      %359 = arith.mulf %340, %350 : vector<8x128xf32>
      %360 = arith.mulf %348, %317 : vector<8x128xf32>
      %361 = arith.addf %359, %360 : vector<8x128xf32>
      %362 = math.tanh %361 : vector<8x128xf32>
      %363 = arith.mulf %358, %362 : vector<8x128xf32>
      %364 = arith.truncf %363 : vector<8x128xf32> to vector<8x128xbf16>
      %365 = arith.index_cast %c7_i32 : i32 to index
      %c0_138 = arith.constant 0 : index
      %c0_139 = arith.constant 0 : index
      %366 = vector.load %arg5[%365, %c0_138, %c0_139] : memref<16x8x128xbf16, #tpu.memory_space<vmem>>, vector<1x8x128xbf16>
      %367 = vector.shape_cast %366 : vector<1x8x128xbf16> to vector<8x128xbf16>
      %368 = vector.shape_cast %364 : vector<8x128xbf16> to vector<1x8x128xbf16>
      tpu.vector_store %arg5[%365, %c0_138, %c0_139], %368 {strides = array<i32>} : memref<16x8x128xbf16, #tpu.memory_space<vmem>>, vector<1x8x128xbf16>,
      %c8_i32 = arith.constant 8 : i32
      %369 = arith.index_cast %c8_i32 : i32 to index
      %c0_140 = arith.constant 0 : index
      %c0_141 = arith.constant 0 : index
      %370 = vector.load %arg2[%369, %c0_140, %c0_141] : memref<16x8x512xbf16, #tpu.memory_space<vmem>>, vector<1x8x512xbf16>
      %371 = vector.shape_cast %370 : vector<1x8x512xbf16> to vector<8x512xbf16>
      %372 = arith.extf %371 : vector<8x512xbf16> to vector<8x512xf32>
      %373 = arith.addf %372, %5 : vector<8x512xf32>
      %c0_142 = arith.constant 0 : index
      %c0_143 = arith.constant 0 : index
      %374 = vector.load %arg3[%c0_142, %c0_143] : memref<128x512xf32, #tpu.memory_space<vmem>>, vector<128x512xf32>
      %cst_144 = arith.constant dense<0.000000e+00> : vector<8x512xf32>
      %375 = tpu.matmul %363, %374, %cst_144 {dimension_numbers = #tpu.dot_dimension_numbers<[1], [0], [0], [1], [0, 0, 1, 1], [], []>} : vector<8x128xf32>, vector<128x512xf32>, vector<8x512xf32> -> vector<8x512xf32>
      %376 = arith.addf %373, %375 : vector<8x512xf32>
      %377 = vector.extract_strided_slice %376 {offsets = [0, 0], sizes = [8, 128], strides = [1, 1]} : vector<8x512xf32> to vector<8x128xf32>
      %cst_145 = arith.constant 5.000000e-01 : f32
      %378 = vector.broadcast %cst_145 : f32 to vector<8x128xf32>
      %379 = arith.mulf %378, %377 : vector<8x128xf32>
      %380 = math.tanh %379 : vector<8x128xf32>
      %cst_146 = arith.constant 5.000000e-01 : f32
      %381 = vector.broadcast %cst_146 : f32 to vector<8x128xf32>
      %382 = arith.mulf %381, %380 : vector<8x128xf32>
      %cst_147 = arith.constant 5.000000e-01 : f32
      %383 = vector.broadcast %cst_147 : f32 to vector<8x128xf32>
      %384 = arith.addf %382, %383 : vector<8x128xf32>
      %385 = vector.extract_strided_slice %376 {offsets = [0, 128], sizes = [8, 128], strides = [1, 1]} : vector<8x512xf32> to vector<8x128xf32>
      %cst_148 = arith.constant 5.000000e-01 : f32
      %386 = vector.broadcast %cst_148 : f32 to vector<8x128xf32>
      %387 = arith.mulf %386, %385 : vector<8x128xf32>
      %388 = math.tanh %387 : vector<8x128xf32>
      %cst_149 = arith.constant 5.000000e-01 : f32
      %389 = vector.broadcast %cst_149 : f32 to vector<8x128xf32>
      %390 = arith.mulf %389, %388 : vector<8x128xf32>
      %cst_150 = arith.constant 5.000000e-01 : f32
      %391 = vector.broadcast %cst_150 : f32 to vector<8x128xf32>
      %392 = arith.addf %390, %391 : vector<8x128xf32>
      %393 = vector.extract_strided_slice %376 {offsets = [0, 256], sizes = [8, 128], strides = [1, 1]} : vector<8x512xf32> to vector<8x128xf32>
      %394 = math.tanh %393 : vector<8x128xf32>
      %395 = vector.extract_strided_slice %376 {offsets = [0, 384], sizes = [8, 128], strides = [1, 1]} : vector<8x512xf32> to vector<8x128xf32>
      %cst_151 = arith.constant 5.000000e-01 : f32
      %396 = vector.broadcast %cst_151 : f32 to vector<8x128xf32>
      %397 = arith.mulf %396, %395 : vector<8x128xf32>
      %398 = math.tanh %397 : vector<8x128xf32>
      %cst_152 = arith.constant 5.000000e-01 : f32
      %399 = vector.broadcast %cst_152 : f32 to vector<8x128xf32>
      %400 = arith.mulf %399, %398 : vector<8x128xf32>
      %cst_153 = arith.constant 5.000000e-01 : f32
      %401 = vector.broadcast %cst_153 : f32 to vector<8x128xf32>
      %402 = arith.addf %400, %401 : vector<8x128xf32>
      %403 = arith.mulf %384, %394 : vector<8x128xf32>
      %404 = arith.mulf %392, %361 : vector<8x128xf32>
      %405 = arith.addf %403, %404 : vector<8x128xf32>
      %406 = math.tanh %405 : vector<8x128xf32>
      %407 = arith.mulf %402, %406 : vector<8x128xf32>
      %408 = arith.truncf %407 : vector<8x128xf32> to vector<8x128xbf16>
      %409 = arith.index_cast %c8_i32 : i32 to index
      %c0_154 = arith.constant 0 : index
      %c0_155 = arith.constant 0 : index
      %410 = vector.load %arg5[%409, %c0_154, %c0_155] : memref<16x8x128xbf16, #tpu.memory_space<vmem>>, vector<1x8x128xbf16>
      %411 = vector.shape_cast %410 : vector<1x8x128xbf16> to vector<8x128xbf16>
      %412 = vector.shape_cast %408 : vector<8x128xbf16> to vector<1x8x128xbf16>
      tpu.vector_store %arg5[%409, %c0_154, %c0_155], %412 {strides = array<i32>} : memref<16x8x128xbf16, #tpu.memory_space<vmem>>, vector<1x8x128xbf16>,
      %c9_i32 = arith.constant 9 : i32
      %413 = arith.index_cast %c9_i32 : i32 to index
      %c0_156 = arith.constant 0 : index
      %c0_157 = arith.constant 0 : index
      %414 = vector.load %arg2[%413, %c0_156, %c0_157] : memref<16x8x512xbf16, #tpu.memory_space<vmem>>, vector<1x8x512xbf16>
      %415 = vector.shape_cast %414 : vector<1x8x512xbf16> to vector<8x512xbf16>
      %416 = arith.extf %415 : vector<8x512xbf16> to vector<8x512xf32>
      %417 = arith.addf %416, %5 : vector<8x512xf32>
      %c0_158 = arith.constant 0 : index
      %c0_159 = arith.constant 0 : index
      %418 = vector.load %arg3[%c0_158, %c0_159] : memref<128x512xf32, #tpu.memory_space<vmem>>, vector<128x512xf32>
      %cst_160 = arith.constant dense<0.000000e+00> : vector<8x512xf32>
      %419 = tpu.matmul %407, %418, %cst_160 {dimension_numbers = #tpu.dot_dimension_numbers<[1], [0], [0], [1], [0, 0, 1, 1], [], []>} : vector<8x128xf32>, vector<128x512xf32>, vector<8x512xf32> -> vector<8x512xf32>
      %420 = arith.addf %417, %419 : vector<8x512xf32>
      %421 = vector.extract_strided_slice %420 {offsets = [0, 0], sizes = [8, 128], strides = [1, 1]} : vector<8x512xf32> to vector<8x128xf32>
      %cst_161 = arith.constant 5.000000e-01 : f32
      %422 = vector.broadcast %cst_161 : f32 to vector<8x128xf32>
      %423 = arith.mulf %422, %421 : vector<8x128xf32>
      %424 = math.tanh %423 : vector<8x128xf32>
      %cst_162 = arith.constant 5.000000e-01 : f32
      %425 = vector.broadcast %cst_162 : f32 to vector<8x128xf32>
      %426 = arith.mulf %425, %424 : vector<8x128xf32>
      %cst_163 = arith.constant 5.000000e-01 : f32
      %427 = vector.broadcast %cst_163 : f32 to vector<8x128xf32>
      %428 = arith.addf %426, %427 : vector<8x128xf32>
      %429 = vector.extract_strided_slice %420 {offsets = [0, 128], sizes = [8, 128], strides = [1, 1]} : vector<8x512xf32> to vector<8x128xf32>
      %cst_164 = arith.constant 5.000000e-01 : f32
      %430 = vector.broadcast %cst_164 : f32 to vector<8x128xf32>
      %431 = arith.mulf %430, %429 : vector<8x128xf32>
      %432 = math.tanh %431 : vector<8x128xf32>
      %cst_165 = arith.constant 5.000000e-01 : f32
      %433 = vector.broadcast %cst_165 : f32 to vector<8x128xf32>
      %434 = arith.mulf %433, %432 : vector<8x128xf32>
      %cst_166 = arith.constant 5.000000e-01 : f32
      %435 = vector.broadcast %cst_166 : f32 to vector<8x128xf32>
      %436 = arith.addf %434, %435 : vector<8x128xf32>
      %437 = vector.extract_strided_slice %420 {offsets = [0, 256], sizes = [8, 128], strides = [1, 1]} : vector<8x512xf32> to vector<8x128xf32>
      %438 = math.tanh %437 : vector<8x128xf32>
      %439 = vector.extract_strided_slice %420 {offsets = [0, 384], sizes = [8, 128], strides = [1, 1]} : vector<8x512xf32> to vector<8x128xf32>
      %cst_167 = arith.constant 5.000000e-01 : f32
      %440 = vector.broadcast %cst_167 : f32 to vector<8x128xf32>
      %441 = arith.mulf %440, %439 : vector<8x128xf32>
      %442 = math.tanh %441 : vector<8x128xf32>
      %cst_168 = arith.constant 5.000000e-01 : f32
      %443 = vector.broadcast %cst_168 : f32 to vector<8x128xf32>
      %444 = arith.mulf %443, %442 : vector<8x128xf32>
      %cst_169 = arith.constant 5.000000e-01 : f32
      %445 = vector.broadcast %cst_169 : f32 to vector<8x128xf32>
      %446 = arith.addf %444, %445 : vector<8x128xf32>
      %447 = arith.mulf %428, %438 : vector<8x128xf32>
      %448 = arith.mulf %436, %405 : vector<8x128xf32>
      %449 = arith.addf %447, %448 : vector<8x128xf32>
      %450 = math.tanh %449 : vector<8x128xf32>
      %451 = arith.mulf %446, %450 : vector<8x128xf32>
      %452 = arith.truncf %451 : vector<8x128xf32> to vector<8x128xbf16>
      %453 = arith.index_cast %c9_i32 : i32 to index
      %c0_170 = arith.constant 0 : index
      %c0_171 = arith.constant 0 : index
      %454 = vector.load %arg5[%453, %c0_170, %c0_171] : memref<16x8x128xbf16, #tpu.memory_space<vmem>>, vector<1x8x128xbf16>
      %455 = vector.shape_cast %454 : vector<1x8x128xbf16> to vector<8x128xbf16>
      %456 = vector.shape_cast %452 : vector<8x128xbf16> to vector<1x8x128xbf16>
      tpu.vector_store %arg5[%453, %c0_170, %c0_171], %456 {strides = array<i32>} : memref<16x8x128xbf16, #tpu.memory_space<vmem>>, vector<1x8x128xbf16>,
      %c10_i32 = arith.constant 10 : i32
      %457 = arith.index_cast %c10_i32 : i32 to index
      %c0_172 = arith.constant 0 : index
      %c0_173 = arith.constant 0 : index
      %458 = vector.load %arg2[%457, %c0_172, %c0_173] : memref<16x8x512xbf16, #tpu.memory_space<vmem>>, vector<1x8x512xbf16>
      %459 = vector.shape_cast %458 : vector<1x8x512xbf16> to vector<8x512xbf16>
      %460 = arith.extf %459 : vector<8x512xbf16> to vector<8x512xf32>
      %461 = arith.addf %460, %5 : vector<8x512xf32>
      %c0_174 = arith.constant 0 : index
      %c0_175 = arith.constant 0 : index
      %462 = vector.load %arg3[%c0_174, %c0_175] : memref<128x512xf32, #tpu.memory_space<vmem>>, vector<128x512xf32>
      %cst_176 = arith.constant dense<0.000000e+00> : vector<8x512xf32>
      %463 = tpu.matmul %451, %462, %cst_176 {dimension_numbers = #tpu.dot_dimension_numbers<[1], [0], [0], [1], [0, 0, 1, 1], [], []>} : vector<8x128xf32>, vector<128x512xf32>, vector<8x512xf32> -> vector<8x512xf32>
      %464 = arith.addf %461, %463 : vector<8x512xf32>
      %465 = vector.extract_strided_slice %464 {offsets = [0, 0], sizes = [8, 128], strides = [1, 1]} : vector<8x512xf32> to vector<8x128xf32>
      %cst_177 = arith.constant 5.000000e-01 : f32
      %466 = vector.broadcast %cst_177 : f32 to vector<8x128xf32>
      %467 = arith.mulf %466, %465 : vector<8x128xf32>
      %468 = math.tanh %467 : vector<8x128xf32>
      %cst_178 = arith.constant 5.000000e-01 : f32
      %469 = vector.broadcast %cst_178 : f32 to vector<8x128xf32>
      %470 = arith.mulf %469, %468 : vector<8x128xf32>
      %cst_179 = arith.constant 5.000000e-01 : f32
      %471 = vector.broadcast %cst_179 : f32 to vector<8x128xf32>
      %472 = arith.addf %470, %471 : vector<8x128xf32>
      %473 = vector.extract_strided_slice %464 {offsets = [0, 128], sizes = [8, 128], strides = [1, 1]} : vector<8x512xf32> to vector<8x128xf32>
      %cst_180 = arith.constant 5.000000e-01 : f32
      %474 = vector.broadcast %cst_180 : f32 to vector<8x128xf32>
      %475 = arith.mulf %474, %473 : vector<8x128xf32>
      %476 = math.tanh %475 : vector<8x128xf32>
      %cst_181 = arith.constant 5.000000e-01 : f32
      %477 = vector.broadcast %cst_181 : f32 to vector<8x128xf32>
      %478 = arith.mulf %477, %476 : vector<8x128xf32>
      %cst_182 = arith.constant 5.000000e-01 : f32
      %479 = vector.broadcast %cst_182 : f32 to vector<8x128xf32>
      %480 = arith.addf %478, %479 : vector<8x128xf32>
      %481 = vector.extract_strided_slice %464 {offsets = [0, 256], sizes = [8, 128], strides = [1, 1]} : vector<8x512xf32> to vector<8x128xf32>
      %482 = math.tanh %481 : vector<8x128xf32>
      %483 = vector.extract_strided_slice %464 {offsets = [0, 384], sizes = [8, 128], strides = [1, 1]} : vector<8x512xf32> to vector<8x128xf32>
      %cst_183 = arith.constant 5.000000e-01 : f32
      %484 = vector.broadcast %cst_183 : f32 to vector<8x128xf32>
      %485 = arith.mulf %484, %483 : vector<8x128xf32>
      %486 = math.tanh %485 : vector<8x128xf32>
      %cst_184 = arith.constant 5.000000e-01 : f32
      %487 = vector.broadcast %cst_184 : f32 to vector<8x128xf32>
      %488 = arith.mulf %487, %486 : vector<8x128xf32>
      %cst_185 = arith.constant 5.000000e-01 : f32
      %489 = vector.broadcast %cst_185 : f32 to vector<8x128xf32>
      %490 = arith.addf %488, %489 : vector<8x128xf32>
      %491 = arith.mulf %472, %482 : vector<8x128xf32>
      %492 = arith.mulf %480, %449 : vector<8x128xf32>
      %493 = arith.addf %491, %492 : vector<8x128xf32>
      %494 = math.tanh %493 : vector<8x128xf32>
      %495 = arith.mulf %490, %494 : vector<8x128xf32>
      %496 = arith.truncf %495 : vector<8x128xf32> to vector<8x128xbf16>
      %497 = arith.index_cast %c10_i32 : i32 to index
      %c0_186 = arith.constant 0 : index
      %c0_187 = arith.constant 0 : index
      %498 = vector.load %arg5[%497, %c0_186, %c0_187] : memref<16x8x128xbf16, #tpu.memory_space<vmem>>, vector<1x8x128xbf16>
      %499 = vector.shape_cast %498 : vector<1x8x128xbf16> to vector<8x128xbf16>
      %500 = vector.shape_cast %496 : vector<8x128xbf16> to vector<1x8x128xbf16>
      tpu.vector_store %arg5[%497, %c0_186, %c0_187], %500 {strides = array<i32>} : memref<16x8x128xbf16, #tpu.memory_space<vmem>>, vector<1x8x128xbf16>,
      %c11_i32 = arith.constant 11 : i32
      %501 = arith.index_cast %c11_i32 : i32 to index
      %c0_188 = arith.constant 0 : index
      %c0_189 = arith.constant 0 : index
      %502 = vector.load %arg2[%501, %c0_188, %c0_189] : memref<16x8x512xbf16, #tpu.memory_space<vmem>>, vector<1x8x512xbf16>
      %503 = vector.shape_cast %502 : vector<1x8x512xbf16> to vector<8x512xbf16>
      %504 = arith.extf %503 : vector<8x512xbf16> to vector<8x512xf32>
      %505 = arith.addf %504, %5 : vector<8x512xf32>
      %c0_190 = arith.constant 0 : index
      %c0_191 = arith.constant 0 : index
      %506 = vector.load %arg3[%c0_190, %c0_191] : memref<128x512xf32, #tpu.memory_space<vmem>>, vector<128x512xf32>
      %cst_192 = arith.constant dense<0.000000e+00> : vector<8x512xf32>
      %507 = tpu.matmul %495, %506, %cst_192 {dimension_numbers = #tpu.dot_dimension_numbers<[1], [0], [0], [1], [0, 0, 1, 1], [], []>} : vector<8x128xf32>, vector<128x512xf32>, vector<8x512xf32> -> vector<8x512xf32>
      %508 = arith.addf %505, %507 : vector<8x512xf32>
      %509 = vector.extract_strided_slice %508 {offsets = [0, 0], sizes = [8, 128], strides = [1, 1]} : vector<8x512xf32> to vector<8x128xf32>
      %cst_193 = arith.constant 5.000000e-01 : f32
      %510 = vector.broadcast %cst_193 : f32 to vector<8x128xf32>
      %511 = arith.mulf %510, %509 : vector<8x128xf32>
      %512 = math.tanh %511 : vector<8x128xf32>
      %cst_194 = arith.constant 5.000000e-01 : f32
      %513 = vector.broadcast %cst_194 : f32 to vector<8x128xf32>
      %514 = arith.mulf %513, %512 : vector<8x128xf32>
      %cst_195 = arith.constant 5.000000e-01 : f32
      %515 = vector.broadcast %cst_195 : f32 to vector<8x128xf32>
      %516 = arith.addf %514, %515 : vector<8x128xf32>
      %517 = vector.extract_strided_slice %508 {offsets = [0, 128], sizes = [8, 128], strides = [1, 1]} : vector<8x512xf32> to vector<8x128xf32>
      %cst_196 = arith.constant 5.000000e-01 : f32
      %518 = vector.broadcast %cst_196 : f32 to vector<8x128xf32>
      %519 = arith.mulf %518, %517 : vector<8x128xf32>
      %520 = math.tanh %519 : vector<8x128xf32>
      %cst_197 = arith.constant 5.000000e-01 : f32
      %521 = vector.broadcast %cst_197 : f32 to vector<8x128xf32>
      %522 = arith.mulf %521, %520 : vector<8x128xf32>
      %cst_198 = arith.constant 5.000000e-01 : f32
      %523 = vector.broadcast %cst_198 : f32 to vector<8x128xf32>
      %524 = arith.addf %522, %523 : vector<8x128xf32>
      %525 = vector.extract_strided_slice %508 {offsets = [0, 256], sizes = [8, 128], strides = [1, 1]} : vector<8x512xf32> to vector<8x128xf32>
      %526 = math.tanh %525 : vector<8x128xf32>
      %527 = vector.extract_strided_slice %508 {offsets = [0, 384], sizes = [8, 128], strides = [1, 1]} : vector<8x512xf32> to vector<8x128xf32>
      %cst_199 = arith.constant 5.000000e-01 : f32
      %528 = vector.broadcast %cst_199 : f32 to vector<8x128xf32>
      %529 = arith.mulf %528, %527 : vector<8x128xf32>
      %530 = math.tanh %529 : vector<8x128xf32>
      %cst_200 = arith.constant 5.000000e-01 : f32
      %531 = vector.broadcast %cst_200 : f32 to vector<8x128xf32>
      %532 = arith.mulf %531, %530 : vector<8x128xf32>
      %cst_201 = arith.constant 5.000000e-01 : f32
      %533 = vector.broadcast %cst_201 : f32 to vector<8x128xf32>
      %534 = arith.addf %532, %533 : vector<8x128xf32>
      %535 = arith.mulf %516, %526 : vector<8x128xf32>
      %536 = arith.mulf %524, %493 : vector<8x128xf32>
      %537 = arith.addf %535, %536 : vector<8x128xf32>
      %538 = math.tanh %537 : vector<8x128xf32>
      %539 = arith.mulf %534, %538 : vector<8x128xf32>
      %540 = arith.truncf %539 : vector<8x128xf32> to vector<8x128xbf16>
      %541 = arith.index_cast %c11_i32 : i32 to index
      %c0_202 = arith.constant 0 : index
      %c0_203 = arith.constant 0 : index
      %542 = vector.load %arg5[%541, %c0_202, %c0_203] : memref<16x8x128xbf16, #tpu.memory_space<vmem>>, vector<1x8x128xbf16>
      %543 = vector.shape_cast %542 : vector<1x8x128xbf16> to vector<8x128xbf16>
      %544 = vector.shape_cast %540 : vector<8x128xbf16> to vector<1x8x128xbf16>
      tpu.vector_store %arg5[%541, %c0_202, %c0_203], %544 {strides = array<i32>} : memref<16x8x128xbf16, #tpu.memory_space<vmem>>, vector<1x8x128xbf16>,
      %c12_i32 = arith.constant 12 : i32
      %545 = arith.index_cast %c12_i32 : i32 to index
      %c0_204 = arith.constant 0 : index
      %c0_205 = arith.constant 0 : index
      %546 = vector.load %arg2[%545, %c0_204, %c0_205] : memref<16x8x512xbf16, #tpu.memory_space<vmem>>, vector<1x8x512xbf16>
      %547 = vector.shape_cast %546 : vector<1x8x512xbf16> to vector<8x512xbf16>
      %548 = arith.extf %547 : vector<8x512xbf16> to vector<8x512xf32>
      %549 = arith.addf %548, %5 : vector<8x512xf32>
      %c0_206 = arith.constant 0 : index
      %c0_207 = arith.constant 0 : index
      %550 = vector.load %arg3[%c0_206, %c0_207] : memref<128x512xf32, #tpu.memory_space<vmem>>, vector<128x512xf32>
      %cst_208 = arith.constant dense<0.000000e+00> : vector<8x512xf32>
      %551 = tpu.matmul %539, %550, %cst_208 {dimension_numbers = #tpu.dot_dimension_numbers<[1], [0], [0], [1], [0, 0, 1, 1], [], []>} : vector<8x128xf32>, vector<128x512xf32>, vector<8x512xf32> -> vector<8x512xf32>
      %552 = arith.addf %549, %551 : vector<8x512xf32>
      %553 = vector.extract_strided_slice %552 {offsets = [0, 0], sizes = [8, 128], strides = [1, 1]} : vector<8x512xf32> to vector<8x128xf32>
      %cst_209 = arith.constant 5.000000e-01 : f32
      %554 = vector.broadcast %cst_209 : f32 to vector<8x128xf32>
      %555 = arith.mulf %554, %553 : vector<8x128xf32>
      %556 = math.tanh %555 : vector<8x128xf32>
      %cst_210 = arith.constant 5.000000e-01 : f32
      %557 = vector.broadcast %cst_210 : f32 to vector<8x128xf32>
      %558 = arith.mulf %557, %556 : vector<8x128xf32>
      %cst_211 = arith.constant 5.000000e-01 : f32
      %559 = vector.broadcast %cst_211 : f32 to vector<8x128xf32>
      %560 = arith.addf %558, %559 : vector<8x128xf32>
      %561 = vector.extract_strided_slice %552 {offsets = [0, 128], sizes = [8, 128], strides = [1, 1]} : vector<8x512xf32> to vector<8x128xf32>
      %cst_212 = arith.constant 5.000000e-01 : f32
      %562 = vector.broadcast %cst_212 : f32 to vector<8x128xf32>
      %563 = arith.mulf %562, %561 : vector<8x128xf32>
      %564 = math.tanh %563 : vector<8x128xf32>
      %cst_213 = arith.constant 5.000000e-01 : f32
      %565 = vector.broadcast %cst_213 : f32 to vector<8x128xf32>
      %566 = arith.mulf %565, %564 : vector<8x128xf32>
      %cst_214 = arith.constant 5.000000e-01 : f32
      %567 = vector.broadcast %cst_214 : f32 to vector<8x128xf32>
      %568 = arith.addf %566, %567 : vector<8x128xf32>
      %569 = vector.extract_strided_slice %552 {offsets = [0, 256], sizes = [8, 128], strides = [1, 1]} : vector<8x512xf32> to vector<8x128xf32>
      %570 = math.tanh %569 : vector<8x128xf32>
      %571 = vector.extract_strided_slice %552 {offsets = [0, 384], sizes = [8, 128], strides = [1, 1]} : vector<8x512xf32> to vector<8x128xf32>
      %cst_215 = arith.constant 5.000000e-01 : f32
      %572 = vector.broadcast %cst_215 : f32 to vector<8x128xf32>
      %573 = arith.mulf %572, %571 : vector<8x128xf32>
      %574 = math.tanh %573 : vector<8x128xf32>
      %cst_216 = arith.constant 5.000000e-01 : f32
      %575 = vector.broadcast %cst_216 : f32 to vector<8x128xf32>
      %576 = arith.mulf %575, %574 : vector<8x128xf32>
      %cst_217 = arith.constant 5.000000e-01 : f32
      %577 = vector.broadcast %cst_217 : f32 to vector<8x128xf32>
      %578 = arith.addf %576, %577 : vector<8x128xf32>
      %579 = arith.mulf %560, %570 : vector<8x128xf32>
      %580 = arith.mulf %568, %537 : vector<8x128xf32>
      %581 = arith.addf %579, %580 : vector<8x128xf32>
      %582 = math.tanh %581 : vector<8x128xf32>
      %583 = arith.mulf %578, %582 : vector<8x128xf32>
      %584 = arith.truncf %583 : vector<8x128xf32> to vector<8x128xbf16>
      %585 = arith.index_cast %c12_i32 : i32 to index
      %c0_218 = arith.constant 0 : index
      %c0_219 = arith.constant 0 : index
      %586 = vector.load %arg5[%585, %c0_218, %c0_219] : memref<16x8x128xbf16, #tpu.memory_space<vmem>>, vector<1x8x128xbf16>
      %587 = vector.shape_cast %586 : vector<1x8x128xbf16> to vector<8x128xbf16>
      %588 = vector.shape_cast %584 : vector<8x128xbf16> to vector<1x8x128xbf16>
      tpu.vector_store %arg5[%585, %c0_218, %c0_219], %588 {strides = array<i32>} : memref<16x8x128xbf16, #tpu.memory_space<vmem>>, vector<1x8x128xbf16>,
      %c13_i32 = arith.constant 13 : i32
      %589 = arith.index_cast %c13_i32 : i32 to index
      %c0_220 = arith.constant 0 : index
      %c0_221 = arith.constant 0 : index
      %590 = vector.load %arg2[%589, %c0_220, %c0_221] : memref<16x8x512xbf16, #tpu.memory_space<vmem>>, vector<1x8x512xbf16>
      %591 = vector.shape_cast %590 : vector<1x8x512xbf16> to vector<8x512xbf16>
      %592 = arith.extf %591 : vector<8x512xbf16> to vector<8x512xf32>
      %593 = arith.addf %592, %5 : vector<8x512xf32>
      %c0_222 = arith.constant 0 : index
      %c0_223 = arith.constant 0 : index
      %594 = vector.load %arg3[%c0_222, %c0_223] : memref<128x512xf32, #tpu.memory_space<vmem>>, vector<128x512xf32>
      %cst_224 = arith.constant dense<0.000000e+00> : vector<8x512xf32>
      %595 = tpu.matmul %583, %594, %cst_224 {dimension_numbers = #tpu.dot_dimension_numbers<[1], [0], [0], [1], [0, 0, 1, 1], [], []>} : vector<8x128xf32>, vector<128x512xf32>, vector<8x512xf32> -> vector<8x512xf32>
      %596 = arith.addf %593, %595 : vector<8x512xf32>
      %597 = vector.extract_strided_slice %596 {offsets = [0, 0], sizes = [8, 128], strides = [1, 1]} : vector<8x512xf32> to vector<8x128xf32>
      %cst_225 = arith.constant 5.000000e-01 : f32
      %598 = vector.broadcast %cst_225 : f32 to vector<8x128xf32>
      %599 = arith.mulf %598, %597 : vector<8x128xf32>
      %600 = math.tanh %599 : vector<8x128xf32>
      %cst_226 = arith.constant 5.000000e-01 : f32
      %601 = vector.broadcast %cst_226 : f32 to vector<8x128xf32>
      %602 = arith.mulf %601, %600 : vector<8x128xf32>
      %cst_227 = arith.constant 5.000000e-01 : f32
      %603 = vector.broadcast %cst_227 : f32 to vector<8x128xf32>
      %604 = arith.addf %602, %603 : vector<8x128xf32>
      %605 = vector.extract_strided_slice %596 {offsets = [0, 128], sizes = [8, 128], strides = [1, 1]} : vector<8x512xf32> to vector<8x128xf32>
      %cst_228 = arith.constant 5.000000e-01 : f32
      %606 = vector.broadcast %cst_228 : f32 to vector<8x128xf32>
      %607 = arith.mulf %606, %605 : vector<8x128xf32>
      %608 = math.tanh %607 : vector<8x128xf32>
      %cst_229 = arith.constant 5.000000e-01 : f32
      %609 = vector.broadcast %cst_229 : f32 to vector<8x128xf32>
      %610 = arith.mulf %609, %608 : vector<8x128xf32>
      %cst_230 = arith.constant 5.000000e-01 : f32
      %611 = vector.broadcast %cst_230 : f32 to vector<8x128xf32>
      %612 = arith.addf %610, %611 : vector<8x128xf32>
      %613 = vector.extract_strided_slice %596 {offsets = [0, 256], sizes = [8, 128], strides = [1, 1]} : vector<8x512xf32> to vector<8x128xf32>
      %614 = math.tanh %613 : vector<8x128xf32>
      %615 = vector.extract_strided_slice %596 {offsets = [0, 384], sizes = [8, 128], strides = [1, 1]} : vector<8x512xf32> to vector<8x128xf32>
      %cst_231 = arith.constant 5.000000e-01 : f32
      %616 = vector.broadcast %cst_231 : f32 to vector<8x128xf32>
      %617 = arith.mulf %616, %615 : vector<8x128xf32>
      %618 = math.tanh %617 : vector<8x128xf32>
      %cst_232 = arith.constant 5.000000e-01 : f32
      %619 = vector.broadcast %cst_232 : f32 to vector<8x128xf32>
      %620 = arith.mulf %619, %618 : vector<8x128xf32>
      %cst_233 = arith.constant 5.000000e-01 : f32
      %621 = vector.broadcast %cst_233 : f32 to vector<8x128xf32>
      %622 = arith.addf %620, %621 : vector<8x128xf32>
      %623 = arith.mulf %604, %614 : vector<8x128xf32>
      %624 = arith.mulf %612, %581 : vector<8x128xf32>
      %625 = arith.addf %623, %624 : vector<8x128xf32>
      %626 = math.tanh %625 : vector<8x128xf32>
      %627 = arith.mulf %622, %626 : vector<8x128xf32>
      %628 = arith.truncf %627 : vector<8x128xf32> to vector<8x128xbf16>
      %629 = arith.index_cast %c13_i32 : i32 to index
      %c0_234 = arith.constant 0 : index
      %c0_235 = arith.constant 0 : index
      %630 = vector.load %arg5[%629, %c0_234, %c0_235] : memref<16x8x128xbf16, #tpu.memory_space<vmem>>, vector<1x8x128xbf16>
      %631 = vector.shape_cast %630 : vector<1x8x128xbf16> to vector<8x128xbf16>
      %632 = vector.shape_cast %628 : vector<8x128xbf16> to vector<1x8x128xbf16>
      tpu.vector_store %arg5[%629, %c0_234, %c0_235], %632 {strides = array<i32>} : memref<16x8x128xbf16, #tpu.memory_space<vmem>>, vector<1x8x128xbf16>,
      %c14_i32 = arith.constant 14 : i32
      %633 = arith.index_cast %c14_i32 : i32 to index
      %c0_236 = arith.constant 0 : index
      %c0_237 = arith.constant 0 : index
      %634 = vector.load %arg2[%633, %c0_236, %c0_237] : memref<16x8x512xbf16, #tpu.memory_space<vmem>>, vector<1x8x512xbf16>
      %635 = vector.shape_cast %634 : vector<1x8x512xbf16> to vector<8x512xbf16>
      %636 = arith.extf %635 : vector<8x512xbf16> to vector<8x512xf32>
      %637 = arith.addf %636, %5 : vector<8x512xf32>
      %c0_238 = arith.constant 0 : index
      %c0_239 = arith.constant 0 : index
      %638 = vector.load %arg3[%c0_238, %c0_239] : memref<128x512xf32, #tpu.memory_space<vmem>>, vector<128x512xf32>
      %cst_240 = arith.constant dense<0.000000e+00> : vector<8x512xf32>
      %639 = tpu.matmul %627, %638, %cst_240 {dimension_numbers = #tpu.dot_dimension_numbers<[1], [0], [0], [1], [0, 0, 1, 1], [], []>} : vector<8x128xf32>, vector<128x512xf32>, vector<8x512xf32> -> vector<8x512xf32>
      %640 = arith.addf %637, %639 : vector<8x512xf32>
      %641 = vector.extract_strided_slice %640 {offsets = [0, 0], sizes = [8, 128], strides = [1, 1]} : vector<8x512xf32> to vector<8x128xf32>
      %cst_241 = arith.constant 5.000000e-01 : f32
      %642 = vector.broadcast %cst_241 : f32 to vector<8x128xf32>
      %643 = arith.mulf %642, %641 : vector<8x128xf32>
      %644 = math.tanh %643 : vector<8x128xf32>
      %cst_242 = arith.constant 5.000000e-01 : f32
      %645 = vector.broadcast %cst_242 : f32 to vector<8x128xf32>
      %646 = arith.mulf %645, %644 : vector<8x128xf32>
      %cst_243 = arith.constant 5.000000e-01 : f32
      %647 = vector.broadcast %cst_243 : f32 to vector<8x128xf32>
      %648 = arith.addf %646, %647 : vector<8x128xf32>
      %649 = vector.extract_strided_slice %640 {offsets = [0, 128], sizes = [8, 128], strides = [1, 1]} : vector<8x512xf32> to vector<8x128xf32>
      %cst_244 = arith.constant 5.000000e-01 : f32
      %650 = vector.broadcast %cst_244 : f32 to vector<8x128xf32>
      %651 = arith.mulf %650, %649 : vector<8x128xf32>
      %652 = math.tanh %651 : vector<8x128xf32>
      %cst_245 = arith.constant 5.000000e-01 : f32
      %653 = vector.broadcast %cst_245 : f32 to vector<8x128xf32>
      %654 = arith.mulf %653, %652 : vector<8x128xf32>
      %cst_246 = arith.constant 5.000000e-01 : f32
      %655 = vector.broadcast %cst_246 : f32 to vector<8x128xf32>
      %656 = arith.addf %654, %655 : vector<8x128xf32>
      %657 = vector.extract_strided_slice %640 {offsets = [0, 256], sizes = [8, 128], strides = [1, 1]} : vector<8x512xf32> to vector<8x128xf32>
      %658 = math.tanh %657 : vector<8x128xf32>
      %659 = vector.extract_strided_slice %640 {offsets = [0, 384], sizes = [8, 128], strides = [1, 1]} : vector<8x512xf32> to vector<8x128xf32>
      %cst_247 = arith.constant 5.000000e-01 : f32
      %660 = vector.broadcast %cst_247 : f32 to vector<8x128xf32>
      %661 = arith.mulf %660, %659 : vector<8x128xf32>
      %662 = math.tanh %661 : vector<8x128xf32>
      %cst_248 = arith.constant 5.000000e-01 : f32
      %663 = vector.broadcast %cst_248 : f32 to vector<8x128xf32>
      %664 = arith.mulf %663, %662 : vector<8x128xf32>
      %cst_249 = arith.constant 5.000000e-01 : f32
      %665 = vector.broadcast %cst_249 : f32 to vector<8x128xf32>
      %666 = arith.addf %664, %665 : vector<8x128xf32>
      %667 = arith.mulf %648, %658 : vector<8x128xf32>
      %668 = arith.mulf %656, %625 : vector<8x128xf32>
      %669 = arith.addf %667, %668 : vector<8x128xf32>
      %670 = math.tanh %669 : vector<8x128xf32>
      %671 = arith.mulf %666, %670 : vector<8x128xf32>
      %672 = arith.truncf %671 : vector<8x128xf32> to vector<8x128xbf16>
      %673 = arith.index_cast %c14_i32 : i32 to index
      %c0_250 = arith.constant 0 : index
      %c0_251 = arith.constant 0 : index
      %674 = vector.load %arg5[%673, %c0_250, %c0_251] : memref<16x8x128xbf16, #tpu.memory_space<vmem>>, vector<1x8x128xbf16>
      %675 = vector.shape_cast %674 : vector<1x8x128xbf16> to vector<8x128xbf16>
      %676 = vector.shape_cast %672 : vector<8x128xbf16> to vector<1x8x128xbf16>
      tpu.vector_store %arg5[%673, %c0_250, %c0_251], %676 {strides = array<i32>} : memref<16x8x128xbf16, #tpu.memory_space<vmem>>, vector<1x8x128xbf16>,
      %c15_i32 = arith.constant 15 : i32
      %677 = arith.index_cast %c15_i32 : i32 to index
      %c0_252 = arith.constant 0 : index
      %c0_253 = arith.constant 0 : index
      %678 = vector.load %arg2[%677, %c0_252, %c0_253] : memref<16x8x512xbf16, #tpu.memory_space<vmem>>, vector<1x8x512xbf16>
      %679 = vector.shape_cast %678 : vector<1x8x512xbf16> to vector<8x512xbf16>
      %680 = arith.extf %679 : vector<8x512xbf16> to vector<8x512xf32>
      %681 = arith.addf %680, %5 : vector<8x512xf32>
      %c0_254 = arith.constant 0 : index
      %c0_255 = arith.constant 0 : index
      %682 = vector.load %arg3[%c0_254, %c0_255] : memref<128x512xf32, #tpu.memory_space<vmem>>, vector<128x512xf32>
      %cst_256 = arith.constant dense<0.000000e+00> : vector<8x512xf32>
      %683 = tpu.matmul %671, %682, %cst_256 {dimension_numbers = #tpu.dot_dimension_numbers<[1], [0], [0], [1], [0, 0, 1, 1], [], []>} : vector<8x128xf32>, vector<128x512xf32>, vector<8x512xf32> -> vector<8x512xf32>
      %684 = arith.addf %681, %683 : vector<8x512xf32>
      %685 = vector.extract_strided_slice %684 {offsets = [0, 0], sizes = [8, 128], strides = [1, 1]} : vector<8x512xf32> to vector<8x128xf32>
      %cst_257 = arith.constant 5.000000e-01 : f32
      %686 = vector.broadcast %cst_257 : f32 to vector<8x128xf32>
      %687 = arith.mulf %686, %685 : vector<8x128xf32>
      %688 = math.tanh %687 : vector<8x128xf32>
      %cst_258 = arith.constant 5.000000e-01 : f32
      %689 = vector.broadcast %cst_258 : f32 to vector<8x128xf32>
      %690 = arith.mulf %689, %688 : vector<8x128xf32>
      %cst_259 = arith.constant 5.000000e-01 : f32
      %691 = vector.broadcast %cst_259 : f32 to vector<8x128xf32>
      %692 = arith.addf %690, %691 : vector<8x128xf32>
      %693 = vector.extract_strided_slice %684 {offsets = [0, 128], sizes = [8, 128], strides = [1, 1]} : vector<8x512xf32> to vector<8x128xf32>
      %cst_260 = arith.constant 5.000000e-01 : f32
      %694 = vector.broadcast %cst_260 : f32 to vector<8x128xf32>
      %695 = arith.mulf %694, %693 : vector<8x128xf32>
      %696 = math.tanh %695 : vector<8x128xf32>
      %cst_261 = arith.constant 5.000000e-01 : f32
      %697 = vector.broadcast %cst_261 : f32 to vector<8x128xf32>
      %698 = arith.mulf %697, %696 : vector<8x128xf32>
      %cst_262 = arith.constant 5.000000e-01 : f32
      %699 = vector.broadcast %cst_262 : f32 to vector<8x128xf32>
      %700 = arith.addf %698, %699 : vector<8x128xf32>
      %701 = vector.extract_strided_slice %684 {offsets = [0, 256], sizes = [8, 128], strides = [1, 1]} : vector<8x512xf32> to vector<8x128xf32>
      %702 = math.tanh %701 : vector<8x128xf32>
      %703 = vector.extract_strided_slice %684 {offsets = [0, 384], sizes = [8, 128], strides = [1, 1]} : vector<8x512xf32> to vector<8x128xf32>
      %cst_263 = arith.constant 5.000000e-01 : f32
      %704 = vector.broadcast %cst_263 : f32 to vector<8x128xf32>
      %705 = arith.mulf %704, %703 : vector<8x128xf32>
      %706 = math.tanh %705 : vector<8x128xf32>
      %cst_264 = arith.constant 5.000000e-01 : f32
      %707 = vector.broadcast %cst_264 : f32 to vector<8x128xf32>
      %708 = arith.mulf %707, %706 : vector<8x128xf32>
      %cst_265 = arith.constant 5.000000e-01 : f32
      %709 = vector.broadcast %cst_265 : f32 to vector<8x128xf32>
      %710 = arith.addf %708, %709 : vector<8x128xf32>
      %711 = arith.mulf %692, %702 : vector<8x128xf32>
      %712 = arith.mulf %700, %669 : vector<8x128xf32>
      %713 = arith.addf %711, %712 : vector<8x128xf32>
      %714 = math.tanh %713 : vector<8x128xf32>
      %715 = arith.mulf %710, %714 : vector<8x128xf32>
      %716 = arith.truncf %715 : vector<8x128xf32> to vector<8x128xbf16>
      %717 = arith.index_cast %c15_i32 : i32 to index
      %c0_266 = arith.constant 0 : index
      %c0_267 = arith.constant 0 : index
      %718 = vector.load %arg5[%717, %c0_266, %c0_267] : memref<16x8x128xbf16, #tpu.memory_space<vmem>>, vector<1x8x128xbf16>
      %719 = vector.shape_cast %718 : vector<1x8x128xbf16> to vector<8x128xbf16>
      %720 = vector.shape_cast %716 : vector<8x128xbf16> to vector<1x8x128xbf16>
      tpu.vector_store %arg5[%717, %c0_266, %c0_267], %720 {strides = array<i32>} : memref<16x8x128xbf16, #tpu.memory_space<vmem>>, vector<1x8x128xbf16>,
      %c16_i32 = arith.constant 16 : i32
      %c0_268 = arith.constant 0 : index
      %c0_269 = arith.constant 0 : index
      %721 = vector.load %arg8[%c0_268, %c0_269] : memref<8x128xf32, #tpu.memory_space<vmem>>, vector<8x128xf32>
      tpu.vector_store %arg8[%c0_268, %c0_269], %715 {strides = array<i32>} : memref<8x128xf32, #tpu.memory_space<vmem>>, vector<8x128xf32>,
      %c0_270 = arith.constant 0 : index
      %c0_271 = arith.constant 0 : index
      %722 = vector.load %arg9[%c0_270, %c0_271] : memref<8x128xf32, #tpu.memory_space<vmem>>, vector<8x128xf32>
      tpu.vector_store %arg9[%c0_270, %c0_271], %713 {strides = array<i32>} : memref<8x128xf32, #tpu.memory_space<vmem>>, vector<8x128xf32>,
    } else {
    }
    %c1_i32_3 = arith.constant 1 : i32
    %9 = arith.cmpi eq, %arg1, %c1_i32_3 : i32
    %10 = arith.extui %9 : i1 to i32
    %c0_i32_4 = arith.constant 0 : i32
    %11 = arith.cmpi ne, %10, %c0_i32_4 : i32
    scf.if %11 {
      %c0_7 = arith.constant 0 : index
      %c0_8 = arith.constant 0 : index
      %15 = vector.load %arg8[%c0_7, %c0_8] : memref<8x128xf32, #tpu.memory_space<vmem>>, vector<8x128xf32>
      %c0_9 = arith.constant 0 : index
      %c0_10 = arith.constant 0 : index
      %16 = vector.load %arg9[%c0_9, %c0_10] : memref<8x128xf32, #tpu.memory_space<vmem>>, vector<8x128xf32>
      %c0_i32_11 = arith.constant 0 : i32
      %17 = arith.index_cast %c0_i32_11 : i32 to index
      %c0_12 = arith.constant 0 : index
      %c0_13 = arith.constant 0 : index
      %18 = vector.load %arg2[%17, %c0_12, %c0_13] : memref<16x8x512xbf16, #tpu.memory_space<vmem>>, vector<1x8x512xbf16>
      %19 = vector.shape_cast %18 : vector<1x8x512xbf16> to vector<8x512xbf16>
      %20 = arith.extf %19 : vector<8x512xbf16> to vector<8x512xf32>
      %21 = arith.addf %20, %5 : vector<8x512xf32>
      %c0_14 = arith.constant 0 : index
      %c0_15 = arith.constant 0 : index
      %22 = vector.load %arg3[%c0_14, %c0_15] : memref<128x512xf32, #tpu.memory_space<vmem>>, vector<128x512xf32>
      %cst = arith.constant dense<0.000000e+00> : vector<8x512xf32>
      %23 = tpu.matmul %15, %22, %cst {dimension_numbers = #tpu.dot_dimension_numbers<[1], [0], [0], [1], [0, 0, 1, 1], [], []>} : vector<8x128xf32>, vector<128x512xf32>, vector<8x512xf32> -> vector<8x512xf32>
      %24 = arith.addf %21, %23 : vector<8x512xf32>
      %25 = vector.extract_strided_slice %24 {offsets = [0, 0], sizes = [8, 128], strides = [1, 1]} : vector<8x512xf32> to vector<8x128xf32>
      %cst_16 = arith.constant 5.000000e-01 : f32
      %26 = vector.broadcast %cst_16 : f32 to vector<8x128xf32>
      %27 = arith.mulf %26, %25 : vector<8x128xf32>
      %28 = math.tanh %27 : vector<8x128xf32>
      %cst_17 = arith.constant 5.000000e-01 : f32
      %29 = vector.broadcast %cst_17 : f32 to vector<8x128xf32>
      %30 = arith.mulf %29, %28 : vector<8x128xf32>
      %cst_18 = arith.constant 5.000000e-01 : f32
      %31 = vector.broadcast %cst_18 : f32 to vector<8x128xf32>
      %32 = arith.addf %30, %31 : vector<8x128xf32>
      %33 = vector.extract_strided_slice %24 {offsets = [0, 128], sizes = [8, 128], strides = [1, 1]} : vector<8x512xf32> to vector<8x128xf32>
      %cst_19 = arith.constant 5.000000e-01 : f32
      %34 = vector.broadcast %cst_19 : f32 to vector<8x128xf32>
      %35 = arith.mulf %34, %33 : vector<8x128xf32>
      %36 = math.tanh %35 : vector<8x128xf32>
      %cst_20 = arith.constant 5.000000e-01 : f32
      %37 = vector.broadcast %cst_20 : f32 to vector<8x128xf32>
      %38 = arith.mulf %37, %36 : vector<8x128xf32>
      %cst_21 = arith.constant 5.000000e-01 : f32
      %39 = vector.broadcast %cst_21 : f32 to vector<8x128xf32>
      %40 = arith.addf %38, %39 : vector<8x128xf32>
      %41 = vector.extract_strided_slice %24 {offsets = [0, 256], sizes = [8, 128], strides = [1, 1]} : vector<8x512xf32> to vector<8x128xf32>
      %42 = math.tanh %41 : vector<8x128xf32>
      %43 = vector.extract_strided_slice %24 {offsets = [0, 384], sizes = [8, 128], strides = [1, 1]} : vector<8x512xf32> to vector<8x128xf32>
      %cst_22 = arith.constant 5.000000e-01 : f32
      %44 = vector.broadcast %cst_22 : f32 to vector<8x128xf32>
      %45 = arith.mulf %44, %43 : vector<8x128xf32>
      %46 = math.tanh %45 : vector<8x128xf32>
      %cst_23 = arith.constant 5.000000e-01 : f32
      %47 = vector.broadcast %cst_23 : f32 to vector<8x128xf32>
      %48 = arith.mulf %47, %46 : vector<8x128xf32>
      %cst_24 = arith.constant 5.000000e-01 : f32
      %49 = vector.broadcast %cst_24 : f32 to vector<8x128xf32>
      %50 = arith.addf %48, %49 : vector<8x128xf32>
      %51 = arith.mulf %32, %42 : vector<8x128xf32>
      %52 = arith.mulf %40, %16 : vector<8x128xf32>
      %53 = arith.addf %51, %52 : vector<8x128xf32>
      %54 = math.tanh %53 : vector<8x128xf32>
      %55 = arith.mulf %50, %54 : vector<8x128xf32>
      %56 = arith.truncf %55 : vector<8x128xf32> to vector<8x128xbf16>
      %57 = arith.index_cast %c0_i32_11 : i32 to index
      %c0_25 = arith.constant 0 : index
      %c0_26 = arith.constant 0 : index
      %58 = vector.load %arg5[%57, %c0_25, %c0_26] : memref<16x8x128xbf16, #tpu.memory_space<vmem>>, vector<1x8x128xbf16>
      %59 = vector.shape_cast %58 : vector<1x8x128xbf16> to vector<8x128xbf16>
      %60 = vector.shape_cast %56 : vector<8x128xbf16> to vector<1x8x128xbf16>
      tpu.vector_store %arg5[%57, %c0_25, %c0_26], %60 {strides = array<i32>} : memref<16x8x128xbf16, #tpu.memory_space<vmem>>, vector<1x8x128xbf16>,
      %c1_i32_27 = arith.constant 1 : i32
      %61 = arith.index_cast %c1_i32_27 : i32 to index
      %c0_28 = arith.constant 0 : index
      %c0_29 = arith.constant 0 : index
      %62 = vector.load %arg2[%61, %c0_28, %c0_29] : memref<16x8x512xbf16, #tpu.memory_space<vmem>>, vector<1x8x512xbf16>
      %63 = vector.shape_cast %62 : vector<1x8x512xbf16> to vector<8x512xbf16>
      %64 = arith.extf %63 : vector<8x512xbf16> to vector<8x512xf32>
      %65 = arith.addf %64, %5 : vector<8x512xf32>
      %c0_30 = arith.constant 0 : index
      %c0_31 = arith.constant 0 : index
      %66 = vector.load %arg3[%c0_30, %c0_31] : memref<128x512xf32, #tpu.memory_space<vmem>>, vector<128x512xf32>
      %cst_32 = arith.constant dense<0.000000e+00> : vector<8x512xf32>
      %67 = tpu.matmul %55, %66, %cst_32 {dimension_numbers = #tpu.dot_dimension_numbers<[1], [0], [0], [1], [0, 0, 1, 1], [], []>} : vector<8x128xf32>, vector<128x512xf32>, vector<8x512xf32> -> vector<8x512xf32>
      %68 = arith.addf %65, %67 : vector<8x512xf32>
      %69 = vector.extract_strided_slice %68 {offsets = [0, 0], sizes = [8, 128], strides = [1, 1]} : vector<8x512xf32> to vector<8x128xf32>
      %cst_33 = arith.constant 5.000000e-01 : f32
      %70 = vector.broadcast %cst_33 : f32 to vector<8x128xf32>
      %71 = arith.mulf %70, %69 : vector<8x128xf32>
      %72 = math.tanh %71 : vector<8x128xf32>
      %cst_34 = arith.constant 5.000000e-01 : f32
      %73 = vector.broadcast %cst_34 : f32 to vector<8x128xf32>
      %74 = arith.mulf %73, %72 : vector<8x128xf32>
      %cst_35 = arith.constant 5.000000e-01 : f32
      %75 = vector.broadcast %cst_35 : f32 to vector<8x128xf32>
      %76 = arith.addf %74, %75 : vector<8x128xf32>
      %77 = vector.extract_strided_slice %68 {offsets = [0, 128], sizes = [8, 128], strides = [1, 1]} : vector<8x512xf32> to vector<8x128xf32>
      %cst_36 = arith.constant 5.000000e-01 : f32
      %78 = vector.broadcast %cst_36 : f32 to vector<8x128xf32>
      %79 = arith.mulf %78, %77 : vector<8x128xf32>
      %80 = math.tanh %79 : vector<8x128xf32>
      %cst_37 = arith.constant 5.000000e-01 : f32
      %81 = vector.broadcast %cst_37 : f32 to vector<8x128xf32>
      %82 = arith.mulf %81, %80 : vector<8x128xf32>
      %cst_38 = arith.constant 5.000000e-01 : f32
      %83 = vector.broadcast %cst_38 : f32 to vector<8x128xf32>
      %84 = arith.addf %82, %83 : vector<8x128xf32>
      %85 = vector.extract_strided_slice %68 {offsets = [0, 256], sizes = [8, 128], strides = [1, 1]} : vector<8x512xf32> to vector<8x128xf32>
      %86 = math.tanh %85 : vector<8x128xf32>
      %87 = vector.extract_strided_slice %68 {offsets = [0, 384], sizes = [8, 128], strides = [1, 1]} : vector<8x512xf32> to vector<8x128xf32>
      %cst_39 = arith.constant 5.000000e-01 : f32
      %88 = vector.broadcast %cst_39 : f32 to vector<8x128xf32>
      %89 = arith.mulf %88, %87 : vector<8x128xf32>
      %90 = math.tanh %89 : vector<8x128xf32>
      %cst_40 = arith.constant 5.000000e-01 : f32
      %91 = vector.broadcast %cst_40 : f32 to vector<8x128xf32>
      %92 = arith.mulf %91, %90 : vector<8x128xf32>
      %cst_41 = arith.constant 5.000000e-01 : f32
      %93 = vector.broadcast %cst_41 : f32 to vector<8x128xf32>
      %94 = arith.addf %92, %93 : vector<8x128xf32>
      %95 = arith.mulf %76, %86 : vector<8x128xf32>
      %96 = arith.mulf %84, %53 : vector<8x128xf32>
      %97 = arith.addf %95, %96 : vector<8x128xf32>
      %98 = math.tanh %97 : vector<8x128xf32>
      %99 = arith.mulf %94, %98 : vector<8x128xf32>
      %100 = arith.truncf %99 : vector<8x128xf32> to vector<8x128xbf16>
      %101 = arith.index_cast %c1_i32_27 : i32 to index
      %c0_42 = arith.constant 0 : index
      %c0_43 = arith.constant 0 : index
      %102 = vector.load %arg5[%101, %c0_42, %c0_43] : memref<16x8x128xbf16, #tpu.memory_space<vmem>>, vector<1x8x128xbf16>
      %103 = vector.shape_cast %102 : vector<1x8x128xbf16> to vector<8x128xbf16>
      %104 = vector.shape_cast %100 : vector<8x128xbf16> to vector<1x8x128xbf16>
      tpu.vector_store %arg5[%101, %c0_42, %c0_43], %104 {strides = array<i32>} : memref<16x8x128xbf16, #tpu.memory_space<vmem>>, vector<1x8x128xbf16>,
      %c2_i32 = arith.constant 2 : i32
      %105 = arith.index_cast %c2_i32 : i32 to index
      %c0_44 = arith.constant 0 : index
      %c0_45 = arith.constant 0 : index
      %106 = vector.load %arg2[%105, %c0_44, %c0_45] : memref<16x8x512xbf16, #tpu.memory_space<vmem>>, vector<1x8x512xbf16>
      %107 = vector.shape_cast %106 : vector<1x8x512xbf16> to vector<8x512xbf16>
      %108 = arith.extf %107 : vector<8x512xbf16> to vector<8x512xf32>
      %109 = arith.addf %108, %5 : vector<8x512xf32>
      %c0_46 = arith.constant 0 : index
      %c0_47 = arith.constant 0 : index
      %110 = vector.load %arg3[%c0_46, %c0_47] : memref<128x512xf32, #tpu.memory_space<vmem>>, vector<128x512xf32>
      %cst_48 = arith.constant dense<0.000000e+00> : vector<8x512xf32>
      %111 = tpu.matmul %99, %110, %cst_48 {dimension_numbers = #tpu.dot_dimension_numbers<[1], [0], [0], [1], [0, 0, 1, 1], [], []>} : vector<8x128xf32>, vector<128x512xf32>, vector<8x512xf32> -> vector<8x512xf32>
      %112 = arith.addf %109, %111 : vector<8x512xf32>
      %113 = vector.extract_strided_slice %112 {offsets = [0, 0], sizes = [8, 128], strides = [1, 1]} : vector<8x512xf32> to vector<8x128xf32>
      %cst_49 = arith.constant 5.000000e-01 : f32
      %114 = vector.broadcast %cst_49 : f32 to vector<8x128xf32>
      %115 = arith.mulf %114, %113 : vector<8x128xf32>
      %116 = math.tanh %115 : vector<8x128xf32>
      %cst_50 = arith.constant 5.000000e-01 : f32
      %117 = vector.broadcast %cst_50 : f32 to vector<8x128xf32>
      %118 = arith.mulf %117, %116 : vector<8x128xf32>
      %cst_51 = arith.constant 5.000000e-01 : f32
      %119 = vector.broadcast %cst_51 : f32 to vector<8x128xf32>
      %120 = arith.addf %118, %119 : vector<8x128xf32>
      %121 = vector.extract_strided_slice %112 {offsets = [0, 128], sizes = [8, 128], strides = [1, 1]} : vector<8x512xf32> to vector<8x128xf32>
      %cst_52 = arith.constant 5.000000e-01 : f32
      %122 = vector.broadcast %cst_52 : f32 to vector<8x128xf32>
      %123 = arith.mulf %122, %121 : vector<8x128xf32>
      %124 = math.tanh %123 : vector<8x128xf32>
      %cst_53 = arith.constant 5.000000e-01 : f32
      %125 = vector.broadcast %cst_53 : f32 to vector<8x128xf32>
      %126 = arith.mulf %125, %124 : vector<8x128xf32>
      %cst_54 = arith.constant 5.000000e-01 : f32
      %127 = vector.broadcast %cst_54 : f32 to vector<8x128xf32>
      %128 = arith.addf %126, %127 : vector<8x128xf32>
      %129 = vector.extract_strided_slice %112 {offsets = [0, 256], sizes = [8, 128], strides = [1, 1]} : vector<8x512xf32> to vector<8x128xf32>
      %130 = math.tanh %129 : vector<8x128xf32>
      %131 = vector.extract_strided_slice %112 {offsets = [0, 384], sizes = [8, 128], strides = [1, 1]} : vector<8x512xf32> to vector<8x128xf32>
      %cst_55 = arith.constant 5.000000e-01 : f32
      %132 = vector.broadcast %cst_55 : f32 to vector<8x128xf32>
      %133 = arith.mulf %132, %131 : vector<8x128xf32>
      %134 = math.tanh %133 : vector<8x128xf32>
      %cst_56 = arith.constant 5.000000e-01 : f32
      %135 = vector.broadcast %cst_56 : f32 to vector<8x128xf32>
      %136 = arith.mulf %135, %134 : vector<8x128xf32>
      %cst_57 = arith.constant 5.000000e-01 : f32
      %137 = vector.broadcast %cst_57 : f32 to vector<8x128xf32>
      %138 = arith.addf %136, %137 : vector<8x128xf32>
      %139 = arith.mulf %120, %130 : vector<8x128xf32>
      %140 = arith.mulf %128, %97 : vector<8x128xf32>
      %141 = arith.addf %139, %140 : vector<8x128xf32>
      %142 = math.tanh %141 : vector<8x128xf32>
      %143 = arith.mulf %138, %142 : vector<8x128xf32>
      %144 = arith.truncf %143 : vector<8x128xf32> to vector<8x128xbf16>
      %145 = arith.index_cast %c2_i32 : i32 to index
      %c0_58 = arith.constant 0 : index
      %c0_59 = arith.constant 0 : index
      %146 = vector.load %arg5[%145, %c0_58, %c0_59] : memref<16x8x128xbf16, #tpu.memory_space<vmem>>, vector<1x8x128xbf16>
      %147 = vector.shape_cast %146 : vector<1x8x128xbf16> to vector<8x128xbf16>
      %148 = vector.shape_cast %144 : vector<8x128xbf16> to vector<1x8x128xbf16>
      tpu.vector_store %arg5[%145, %c0_58, %c0_59], %148 {strides = array<i32>} : memref<16x8x128xbf16, #tpu.memory_space<vmem>>, vector<1x8x128xbf16>,
      %c3_i32 = arith.constant 3 : i32
      %149 = arith.index_cast %c3_i32 : i32 to index
      %c0_60 = arith.constant 0 : index
      %c0_61 = arith.constant 0 : index
      %150 = vector.load %arg2[%149, %c0_60, %c0_61] : memref<16x8x512xbf16, #tpu.memory_space<vmem>>, vector<1x8x512xbf16>
      %151 = vector.shape_cast %150 : vector<1x8x512xbf16> to vector<8x512xbf16>
      %152 = arith.extf %151 : vector<8x512xbf16> to vector<8x512xf32>
      %153 = arith.addf %152, %5 : vector<8x512xf32>
      %c0_62 = arith.constant 0 : index
      %c0_63 = arith.constant 0 : index
      %154 = vector.load %arg3[%c0_62, %c0_63] : memref<128x512xf32, #tpu.memory_space<vmem>>, vector<128x512xf32>
      %cst_64 = arith.constant dense<0.000000e+00> : vector<8x512xf32>
      %155 = tpu.matmul %143, %154, %cst_64 {dimension_numbers = #tpu.dot_dimension_numbers<[1], [0], [0], [1], [0, 0, 1, 1], [], []>} : vector<8x128xf32>, vector<128x512xf32>, vector<8x512xf32> -> vector<8x512xf32>
      %156 = arith.addf %153, %155 : vector<8x512xf32>
      %157 = vector.extract_strided_slice %156 {offsets = [0, 0], sizes = [8, 128], strides = [1, 1]} : vector<8x512xf32> to vector<8x128xf32>
      %cst_65 = arith.constant 5.000000e-01 : f32
      %158 = vector.broadcast %cst_65 : f32 to vector<8x128xf32>
      %159 = arith.mulf %158, %157 : vector<8x128xf32>
      %160 = math.tanh %159 : vector<8x128xf32>
      %cst_66 = arith.constant 5.000000e-01 : f32
      %161 = vector.broadcast %cst_66 : f32 to vector<8x128xf32>
      %162 = arith.mulf %161, %160 : vector<8x128xf32>
      %cst_67 = arith.constant 5.000000e-01 : f32
      %163 = vector.broadcast %cst_67 : f32 to vector<8x128xf32>
      %164 = arith.addf %162, %163 : vector<8x128xf32>
      %165 = vector.extract_strided_slice %156 {offsets = [0, 128], sizes = [8, 128], strides = [1, 1]} : vector<8x512xf32> to vector<8x128xf32>
      %cst_68 = arith.constant 5.000000e-01 : f32
      %166 = vector.broadcast %cst_68 : f32 to vector<8x128xf32>
      %167 = arith.mulf %166, %165 : vector<8x128xf32>
      %168 = math.tanh %167 : vector<8x128xf32>
      %cst_69 = arith.constant 5.000000e-01 : f32
      %169 = vector.broadcast %cst_69 : f32 to vector<8x128xf32>
      %170 = arith.mulf %169, %168 : vector<8x128xf32>
      %cst_70 = arith.constant 5.000000e-01 : f32
      %171 = vector.broadcast %cst_70 : f32 to vector<8x128xf32>
      %172 = arith.addf %170, %171 : vector<8x128xf32>
      %173 = vector.extract_strided_slice %156 {offsets = [0, 256], sizes = [8, 128], strides = [1, 1]} : vector<8x512xf32> to vector<8x128xf32>
      %174 = math.tanh %173 : vector<8x128xf32>
      %175 = vector.extract_strided_slice %156 {offsets = [0, 384], sizes = [8, 128], strides = [1, 1]} : vector<8x512xf32> to vector<8x128xf32>
      %cst_71 = arith.constant 5.000000e-01 : f32
      %176 = vector.broadcast %cst_71 : f32 to vector<8x128xf32>
      %177 = arith.mulf %176, %175 : vector<8x128xf32>
      %178 = math.tanh %177 : vector<8x128xf32>
      %cst_72 = arith.constant 5.000000e-01 : f32
      %179 = vector.broadcast %cst_72 : f32 to vector<8x128xf32>
      %180 = arith.mulf %179, %178 : vector<8x128xf32>
      %cst_73 = arith.constant 5.000000e-01 : f32
      %181 = vector.broadcast %cst_73 : f32 to vector<8x128xf32>
      %182 = arith.addf %180, %181 : vector<8x128xf32>
      %183 = arith.mulf %164, %174 : vector<8x128xf32>
      %184 = arith.mulf %172, %141 : vector<8x128xf32>
      %185 = arith.addf %183, %184 : vector<8x128xf32>
      %186 = math.tanh %185 : vector<8x128xf32>
      %187 = arith.mulf %182, %186 : vector<8x128xf32>
      %188 = arith.truncf %187 : vector<8x128xf32> to vector<8x128xbf16>
      %189 = arith.index_cast %c3_i32 : i32 to index
      %c0_74 = arith.constant 0 : index
      %c0_75 = arith.constant 0 : index
      %190 = vector.load %arg5[%189, %c0_74, %c0_75] : memref<16x8x128xbf16, #tpu.memory_space<vmem>>, vector<1x8x128xbf16>
      %191 = vector.shape_cast %190 : vector<1x8x128xbf16> to vector<8x128xbf16>
      %192 = vector.shape_cast %188 : vector<8x128xbf16> to vector<1x8x128xbf16>
      tpu.vector_store %arg5[%189, %c0_74, %c0_75], %192 {strides = array<i32>} : memref<16x8x128xbf16, #tpu.memory_space<vmem>>, vector<1x8x128xbf16>,
      %c4_i32 = arith.constant 4 : i32
      %193 = arith.index_cast %c4_i32 : i32 to index
      %c0_76 = arith.constant 0 : index
      %c0_77 = arith.constant 0 : index
      %194 = vector.load %arg2[%193, %c0_76, %c0_77] : memref<16x8x512xbf16, #tpu.memory_space<vmem>>, vector<1x8x512xbf16>
      %195 = vector.shape_cast %194 : vector<1x8x512xbf16> to vector<8x512xbf16>
      %196 = arith.extf %195 : vector<8x512xbf16> to vector<8x512xf32>
      %197 = arith.addf %196, %5 : vector<8x512xf32>
      %c0_78 = arith.constant 0 : index
      %c0_79 = arith.constant 0 : index
      %198 = vector.load %arg3[%c0_78, %c0_79] : memref<128x512xf32, #tpu.memory_space<vmem>>, vector<128x512xf32>
      %cst_80 = arith.constant dense<0.000000e+00> : vector<8x512xf32>
      %199 = tpu.matmul %187, %198, %cst_80 {dimension_numbers = #tpu.dot_dimension_numbers<[1], [0], [0], [1], [0, 0, 1, 1], [], []>} : vector<8x128xf32>, vector<128x512xf32>, vector<8x512xf32> -> vector<8x512xf32>
      %200 = arith.addf %197, %199 : vector<8x512xf32>
      %201 = vector.extract_strided_slice %200 {offsets = [0, 0], sizes = [8, 128], strides = [1, 1]} : vector<8x512xf32> to vector<8x128xf32>
      %cst_81 = arith.constant 5.000000e-01 : f32
      %202 = vector.broadcast %cst_81 : f32 to vector<8x128xf32>
      %203 = arith.mulf %202, %201 : vector<8x128xf32>
      %204 = math.tanh %203 : vector<8x128xf32>
      %cst_82 = arith.constant 5.000000e-01 : f32
      %205 = vector.broadcast %cst_82 : f32 to vector<8x128xf32>
      %206 = arith.mulf %205, %204 : vector<8x128xf32>
      %cst_83 = arith.constant 5.000000e-01 : f32
      %207 = vector.broadcast %cst_83 : f32 to vector<8x128xf32>
      %208 = arith.addf %206, %207 : vector<8x128xf32>
      %209 = vector.extract_strided_slice %200 {offsets = [0, 128], sizes = [8, 128], strides = [1, 1]} : vector<8x512xf32> to vector<8x128xf32>
      %cst_84 = arith.constant 5.000000e-01 : f32
      %210 = vector.broadcast %cst_84 : f32 to vector<8x128xf32>
      %211 = arith.mulf %210, %209 : vector<8x128xf32>
      %212 = math.tanh %211 : vector<8x128xf32>
      %cst_85 = arith.constant 5.000000e-01 : f32
      %213 = vector.broadcast %cst_85 : f32 to vector<8x128xf32>
      %214 = arith.mulf %213, %212 : vector<8x128xf32>
      %cst_86 = arith.constant 5.000000e-01 : f32
      %215 = vector.broadcast %cst_86 : f32 to vector<8x128xf32>
      %216 = arith.addf %214, %215 : vector<8x128xf32>
      %217 = vector.extract_strided_slice %200 {offsets = [0, 256], sizes = [8, 128], strides = [1, 1]} : vector<8x512xf32> to vector<8x128xf32>
      %218 = math.tanh %217 : vector<8x128xf32>
      %219 = vector.extract_strided_slice %200 {offsets = [0, 384], sizes = [8, 128], strides = [1, 1]} : vector<8x512xf32> to vector<8x128xf32>
      %cst_87 = arith.constant 5.000000e-01 : f32
      %220 = vector.broadcast %cst_87 : f32 to vector<8x128xf32>
      %221 = arith.mulf %220, %219 : vector<8x128xf32>
      %222 = math.tanh %221 : vector<8x128xf32>
      %cst_88 = arith.constant 5.000000e-01 : f32
      %223 = vector.broadcast %cst_88 : f32 to vector<8x128xf32>
      %224 = arith.mulf %223, %222 : vector<8x128xf32>
      %cst_89 = arith.constant 5.000000e-01 : f32
      %225 = vector.broadcast %cst_89 : f32 to vector<8x128xf32>
      %226 = arith.addf %224, %225 : vector<8x128xf32>
      %227 = arith.mulf %208, %218 : vector<8x128xf32>
      %228 = arith.mulf %216, %185 : vector<8x128xf32>
      %229 = arith.addf %227, %228 : vector<8x128xf32>
      %230 = math.tanh %229 : vector<8x128xf32>
      %231 = arith.mulf %226, %230 : vector<8x128xf32>
      %232 = arith.truncf %231 : vector<8x128xf32> to vector<8x128xbf16>
      %233 = arith.index_cast %c4_i32 : i32 to index
      %c0_90 = arith.constant 0 : index
      %c0_91 = arith.constant 0 : index
      %234 = vector.load %arg5[%233, %c0_90, %c0_91] : memref<16x8x128xbf16, #tpu.memory_space<vmem>>, vector<1x8x128xbf16>
      %235 = vector.shape_cast %234 : vector<1x8x128xbf16> to vector<8x128xbf16>
      %236 = vector.shape_cast %232 : vector<8x128xbf16> to vector<1x8x128xbf16>
      tpu.vector_store %arg5[%233, %c0_90, %c0_91], %236 {strides = array<i32>} : memref<16x8x128xbf16, #tpu.memory_space<vmem>>, vector<1x8x128xbf16>,
      %c5_i32 = arith.constant 5 : i32
      %237 = arith.index_cast %c5_i32 : i32 to index
      %c0_92 = arith.constant 0 : index
      %c0_93 = arith.constant 0 : index
      %238 = vector.load %arg2[%237, %c0_92, %c0_93] : memref<16x8x512xbf16, #tpu.memory_space<vmem>>, vector<1x8x512xbf16>
      %239 = vector.shape_cast %238 : vector<1x8x512xbf16> to vector<8x512xbf16>
      %240 = arith.extf %239 : vector<8x512xbf16> to vector<8x512xf32>
      %241 = arith.addf %240, %5 : vector<8x512xf32>
      %c0_94 = arith.constant 0 : index
      %c0_95 = arith.constant 0 : index
      %242 = vector.load %arg3[%c0_94, %c0_95] : memref<128x512xf32, #tpu.memory_space<vmem>>, vector<128x512xf32>
      %cst_96 = arith.constant dense<0.000000e+00> : vector<8x512xf32>
      %243 = tpu.matmul %231, %242, %cst_96 {dimension_numbers = #tpu.dot_dimension_numbers<[1], [0], [0], [1], [0, 0, 1, 1], [], []>} : vector<8x128xf32>, vector<128x512xf32>, vector<8x512xf32> -> vector<8x512xf32>
      %244 = arith.addf %241, %243 : vector<8x512xf32>
      %245 = vector.extract_strided_slice %244 {offsets = [0, 0], sizes = [8, 128], strides = [1, 1]} : vector<8x512xf32> to vector<8x128xf32>
      %cst_97 = arith.constant 5.000000e-01 : f32
      %246 = vector.broadcast %cst_97 : f32 to vector<8x128xf32>
      %247 = arith.mulf %246, %245 : vector<8x128xf32>
      %248 = math.tanh %247 : vector<8x128xf32>
      %cst_98 = arith.constant 5.000000e-01 : f32
      %249 = vector.broadcast %cst_98 : f32 to vector<8x128xf32>
      %250 = arith.mulf %249, %248 : vector<8x128xf32>
      %cst_99 = arith.constant 5.000000e-01 : f32
      %251 = vector.broadcast %cst_99 : f32 to vector<8x128xf32>
      %252 = arith.addf %250, %251 : vector<8x128xf32>
      %253 = vector.extract_strided_slice %244 {offsets = [0, 128], sizes = [8, 128], strides = [1, 1]} : vector<8x512xf32> to vector<8x128xf32>
      %cst_100 = arith.constant 5.000000e-01 : f32
      %254 = vector.broadcast %cst_100 : f32 to vector<8x128xf32>
      %255 = arith.mulf %254, %253 : vector<8x128xf32>
      %256 = math.tanh %255 : vector<8x128xf32>
      %cst_101 = arith.constant 5.000000e-01 : f32
      %257 = vector.broadcast %cst_101 : f32 to vector<8x128xf32>
      %258 = arith.mulf %257, %256 : vector<8x128xf32>
      %cst_102 = arith.constant 5.000000e-01 : f32
      %259 = vector.broadcast %cst_102 : f32 to vector<8x128xf32>
      %260 = arith.addf %258, %259 : vector<8x128xf32>
      %261 = vector.extract_strided_slice %244 {offsets = [0, 256], sizes = [8, 128], strides = [1, 1]} : vector<8x512xf32> to vector<8x128xf32>
      %262 = math.tanh %261 : vector<8x128xf32>
      %263 = vector.extract_strided_slice %244 {offsets = [0, 384], sizes = [8, 128], strides = [1, 1]} : vector<8x512xf32> to vector<8x128xf32>
      %cst_103 = arith.constant 5.000000e-01 : f32
      %264 = vector.broadcast %cst_103 : f32 to vector<8x128xf32>
      %265 = arith.mulf %264, %263 : vector<8x128xf32>
      %266 = math.tanh %265 : vector<8x128xf32>
      %cst_104 = arith.constant 5.000000e-01 : f32
      %267 = vector.broadcast %cst_104 : f32 to vector<8x128xf32>
      %268 = arith.mulf %267, %266 : vector<8x128xf32>
      %cst_105 = arith.constant 5.000000e-01 : f32
      %269 = vector.broadcast %cst_105 : f32 to vector<8x128xf32>
      %270 = arith.addf %268, %269 : vector<8x128xf32>
      %271 = arith.mulf %252, %262 : vector<8x128xf32>
      %272 = arith.mulf %260, %229 : vector<8x128xf32>
      %273 = arith.addf %271, %272 : vector<8x128xf32>
      %274 = math.tanh %273 : vector<8x128xf32>
      %275 = arith.mulf %270, %274 : vector<8x128xf32>
      %276 = arith.truncf %275 : vector<8x128xf32> to vector<8x128xbf16>
      %277 = arith.index_cast %c5_i32 : i32 to index
      %c0_106 = arith.constant 0 : index
      %c0_107 = arith.constant 0 : index
      %278 = vector.load %arg5[%277, %c0_106, %c0_107] : memref<16x8x128xbf16, #tpu.memory_space<vmem>>, vector<1x8x128xbf16>
      %279 = vector.shape_cast %278 : vector<1x8x128xbf16> to vector<8x128xbf16>
      %280 = vector.shape_cast %276 : vector<8x128xbf16> to vector<1x8x128xbf16>
      tpu.vector_store %arg5[%277, %c0_106, %c0_107], %280 {strides = array<i32>} : memref<16x8x128xbf16, #tpu.memory_space<vmem>>, vector<1x8x128xbf16>,
      %c6_i32 = arith.constant 6 : i32
      %281 = arith.index_cast %c6_i32 : i32 to index
      %c0_108 = arith.constant 0 : index
      %c0_109 = arith.constant 0 : index
      %282 = vector.load %arg2[%281, %c0_108, %c0_109] : memref<16x8x512xbf16, #tpu.memory_space<vmem>>, vector<1x8x512xbf16>
      %283 = vector.shape_cast %282 : vector<1x8x512xbf16> to vector<8x512xbf16>
      %284 = arith.extf %283 : vector<8x512xbf16> to vector<8x512xf32>
      %285 = arith.addf %284, %5 : vector<8x512xf32>
      %c0_110 = arith.constant 0 : index
      %c0_111 = arith.constant 0 : index
      %286 = vector.load %arg3[%c0_110, %c0_111] : memref<128x512xf32, #tpu.memory_space<vmem>>, vector<128x512xf32>
      %cst_112 = arith.constant dense<0.000000e+00> : vector<8x512xf32>
      %287 = tpu.matmul %275, %286, %cst_112 {dimension_numbers = #tpu.dot_dimension_numbers<[1], [0], [0], [1], [0, 0, 1, 1], [], []>} : vector<8x128xf32>, vector<128x512xf32>, vector<8x512xf32> -> vector<8x512xf32>
      %288 = arith.addf %285, %287 : vector<8x512xf32>
      %289 = vector.extract_strided_slice %288 {offsets = [0, 0], sizes = [8, 128], strides = [1, 1]} : vector<8x512xf32> to vector<8x128xf32>
      %cst_113 = arith.constant 5.000000e-01 : f32
      %290 = vector.broadcast %cst_113 : f32 to vector<8x128xf32>
      %291 = arith.mulf %290, %289 : vector<8x128xf32>
      %292 = math.tanh %291 : vector<8x128xf32>
      %cst_114 = arith.constant 5.000000e-01 : f32
      %293 = vector.broadcast %cst_114 : f32 to vector<8x128xf32>
      %294 = arith.mulf %293, %292 : vector<8x128xf32>
      %cst_115 = arith.constant 5.000000e-01 : f32
      %295 = vector.broadcast %cst_115 : f32 to vector<8x128xf32>
      %296 = arith.addf %294, %295 : vector<8x128xf32>
      %297 = vector.extract_strided_slice %288 {offsets = [0, 128], sizes = [8, 128], strides = [1, 1]} : vector<8x512xf32> to vector<8x128xf32>
      %cst_116 = arith.constant 5.000000e-01 : f32
      %298 = vector.broadcast %cst_116 : f32 to vector<8x128xf32>
      %299 = arith.mulf %298, %297 : vector<8x128xf32>
      %300 = math.tanh %299 : vector<8x128xf32>
      %cst_117 = arith.constant 5.000000e-01 : f32
      %301 = vector.broadcast %cst_117 : f32 to vector<8x128xf32>
      %302 = arith.mulf %301, %300 : vector<8x128xf32>
      %cst_118 = arith.constant 5.000000e-01 : f32
      %303 = vector.broadcast %cst_118 : f32 to vector<8x128xf32>
      %304 = arith.addf %302, %303 : vector<8x128xf32>
      %305 = vector.extract_strided_slice %288 {offsets = [0, 256], sizes = [8, 128], strides = [1, 1]} : vector<8x512xf32> to vector<8x128xf32>
      %306 = math.tanh %305 : vector<8x128xf32>
      %307 = vector.extract_strided_slice %288 {offsets = [0, 384], sizes = [8, 128], strides = [1, 1]} : vector<8x512xf32> to vector<8x128xf32>
      %cst_119 = arith.constant 5.000000e-01 : f32
      %308 = vector.broadcast %cst_119 : f32 to vector<8x128xf32>
      %309 = arith.mulf %308, %307 : vector<8x128xf32>
      %310 = math.tanh %309 : vector<8x128xf32>
      %cst_120 = arith.constant 5.000000e-01 : f32
      %311 = vector.broadcast %cst_120 : f32 to vector<8x128xf32>
      %312 = arith.mulf %311, %310 : vector<8x128xf32>
      %cst_121 = arith.constant 5.000000e-01 : f32
      %313 = vector.broadcast %cst_121 : f32 to vector<8x128xf32>
      %314 = arith.addf %312, %313 : vector<8x128xf32>
      %315 = arith.mulf %296, %306 : vector<8x128xf32>
      %316 = arith.mulf %304, %273 : vector<8x128xf32>
      %317 = arith.addf %315, %316 : vector<8x128xf32>
      %318 = math.tanh %317 : vector<8x128xf32>
      %319 = arith.mulf %314, %318 : vector<8x128xf32>
      %320 = arith.truncf %319 : vector<8x128xf32> to vector<8x128xbf16>
      %321 = arith.index_cast %c6_i32 : i32 to index
      %c0_122 = arith.constant 0 : index
      %c0_123 = arith.constant 0 : index
      %322 = vector.load %arg5[%321, %c0_122, %c0_123] : memref<16x8x128xbf16, #tpu.memory_space<vmem>>, vector<1x8x128xbf16>
      %323 = vector.shape_cast %322 : vector<1x8x128xbf16> to vector<8x128xbf16>
      %324 = vector.shape_cast %320 : vector<8x128xbf16> to vector<1x8x128xbf16>
      tpu.vector_store %arg5[%321, %c0_122, %c0_123], %324 {strides = array<i32>} : memref<16x8x128xbf16, #tpu.memory_space<vmem>>, vector<1x8x128xbf16>,
      %c7_i32 = arith.constant 7 : i32
      %325 = arith.index_cast %c7_i32 : i32 to index
      %c0_124 = arith.constant 0 : index
      %c0_125 = arith.constant 0 : index
      %326 = vector.load %arg2[%325, %c0_124, %c0_125] : memref<16x8x512xbf16, #tpu.memory_space<vmem>>, vector<1x8x512xbf16>
      %327 = vector.shape_cast %326 : vector<1x8x512xbf16> to vector<8x512xbf16>
      %328 = arith.extf %327 : vector<8x512xbf16> to vector<8x512xf32>
      %329 = arith.addf %328, %5 : vector<8x512xf32>
      %c0_126 = arith.constant 0 : index
      %c0_127 = arith.constant 0 : index
      %330 = vector.load %arg3[%c0_126, %c0_127] : memref<128x512xf32, #tpu.memory_space<vmem>>, vector<128x512xf32>
      %cst_128 = arith.constant dense<0.000000e+00> : vector<8x512xf32>
      %331 = tpu.matmul %319, %330, %cst_128 {dimension_numbers = #tpu.dot_dimension_numbers<[1], [0], [0], [1], [0, 0, 1, 1], [], []>} : vector<8x128xf32>, vector<128x512xf32>, vector<8x512xf32> -> vector<8x512xf32>
      %332 = arith.addf %329, %331 : vector<8x512xf32>
      %333 = vector.extract_strided_slice %332 {offsets = [0, 0], sizes = [8, 128], strides = [1, 1]} : vector<8x512xf32> to vector<8x128xf32>
      %cst_129 = arith.constant 5.000000e-01 : f32
      %334 = vector.broadcast %cst_129 : f32 to vector<8x128xf32>
      %335 = arith.mulf %334, %333 : vector<8x128xf32>
      %336 = math.tanh %335 : vector<8x128xf32>
      %cst_130 = arith.constant 5.000000e-01 : f32
      %337 = vector.broadcast %cst_130 : f32 to vector<8x128xf32>
      %338 = arith.mulf %337, %336 : vector<8x128xf32>
      %cst_131 = arith.constant 5.000000e-01 : f32
      %339 = vector.broadcast %cst_131 : f32 to vector<8x128xf32>
      %340 = arith.addf %338, %339 : vector<8x128xf32>
      %341 = vector.extract_strided_slice %332 {offsets = [0, 128], sizes = [8, 128], strides = [1, 1]} : vector<8x512xf32> to vector<8x128xf32>
      %cst_132 = arith.constant 5.000000e-01 : f32
      %342 = vector.broadcast %cst_132 : f32 to vector<8x128xf32>
      %343 = arith.mulf %342, %341 : vector<8x128xf32>
      %344 = math.tanh %343 : vector<8x128xf32>
      %cst_133 = arith.constant 5.000000e-01 : f32
      %345 = vector.broadcast %cst_133 : f32 to vector<8x128xf32>
      %346 = arith.mulf %345, %344 : vector<8x128xf32>
      %cst_134 = arith.constant 5.000000e-01 : f32
      %347 = vector.broadcast %cst_134 : f32 to vector<8x128xf32>
      %348 = arith.addf %346, %347 : vector<8x128xf32>
      %349 = vector.extract_strided_slice %332 {offsets = [0, 256], sizes = [8, 128], strides = [1, 1]} : vector<8x512xf32> to vector<8x128xf32>
      %350 = math.tanh %349 : vector<8x128xf32>
      %351 = vector.extract_strided_slice %332 {offsets = [0, 384], sizes = [8, 128], strides = [1, 1]} : vector<8x512xf32> to vector<8x128xf32>
      %cst_135 = arith.constant 5.000000e-01 : f32
      %352 = vector.broadcast %cst_135 : f32 to vector<8x128xf32>
      %353 = arith.mulf %352, %351 : vector<8x128xf32>
      %354 = math.tanh %353 : vector<8x128xf32>
      %cst_136 = arith.constant 5.000000e-01 : f32
      %355 = vector.broadcast %cst_136 : f32 to vector<8x128xf32>
      %356 = arith.mulf %355, %354 : vector<8x128xf32>
      %cst_137 = arith.constant 5.000000e-01 : f32
      %357 = vector.broadcast %cst_137 : f32 to vector<8x128xf32>
      %358 = arith.addf %356, %357 : vector<8x128xf32>
      %359 = arith.mulf %340, %350 : vector<8x128xf32>
      %360 = arith.mulf %348, %317 : vector<8x128xf32>
      %361 = arith.addf %359, %360 : vector<8x128xf32>
      %362 = math.tanh %361 : vector<8x128xf32>
      %363 = arith.mulf %358, %362 : vector<8x128xf32>
      %364 = arith.truncf %363 : vector<8x128xf32> to vector<8x128xbf16>
      %365 = arith.index_cast %c7_i32 : i32 to index
      %c0_138 = arith.constant 0 : index
      %c0_139 = arith.constant 0 : index
      %366 = vector.load %arg5[%365, %c0_138, %c0_139] : memref<16x8x128xbf16, #tpu.memory_space<vmem>>, vector<1x8x128xbf16>
      %367 = vector.shape_cast %366 : vector<1x8x128xbf16> to vector<8x128xbf16>
      %368 = vector.shape_cast %364 : vector<8x128xbf16> to vector<1x8x128xbf16>
      tpu.vector_store %arg5[%365, %c0_138, %c0_139], %368 {strides = array<i32>} : memref<16x8x128xbf16, #tpu.memory_space<vmem>>, vector<1x8x128xbf16>,
      %c8_i32 = arith.constant 8 : i32
      %c0_140 = arith.constant 0 : index
      %c0_141 = arith.constant 0 : index
      %369 = vector.load %arg8[%c0_140, %c0_141] : memref<8x128xf32, #tpu.memory_space<vmem>>, vector<8x128xf32>
      tpu.vector_store %arg8[%c0_140, %c0_141], %363 {strides = array<i32>} : memref<8x128xf32, #tpu.memory_space<vmem>>, vector<8x128xf32>,
      %c0_142 = arith.constant 0 : index
      %c0_143 = arith.constant 0 : index
      %370 = vector.load %arg9[%c0_142, %c0_143] : memref<8x128xf32, #tpu.memory_space<vmem>>, vector<8x128xf32>
      tpu.vector_store %arg9[%c0_142, %c0_143], %361 {strides = array<i32>} : memref<8x128xf32, #tpu.memory_space<vmem>>, vector<8x128xf32>,
      %371 = arith.truncf %363 : vector<8x128xf32> to vector<8x128xbf16>
      %c8 = arith.constant 8 : index
      %c0_144 = arith.constant 0 : index
      %c0_145 = arith.constant 0 : index
      %372 = vector.load %arg5[%c8, %c0_144, %c0_145] : memref<16x8x128xbf16, #tpu.memory_space<vmem>>, vector<1x8x128xbf16>
      %373 = vector.shape_cast %372 : vector<1x8x128xbf16> to vector<8x128xbf16>
      %374 = vector.shape_cast %371 : vector<8x128xbf16> to vector<1x8x128xbf16>
      tpu.vector_store %arg5[%c8, %c0_144, %c0_145], %374 {strides = array<i32>} : memref<16x8x128xbf16, #tpu.memory_space<vmem>>, vector<1x8x128xbf16>,
      %c9 = arith.constant 9 : index
      %c0_146 = arith.constant 0 : index
      %c0_147 = arith.constant 0 : index
      %375 = vector.load %arg5[%c9, %c0_146, %c0_147] : memref<16x8x128xbf16, #tpu.memory_space<vmem>>, vector<1x8x128xbf16>
      %376 = vector.shape_cast %375 : vector<1x8x128xbf16> to vector<8x128xbf16>
      %377 = vector.shape_cast %371 : vector<8x128xbf16> to vector<1x8x128xbf16>
      tpu.vector_store %arg5[%c9, %c0_146, %c0_147], %377 {strides = array<i32>} : memref<16x8x128xbf16, #tpu.memory_space<vmem>>, vector<1x8x128xbf16>,
      %c10 = arith.constant 10 : index
      %c0_148 = arith.constant 0 : index
      %c0_149 = arith.constant 0 : index
      %378 = vector.load %arg5[%c10, %c0_148, %c0_149] : memref<16x8x128xbf16, #tpu.memory_space<vmem>>, vector<1x8x128xbf16>
      %379 = vector.shape_cast %378 : vector<1x8x128xbf16> to vector<8x128xbf16>
      %380 = vector.shape_cast %371 : vector<8x128xbf16> to vector<1x8x128xbf16>
      tpu.vector_store %arg5[%c10, %c0_148, %c0_149], %380 {strides = array<i32>} : memref<16x8x128xbf16, #tpu.memory_space<vmem>>, vector<1x8x128xbf16>,
      %c11 = arith.constant 11 : index
      %c0_150 = arith.constant 0 : index
      %c0_151 = arith.constant 0 : index
      %381 = vector.load %arg5[%c11, %c0_150, %c0_151] : memref<16x8x128xbf16, #tpu.memory_space<vmem>>, vector<1x8x128xbf16>
      %382 = vector.shape_cast %381 : vector<1x8x128xbf16> to vector<8x128xbf16>
      %383 = vector.shape_cast %371 : vector<8x128xbf16> to vector<1x8x128xbf16>
      tpu.vector_store %arg5[%c11, %c0_150, %c0_151], %383 {strides = array<i32>} : memref<16x8x128xbf16, #tpu.memory_space<vmem>>, vector<1x8x128xbf16>,
      %c12 = arith.constant 12 : index
      %c0_152 = arith.constant 0 : index
      %c0_153 = arith.constant 0 : index
      %384 = vector.load %arg5[%c12, %c0_152, %c0_153] : memref<16x8x128xbf16, #tpu.memory_space<vmem>>, vector<1x8x128xbf16>
      %385 = vector.shape_cast %384 : vector<1x8x128xbf16> to vector<8x128xbf16>
      %386 = vector.shape_cast %371 : vector<8x128xbf16> to vector<1x8x128xbf16>
      tpu.vector_store %arg5[%c12, %c0_152, %c0_153], %386 {strides = array<i32>} : memref<16x8x128xbf16, #tpu.memory_space<vmem>>, vector<1x8x128xbf16>,
      %c13 = arith.constant 13 : index
      %c0_154 = arith.constant 0 : index
      %c0_155 = arith.constant 0 : index
      %387 = vector.load %arg5[%c13, %c0_154, %c0_155] : memref<16x8x128xbf16, #tpu.memory_space<vmem>>, vector<1x8x128xbf16>
      %388 = vector.shape_cast %387 : vector<1x8x128xbf16> to vector<8x128xbf16>
      %389 = vector.shape_cast %371 : vector<8x128xbf16> to vector<1x8x128xbf16>
      tpu.vector_store %arg5[%c13, %c0_154, %c0_155], %389 {strides = array<i32>} : memref<16x8x128xbf16, #tpu.memory_space<vmem>>, vector<1x8x128xbf16>,
      %c14 = arith.constant 14 : index
      %c0_156 = arith.constant 0 : index
      %c0_157 = arith.constant 0 : index
      %390 = vector.load %arg5[%c14, %c0_156, %c0_157] : memref<16x8x128xbf16, #tpu.memory_space<vmem>>, vector<1x8x128xbf16>
      %391 = vector.shape_cast %390 : vector<1x8x128xbf16> to vector<8x128xbf16>
      %392 = vector.shape_cast %371 : vector<8x128xbf16> to vector<1x8x128xbf16>
      tpu.vector_store %arg5[%c14, %c0_156, %c0_157], %392 {strides = array<i32>} : memref<16x8x128xbf16, #tpu.memory_space<vmem>>, vector<1x8x128xbf16>,
      %c15 = arith.constant 15 : index
      %c0_158 = arith.constant 0 : index
      %c0_159 = arith.constant 0 : index
      %393 = vector.load %arg5[%c15, %c0_158, %c0_159] : memref<16x8x128xbf16, #tpu.memory_space<vmem>>, vector<1x8x128xbf16>
      %394 = vector.shape_cast %393 : vector<1x8x128xbf16> to vector<8x128xbf16>
      %395 = vector.shape_cast %371 : vector<8x128xbf16> to vector<1x8x128xbf16>
      tpu.vector_store %arg5[%c15, %c0_158, %c0_159], %395 {strides = array<i32>} : memref<16x8x128xbf16, #tpu.memory_space<vmem>>, vector<1x8x128xbf16>,
    } else {
    }
    %c1_i32_5 = arith.constant 1 : i32
    %12 = arith.cmpi eq, %arg1, %c1_i32_5 : i32
    %13 = arith.extui %12 : i1 to i32
    %c0_i32_6 = arith.constant 0 : i32
    %14 = arith.cmpi ne, %13, %c0_i32_6 : i32
    scf.if %14 {
      %c0_7 = arith.constant 0 : index
      %c0_8 = arith.constant 0 : index
      %15 = vector.load %arg8[%c0_7, %c0_8] : memref<8x128xf32, #tpu.memory_space<vmem>>, vector<8x128xf32>
      %c0_9 = arith.constant 0 : index
      %c0_10 = arith.constant 0 : index
      %16 = vector.load %arg6[%c0_9, %c0_10] : memref<8x128xf32, #tpu.memory_space<vmem>>, vector<8x128xf32>
      tpu.vector_store %arg6[%c0_9, %c0_10], %15 {strides = array<i32>} : memref<8x128xf32, #tpu.memory_space<vmem>>, vector<8x128xf32>,
      %c0_11 = arith.constant 0 : index
      %c0_12 = arith.constant 0 : index
      %17 = vector.load %arg9[%c0_11, %c0_12] : memref<8x128xf32, #tpu.memory_space<vmem>>, vector<8x128xf32>
      %c0_13 = arith.constant 0 : index
      %c0_14 = arith.constant 0 : index
      %18 = vector.load %arg7[%c0_13, %c0_14] : memref<8x128xf32, #tpu.memory_space<vmem>>, vector<8x128xf32>
      tpu.vector_store %arg7[%c0_13, %c0_14], %17 {strides = array<i32>} : memref<8x128xf32, #tpu.memory_space<vmem>>, vector<8x128xf32>,
    } else {
    }
    return
  }
  func.func @transform_0(%arg0: i32, %arg1: i32) -> (i32, i32, i32) {
    %c0_i32 = arith.constant 0 : i32
    %c0_i32_0 = arith.constant 0 : i32
    return %arg1, %arg0, %c0_i32 : i32, i32, i32
  }
  func.func @transform_1(%arg0: i32, %arg1: i32) -> (i32, i32) {
    %c0_i32 = arith.constant 0 : i32
    %c0_i32_0 = arith.constant 0 : i32
    %c0_i32_1 = arith.constant 0 : i32
    return %c0_i32, %c0_i32_0 : i32, i32
  }
  func.func @transform_2(%arg0: i32, %arg1: i32) -> (i32, i32) {
    %c0_i32 = arith.constant 0 : i32
    %c0_i32_0 = arith.constant 0 : i32
    %c0_i32_1 = arith.constant 0 : i32
    return %c0_i32, %c0_i32_0 : i32, i32
  }
  func.func @transform_3(%arg0: i32, %arg1: i32) -> (i32, i32, i32) {
    %c0_i32 = arith.constant 0 : i32
    %c0_i32_0 = arith.constant 0 : i32
    return %arg1, %arg0, %c0_i32 : i32, i32, i32
  }
  func.func @transform_4(%arg0: i32, %arg1: i32) -> (i32, i32) {
    %c0_i32 = arith.constant 0 : i32
    %c0_i32_0 = arith.constant 0 : i32
    return %arg0, %c0_i32 : i32, i32
  }
  func.func @transform_5(%arg0: i32, %arg1: i32) -> (i32, i32) {
    %c0_i32 = arith.constant 0 : i32
    %c0_i32_0 = arith.constant 0 : i32
    return %arg0, %c0_i32 : i32, i32
  }
}

</mosaic_0001>

<bundles_post_ra>
// kernel: lstm_decoder_forward.2
= control target key start
LH: loop header
LB: loop body
LE: loop exit
PB: predicated region body
PF: predicated region fallthrough
CT: control target
= control target key end

     0   :  { %s6734_s18 = smov 0   ;;  %s6736_s19 = smov 0   ;;  %s10670_s0 = inlined_call_operand.vmem [shape: bf16[32,8,512], index: 0, kind: input, shape index: {}]   ;;  %s10671_s1 = inlined_call_operand.vmem [shape: f32[128,512], index: 1, kind: input, shape index: {}]   ;;  %s10672_s2 = inlined_call_operand.vmem [shape: f32[1,512], index: 2, kind: input, shape index: {}]   ;;  %s10673_s3 = inlined_call_operand.vmem [shape: bf16[32,8,128], index: 3, kind: output, shape index: {0}]   ;;  %s10674_s4 = inlined_call_operand.vmem [shape: f32[8,128], index: 4, kind: output, shape index: {1}]   ;;  %s10675_s5 = inlined_call_operand.vmem [shape: f32[8,128], index: 5, kind: output, shape index: {2}]  }
   0x1   :  { %s6738_s20 = smov 0  }
   0x2 LB: > { %s25_s21 = sadd.s32 1, %s6695_s19  ;;  %p6298_p0 = scmp.ge.s32.totalorder %s6699_s20, 1  ;;  %s6699_s20 = sphi %s6738_s20, %s16_s20   ;;  %s6695_s19 = sphi %s6736_s19, %s11369_s19   ;;  %s6691_s18 = sphi %s6734_s18, %s11368_s18  }
   0x3   : > { %p26_p1 = scmp.ge.s32.totalorder %s25_s21, 2  ;;  %p214_p2 = scmp.lt.s32.totalorder %s6699_s20, 3 }
   0x5   : > { %s11371_s21 = smov (%p26_p1, %s25_s21), 0  ;;  %p215_p3 = pnand %p6298_p0, %p214_p2 }
   0x7   : > { %218 = sbr.rel (%p215_p3) target bundleno = 5800 (0x16a8), region = 32 }
   0xc   : > { %s6299_s22 = sshll.u32 %s6691_s18, 4  ;;  %p6304_p5 = scmp.ne.s32.totalorder %s6691_s18, 0 }
   0xd   : > { %p259_p4 = scmp.lt.s32.totalorder %s6299_s22, 31 }
   0xe   : > { %289 = sbr.rel (%p6304_p5) target bundleno = 21 (0x15), region = 36 }
   0xf   : > { %s11373_s22 = smov (!%p259_p4, %s6299_s22), 31 }
  0x10   : > { %s6385_s23 = sshll.u32 %s11373_s22, 4  ;;  %s6303_s24 = sshll.u32 %s11373_s22, 2 }
  0x11   : > { %s6758_s27 = scalar_lea.vmem %s10670_s0, %s6385_s23  ;;  %s6763_s30 = scalar_lea.vmem %s10673_s3, %s6303_s24 }
  0x13   : > { %v6701_v0 = vmov 0.0  }
  0x14   : > { %290 = vst [vmem:[#allocation2] sm:$0xff] %v6701_v0  ;;  %291 = vst [vmem:[#allocation3] sm:$0xff] %v6701_v0 }
  0x15 PF: > { %v294_v1 = vlaneseq  ;;  %v292_v3 = vld [vmem:[%s10672_s2] sm:$0xf]  ;;  %p6305_p6 = scmp.eq.s32.totalorder %s6691_s18, 1 }
  0x17   : > { %v295_v2 = vshrl.u32 %v294_v1, 7 }
  0x19   : > { %v296_v4 = vsub.s32 0, %v295_v2  ;;  %v300_v5 = vsub.s32 1, %v295_v2  ;;  %v304_v6 = vsub.s32 2, %v295_v2  ;;  %v308_v7 = vsub.s32 3, %v295_v2 }
  0x1a   : > { %317 = sbr.rel (%p6305_p6) target bundleno = 3859 (0xf13), region = 40 }
  0x1b   : > { %v6769_v8 = vrot.slane %v292_v3, %v296_v4  ;;  %v6771_v9 = vrot.slane %v292_v3, %v300_v5  ;;  %v6773_v10 = vrot.slane %v292_v3, %v304_v6  ;;  %v6775_v11 = vrot.slane %v292_v3, %v308_v7 }
  0x1d   : > { %10956 = vst [vmem:[#allocation4_spill] sm:$0xff] %v6769_v8  ;;  %10957 = vst [vmem:[#allocation5_spill] sm:$0xff] %v6771_v9 }
  0x1e   : > { %10958 = vst [vmem:[#allocation6_spill] sm:$0xff] %v6773_v10  ;;  %10959 = vst [vmem:[#allocation7_spill] sm:$0xff] %v6775_v11 }
  0x1f   : > { %v6781_v12 = vld [vmem:[%s10671_s1 + $0x1e8] sm:$0xff]  ;;  %v6786_v13 = vld [vmem:[%s10671_s1 + $0x1e0] sm:$0xff]  ;;  %v10676_v16 = vmov 0.0   ;;  %v6809_v18 = vld [vmem:[%s10671_s1 + $0x1f8] sm:$0xff] }
  0x20   : > { %10960 = vst [vmem:[#allocation8_spill] sm:$0xff] %v6781_v12  ;;  %v6791_v14 = vld [vmem:[%s10671_s1 + $0x1c8] sm:$0xff]  ;;  %394 = vmatprep.subr.mxu0 %v6781_v12  ;;  %v6797_v15 = vld [vmem:[%s10671_s1 + $0x1c0] sm:$0xff]  ;;  %458 = vmatprep.mubr.f32.mxu0 %v10676_v16  ;;  %10961 = vst [vmem:[#allocation9_spill] sm:$0xff] %v6809_v18 }
  0x21   : > { %395 = vmatpush1.msra.mxu0 %v6786_v13  ;;  %v6804_v17 = vld [vmem:[%s10671_s1 + $0x1a8] sm:$0xff]  ;;  %529 = vmatprep.mubr.f32.mxu1 %v10676_v16  ;;  %v6816_v19 = vld [vmem:[%s10671_s1 + $0x1a0] sm:$0xff]  ;;  %v6822_v20 = vld [vmem:[%s10671_s1 + $0x1f0] sm:$0xff] }
  0x22   : > { %396 = vmatprep.subr.mxu0 %v6791_v14  ;;  %465 = vmatprep.subr.mxu1 %v6809_v18  ;;  %v6827_v21 = vld [vmem:[%s10671_s1 + $0x1d8] sm:$0xff]  ;;  %v6833_v22 = vld [vmem:[%s10671_s1 + $0x188] sm:$0xff]  ;;  %v6839_v23 = vld [vmem:[%s10671_s1 + $0x1d0] sm:$0xff] }
  0x23   : > { %397 = vmatpush1.msra.mxu0 %v6797_v15  ;;  %466 = vmatpush1.msra.mxu1 %v6822_v20  ;;  %v6845_v24 = vld [vmem:[%s10671_s1 + $0x180] sm:$0xff]  ;;  %v6851_v25 = vld [vmem:[%s10671_s1 + $0x1b8] sm:$0xff]  ;;  %v6856_v26 = vld [vmem:[%s10671_s1 + $0x1b0] sm:$0xff] }
  0x24   : > { %398 = vmatprep.subr.mxu0 %v6804_v17  ;;  %467 = vmatprep.subr.mxu1 %v6827_v21  ;;  %v6862_v27 = vld [vmem:[%s10671_s1 + $0x168] sm:$0xff]  ;;  %v6868_v28 = vld [vmem:[%s10671_s1 + $0x198] sm:$0xff]  ;;  %v6874_v29 = vld [vmem:[%s10671_s1 + $0x160] sm:$0xff] }
  0x25   : > { %399 = vmatpush1.msra.mxu0 %v6816_v19  ;;  %468 = vmatpush1.msra.mxu1 %v6839_v23  ;;  %v6880_v30 = vld [vmem:[%s10671_s1 + $0x190] sm:$0xff]  ;;  %v6886_v31 = vld [vmem:[%s10671_s1 + $0x148] sm:$0xff]  ;;  %v6892_v32 = vld [vmem:[%s10671_s1 + $0x178] sm:$0xff] }
  0x26   : > { %400 = vmatprep.subr.mxu0 %v6833_v22  ;;  %469 = vmatprep.subr.mxu1 %v6851_v25  ;;  %v6898_v33 = vld [vmem:[%s10671_s1 + $0x140] sm:$0xff]  ;;  %v6904_v34 = vld [vmem:[%s10671_s1 + $0x170] sm:$0xff]  ;;  %v6910_v35 = vld [vmem:[%s10671_s1 + $0x128] sm:$0xff] }
  0x27   : > { %401 = vmatpush1.msra.mxu0 %v6845_v24  ;;  %470 = vmatpush1.msra.mxu1 %v6856_v26  ;;  %v6916_v36 = vld [vmem:[%s10671_s1 + $0x158] sm:$0xff]  ;;  %v6922_v37 = vld [vmem:[%s10671_s1 + $0x120] sm:$0xff]  ;;  %v6928_v38 = vld [vmem:[%s10671_s1 + $0x150] sm:$0xff] }
  0x28   : > { %402 = vmatprep.subr.mxu0 %v6862_v27  ;;  %471 = vmatprep.subr.mxu1 %v6868_v28  ;;  %v6934_v39 = vld [vmem:[%s10671_s1 + $0x108] sm:$0xff]  ;;  %v6940_v40 = vld [vmem:[%s10671_s1 + $0x138] sm:$0xff]  ;;  %v6946_v41 = vld [vmem:[%s10671_s1 + $0x100] sm:$0xff] }
  0x29   : > { %403 = vmatpush1.msra.mxu0 %v6874_v29  ;;  %472 = vmatpush1.msra.mxu1 %v6880_v30  ;;  %v6952_v42 = vld [vmem:[%s10671_s1 + $0x130] sm:$0xff]  ;;  %v6958_v43 = vld [vmem:[%s10671_s1 + $0xe8] sm:$0xff]  ;;  %v6964_v44 = vld [vmem:[%s10671_s1 + $0x118] sm:$0xff] }
  0x2a   : > { %404 = vmatprep.subr.mxu0 %v6886_v31  ;;  %473 = vmatprep.subr.mxu1 %v6892_v32  ;;  %v6970_v45 = vld [vmem:[%s10671_s1 + $0xe0] sm:$0xff]  ;;  %v6976_v46 = vld [vmem:[%s10671_s1 + $0x110] sm:$0xff]  ;;  %v6982_v47 = vld [vmem:[%s10671_s1 + $0xc8] sm:$0xff] }
  0x2b   : > { %405 = vmatpush1.msra.mxu0 %v6898_v33  ;;  %474 = vmatpush1.msra.mxu1 %v6904_v34  ;;  %v6988_v48 = vld [vmem:[%s10671_s1 + $0xf8] sm:$0xff]  ;;  %v6994_v49 = vld [vmem:[%s10671_s1 + $0xc0] sm:$0xff]  ;;  %v7000_v50 = vld [vmem:[%s10671_s1 + $0xf0] sm:$0xff] }
  0x2c   : > { %406 = vmatprep.subr.mxu0 %v6910_v35  ;;  %475 = vmatprep.subr.mxu1 %v6916_v36  ;;  %v7006_v51 = vld [vmem:[%s10671_s1 + $0xa8] sm:$0xff]  ;;  %v7012_v52 = vld [vmem:[%s10671_s1 + $0xd8] sm:$0xff]  ;;  %v7018_v53 = vld [vmem:[%s10671_s1 + $0xa0] sm:$0xff] }
  0x2d   : > { %407 = vmatpush1.msra.mxu0 %v6922_v37  ;;  %476 = vmatpush1.msra.mxu1 %v6928_v38  ;;  %v7024_v54 = vld [vmem:[%s10671_s1 + $0xd0] sm:$0xff]  ;;  %v7030_v55 = vld [vmem:[%s10671_s1 + $0x88] sm:$0xff]  ;;  %v7036_v56 = vld [vmem:[%s10671_s1 + $0xb8] sm:$0xff] }
  0x2e   : > { %408 = vmatprep.subr.mxu0 %v6934_v39  ;;  %477 = vmatprep.subr.mxu1 %v6940_v40  ;;  %10962 = vst [vmem:[#allocation10_spill] sm:$0xff] %v7030_v55  ;;  %v7042_v57 = vld [vmem:[%s10671_s1 + $0x80] sm:$0xff]  ;;  %v7048_v58 = vld [vmem:[%s10671_s1 + $0xb0] sm:$0xff]  ;;  %v7054_v59 = vld [vmem:[%s10671_s1 + $0x68] sm:$0xff] }
  0x2f   : > { %409 = vmatpush1.msra.mxu0 %v6946_v41  ;;  %478 = vmatpush1.msra.mxu1 %v6952_v42  ;;  %10963 = vst [vmem:[#allocation11_spill] sm:$0xff] %v7042_v57  ;;  %10964 = vst [vmem:[#allocation12_spill] sm:$0xff] %v7054_v59  ;;  %v7060_v60 = vld [vmem:[%s10671_s1 + $0x98] sm:$0xff]  ;;  %v7066_v61 = vld [vmem:[%s10671_s1 + $0x60] sm:$0xff] }
  0x30   : > { %410 = vmatprep.subr.mxu0 %v6958_v43  ;;  %479 = vmatprep.subr.mxu1 %v6964_v44  ;;  %10965 = vst [vmem:[#allocation13_spill] sm:$0xff] %v7060_v60  ;;  %10966 = vst [vmem:[#allocation14_spill] sm:$0xff] %v7066_v61  ;;  %v7072_v62 = vld [vmem:[%s10671_s1 + $0x90] sm:$0xff]  ;;  %v7078_v63 = vld [vmem:[%s10671_s1 + $0x48] sm:$0xff] }
  0x31   : > { %411 = vmatpush1.msra.mxu0 %v6970_v45  ;;  %480 = vmatpush1.msra.mxu1 %v6976_v46  ;;  %10967 = vst [vmem:[#allocation15_spill] sm:$0xff] %v7072_v62  ;;  %10968 = vst [vmem:[#allocation16_spill] sm:$0xff] %v7078_v63  ;;  %v7084_v0 = vld [vmem:[%s10671_s1 + $0x78] sm:$0xff]  ;;  %v7090_v1 = vld [vmem:[%s10671_s1 + $0x40] sm:$0xff] }
  0x32   : > { %412 = vmatprep.subr.mxu0 %v6982_v47  ;;  %481 = vmatprep.subr.mxu1 %v6988_v48  ;;  %10969 = vst [vmem:[#allocation17_spill] sm:$0xff] %v7084_v0  ;;  %10970 = vst [vmem:[#allocation18_spill] sm:$0xff] %v7090_v1  ;;  %v7096_v2 = vld [vmem:[%s10671_s1 + $0x70] sm:$0xff]  ;;  %v7102_v3 = vld [vmem:[%s10671_s1 + $0x28] sm:$0xff] }
  0x33   : > { %413 = vmatpush1.msra.mxu0 %v6994_v49  ;;  %482 = vmatpush1.msra.mxu1 %v7000_v50  ;;  %10971 = vst [vmem:[#allocation19_spill] sm:$0xff] %v7096_v2  ;;  %10972 = vst [vmem:[#allocation20_spill] sm:$0xff] %v7102_v3  ;;  %v7108_v4 = vld [vmem:[%s10671_s1 + $0x58] sm:$0xff]  ;;  %v7114_v5 = vld [vmem:[%s10671_s1 + $0x20] sm:$0xff] }
  0x34   : > { %414 = vmatprep.subr.mxu0 %v7006_v51  ;;  %483 = vmatprep.subr.mxu1 %v7012_v52  ;;  %10973 = vst [vmem:[#allocation21_spill] sm:$0xff] %v7108_v4  ;;  %10974 = vst [vmem:[#allocation22_spill] sm:$0xff] %v7114_v5  ;;  %v7120_v6 = vld [vmem:[%s10671_s1 + $0x50] sm:$0xff]  ;;  %v7126_v7 = vld [vmem:[%s10671_s1 + $0x8] sm:$0xff] }
  0x35   : > { %415 = vmatpush1.msra.mxu0 %v7018_v53  ;;  %484 = vmatpush1.msra.mxu1 %v7024_v54  ;;  %10975 = vst [vmem:[#allocation23_spill] sm:$0xff] %v7120_v6  ;;  %10976 = vst [vmem:[#allocation24_spill] sm:$0xff] %v7126_v7  ;;  %v7132_v16 = vld [vmem:[%s10671_s1 + $0x38] sm:$0xff]  ;;  %v7138_v11 = vld [vmem:[%s10671_s1] sm:$0xff] }
  0x36   : > { %416 = vmatprep.subr.mxu0 %v7030_v55  ;;  %485 = vmatprep.subr.mxu1 %v7036_v56  ;;  %10977 = vst [vmem:[#allocation25_spill] sm:$0xff] %v7132_v16  ;;  %10978 = vst [vmem:[#allocation26_spill] sm:$0xff] %v7138_v11  ;;  %v7144_v10 = vld [vmem:[%s10671_s1 + $0x30] sm:$0xff]  ;;  %v318_v9 = vld [vmem:[#allocation2] sm:$0xff] }
  0x37   : > { %417 = vmatpush1.msra.mxu0 %v7042_v57  ;;  %486 = vmatpush1.msra.mxu1 %v7048_v58  ;;  %10979 = vst [vmem:[#allocation27_spill] sm:$0xff] %v7144_v10  ;;  %v7151_v8 = vld [vmem:[%s10671_s1 + $0x18] sm:$0xff] }
  0x38   : > { %418 = vmatprep.subr.mxu0 %v7054_v59  ;;  %487 = vmatprep.subr.mxu1 %v7060_v60  ;;  %10980 = vst [vmem:[#allocation28_spill] sm:$0xff] %v7151_v8 }
  0x39   : > { %419 = vmatpush1.msra.mxu0 %v7066_v61  ;;  %488 = vmatpush1.msra.mxu1 %v7072_v62 }
  0x3a   : > { %420 = vmatprep.subr.mxu0 %v7078_v63  ;;  %489 = vmatprep.subr.mxu1 %v7084_v0 }
  0x3b   : > { %421 = vmatpush1.msra.mxu0 %v7090_v1  ;;  %490 = vmatpush1.msra.mxu1 %v7096_v2 }
  0x3c   : > { %422 = vmatprep.subr.mxu0 %v7102_v3  ;;  %491 = vmatprep.subr.mxu1 %v7108_v4  ;;  %v7158_v3 = vld [vmem:[%s10671_s1 + $0x10] sm:$0xff] }
  0x3d   : > { %423 = vmatpush1.msra.mxu0 %v7114_v5  ;;  %492 = vmatpush1.msra.mxu1 %v7120_v6  ;;  %10981 = vst [vmem:[#allocation29_spill] sm:$0xff] %v7158_v3 }
  0x3e   : > { %424 = vmatprep.subr.mxu0 %v7126_v7  ;;  %493 = vmatprep.subr.mxu1 %v7132_v16 }
  0x3f   : > { %425 = vmatpush1.msra.mxu0 %v7138_v11  ;;  %494 = vmatpush1.msra.mxu1 %v7144_v10 }
  0x40   : > { %459 = vmatmul.mubr.f32.vlgmr.msra.gmra.mxu0 %v318_v9  ;;  %495 = vmatprep.subr.mxu1 %v7151_v8 }
  0x41   : > { %496 = vmatpush1.msra.mxu1 %v7158_v3  ;;  %635 = vmatprep.subr.mxu0 %v6781_v12 }
  0x42   : > { %530 = vmatmul.mubr.f32.vlgmr.msra.gmra.mxu1 %v318_v9  ;;  %706 = vmatprep.subr.mxu1 %v6809_v18  ;;  %v10982_v9 = vld [vmem:[#allocation20_spill] sm:$0xff] }
  0x43   : > { %636 = vmatpush1.msra.mxu0 %v6786_v13  ;;  %707 = vmatpush1.msra.mxu1 %v6822_v20 }
  0x44   : > { %637 = vmatprep.subr.mxu0 %v6791_v14  ;;  %708 = vmatprep.subr.mxu1 %v6827_v21 }
  0x45   : > { %638 = vmatpush1.msra.mxu0 %v6797_v15  ;;  %709 = vmatpush1.msra.mxu1 %v6839_v23 }
  0x46   : > { %639 = vmatprep.subr.mxu0 %v6804_v17  ;;  %710 = vmatprep.subr.mxu1 %v6851_v25 }
  0x47   : > { %640 = vmatpush1.msra.mxu0 %v6816_v19  ;;  %711 = vmatpush1.msra.mxu1 %v6856_v26 }
  0x48   : > { %641 = vmatprep.subr.mxu0 %v6833_v22  ;;  %712 = vmatprep.subr.mxu1 %v6868_v28 }
  0x49   : > { %642 = vmatpush1.msra.mxu0 %v6845_v24  ;;  %713 = vmatpush1.msra.mxu1 %v6880_v30 }
  0x4a   : > { %643 = vmatprep.subr.mxu0 %v6862_v27  ;;  %714 = vmatprep.subr.mxu1 %v6892_v32 }
  0x4b   : > { %644 = vmatpush1.msra.mxu0 %v6874_v29  ;;  %715 = vmatpush1.msra.mxu1 %v6904_v34 }
  0x4c   : > { %645 = vmatprep.subr.mxu0 %v6886_v31  ;;  %716 = vmatprep.subr.mxu1 %v6916_v36 }
  0x4d   : > { %646 = vmatpush1.msra.mxu0 %v6898_v33  ;;  %717 = vmatpush1.msra.mxu1 %v6928_v38 }
  0x4e   : > { %647 = vmatprep.subr.mxu0 %v6910_v35  ;;  %718 = vmatprep.subr.mxu1 %v6940_v40 }
  0x4f   : > { %648 = vmatpush1.msra.mxu0 %v6922_v37  ;;  %719 = vmatpush1.msra.mxu1 %v6952_v42 }
  0x50   : > { %649 = vmatprep.subr.mxu0 %v6934_v39  ;;  %720 = vmatprep.subr.mxu1 %v6964_v44 }
  0x51   : > { %650 = vmatpush1.msra.mxu0 %v6946_v41  ;;  %721 = vmatpush1.msra.mxu1 %v6976_v46 }
  0x52   : > { %651 = vmatprep.subr.mxu0 %v6958_v43  ;;  %722 = vmatprep.subr.mxu1 %v6988_v48 }
  0x53   : > { %652 = vmatpush1.msra.mxu0 %v6970_v45  ;;  %723 = vmatpush1.msra.mxu1 %v7000_v50 }
  0x54   : > { %653 = vmatprep.subr.mxu0 %v6982_v47  ;;  %724 = vmatprep.subr.mxu1 %v7012_v52 }
  0x55   : > { %654 = vmatpush1.msra.mxu0 %v6994_v49  ;;  %725 = vmatpush1.msra.mxu1 %v7024_v54 }
  0x56   : > { %655 = vmatprep.subr.mxu0 %v7006_v51  ;;  %726 = vmatprep.subr.mxu1 %v7036_v56 }
  0x57   : > { %656 = vmatpush1.msra.mxu0 %v7018_v53  ;;  %727 = vmatpush1.msra.mxu1 %v7048_v58 }
  0x58   : > { %657 = vmatprep.subr.mxu0 %v7030_v55  ;;  %728 = vmatprep.subr.mxu1 %v7060_v60 }
  0x59   : > { %658 = vmatpush1.msra.mxu0 %v7042_v57  ;;  %729 = vmatpush1.msra.mxu1 %v7072_v62 }
  0x5a   : > { %659 = vmatprep.subr.mxu0 %v7054_v59  ;;  %730 = vmatprep.subr.mxu1 %v7084_v0 }
  0x5b   : > { %660 = vmatpush1.msra.mxu0 %v7066_v61  ;;  %731 = vmatpush1.msra.mxu1 %v7096_v2  ;;  %v10986_v61 = vld [vmem:[#allocation6_spill] sm:$0xff] }
  0x5c   : > { %661 = vmatprep.subr.mxu0 %v7078_v63  ;;  %732 = vmatprep.subr.mxu1 %v7108_v4  ;;  %v10983_v4 = vmov 0.0  }
  0x5d   : > { %662 = vmatpush1.msra.mxu0 %v7090_v1  ;;  %733 = vmatpush1.msra.mxu1 %v7120_v6  ;;  %v10984_v6 = vld [vmem:[#allocation4_spill] sm:$0xff] }
  0x5e   : > { %663 = vmatprep.subr.mxu0 %v10982_v9  ;;  %734 = vmatprep.subr.mxu1 %v7132_v16  ;;  %v320_v16 = vld [vmem:[%s6758_s27] sm:$0xff]  ;;  %v321_v9 = vld [vmem:[%s6758_s27 + $0x8] sm:$0xff] }
  0x5f   : > { %664 = vmatpush1.msra.mxu0 %v7114_v5  ;;  %735 = vmatpush1.msra.mxu1 %v7144_v10  ;;  %v322_v5 = vunpack.c.l.bf16 %v320_v16  ;;  %v323_v10 = vunpack.c.h.bf16 %v320_v16  ;;  %v324_v1 = vunpack.c.l.bf16 %v321_v9  ;;  %v325_v57 = vunpack.c.h.bf16 %v321_v9  ;;  %v10987_v16 = vld [vmem:[#allocation7_spill] sm:$0xff] }
  0x60   : > { %665 = vmatprep.subr.mxu0 %v7126_v7  ;;  %736 = vmatprep.subr.mxu1 %v7151_v8  ;;  %v10985_v8 = vld [vmem:[#allocation5_spill] sm:$0xff] }
  0x61   : > { %666 = vmatpush1.msra.mxu0 %v7138_v11  ;;  %699 = vmatprep.mubr.f32.mxu0 %v10983_v4  ;;  %v326_v7 = vadd.f32 %v322_v5, %v10984_v6  ;;  %v327_v63 = vadd.f32 %v323_v10, %v10985_v8  ;;  %v328_v0 = vadd.f32 %v324_v1, %v10986_v61 }
  0x62   : > { %737 = vmatpush1.msra.mxu1 %v7158_v3  ;;  %770 = vmatprep.mubr.f32.mxu1 %v10983_v4  ;;  %v329_v60 = vadd.f32 %v325_v57, %v10987_v16 }
  0x63   : > { %877 = vmatprep.subr.mxu0 %v6781_v12  ;;  %948 = vmatprep.subr.mxu1 %v6809_v18 }
 0x100   : > { %v460_v11 = vpop.f32.mrf.mxu0 }
 0x101   : > { %v536_v2 = vadd.f32 %v460_v11, %v326_v7 }
 0x102   : > { %v462_v3 = vpop.f32.mrf.mxu0  ;;  %v531_v59 = vpop.f32.mrf.mxu1 }
 0x103   : > { %v540_v4 = vmul.f32 0.5, %v536_v2  ;;  %v537_v62 = vadd.f32 %v462_v3, %v327_v63  ;;  %v538_v18 = vadd.f32 %v531_v59, %v328_v0  ;;  %v319_v2 = vld [vmem:[#allocation3] sm:$0xff] }
 0x104   : > { %v533_v5 = vpop.f32.mrf.mxu1 }
 0x105   : > { %6437 = vtanh.f32 %v540_v4  ;;  %v544_v12 = vmul.f32 0.5, %v537_v62  ;;  %v539_v6 = vadd.f32 %v533_v5, %v329_v60 }
 0x107   : > { %6439 = vtanh.f32 %v544_v12  ;;  %v549_v55 = vmul.f32 0.5, %v539_v6  ;;  %v6306_v6 = vld [vmem:[%s6758_s27 + $0x10] sm:$0xff] }
 0x108   : > { %6441 = vtanh.f32 %v538_v18  ;;  %v563_v9 = vunpack.c.l.bf16 %v6306_v6  ;;  %v564_v5 = vunpack.c.h.bf16 %v6306_v6 }
 0x109   : > { %6443 = vtanh.f32 %v549_v55  ;;  %v11009_v55 = vld [vmem:[#allocation8_spill] sm:$0xff] }
 0x112   : > { %v6438_v10 = vpop.eup %6437 }
 0x113   : > { %v542_v8 = vmul.f32 0.5, %v6438_v10  ;;  %v6307_v10 = vld [vmem:[%s6758_s27 + $0x18] sm:$0xff] }
 0x114   : > { %v6440_v11 = vpop.eup %6439 }
 0x115   : > { %v543_v7 = vadd.f32 0.5, %v542_v8  ;;  %v546_v1 = vmul.f32 0.5, %v6440_v11  ;;  %v6442_v61 = vpop.eup %6441  ;;  %v10988_v8 = vld [vmem:[#allocation10_spill] sm:$0xff]  ;;  %v11011_v11 = vld [vmem:[#allocation4_spill] sm:$0xff] }
 0x116   : > { %v6444_v12 = vpop.eup %6443 }
 0x117   : > { %v547_v63 = vadd.f32 0.5, %v546_v1  ;;  %v553_v59 = vmul.f32 %v6442_v61, %v543_v7  ;;  %v551_v18 = vmul.f32 0.5, %v6444_v12  ;;  %v11010_v61 = vld [vmem:[#allocation9_spill] sm:$0xff]  ;;  %v567_v7 = vadd.f32 %v563_v9, %v11011_v11 }
 0x118   : > { %v565_v1 = vunpack.c.l.bf16 %v6307_v10 }
 0x119   : > { %v554_v62 = vmul.f32 %v547_v63, %v319_v2  ;;  %v552_v57 = vadd.f32 0.5, %v551_v18  ;;  %v11012_v2 = vld [vmem:[#allocation5_spill] sm:$0xff] }
 0x11a   : > { %v568_v63 = vadd.f32 %v564_v5, %v11012_v2 }
 0x11b   : > { %v7238_v0 = vadd.f32 %v554_v62, %v553_v59 }
 0x11d   : > { %6445 = vtanh.f32 %v7238_v0 }
 0x12a   : > { %v6446_v60 = vpop.eup %6445 }
 0x12b   : > { %v557_v3 = vmul.f32 %v6446_v60, %v552_v57  ;;  %v11013_v57 = vld [vmem:[#allocation6_spill] sm:$0xff] }
 0x12c   : > { %v569_v60 = vadd.f32 %v565_v1, %v11013_v57 }
 0x12d   : > { %v558_v4 = vpack.c.bf16 %v557_v3, %v557_v3  ;;  %700 = vmatmul.mubr.f32.vlgmr.msra.gmra.mxu0 %v557_v3  ;;  %771 = vmatmul.mubr.f32.vlgmr.msra.gmra.mxu1 %v557_v3 }
 0x12e   : > { %878 = vmatpush1.msra.mxu0 %v6786_v13  ;;  %949 = vmatpush1.msra.mxu1 %v6822_v20 }
 0x12f   : > { %559 = vst [vmem:[%s6763_s30] sm:$0xf] %v558_v4  ;;  %879 = vmatprep.subr.mxu0 %v6791_v14  ;;  %950 = vmatprep.subr.mxu1 %v6827_v21  ;;  %v10989_v14 = vld [vmem:[#allocation13_spill] sm:$0xff] }
 0x130   : > { %880 = vmatpush1.msra.mxu0 %v6797_v15  ;;  %951 = vmatpush1.msra.mxu1 %v6839_v23  ;;  %v10990_v15 = vld [vmem:[#allocation11_spill] sm:$0xff] }
 0x131   : > { %881 = vmatprep.subr.mxu0 %v6804_v17  ;;  %952 = vmatprep.subr.mxu1 %v6851_v25  ;;  %v10991_v17 = vld [vmem:[#allocation15_spill] sm:$0xff] }
 0x132   : > { %882 = vmatpush1.msra.mxu0 %v6816_v19  ;;  %953 = vmatpush1.msra.mxu1 %v6856_v26  ;;  %v10992_v19 = vld [vmem:[#allocation12_spill] sm:$0xff] }
 0x133   : > { %883 = vmatprep.subr.mxu0 %v6833_v22  ;;  %954 = vmatprep.subr.mxu1 %v6868_v28  ;;  %v10993_v22 = vld [vmem:[#allocation17_spill] sm:$0xff] }
 0x134   : > { %884 = vmatpush1.msra.mxu0 %v6845_v24  ;;  %955 = vmatpush1.msra.mxu1 %v6880_v30  ;;  %v10994_v24 = vld [vmem:[#allocation14_spill] sm:$0xff] }
 0x135   : > { %885 = vmatprep.subr.mxu0 %v6862_v27  ;;  %956 = vmatprep.subr.mxu1 %v6892_v32  ;;  %v10995_v27 = vld [vmem:[#allocation19_spill] sm:$0xff] }
 0x136   : > { %886 = vmatpush1.msra.mxu0 %v6874_v29  ;;  %957 = vmatpush1.msra.mxu1 %v6904_v34  ;;  %v10996_v29 = vld [vmem:[#allocation16_spill] sm:$0xff] }
 0x137   : > { %887 = vmatprep.subr.mxu0 %v6886_v31  ;;  %958 = vmatprep.subr.mxu1 %v6916_v36  ;;  %v10997_v31 = vld [vmem:[#allocation21_spill] sm:$0xff] }
 0x138   : > { %888 = vmatpush1.msra.mxu0 %v6898_v33  ;;  %959 = vmatpush1.msra.mxu1 %v6928_v38  ;;  %v10998_v33 = vld [vmem:[#allocation18_spill] sm:$0xff] }
 0x139   : > { %889 = vmatprep.subr.mxu0 %v6910_v35  ;;  %960 = vmatprep.subr.mxu1 %v6940_v40  ;;  %v10999_v35 = vld [vmem:[#allocation23_spill] sm:$0xff] }
 0x13a   : > { %890 = vmatpush1.msra.mxu0 %v6922_v37  ;;  %961 = vmatpush1.msra.mxu1 %v6952_v42  ;;  %v11000_v37 = vld [vmem:[#allocation20_spill] sm:$0xff] }
 0x13b   : > { %891 = vmatprep.subr.mxu0 %v6934_v39  ;;  %962 = vmatprep.subr.mxu1 %v6964_v44  ;;  %v11001_v39 = vld [vmem:[#allocation25_spill] sm:$0xff] }
 0x13c   : > { %892 = vmatpush1.msra.mxu0 %v6946_v41  ;;  %963 = vmatpush1.msra.mxu1 %v6976_v46  ;;  %v11002_v41 = vld [vmem:[#allocation22_spill] sm:$0xff] }
 0x13d   : > { %893 = vmatprep.subr.mxu0 %v6958_v43  ;;  %964 = vmatprep.subr.mxu1 %v6988_v48  ;;  %v11003_v43 = vld [vmem:[#allocation27_spill] sm:$0xff] }
 0x13e   : > { %894 = vmatpush1.msra.mxu0 %v6970_v45  ;;  %965 = vmatpush1.msra.mxu1 %v7000_v50  ;;  %v11004_v45 = vld [vmem:[#allocation24_spill] sm:$0xff] }
 0x13f   : > { %895 = vmatprep.subr.mxu0 %v6982_v47  ;;  %966 = vmatprep.subr.mxu1 %v7012_v52  ;;  %v11005_v47 = vld [vmem:[#allocation28_spill] sm:$0xff] }
 0x140   : > { %896 = vmatpush1.msra.mxu0 %v6994_v49  ;;  %967 = vmatpush1.msra.mxu1 %v7024_v54  ;;  %v11006_v49 = vld [vmem:[#allocation26_spill] sm:$0xff] }
 0x141   : > { %897 = vmatprep.subr.mxu0 %v7006_v51  ;;  %968 = vmatprep.subr.mxu1 %v7036_v56  ;;  %v11007_v51 = vmov 0.0  }
 0x142   : > { %898 = vmatpush1.msra.mxu0 %v7018_v53  ;;  %969 = vmatpush1.msra.mxu1 %v7048_v58  ;;  %v11008_v53 = vld [vmem:[#allocation29_spill] sm:$0xff] }
 0x143   : > { %899 = vmatprep.subr.mxu0 %v10988_v8  ;;  %970 = vmatprep.subr.mxu1 %v10989_v14 }
 0x144   : > { %900 = vmatpush1.msra.mxu0 %v10990_v15  ;;  %971 = vmatpush1.msra.mxu1 %v10991_v17  ;;  %v566_v15 = vunpack.c.h.bf16 %v6307_v10 }
 0x145   : > { %901 = vmatprep.subr.mxu0 %v10992_v19  ;;  %972 = vmatprep.subr.mxu1 %v10993_v22 }
 0x146   : > { %902 = vmatpush1.msra.mxu0 %v10994_v24  ;;  %973 = vmatpush1.msra.mxu1 %v10995_v27  ;;  %v570_v24 = vadd.f32 %v566_v15, %v10987_v16 }
 0x147   : > { %903 = vmatprep.subr.mxu0 %v10996_v29  ;;  %974 = vmatprep.subr.mxu1 %v10997_v31 }
 0x148   : > { %904 = vmatpush1.msra.mxu0 %v10998_v33  ;;  %975 = vmatpush1.msra.mxu1 %v10999_v35 }
 0x149   : > { %905 = vmatprep.subr.mxu0 %v11000_v37  ;;  %976 = vmatprep.subr.mxu1 %v11001_v39 }
 0x14a   : > { %906 = vmatpush1.msra.mxu0 %v11002_v41  ;;  %977 = vmatpush1.msra.mxu1 %v11003_v43 }
 0x14b   : > { %907 = vmatprep.subr.mxu0 %v11004_v45  ;;  %978 = vmatprep.subr.mxu1 %v11005_v47 }
 0x14c   : > { %908 = vmatpush1.msra.mxu0 %v11006_v49  ;;  %941 = vmatprep.mubr.f32.mxu0 %v11007_v51 }
 0x14d   : > { %979 = vmatpush1.msra.mxu1 %v11008_v53  ;;  %1012 = vmatprep.mubr.f32.mxu1 %v11007_v51 }
 0x14e   : > { %1119 = vmatprep.subr.mxu0 %v11009_v55  ;;  %1190 = vmatprep.subr.mxu1 %v11010_v61 }
 0x1ed   : > { %v701_v62 = vpop.f32.mrf.mxu0  ;;  %v772_v4 = vpop.f32.mrf.mxu1 }
 0x1ee   : > { %v777_v59 = vadd.f32 %v701_v62, %v567_v7  ;;  %v779_v19 = vadd.f32 %v772_v4, %v569_v60  ;;  %v6310_v60 = vld [vmem:[%s6758_s27 + $0x28] sm:$0xff] }
 0x1ef   : > { %v703_v12 = vpop.f32.mrf.mxu0  ;;  %v774_v29 = vpop.f32.mrf.mxu1  ;;  %v807_v4 = vunpack.c.l.bf16 %v6310_v60 }
 0x1f0   : > { %v781_v18 = vmul.f32 0.5, %v777_v59  ;;  %v778_v3 = vadd.f32 %v703_v12, %v568_v63  ;;  %v780_v33 = vadd.f32 %v774_v29, %v570_v24 }
 0x1f2   : > { %6447 = vtanh.f32 %v781_v18  ;;  %v785_v8 = vmul.f32 0.5, %v778_v3  ;;  %v790_v37 = vmul.f32 0.5, %v780_v33  ;;  %v811_v33 = vadd.f32 %v807_v4, %v11013_v57 }
 0x1f4   : > { %6449 = vtanh.f32 %v785_v8 }
 0x1f5   : > { %6451 = vtanh.f32 %v779_v19 }
 0x1f6   : > { %6453 = vtanh.f32 %v790_v37 }
 0x1ff   : > { %v6448_v41 = vpop.eup %6447 }
 0x200   : > { %v783_v45 = vmul.f32 0.5, %v6448_v41 }
 0x201   : > { %v6450_v49 = vpop.eup %6449 }
 0x202   : > { %v784_v55 = vadd.f32 0.5, %v783_v45  ;;  %v787_v61 = vmul.f32 0.5, %v6450_v49  ;;  %v6452_v9 = vpop.eup %6451  ;;  %v808_v49 = vunpack.c.h.bf16 %v6310_v60 }
 0x203   : > { %v6454_v1 = vpop.eup %6453 }
 0x204   : > { %v788_v6 = vadd.f32 0.5, %v787_v61  ;;  %v794_v5 = vmul.f32 %v6452_v9, %v784_v55  ;;  %v792_v63 = vmul.f32 0.5, %v6454_v1  ;;  %v812_v61 = vadd.f32 %v808_v49, %v10987_v16  ;;  %v7594_v49 = vld [vmem:[%s10671_s1 + $0x1b0] sm:$0xff] }
 0x206   : > { %v795_v10 = vmul.f32 %v788_v6, %v7238_v0  ;;  %v793_v62 = vadd.f32 0.5, %v792_v63  ;;  %v7486_v0 = vld [vmem:[%s10671_s1 + $0x68] sm:$0xff] }
 0x207   : > { %11016 = vst [vmem:[#allocation11_spill] sm:$0xff] %v7486_v0 }
 0x208   : > { %v7315_v7 = vadd.f32 %v795_v10, %v794_v5 }
 0x20a   : > { %6455 = vtanh.f32 %v7315_v7 }
 0x217   : > { %v6456_v59 = vpop.eup %6455 }
 0x218   : > { %v798_v12 = vmul.f32 %v6456_v59, %v793_v62 }
 0x21a   : > { %v799_v18 = vpack.c.bf16 %v798_v12, %v798_v12  ;;  %942 = vmatmul.mubr.f32.vlgmr.msra.gmra.mxu0 %v798_v12  ;;  %1013 = vmatmul.mubr.f32.vlgmr.msra.gmra.mxu1 %v798_v12 }
 0x21b   : > { %1120 = vmatpush1.msra.mxu0 %v6786_v13  ;;  %1191 = vmatpush1.msra.mxu1 %v6822_v20  ;;  %v7356_v13 = vld [vmem:[%s10671_s1 + $0x1c8] sm:$0xff]  ;;  %v7362_v20 = vld [vmem:[%s10671_s1 + $0x1c0] sm:$0xff] }
 0x21c   : > { %6308 = vst [vmem:[%s6763_s30 + $0x4] sm:$0xf] %v799_v18  ;;  %1192 = vmatprep.subr.mxu1 %v6827_v21  ;;  %1183 = vmatprep.mubr.f32.mxu0 %v11007_v51  ;;  %v7368_v21 = vld [vmem:[%s10671_s1 + $0x1a8] sm:$0xff] }
 0x21d   : > { %1193 = vmatpush1.msra.mxu1 %v6839_v23  ;;  %1254 = vmatprep.mubr.f32.mxu1 %v11007_v51  ;;  %v7374_v23 = vld [vmem:[%s10671_s1 + $0x1a0] sm:$0xff] }
 0x21e   : > { %1194 = vmatprep.subr.mxu1 %v6851_v25  ;;  %1121 = vmatprep.subr.mxu0 %v7356_v13  ;;  %v7380_v25 = vld [vmem:[%s10671_s1 + $0x188] sm:$0xff] }
 0x21f   : > { %1195 = vmatpush1.msra.mxu1 %v6856_v26  ;;  %1122 = vmatpush1.msra.mxu0 %v7362_v20  ;;  %v7386_v26 = vld [vmem:[%s10671_s1 + $0x180] sm:$0xff] }
 0x220   : > { %1196 = vmatprep.subr.mxu1 %v6868_v28  ;;  %1123 = vmatprep.subr.mxu0 %v7368_v21  ;;  %v7392_v28 = vld [vmem:[%s10671_s1 + $0x168] sm:$0xff] }
 0x221   : > { %1197 = vmatpush1.msra.mxu1 %v6880_v30  ;;  %1124 = vmatpush1.msra.mxu0 %v7374_v23  ;;  %v7398_v30 = vld [vmem:[%s10671_s1 + $0x160] sm:$0xff] }
 0x222   : > { %1198 = vmatprep.subr.mxu1 %v6892_v32  ;;  %1125 = vmatprep.subr.mxu0 %v7380_v25  ;;  %v7404_v32 = vld [vmem:[%s10671_s1 + $0x148] sm:$0xff] }
 0x223   : > { %1199 = vmatpush1.msra.mxu1 %v6904_v34  ;;  %1126 = vmatpush1.msra.mxu0 %v7386_v26  ;;  %v7410_v34 = vld [vmem:[%s10671_s1 + $0x140] sm:$0xff] }
 0x224   : > { %1200 = vmatprep.subr.mxu1 %v6916_v36  ;;  %1127 = vmatprep.subr.mxu0 %v7392_v28  ;;  %v7416_v36 = vld [vmem:[%s10671_s1 + $0x128] sm:$0xff] }
 0x225   : > { %1201 = vmatpush1.msra.mxu1 %v6928_v38  ;;  %1128 = vmatpush1.msra.mxu0 %v7398_v30  ;;  %v7422_v38 = vld [vmem:[%s10671_s1 + $0x120] sm:$0xff] }
 0x226   : > { %1202 = vmatprep.subr.mxu1 %v6940_v40  ;;  %1129 = vmatprep.subr.mxu0 %v7404_v32  ;;  %v7428_v40 = vld [vmem:[%s10671_s1 + $0x108] sm:$0xff] }
 0x227   : > { %1203 = vmatpush1.msra.mxu1 %v6952_v42  ;;  %1130 = vmatpush1.msra.mxu0 %v7410_v34  ;;  %v7434_v42 = vld [vmem:[%s10671_s1 + $0x100] sm:$0xff] }
 0x228   : > { %1204 = vmatprep.subr.mxu1 %v6964_v44  ;;  %1131 = vmatprep.subr.mxu0 %v7416_v36  ;;  %v7440_v44 = vld [vmem:[%s10671_s1 + $0xe8] sm:$0xff] }
 0x229   : > { %1205 = vmatpush1.msra.mxu1 %v6976_v46  ;;  %1132 = vmatpush1.msra.mxu0 %v7422_v38  ;;  %v7445_v46 = vld [vmem:[%s10671_s1 + $0xe0] sm:$0xff] }
 0x22a   : > { %1206 = vmatprep.subr.mxu1 %v6988_v48  ;;  %1133 = vmatprep.subr.mxu0 %v7428_v40  ;;  %v7450_v48 = vld [vmem:[%s10671_s1 + $0xc8] sm:$0xff] }
 0x22b   : > { %1207 = vmatpush1.msra.mxu1 %v7000_v50  ;;  %1134 = vmatpush1.msra.mxu0 %v7434_v42  ;;  %v7456_v50 = vld [vmem:[%s10671_s1 + $0xc0] sm:$0xff] }
 0x22c   : > { %1208 = vmatprep.subr.mxu1 %v7012_v52  ;;  %1135 = vmatprep.subr.mxu0 %v7440_v44  ;;  %v7462_v52 = vld [vmem:[%s10671_s1 + $0xa8] sm:$0xff] }
 0x22d   : > { %1209 = vmatpush1.msra.mxu1 %v7024_v54  ;;  %1136 = vmatpush1.msra.mxu0 %v7445_v46  ;;  %v7468_v54 = vld [vmem:[%s10671_s1 + $0xa0] sm:$0xff] }
 0x22e   : > { %1210 = vmatprep.subr.mxu1 %v7036_v56  ;;  %1137 = vmatprep.subr.mxu0 %v7450_v48  ;;  %v7474_v56 = vld [vmem:[%s10671_s1 + $0x88] sm:$0xff] }
 0x22f   : > { %1211 = vmatpush1.msra.mxu1 %v7048_v58  ;;  %1138 = vmatpush1.msra.mxu0 %v7456_v50  ;;  %11014 = vst [vmem:[#allocation10_spill] sm:$0xff] %v7474_v56  ;;  %v7480_v58 = vld [vmem:[%s10671_s1 + $0x80] sm:$0xff] }
 0x230   : > { %1212 = vmatprep.subr.mxu1 %v10989_v14  ;;  %1139 = vmatprep.subr.mxu0 %v7462_v52  ;;  %11015 = vst [vmem:[#allocation13_spill] sm:$0xff] %v7480_v58  ;;  %v7492_v14 = vld [vmem:[%s10671_s1 + $0x60] sm:$0xff] }
 0x231   : > { %1213 = vmatpush1.msra.mxu1 %v10991_v17  ;;  %1140 = vmatpush1.msra.mxu0 %v7468_v54  ;;  %11017 = vst [vmem:[#allocation15_spill] sm:$0xff] %v7492_v14  ;;  %v7498_v17 = vld [vmem:[%s10671_s1 + $0x48] sm:$0xff] }
 0x232   : > { %1214 = vmatprep.subr.mxu1 %v10993_v22  ;;  %1141 = vmatprep.subr.mxu0 %v7474_v56  ;;  %11018 = vst [vmem:[#allocation12_spill] sm:$0xff] %v7498_v17  ;;  %v7504_v22 = vld [vmem:[%s10671_s1 + $0x40] sm:$0xff] }
 0x233   : > { %1215 = vmatpush1.msra.mxu1 %v10995_v27  ;;  %1142 = vmatpush1.msra.mxu0 %v7480_v58  ;;  %11019 = vst [vmem:[#allocation17_spill] sm:$0xff] %v7504_v22  ;;  %v7510_v27 = vld [vmem:[%s10671_s1 + $0x28] sm:$0xff] }
 0x234   : > { %1216 = vmatprep.subr.mxu1 %v10997_v31  ;;  %1143 = vmatprep.subr.mxu0 %v7486_v0  ;;  %11020 = vst [vmem:[#allocation14_spill] sm:$0xff] %v7510_v27  ;;  %v7516_v31 = vld [vmem:[%s10671_s1 + $0x20] sm:$0xff] }
 0x235   : > { %1217 = vmatpush1.msra.mxu1 %v10999_v35  ;;  %1144 = vmatpush1.msra.mxu0 %v7492_v14  ;;  %11021 = vst [vmem:[#allocation19_spill] sm:$0xff] %v7516_v31  ;;  %v7522_v35 = vld [vmem:[%s10671_s1 + $0x8] sm:$0xff] }
 0x236   : > { %1218 = vmatprep.subr.mxu1 %v11001_v39  ;;  %1145 = vmatprep.subr.mxu0 %v7498_v17  ;;  %11022 = vst [vmem:[#allocation16_spill] sm:$0xff] %v7522_v35  ;;  %v7528_v39 = vld [vmem:[%s10671_s1] sm:$0xff] }
 0x237   : > { %1219 = vmatpush1.msra.mxu1 %v11003_v43  ;;  %1146 = vmatpush1.msra.mxu0 %v7504_v22  ;;  %11023 = vst [vmem:[#allocation21_spill] sm:$0xff] %v7528_v39  ;;  %v6309_v43 = vld [vmem:[%s6758_s27 + $0x20] sm:$0xff] }
 0x238   : > { %1220 = vmatprep.subr.mxu1 %v11005_v47  ;;  %1147 = vmatprep.subr.mxu0 %v7510_v27  ;;  %v805_v47 = vunpack.c.l.bf16 %v6309_v43 }
 0x239   : > { %1221 = vmatpush1.msra.mxu1 %v11008_v53  ;;  %1148 = vmatpush1.msra.mxu0 %v7516_v31  ;;  %v806_v53 = vunpack.c.h.bf16 %v6309_v43 }
 0x23a   : > { %1149 = vmatprep.subr.mxu0 %v7522_v35  ;;  %v809_v3 = vadd.f32 %v805_v47, %v11011_v11 }
 0x23b   : > { %1150 = vmatpush1.msra.mxu0 %v7528_v39  ;;  %v810_v8 = vadd.f32 %v806_v53, %v11012_v2 }
 0x2da   : > { %v943_v15 = vpop.f32.mrf.mxu0  ;;  %v1014_v41 = vpop.f32.mrf.mxu1 }
 0x2db   : > { %v1019_v19 = vadd.f32 %v943_v15, %v809_v3  ;;  %v1021_v55 = vadd.f32 %v1014_v41, %v811_v33  ;;  %v7566_v33 = vld [vmem:[%s10671_s1 + $0x1f0] sm:$0xff] }
 0x2dc   : > { %v945_v24 = vpop.f32.mrf.mxu0  ;;  %v1016_v6 = vpop.f32.mrf.mxu1  ;;  %v7580_v41 = vld [vmem:[%s10671_s1 + $0x1d0] sm:$0xff] }
 0x2dd   : > { %v1023_v29 = vmul.f32 0.5, %v1019_v19  ;;  %v1020_v37 = vadd.f32 %v945_v24, %v810_v8  ;;  %v1022_v9 = vadd.f32 %v1016_v6, %v812_v61  ;;  %v7554_v24 = vld [vmem:[%s10671_s1 + $0x1f8] sm:$0xff]  ;;  %v7608_v61 = vld [vmem:[%s10671_s1 + $0x190] sm:$0xff] }
 0x2de   : > { %11025 = vst [vmem:[#allocation23_spill] sm:$0xff] %v7554_v24  ;;  %1432 = vmatprep.subr.mxu1 %v7554_v24  ;;  %v7615_v6 = vld [vmem:[%s10671_s1 + $0x178] sm:$0xff] }
 0x2df   : > { %6457 = vtanh.f32 %v1023_v29  ;;  %v1027_v45 = vmul.f32 0.5, %v1020_v37  ;;  %v1032_v5 = vmul.f32 0.5, %v1022_v9  ;;  %v7561_v29 = vld [vmem:[%s10671_s1 + $0x1e0] sm:$0xff]  ;;  %v7573_v37 = vld [vmem:[%s10671_s1 + $0x1d8] sm:$0xff]  ;;  %v7622_v9 = vld [vmem:[%s10671_s1 + $0x170] sm:$0xff] }
 0x2e1   : > { %6459 = vtanh.f32 %v1027_v45  ;;  %v7587_v45 = vld [vmem:[%s10671_s1 + $0x1b8] sm:$0xff] }
 0x2e2   : > { %6461 = vtanh.f32 %v1021_v55  ;;  %v7601_v55 = vld [vmem:[%s10671_s1 + $0x198] sm:$0xff] }
 0x2e3   : > { %6463 = vtanh.f32 %v1032_v5  ;;  %v7629_v5 = vld [vmem:[%s10671_s1 + $0x158] sm:$0xff] }
 0x2ec   : > { %v6458_v10 = vpop.eup %6457 }
 0x2ed   : > { %v1025_v1 = vmul.f32 0.5, %v6458_v10  ;;  %v7636_v10 = vld [vmem:[%s10671_s1 + $0x150] sm:$0xff] }
 0x2ee   : > { %v6460_v63 = vpop.eup %6459 }
 0x2ef   : > { %v1026_v62 = vadd.f32 0.5, %v1025_v1  ;;  %v1029_v59 = vmul.f32 0.5, %v6460_v63  ;;  %v6462_v18 = vpop.eup %6461  ;;  %v7643_v1 = vld [vmem:[%s10671_s1 + $0x138] sm:$0xff]  ;;  %v7650_v63 = vld [vmem:[%s10671_s1 + $0x130] sm:$0xff] }
 0x2f0   : > { %v6464_v60 = vpop.eup %6463 }
 0x2f1   : > { %v1030_v12 = vadd.f32 0.5, %v1029_v59  ;;  %v1036_v43 = vmul.f32 %v6462_v18, %v1026_v62  ;;  %v1034_v3 = vmul.f32 0.5, %v6464_v60  ;;  %v7657_v62 = vld [vmem:[%s10671_s1 + $0x118] sm:$0xff]  ;;  %v7664_v59 = vld [vmem:[%s10671_s1 + $0x110] sm:$0xff] }
 0x2f2   : > { %v7676_v18 = vld [vmem:[%s10671_s1 + $0xf0] sm:$0xff]  ;;  %v7695_v60 = vld [vmem:[%s10671_s1 + $0xb8] sm:$0xff] }
 0x2f3   : > { %v1037_v47 = vmul.f32 %v1030_v12, %v7315_v7  ;;  %v1035_v4 = vadd.f32 0.5, %v1034_v3  ;;  %v7549_v7 = vld [vmem:[%s10671_s1 + $0x1e8] sm:$0xff]  ;;  %v7671_v12 = vld [vmem:[%s10671_s1 + $0xf8] sm:$0xff]  ;;  %v7702_v3 = vld [vmem:[%s10671_s1 + $0xb0] sm:$0xff] }
 0x2f4   : > { %11024 = vst [vmem:[#allocation18_spill] sm:$0xff] %v7549_v7  ;;  %1361 = vmatprep.subr.mxu0 %v7549_v7  ;;  %11026 = vst [vmem:[#allocation20_spill] sm:$0xff] %v7702_v3 }
 0x2f5   : > { %v7540_v53 = vadd.f32 %v1037_v47, %v1036_v43  ;;  %v7681_v43 = vld [vmem:[%s10671_s1 + $0xd8] sm:$0xff]  ;;  %v7688_v47 = vld [vmem:[%s10671_s1 + $0xd0] sm:$0xff] }
 0x2f7   : > { %6465 = vtanh.f32 %v7540_v53 }
 0x304   : > { %v6466_v8 = vpop.eup %6465 }
 0x305   : > { %v1040_v15 = vmul.f32 %v6466_v8, %v1035_v4  ;;  %v7709_v4 = vld [vmem:[%s10671_s1 + $0x98] sm:$0xff]  ;;  %v7716_v8 = vld [vmem:[%s10671_s1 + $0x90] sm:$0xff] }
 0x306   : > { %11027 = vst [vmem:[#allocation25_spill] sm:$0xff] %v7709_v4  ;;  %11028 = vst [vmem:[#allocation22_spill] sm:$0xff] %v7716_v8 }
 0x307   : > { %v1041_v19 = vpack.c.bf16 %v1040_v15, %v1040_v15  ;;  %1184 = vmatmul.mubr.f32.vlgmr.msra.gmra.mxu0 %v1040_v15  ;;  %1255 = vmatmul.mubr.f32.vlgmr.msra.gmra.mxu1 %v1040_v15  ;;  %v7723_v15 = vld [vmem:[%s10671_s1 + $0x78] sm:$0xff] }
 0x308   : > { %1425 = vmatprep.mubr.f32.mxu0 %v11007_v51  ;;  %1496 = vmatprep.mubr.f32.mxu1 %v11007_v51  ;;  %11029 = vst [vmem:[#allocation27_spill] sm:$0xff] %v7723_v15  ;;  %v7737_v51 = vld [vmem:[%s10671_s1 + $0x58] sm:$0xff] }
 0x309   : > { %6311 = vst [vmem:[%s6763_s30 + $0x8] sm:$0xf] %v1041_v19  ;;  %1362 = vmatpush1.msra.mxu0 %v7561_v29  ;;  %1433 = vmatpush1.msra.mxu1 %v7566_v33  ;;  %v7730_v19 = vld [vmem:[%s10671_s1 + $0x70] sm:$0xff]  ;;  %11031 = vst [vmem:[#allocation28_spill] sm:$0xff] %v7737_v51 }
 0x30a   : > { %1363 = vmatprep.subr.mxu0 %v7356_v13  ;;  %1434 = vmatprep.subr.mxu1 %v7573_v37  ;;  %11030 = vst [vmem:[#allocation24_spill] sm:$0xff] %v7730_v19 }
 0x30b   : > { %1364 = vmatpush1.msra.mxu0 %v7362_v20  ;;  %1435 = vmatpush1.msra.mxu1 %v7580_v41 }
 0x30c   : > { %1365 = vmatprep.subr.mxu0 %v7368_v21  ;;  %1436 = vmatprep.subr.mxu1 %v7587_v45 }
 0x30d   : > { %1366 = vmatpush1.msra.mxu0 %v7374_v23  ;;  %1437 = vmatpush1.msra.mxu1 %v7594_v49 }
 0x30e   : > { %1367 = vmatprep.subr.mxu0 %v7380_v25  ;;  %1438 = vmatprep.subr.mxu1 %v7601_v55 }
 0x30f   : > { %1368 = vmatpush1.msra.mxu0 %v7386_v26  ;;  %1439 = vmatpush1.msra.mxu1 %v7608_v61 }
 0x310   : > { %1369 = vmatprep.subr.mxu0 %v7392_v28  ;;  %1440 = vmatprep.subr.mxu1 %v7615_v6 }
 0x311   : > { %1370 = vmatpush1.msra.mxu0 %v7398_v30  ;;  %1441 = vmatpush1.msra.mxu1 %v7622_v9 }
 0x312   : > { %1371 = vmatprep.subr.mxu0 %v7404_v32  ;;  %1442 = vmatprep.subr.mxu1 %v7629_v5 }
 0x313   : > { %1372 = vmatpush1.msra.mxu0 %v7410_v34  ;;  %1443 = vmatpush1.msra.mxu1 %v7636_v10 }
 0x314   : > { %1373 = vmatprep.subr.mxu0 %v7416_v36  ;;  %1444 = vmatprep.subr.mxu1 %v7643_v1 }
 0x315   : > { %1374 = vmatpush1.msra.mxu0 %v7422_v38  ;;  %1445 = vmatpush1.msra.mxu1 %v7650_v63 }
 0x316   : > { %1375 = vmatprep.subr.mxu0 %v7428_v40  ;;  %1446 = vmatprep.subr.mxu1 %v7657_v62 }
 0x317   : > { %1376 = vmatpush1.msra.mxu0 %v7434_v42  ;;  %1447 = vmatpush1.msra.mxu1 %v7664_v59 }
 0x318   : > { %1377 = vmatprep.subr.mxu0 %v7440_v44  ;;  %1448 = vmatprep.subr.mxu1 %v7671_v12 }
 0x319   : > { %1378 = vmatpush1.msra.mxu0 %v7445_v46  ;;  %1449 = vmatpush1.msra.mxu1 %v7676_v18 }
 0x31a   : > { %1379 = vmatprep.subr.mxu0 %v7450_v48  ;;  %1450 = vmatprep.subr.mxu1 %v7681_v43 }
 0x31b   : > { %1380 = vmatpush1.msra.mxu0 %v7456_v50  ;;  %1451 = vmatpush1.msra.mxu1 %v7688_v47 }
 0x31c   : > { %1381 = vmatprep.subr.mxu0 %v7462_v52  ;;  %1452 = vmatprep.subr.mxu1 %v7695_v60 }
 0x31d   : > { %1382 = vmatpush1.msra.mxu0 %v7468_v54  ;;  %1453 = vmatpush1.msra.mxu1 %v7702_v3 }
 0x31e   : > { %1383 = vmatprep.subr.mxu0 %v7474_v56  ;;  %1454 = vmatprep.subr.mxu1 %v7709_v4  ;;  %v7744_v4 = vld [vmem:[%s10671_s1 + $0x50] sm:$0xff] }
 0x31f   : > { %1384 = vmatpush1.msra.mxu0 %v7480_v58  ;;  %1455 = vmatpush1.msra.mxu1 %v7716_v8  ;;  %11032 = vst [vmem:[#allocation26_spill] sm:$0xff] %v7744_v4  ;;  %v7751_v8 = vld [vmem:[%s10671_s1 + $0x38] sm:$0xff] }
 0x320   : > { %1385 = vmatprep.subr.mxu0 %v7486_v0  ;;  %1456 = vmatprep.subr.mxu1 %v7723_v15  ;;  %11033 = vst [vmem:[#allocation29_spill] sm:$0xff] %v7751_v8  ;;  %v7758_v15 = vld [vmem:[%s10671_s1 + $0x30] sm:$0xff] }
 0x321   : > { %1386 = vmatpush1.msra.mxu0 %v7492_v14  ;;  %1457 = vmatpush1.msra.mxu1 %v7730_v19  ;;  %11034 = vst [vmem:[#allocation8_spill] sm:$0xff] %v7758_v15  ;;  %v7765_v19 = vld [vmem:[%s10671_s1 + $0x18] sm:$0xff] }
 0x322   : > { %1387 = vmatprep.subr.mxu0 %v7498_v17  ;;  %1458 = vmatprep.subr.mxu1 %v7737_v51  ;;  %11035 = vst [vmem:[#allocation9_spill] sm:$0xff] %v7765_v19  ;;  %v7772_v51 = vld [vmem:[%s10671_s1 + $0x10] sm:$0xff] }
 0x323   : > { %1388 = vmatpush1.msra.mxu0 %v7504_v22  ;;  %1459 = vmatpush1.msra.mxu1 %v7744_v4  ;;  %11036 = vst [vmem:[#allocation30_spill] sm:$0xff] %v7772_v51  ;;  %v6313_v22 = vld [vmem:[%s6758_s27 + $0x38] sm:$0xff] }
 0x324   : > { %1389 = vmatprep.subr.mxu0 %v7510_v27  ;;  %1460 = vmatprep.subr.mxu1 %v7751_v8  ;;  %v6312_v8 = vld [vmem:[%s6758_s27 + $0x30] sm:$0xff]  ;;  %v1049_v17 = vunpack.c.l.bf16 %v6313_v22 }
 0x325   : > { %1390 = vmatpush1.msra.mxu0 %v7516_v31  ;;  %1461 = vmatpush1.msra.mxu1 %v7758_v15  ;;  %v1047_v27 = vunpack.c.l.bf16 %v6312_v8  ;;  %v1048_v4 = vunpack.c.h.bf16 %v6312_v8 }
 0x326   : > { %1391 = vmatprep.subr.mxu0 %v7522_v35  ;;  %1462 = vmatprep.subr.mxu1 %v7765_v19 }
 0x327   : > { %1392 = vmatpush1.msra.mxu0 %v7528_v39  ;;  %1463 = vmatpush1.msra.mxu1 %v7772_v51  ;;  %v1051_v31 = vadd.f32 %v1047_v27, %v11011_v11  ;;  %v1052_v15 = vadd.f32 %v1048_v4, %v11012_v2  ;;  %v1053_v39 = vadd.f32 %v1049_v17, %v11013_v57 }
 0x328   : > { %1603 = vmatprep.subr.mxu0 %v7549_v7  ;;  %1674 = vmatprep.subr.mxu1 %v7554_v24  ;;  %v1050_v24 = vunpack.c.h.bf16 %v6313_v22 }
 0x32a   : > { %v1054_v8 = vadd.f32 %v1050_v24, %v10987_v16 }
 0x3c7   : > { %v1185_v35 = vpop.f32.mrf.mxu0  ;;  %v1256_v58 = vpop.f32.mrf.mxu1 }
 0x3c8   : > { %v1261_v14 = vadd.f32 %v1185_v35, %v1051_v31  ;;  %v1263_v56 = vadd.f32 %v1256_v58, %v1053_v39 }
 0x3c9   : > { %v1187_v19 = vpop.f32.mrf.mxu0  ;;  %v1258_v3 = vpop.f32.mrf.mxu1 }
 0x3ca   : > { %v1265_v0 = vmul.f32 0.5, %v1261_v14  ;;  %v1262_v51 = vadd.f32 %v1187_v19, %v1052_v15  ;;  %v1264_v27 = vadd.f32 %v1258_v3, %v1054_v8  ;;  %v11040_v19 = vld [vmem:[#allocation13_spill] sm:$0xff]  ;;  %v11041_v8 = vld [vmem:[#allocation22_spill] sm:$0xff] }
 0x3cc   : > { %6467 = vtanh.f32 %v1265_v0  ;;  %v1269_v7 = vmul.f32 0.5, %v1262_v51  ;;  %v1274_v11 = vmul.f32 0.5, %v1264_v27  ;;  %v11042_v27 = vld [vmem:[#allocation11_spill] sm:$0xff] }
 0x3ce   : > { %6469 = vtanh.f32 %v1269_v7 }
 0x3cf   : > { %6471 = vtanh.f32 %v1263_v56 }
 0x3d0   : > { %6473 = vtanh.f32 %v1274_v11  ;;  %v11037_v11 = vld [vmem:[#allocation20_spill] sm:$0xff] }
 0x3d9   : > { %v6468_v4 = vpop.eup %6467 }
 0x3da   : > { %v1267_v2 = vmul.f32 0.5, %v6468_v4  ;;  %v11043_v4 = vld [vmem:[#allocation27_spill] sm:$0xff] }
 0x3db   : > { %v6470_v31 = vpop.eup %6469 }
 0x3dc   : > { %v1268_v35 = vadd.f32 0.5, %v1267_v2  ;;  %v1271_v14 = vmul.f32 0.5, %v6470_v31  ;;  %v6472_v15 = vpop.eup %6471  ;;  %v11038_v2 = vld [vmem:[#allocation10_spill] sm:$0xff]  ;;  %v11044_v31 = vld [vmem:[#allocation15_spill] sm:$0xff] }
 0x3dd   : > { %v6474_v22 = vpop.eup %6473 }
 0x3de   : > { %v1272_v17 = vadd.f32 0.5, %v1271_v14  ;;  %v1278_v0 = vmul.f32 %v6472_v15, %v1268_v35  ;;  %v1276_v56 = vmul.f32 0.5, %v6474_v22  ;;  %v11045_v35 = vld [vmem:[#allocation24_spill] sm:$0xff]  ;;  %v11048_v15 = vld [vmem:[#allocation17_spill] sm:$0xff] }
 0x3df   : > { %v11046_v14 = vld [vmem:[#allocation12_spill] sm:$0xff]  ;;  %v11051_v22 = vld [vmem:[#allocation29_spill] sm:$0xff] }
 0x3e0   : > { %v1279_v51 = vmul.f32 %v1272_v17, %v7540_v53  ;;  %v1277_v39 = vadd.f32 0.5, %v1276_v56  ;;  %v11039_v53 = vld [vmem:[#allocation25_spill] sm:$0xff]  ;;  %v11047_v17 = vld [vmem:[#allocation28_spill] sm:$0xff]  ;;  %v11052_v56 = vld [vmem:[#allocation19_spill] sm:$0xff] }
 0x3e2   : > { %v7789_v58 = vadd.f32 %v1279_v51, %v1278_v0  ;;  %v11049_v0 = vld [vmem:[#allocation26_spill] sm:$0xff] }
 0x3e3   : > { %v11050_v51 = vld [vmem:[#allocation14_spill] sm:$0xff] }
 0x3e4   : > { %6475 = vtanh.f32 %v7789_v58 }
 0x3f1   : > { %v6476_v7 = vpop.eup %6475 }
 0x3f2   : > { %v1282_v24 = vmul.f32 %v6476_v7, %v1277_v39  ;;  %v11053_v39 = vld [vmem:[#allocation8_spill] sm:$0xff] }
 0x3f3   : > { %v11054_v7 = vld [vmem:[#allocation16_spill] sm:$0xff] }
 0x3f4   : > { %v1283_v3 = vpack.c.bf16 %v1282_v24, %v1282_v24  ;;  %1426 = vmatmul.mubr.f32.vlgmr.msra.gmra.mxu0 %v1282_v24  ;;  %1497 = vmatmul.mubr.f32.vlgmr.msra.gmra.mxu1 %v1282_v24  ;;  %v11055_v24 = vld [vmem:[#allocation9_spill] sm:$0xff] }
 0x3f5   : > { %1604 = vmatpush1.msra.mxu0 %v7561_v29  ;;  %1675 = vmatpush1.msra.mxu1 %v7566_v33 }
 0x3f6   : > { %6314 = vst [vmem:[%s6763_s30 + $0xc] sm:$0xf] %v1283_v3  ;;  %1605 = vmatprep.subr.mxu0 %v7356_v13  ;;  %1676 = vmatprep.subr.mxu1 %v7573_v37  ;;  %v11056_v3 = vld [vmem:[#allocation21_spill] sm:$0xff] }
 0x3f7   : > { %1606 = vmatpush1.msra.mxu0 %v7362_v20  ;;  %1677 = vmatpush1.msra.mxu1 %v7580_v41 }
 0x3f8   : > { %1607 = vmatprep.subr.mxu0 %v7368_v21  ;;  %1678 = vmatprep.subr.mxu1 %v7587_v45 }
 0x3f9   : > { %1608 = vmatpush1.msra.mxu0 %v7374_v23  ;;  %1679 = vmatpush1.msra.mxu1 %v7594_v49 }
 0x3fa   : > { %1609 = vmatprep.subr.mxu0 %v7380_v25  ;;  %1680 = vmatprep.subr.mxu1 %v7601_v55 }
 0x3fb   : > { %1610 = vmatpush1.msra.mxu0 %v7386_v26  ;;  %1681 = vmatpush1.msra.mxu1 %v7608_v61 }
 0x3fc   : > { %1611 = vmatprep.subr.mxu0 %v7392_v28  ;;  %1682 = vmatprep.subr.mxu1 %v7615_v6 }
 0x3fd   : > { %1612 = vmatpush1.msra.mxu0 %v7398_v30  ;;  %1683 = vmatpush1.msra.mxu1 %v7622_v9 }
 0x3fe   : > { %1613 = vmatprep.subr.mxu0 %v7404_v32  ;;  %1684 = vmatprep.subr.mxu1 %v7629_v5 }
 0x3ff   : > { %1614 = vmatpush1.msra.mxu0 %v7410_v34  ;;  %1685 = vmatpush1.msra.mxu1 %v7636_v10 }
 0x400   : > { %1615 = vmatprep.subr.mxu0 %v7416_v36  ;;  %1686 = vmatprep.subr.mxu1 %v7643_v1 }
 0x401   : > { %1616 = vmatpush1.msra.mxu0 %v7422_v38  ;;  %1687 = vmatpush1.msra.mxu1 %v7650_v63 }
 0x402   : > { %1617 = vmatprep.subr.mxu0 %v7428_v40  ;;  %1688 = vmatprep.subr.mxu1 %v7657_v62 }
 0x403   : > { %1618 = vmatpush1.msra.mxu0 %v7434_v42  ;;  %1689 = vmatpush1.msra.mxu1 %v7664_v59 }
 0x404   : > { %1619 = vmatprep.subr.mxu0 %v7440_v44  ;;  %1690 = vmatprep.subr.mxu1 %v7671_v12 }
 0x405   : > { %1620 = vmatpush1.msra.mxu0 %v7445_v46  ;;  %1691 = vmatpush1.msra.mxu1 %v7676_v18 }
 0x406   : > { %1621 = vmatprep.subr.mxu0 %v7450_v48  ;;  %1692 = vmatprep.subr.mxu1 %v7681_v43 }
 0x407   : > { %1622 = vmatpush1.msra.mxu0 %v7456_v50  ;;  %1693 = vmatpush1.msra.mxu1 %v7688_v47 }
 0x408   : > { %1623 = vmatprep.subr.mxu0 %v7462_v52  ;;  %1694 = vmatprep.subr.mxu1 %v7695_v60 }
 0x409   : > { %1624 = vmatpush1.msra.mxu0 %v7468_v54  ;;  %1695 = vmatpush1.msra.mxu1 %v11037_v11 }
 0x40a   : > { %1625 = vmatprep.subr.mxu0 %v11038_v2  ;;  %1696 = vmatprep.subr.mxu1 %v11039_v53 }
 0x40b   : > { %1626 = vmatpush1.msra.mxu0 %v11040_v19  ;;  %1697 = vmatpush1.msra.mxu1 %v11041_v8 }
 0x40c   : > { %1627 = vmatprep.subr.mxu0 %v11042_v27  ;;  %1698 = vmatprep.subr.mxu1 %v11043_v4 }
 0x40d   : > { %1628 = vmatpush1.msra.mxu0 %v11044_v31  ;;  %1699 = vmatpush1.msra.mxu1 %v11045_v35  ;;  %v11061_v35 = vld [vmem:[#allocation4_spill] sm:$0xff] }
 0x40e   : > { %1629 = vmatprep.subr.mxu0 %v11046_v14  ;;  %1700 = vmatprep.subr.mxu1 %v11047_v17  ;;  %v11057_v17 = vmov 0.0  }
 0x40f   : > { %1630 = vmatpush1.msra.mxu0 %v11048_v15  ;;  %1701 = vmatpush1.msra.mxu1 %v11049_v0  ;;  %v11058_v15 = vld [vmem:[#allocation30_spill] sm:$0xff] }
 0x410   : > { %1631 = vmatprep.subr.mxu0 %v11050_v51  ;;  %1702 = vmatprep.subr.mxu1 %v11051_v22  ;;  %v11059_v0 = vld [vmem:[#allocation18_spill] sm:$0xff]  ;;  %v11060_v51 = vld [vmem:[#allocation23_spill] sm:$0xff] }
 0x411   : > { %1632 = vmatpush1.msra.mxu0 %v11052_v56  ;;  %1703 = vmatpush1.msra.mxu1 %v11053_v39  ;;  %v6315_v22 = vld [vmem:[%s6758_s27 + $0x40] sm:$0xff]  ;;  %v6316_v39 = vld [vmem:[%s6758_s27 + $0x48] sm:$0xff] }
 0x412   : > { %1633 = vmatprep.subr.mxu0 %v11054_v7  ;;  %1704 = vmatprep.subr.mxu1 %v11055_v24  ;;  %v1289_v56 = vunpack.c.l.bf16 %v6315_v22  ;;  %v1290_v14 = vunpack.c.h.bf16 %v6315_v22  ;;  %v1291_v31 = vunpack.c.l.bf16 %v6316_v39  ;;  %v11062_v24 = vld [vmem:[#allocation5_spill] sm:$0xff] }
 0x413   : > { %1634 = vmatpush1.msra.mxu0 %v11056_v3  ;;  %1667 = vmatprep.mubr.f32.mxu0 %v11057_v17 }
 0x414   : > { %1705 = vmatpush1.msra.mxu1 %v11058_v15  ;;  %1738 = vmatprep.mubr.f32.mxu1 %v11057_v17  ;;  %v1293_v7 = vadd.f32 %v1289_v56, %v11061_v35  ;;  %v1294_v4 = vadd.f32 %v1290_v14, %v11062_v24  ;;  %v1295_v15 = vadd.f32 %v1291_v31, %v11013_v57 }
 0x415   : > { %1845 = vmatprep.subr.mxu0 %v11059_v0  ;;  %1916 = vmatprep.subr.mxu1 %v11060_v51  ;;  %v1292_v51 = vunpack.c.h.bf16 %v6316_v39  ;;  %v11085_v39 = vld [vmem:[#allocation18_spill] sm:$0xff] }
 0x417   : > { %v1296_v22 = vadd.f32 %v1292_v51, %v10987_v16 }
 0x4b4   : > { %v1427_v3 = vpop.f32.mrf.mxu0  ;;  %v1498_v53 = vpop.f32.mrf.mxu1 }
 0x4b5   : > { %v1503_v27 = vadd.f32 %v1427_v3, %v1293_v7  ;;  %v1505_v2 = vadd.f32 %v1498_v53, %v1295_v15 }
 0x4b6   : > { %v1429_v8 = vpop.f32.mrf.mxu0  ;;  %v1500_v11 = vpop.f32.mrf.mxu1 }
 0x4b7   : > { %v1507_v19 = vmul.f32 0.5, %v1503_v27  ;;  %v1504_v17 = vadd.f32 %v1429_v8, %v1294_v4  ;;  %v1506_v56 = vadd.f32 %v1500_v11, %v1296_v22  ;;  %v6318_v22 = vld [vmem:[%s6758_s27 + $0x50] sm:$0xff] }
 0x4b9   : > { %6477 = vtanh.f32 %v1507_v19  ;;  %v1511_v0 = vmul.f32 0.5, %v1504_v17  ;;  %v1516_v35 = vmul.f32 0.5, %v1506_v56  ;;  %v1531_v56 = vunpack.c.l.bf16 %v6318_v22 }
 0x4bb   : > { %6479 = vtanh.f32 %v1511_v0 }
 0x4bc   : > { %6481 = vtanh.f32 %v1505_v2 }
 0x4bd   : > { %6483 = vtanh.f32 %v1516_v35  ;;  %v11084_v35 = vld [vmem:[#allocation30_spill] sm:$0xff] }
 0x4c6   : > { %v6478_v14 = vpop.eup %6477 }
 0x4c7   : > { %v1509_v24 = vmul.f32 0.5, %v6478_v14  ;;  %v1532_v14 = vunpack.c.h.bf16 %v6318_v22 }
 0x4c8   : > { %v6480_v7 = vpop.eup %6479 }
 0x4c9   : > { %v1510_v3 = vadd.f32 0.5, %v1509_v24  ;;  %v1513_v27 = vmul.f32 0.5, %v6480_v7  ;;  %v6482_v8 = vpop.eup %6481  ;;  %v11086_v24 = vld [vmem:[#allocation23_spill] sm:$0xff]  ;;  %v6319_v7 = vld [vmem:[%s6758_s27 + $0x58] sm:$0xff] }
 0x4ca   : > { %v6484_v17 = vpop.eup %6483 }
 0x4cb   : > { %v1514_v31 = vadd.f32 0.5, %v1513_v27  ;;  %v1520_v19 = vmul.f32 %v6482_v8, %v1510_v3  ;;  %v1518_v2 = vmul.f32 0.5, %v6484_v17  ;;  %v11087_v3 = vld [vmem:[#allocation4_spill] sm:$0xff]  ;;  %v11088_v8 = vld [vmem:[#allocation5_spill] sm:$0xff] }
 0x4cc   : > { %v1535_v27 = vadd.f32 %v1531_v56, %v11087_v3 }
 0x4cd   : > { %v1521_v4 = vmul.f32 %v1514_v31, %v7789_v58  ;;  %v1519_v11 = vadd.f32 0.5, %v1518_v2  ;;  %v11083_v58 = vmov 0.0   ;;  %v1533_v31 = vunpack.c.l.bf16 %v6319_v7 }
 0x4cf   : > { %v7866_v53 = vadd.f32 %v1521_v4, %v1520_v19  ;;  %v1536_v19 = vadd.f32 %v1532_v14, %v11088_v8 }
 0x4d1   : > { %6485 = vtanh.f32 %v7866_v53 }
 0x4de   : > { %v6486_v15 = vpop.eup %6485 }
 0x4df   : > { %v1524_v0 = vmul.f32 %v6486_v15, %v1519_v11  ;;  %v1537_v15 = vadd.f32 %v1533_v31, %v11013_v57 }
 0x4e1   : > { %v1525_v51 = vpack.c.bf16 %v1524_v0, %v1524_v0  ;;  %1668 = vmatmul.mubr.f32.vlgmr.msra.gmra.mxu0 %v1524_v0  ;;  %1739 = vmatmul.mubr.f32.vlgmr.msra.gmra.mxu1 %v1524_v0 }
 0x4e2   : > { %1846 = vmatpush1.msra.mxu0 %v7561_v29  ;;  %1917 = vmatpush1.msra.mxu1 %v7566_v33 }
 0x4e3   : > { %6317 = vst [vmem:[%s6763_s30 + $0x10] sm:$0xf] %v1525_v51  ;;  %1847 = vmatprep.subr.mxu0 %v7356_v13  ;;  %1918 = vmatprep.subr.mxu1 %v7573_v37  ;;  %v11063_v13 = vld [vmem:[#allocation20_spill] sm:$0xff] }
 0x4e4   : > { %1848 = vmatpush1.msra.mxu0 %v7362_v20  ;;  %1919 = vmatpush1.msra.mxu1 %v7580_v41  ;;  %v11064_v20 = vld [vmem:[#allocation10_spill] sm:$0xff] }
 0x4e5   : > { %1849 = vmatprep.subr.mxu0 %v7368_v21  ;;  %1920 = vmatprep.subr.mxu1 %v7587_v45  ;;  %v11065_v21 = vld [vmem:[#allocation25_spill] sm:$0xff] }
 0x4e6   : > { %1850 = vmatpush1.msra.mxu0 %v7374_v23  ;;  %1921 = vmatpush1.msra.mxu1 %v7594_v49  ;;  %v11066_v23 = vld [vmem:[#allocation13_spill] sm:$0xff] }
 0x4e7   : > { %1851 = vmatprep.subr.mxu0 %v7380_v25  ;;  %1922 = vmatprep.subr.mxu1 %v7601_v55  ;;  %v11067_v25 = vld [vmem:[#allocation22_spill] sm:$0xff] }
 0x4e8   : > { %1852 = vmatpush1.msra.mxu0 %v7386_v26  ;;  %1923 = vmatpush1.msra.mxu1 %v7608_v61  ;;  %v11068_v26 = vld [vmem:[#allocation11_spill] sm:$0xff] }
 0x4e9   : > { %1853 = vmatprep.subr.mxu0 %v7392_v28  ;;  %1924 = vmatprep.subr.mxu1 %v7615_v6  ;;  %v11069_v28 = vld [vmem:[#allocation27_spill] sm:$0xff] }
 0x4ea   : > { %1854 = vmatpush1.msra.mxu0 %v7398_v30  ;;  %1925 = vmatpush1.msra.mxu1 %v7622_v9  ;;  %v11070_v30 = vld [vmem:[#allocation15_spill] sm:$0xff] }
 0x4eb   : > { %1855 = vmatprep.subr.mxu0 %v7404_v32  ;;  %1926 = vmatprep.subr.mxu1 %v7629_v5  ;;  %v11071_v32 = vld [vmem:[#allocation24_spill] sm:$0xff] }
 0x4ec   : > { %1856 = vmatpush1.msra.mxu0 %v7410_v34  ;;  %1927 = vmatpush1.msra.mxu1 %v7636_v10  ;;  %v11072_v34 = vld [vmem:[#allocation12_spill] sm:$0xff] }
 0x4ed   : > { %1857 = vmatprep.subr.mxu0 %v7416_v36  ;;  %1928 = vmatprep.subr.mxu1 %v7643_v1  ;;  %v11073_v36 = vld [vmem:[#allocation28_spill] sm:$0xff] }
 0x4ee   : > { %1858 = vmatpush1.msra.mxu0 %v7422_v38  ;;  %1929 = vmatpush1.msra.mxu1 %v7650_v63  ;;  %v11074_v38 = vld [vmem:[#allocation17_spill] sm:$0xff] }
 0x4ef   : > { %1859 = vmatprep.subr.mxu0 %v7428_v40  ;;  %1930 = vmatprep.subr.mxu1 %v7657_v62  ;;  %v11075_v40 = vld [vmem:[#allocation26_spill] sm:$0xff] }
 0x4f0   : > { %1860 = vmatpush1.msra.mxu0 %v7434_v42  ;;  %1931 = vmatpush1.msra.mxu1 %v7664_v59  ;;  %v11076_v42 = vld [vmem:[#allocation14_spill] sm:$0xff] }
 0x4f1   : > { %1861 = vmatprep.subr.mxu0 %v7440_v44  ;;  %1932 = vmatprep.subr.mxu1 %v7671_v12  ;;  %v11077_v44 = vld [vmem:[#allocation29_spill] sm:$0xff] }
 0x4f2   : > { %1862 = vmatpush1.msra.mxu0 %v7445_v46  ;;  %1933 = vmatpush1.msra.mxu1 %v7676_v18  ;;  %v11078_v46 = vld [vmem:[#allocation19_spill] sm:$0xff] }
 0x4f3   : > { %1863 = vmatprep.subr.mxu0 %v7450_v48  ;;  %1934 = vmatprep.subr.mxu1 %v7681_v43  ;;  %v11079_v48 = vld [vmem:[#allocation8_spill] sm:$0xff] }
 0x4f4   : > { %1864 = vmatpush1.msra.mxu0 %v7456_v50  ;;  %1935 = vmatpush1.msra.mxu1 %v7688_v47  ;;  %v11080_v50 = vld [vmem:[#allocation16_spill] sm:$0xff] }
 0x4f5   : > { %1865 = vmatprep.subr.mxu0 %v7462_v52  ;;  %1936 = vmatprep.subr.mxu1 %v7695_v60  ;;  %v11081_v52 = vld [vmem:[#allocation9_spill] sm:$0xff] }
 0x4f6   : > { %1866 = vmatpush1.msra.mxu0 %v7468_v54  ;;  %1937 = vmatpush1.msra.mxu1 %v11063_v13  ;;  %v11082_v54 = vld [vmem:[#allocation21_spill] sm:$0xff] }
 0x4f7   : > { %1867 = vmatprep.subr.mxu0 %v11064_v20  ;;  %1938 = vmatprep.subr.mxu1 %v11065_v21 }
 0x4f8   : > { %1868 = vmatpush1.msra.mxu0 %v11066_v23  ;;  %1939 = vmatpush1.msra.mxu1 %v11067_v25  ;;  %v1534_v23 = vunpack.c.h.bf16 %v6319_v7 }
 0x4f9   : > { %1869 = vmatprep.subr.mxu0 %v11068_v26  ;;  %1940 = vmatprep.subr.mxu1 %v11069_v28 }
 0x4fa   : > { %1870 = vmatpush1.msra.mxu0 %v11070_v30  ;;  %1941 = vmatpush1.msra.mxu1 %v11071_v32  ;;  %v1538_v30 = vadd.f32 %v1534_v23, %v10987_v16 }
 0x4fb   : > { %1871 = vmatprep.subr.mxu0 %v11072_v34  ;;  %1942 = vmatprep.subr.mxu1 %v11073_v36 }
 0x4fc   : > { %1872 = vmatpush1.msra.mxu0 %v11074_v38  ;;  %1943 = vmatpush1.msra.mxu1 %v11075_v40 }
 0x4fd   : > { %1873 = vmatprep.subr.mxu0 %v11076_v42  ;;  %1944 = vmatprep.subr.mxu1 %v11077_v44 }
 0x4fe   : > { %1874 = vmatpush1.msra.mxu0 %v11078_v46  ;;  %1945 = vmatpush1.msra.mxu1 %v11079_v48 }
 0x4ff   : > { %1875 = vmatprep.subr.mxu0 %v11080_v50  ;;  %1946 = vmatprep.subr.mxu1 %v11081_v52 }
 0x500   : > { %1876 = vmatpush1.msra.mxu0 %v11082_v54  ;;  %1909 = vmatprep.mubr.f32.mxu0 %v11083_v58 }
 0x501   : > { %1947 = vmatpush1.msra.mxu1 %v11084_v35  ;;  %1980 = vmatprep.mubr.f32.mxu1 %v11083_v58 }
 0x502   : > { %2087 = vmatprep.subr.mxu0 %v11085_v39  ;;  %2158 = vmatprep.subr.mxu1 %v11086_v24 }
 0x5a1   : > { %v1669_v4 = vpop.f32.mrf.mxu0  ;;  %v1740_v51 = vpop.f32.mrf.mxu1 }
 0x5a2   : > { %v1745_v17 = vadd.f32 %v1669_v4, %v1535_v27  ;;  %v1747_v26 = vadd.f32 %v1740_v51, %v1537_v15  ;;  %v6322_v15 = vld [vmem:[%s6758_s27 + $0x68] sm:$0xff] }
 0x5a3   : > { %v1671_v2 = vpop.f32.mrf.mxu0  ;;  %v1742_v34 = vpop.f32.mrf.mxu1  ;;  %v1775_v51 = vunpack.c.l.bf16 %v6322_v15 }
 0x5a4   : > { %v1749_v11 = vmul.f32 0.5, %v1745_v17  ;;  %v1746_v0 = vadd.f32 %v1671_v2, %v1536_v19  ;;  %v1748_v38 = vadd.f32 %v1742_v34, %v1538_v30 }
 0x5a6   : > { %6487 = vtanh.f32 %v1749_v11  ;;  %v1753_v20 = vmul.f32 0.5, %v1746_v0  ;;  %v1758_v42 = vmul.f32 0.5, %v1748_v38  ;;  %v1779_v38 = vadd.f32 %v1775_v51, %v11013_v57 }
 0x5a8   : > { %6489 = vtanh.f32 %v1753_v20 }
 0x5a9   : > { %6491 = vtanh.f32 %v1747_v26 }
 0x5aa   : > { %6493 = vtanh.f32 %v1758_v42 }
 0x5b3   : > { %v6488_v46 = vpop.eup %6487 }
 0x5b4   : > { %v1751_v50 = vmul.f32 0.5, %v6488_v46 }
 0x5b5   : > { %v6490_v54 = vpop.eup %6489 }
 0x5b6   : > { %v1752_v39 = vadd.f32 0.5, %v1751_v50  ;;  %v1755_v24 = vmul.f32 0.5, %v6490_v54  ;;  %v6492_v56 = vpop.eup %6491  ;;  %v1776_v54 = vunpack.c.h.bf16 %v6322_v15 }
 0x5b7   : > { %v6494_v31 = vpop.eup %6493 }
 0x5b8   : > { %v1756_v22 = vadd.f32 0.5, %v1755_v24  ;;  %v1762_v14 = vmul.f32 %v6492_v56, %v1752_v39  ;;  %v1760_v19 = vmul.f32 0.5, %v6494_v31  ;;  %v1780_v24 = vadd.f32 %v1776_v54, %v10987_v16  ;;  %v8222_v54 = vld [vmem:[%s10671_s1 + $0x1b0] sm:$0xff] }
 0x5ba   : > { %v1763_v7 = vmul.f32 %v1756_v22, %v7866_v53  ;;  %v1761_v4 = vadd.f32 0.5, %v1760_v19  ;;  %v8108_v53 = vld [vmem:[%s10671_s1 + $0x80] sm:$0xff] }
 0x5bb   : > { %11090 = vst [vmem:[#allocation10_spill] sm:$0xff] %v8108_v53 }
 0x5bc   : > { %v7943_v27 = vadd.f32 %v1763_v7, %v1762_v14 }
 0x5be   : > { %6495 = vtanh.f32 %v7943_v27 }
 0x5cb   : > { %v6496_v17 = vpop.eup %6495 }
 0x5cc   : > { %v1766_v2 = vmul.f32 %v6496_v17, %v1761_v4 }
 0x5ce   : > { %v1767_v11 = vpack.c.bf16 %v1766_v2, %v1766_v2  ;;  %1910 = vmatmul.mubr.f32.vlgmr.msra.gmra.mxu0 %v1766_v2  ;;  %1981 = vmatmul.mubr.f32.vlgmr.msra.gmra.mxu1 %v1766_v2 }
 0x5cf   : > { %2088 = vmatpush1.msra.mxu0 %v7561_v29  ;;  %2159 = vmatpush1.msra.mxu1 %v7566_v33  ;;  %v7984_v29 = vld [vmem:[%s10671_s1 + $0x1c8] sm:$0xff]  ;;  %v7990_v33 = vld [vmem:[%s10671_s1 + $0x1c0] sm:$0xff] }
 0x5d0   : > { %6320 = vst [vmem:[%s6763_s30 + $0x14] sm:$0xf] %v1767_v11  ;;  %2160 = vmatprep.subr.mxu1 %v7573_v37  ;;  %2151 = vmatprep.mubr.f32.mxu0 %v11083_v58  ;;  %v7996_v37 = vld [vmem:[%s10671_s1 + $0x1a8] sm:$0xff] }
 0x5d1   : > { %2161 = vmatpush1.msra.mxu1 %v7580_v41  ;;  %2222 = vmatprep.mubr.f32.mxu1 %v11083_v58  ;;  %v8002_v41 = vld [vmem:[%s10671_s1 + $0x1a0] sm:$0xff] }
 0x5d2   : > { %2162 = vmatprep.subr.mxu1 %v7587_v45  ;;  %2089 = vmatprep.subr.mxu0 %v7984_v29  ;;  %v8008_v45 = vld [vmem:[%s10671_s1 + $0x188] sm:$0xff] }
 0x5d3   : > { %2163 = vmatpush1.msra.mxu1 %v7594_v49  ;;  %2090 = vmatpush1.msra.mxu0 %v7990_v33  ;;  %v8014_v49 = vld [vmem:[%s10671_s1 + $0x180] sm:$0xff] }
 0x5d4   : > { %2164 = vmatprep.subr.mxu1 %v7601_v55  ;;  %2091 = vmatprep.subr.mxu0 %v7996_v37  ;;  %v8020_v55 = vld [vmem:[%s10671_s1 + $0x168] sm:$0xff] }
 0x5d5   : > { %2165 = vmatpush1.msra.mxu1 %v7608_v61  ;;  %2092 = vmatpush1.msra.mxu0 %v8002_v41  ;;  %v8026_v61 = vld [vmem:[%s10671_s1 + $0x160] sm:$0xff] }
 0x5d6   : > { %2166 = vmatprep.subr.mxu1 %v7615_v6  ;;  %2093 = vmatprep.subr.mxu0 %v8008_v45  ;;  %v8032_v6 = vld [vmem:[%s10671_s1 + $0x148] sm:$0xff] }
 0x5d7   : > { %2167 = vmatpush1.msra.mxu1 %v7622_v9  ;;  %2094 = vmatpush1.msra.mxu0 %v8014_v49  ;;  %v8038_v9 = vld [vmem:[%s10671_s1 + $0x140] sm:$0xff] }
 0x5d8   : > { %2168 = vmatprep.subr.mxu1 %v7629_v5  ;;  %2095 = vmatprep.subr.mxu0 %v8020_v55  ;;  %v8044_v5 = vld [vmem:[%s10671_s1 + $0x128] sm:$0xff] }
 0x5d9   : > { %2169 = vmatpush1.msra.mxu1 %v7636_v10  ;;  %2096 = vmatpush1.msra.mxu0 %v8026_v61  ;;  %v8050_v10 = vld [vmem:[%s10671_s1 + $0x120] sm:$0xff] }
 0x5da   : > { %2170 = vmatprep.subr.mxu1 %v7643_v1  ;;  %2097 = vmatprep.subr.mxu0 %v8032_v6  ;;  %v8056_v1 = vld [vmem:[%s10671_s1 + $0x108] sm:$0xff] }
 0x5db   : > { %2171 = vmatpush1.msra.mxu1 %v7650_v63  ;;  %2098 = vmatpush1.msra.mxu0 %v8038_v9  ;;  %v8062_v63 = vld [vmem:[%s10671_s1 + $0x100] sm:$0xff] }
 0x5dc   : > { %2172 = vmatprep.subr.mxu1 %v7657_v62  ;;  %2099 = vmatprep.subr.mxu0 %v8044_v5  ;;  %v8068_v62 = vld [vmem:[%s10671_s1 + $0xe8] sm:$0xff] }
 0x5dd   : > { %2173 = vmatpush1.msra.mxu1 %v7664_v59  ;;  %2100 = vmatpush1.msra.mxu0 %v8050_v10  ;;  %v8073_v59 = vld [vmem:[%s10671_s1 + $0xe0] sm:$0xff] }
 0x5de   : > { %2174 = vmatprep.subr.mxu1 %v7671_v12  ;;  %2101 = vmatprep.subr.mxu0 %v8056_v1  ;;  %v8078_v12 = vld [vmem:[%s10671_s1 + $0xc8] sm:$0xff] }
 0x5df   : > { %2175 = vmatpush1.msra.mxu1 %v7676_v18  ;;  %2102 = vmatpush1.msra.mxu0 %v8062_v63  ;;  %v8084_v18 = vld [vmem:[%s10671_s1 + $0xc0] sm:$0xff] }
 0x5e0   : > { %2176 = vmatprep.subr.mxu1 %v7681_v43  ;;  %2103 = vmatprep.subr.mxu0 %v8068_v62  ;;  %v8090_v43 = vld [vmem:[%s10671_s1 + $0xa8] sm:$0xff] }
 0x5e1   : > { %2177 = vmatpush1.msra.mxu1 %v7688_v47  ;;  %2104 = vmatpush1.msra.mxu0 %v8073_v59  ;;  %v8096_v47 = vld [vmem:[%s10671_s1 + $0xa0] sm:$0xff] }
 0x5e2   : > { %2178 = vmatprep.subr.mxu1 %v7695_v60  ;;  %2105 = vmatprep.subr.mxu0 %v8078_v12  ;;  %v8102_v60 = vld [vmem:[%s10671_s1 + $0x88] sm:$0xff] }
 0x5e3   : > { %2179 = vmatpush1.msra.mxu1 %v11063_v13  ;;  %2106 = vmatpush1.msra.mxu0 %v8084_v18  ;;  %11089 = vst [vmem:[#allocation20_spill] sm:$0xff] %v8102_v60  ;;  %v8114_v13 = vld [vmem:[%s10671_s1 + $0x68] sm:$0xff] }
 0x5e4   : > { %2180 = vmatprep.subr.mxu1 %v11065_v21  ;;  %2107 = vmatprep.subr.mxu0 %v8090_v43  ;;  %11091 = vst [vmem:[#allocation25_spill] sm:$0xff] %v8114_v13  ;;  %v8120_v21 = vld [vmem:[%s10671_s1 + $0x60] sm:$0xff] }
 0x5e5   : > { %2181 = vmatpush1.msra.mxu1 %v11067_v25  ;;  %2108 = vmatpush1.msra.mxu0 %v8096_v47  ;;  %11092 = vst [vmem:[#allocation13_spill] sm:$0xff] %v8120_v21  ;;  %v8126_v25 = vld [vmem:[%s10671_s1 + $0x48] sm:$0xff] }
 0x5e6   : > { %2182 = vmatprep.subr.mxu1 %v11069_v28  ;;  %2109 = vmatprep.subr.mxu0 %v8102_v60  ;;  %11093 = vst [vmem:[#allocation22_spill] sm:$0xff] %v8126_v25  ;;  %v8132_v28 = vld [vmem:[%s10671_s1 + $0x40] sm:$0xff] }
 0x5e7   : > { %2183 = vmatpush1.msra.mxu1 %v11071_v32  ;;  %2110 = vmatpush1.msra.mxu0 %v8108_v53  ;;  %11094 = vst [vmem:[#allocation11_spill] sm:$0xff] %v8132_v28  ;;  %v8138_v32 = vld [vmem:[%s10671_s1 + $0x28] sm:$0xff] }
 0x5e8   : > { %2184 = vmatprep.subr.mxu1 %v11073_v36  ;;  %2111 = vmatprep.subr.mxu0 %v8114_v13  ;;  %11095 = vst [vmem:[#allocation27_spill] sm:$0xff] %v8138_v32  ;;  %v8144_v36 = vld [vmem:[%s10671_s1 + $0x20] sm:$0xff] }
 0x5e9   : > { %2185 = vmatpush1.msra.mxu1 %v11075_v40  ;;  %2112 = vmatpush1.msra.mxu0 %v8120_v21  ;;  %11096 = vst [vmem:[#allocation15_spill] sm:$0xff] %v8144_v36  ;;  %v8150_v40 = vld [vmem:[%s10671_s1 + $0x8] sm:$0xff] }
 0x5ea   : > { %2186 = vmatprep.subr.mxu1 %v11077_v44  ;;  %2113 = vmatprep.subr.mxu0 %v8126_v25  ;;  %11097 = vst [vmem:[#allocation24_spill] sm:$0xff] %v8150_v40  ;;  %v8156_v44 = vld [vmem:[%s10671_s1] sm:$0xff] }
 0x5eb   : > { %2187 = vmatpush1.msra.mxu1 %v11079_v48  ;;  %2114 = vmatpush1.msra.mxu0 %v8132_v28  ;;  %11098 = vst [vmem:[#allocation12_spill] sm:$0xff] %v8156_v44  ;;  %v6321_v48 = vld [vmem:[%s6758_s27 + $0x60] sm:$0xff] }
 0x5ec   : > { %2188 = vmatprep.subr.mxu1 %v11081_v52  ;;  %2115 = vmatprep.subr.mxu0 %v8138_v32  ;;  %v1773_v52 = vunpack.c.l.bf16 %v6321_v48 }
 0x5ed   : > { %2189 = vmatpush1.msra.mxu1 %v11084_v35  ;;  %2116 = vmatpush1.msra.mxu0 %v8144_v36  ;;  %v1774_v35 = vunpack.c.h.bf16 %v6321_v48 }
 0x5ee   : > { %2117 = vmatprep.subr.mxu0 %v8150_v40  ;;  %v1777_v0 = vadd.f32 %v1773_v52, %v11087_v3 }
 0x5ef   : > { %2118 = vmatpush1.msra.mxu0 %v8156_v44  ;;  %v1778_v20 = vadd.f32 %v1774_v35, %v11088_v8 }
 0x68e   : > { %v1911_v23 = vpop.f32.mrf.mxu0  ;;  %v1982_v46 = vpop.f32.mrf.mxu1 }
 0x68f   : > { %v1987_v26 = vadd.f32 %v1911_v23, %v1777_v0  ;;  %v1989_v39 = vadd.f32 %v1982_v46, %v1779_v38  ;;  %v8194_v38 = vld [vmem:[%s10671_s1 + $0x1f0] sm:$0xff] }
 0x690   : > { %v1913_v30 = vpop.f32.mrf.mxu0  ;;  %v1984_v22 = vpop.f32.mrf.mxu1  ;;  %v8208_v46 = vld [vmem:[%s10671_s1 + $0x1d0] sm:$0xff] }
 0x691   : > { %v1991_v34 = vmul.f32 0.5, %v1987_v26  ;;  %v1988_v42 = vadd.f32 %v1913_v30, %v1778_v20  ;;  %v1990_v56 = vadd.f32 %v1984_v22, %v1780_v24  ;;  %v8182_v30 = vld [vmem:[%s10671_s1 + $0x1f8] sm:$0xff]  ;;  %v8236_v24 = vld [vmem:[%s10671_s1 + $0x190] sm:$0xff] }
 0x692   : > { %11100 = vst [vmem:[#allocation17_spill] sm:$0xff] %v8182_v30  ;;  %2400 = vmatprep.subr.mxu1 %v8182_v30  ;;  %v8243_v22 = vld [vmem:[%s10671_s1 + $0x178] sm:$0xff] }
 0x693   : > { %6497 = vtanh.f32 %v1991_v34  ;;  %v1995_v50 = vmul.f32 0.5, %v1988_v42  ;;  %v2000_v14 = vmul.f32 0.5, %v1990_v56  ;;  %v8189_v34 = vld [vmem:[%s10671_s1 + $0x1e0] sm:$0xff]  ;;  %v8201_v42 = vld [vmem:[%s10671_s1 + $0x1d8] sm:$0xff]  ;;  %v8250_v56 = vld [vmem:[%s10671_s1 + $0x170] sm:$0xff] }
 0x695   : > { %6499 = vtanh.f32 %v1995_v50  ;;  %v8215_v50 = vld [vmem:[%s10671_s1 + $0x1b8] sm:$0xff] }
 0x696   : > { %6501 = vtanh.f32 %v1989_v39  ;;  %v8229_v39 = vld [vmem:[%s10671_s1 + $0x198] sm:$0xff] }
 0x697   : > { %6503 = vtanh.f32 %v2000_v14  ;;  %v8257_v14 = vld [vmem:[%s10671_s1 + $0x158] sm:$0xff] }
 0x6a0   : > { %v6498_v7 = vpop.eup %6497 }
 0x6a1   : > { %v1993_v31 = vmul.f32 0.5, %v6498_v7  ;;  %v8264_v7 = vld [vmem:[%s10671_s1 + $0x150] sm:$0xff] }
 0x6a2   : > { %v6500_v19 = vpop.eup %6499 }
 0x6a3   : > { %v1994_v4 = vadd.f32 0.5, %v1993_v31  ;;  %v1997_v17 = vmul.f32 0.5, %v6500_v19  ;;  %v6502_v11 = vpop.eup %6501  ;;  %v8271_v31 = vld [vmem:[%s10671_s1 + $0x138] sm:$0xff]  ;;  %v8278_v19 = vld [vmem:[%s10671_s1 + $0x130] sm:$0xff] }
 0x6a4   : > { %v6504_v15 = vpop.eup %6503 }
 0x6a5   : > { %v1998_v2 = vadd.f32 0.5, %v1997_v17  ;;  %v2004_v48 = vmul.f32 %v6502_v11, %v1994_v4  ;;  %v2002_v0 = vmul.f32 0.5, %v6504_v15  ;;  %v8285_v4 = vld [vmem:[%s10671_s1 + $0x118] sm:$0xff]  ;;  %v8292_v17 = vld [vmem:[%s10671_s1 + $0x110] sm:$0xff] }
 0x6a6   : > { %v8304_v11 = vld [vmem:[%s10671_s1 + $0xf0] sm:$0xff]  ;;  %v8323_v15 = vld [vmem:[%s10671_s1 + $0xb8] sm:$0xff] }
 0x6a7   : > { %v2005_v52 = vmul.f32 %v1998_v2, %v7943_v27  ;;  %v2003_v51 = vadd.f32 0.5, %v2002_v0  ;;  %v8177_v27 = vld [vmem:[%s10671_s1 + $0x1e8] sm:$0xff]  ;;  %v8299_v2 = vld [vmem:[%s10671_s1 + $0xf8] sm:$0xff]  ;;  %v8330_v0 = vld [vmem:[%s10671_s1 + $0xb0] sm:$0xff] }
 0x6a8   : > { %11099 = vst [vmem:[#allocation28_spill] sm:$0xff] %v8177_v27  ;;  %2329 = vmatprep.subr.mxu0 %v8177_v27  ;;  %11101 = vst [vmem:[#allocation26_spill] sm:$0xff] %v8330_v0 }
 0x6a9   : > { %v8168_v35 = vadd.f32 %v2005_v52, %v2004_v48  ;;  %v8309_v48 = vld [vmem:[%s10671_s1 + $0xd8] sm:$0xff]  ;;  %v8316_v52 = vld [vmem:[%s10671_s1 + $0xd0] sm:$0xff] }
 0x6ab   : > { %6505 = vtanh.f32 %v8168_v35 }
 0x6b8   : > { %v6506_v20 = vpop.eup %6505 }
 0x6b9   : > { %v2008_v23 = vmul.f32 %v6506_v20, %v2003_v51  ;;  %v8337_v51 = vld [vmem:[%s10671_s1 + $0x98] sm:$0xff]  ;;  %v8344_v20 = vld [vmem:[%s10671_s1 + $0x90] sm:$0xff] }
 0x6ba   : > { %11102 = vst [vmem:[#allocation14_spill] sm:$0xff] %v8337_v51  ;;  %11103 = vst [vmem:[#allocation29_spill] sm:$0xff] %v8344_v20 }
 0x6bb   : > { %v2009_v26 = vpack.c.bf16 %v2008_v23, %v2008_v23  ;;  %2152 = vmatmul.mubr.f32.vlgmr.msra.gmra.mxu0 %v2008_v23  ;;  %2223 = vmatmul.mubr.f32.vlgmr.msra.gmra.mxu1 %v2008_v23  ;;  %v8351_v23 = vld [vmem:[%s10671_s1 + $0x78] sm:$0xff] }
 0x6bc   : > { %2393 = vmatprep.mubr.f32.mxu0 %v11083_v58  ;;  %2464 = vmatprep.mubr.f32.mxu1 %v11083_v58  ;;  %11104 = vst [vmem:[#allocation19_spill] sm:$0xff] %v8351_v23  ;;  %v8365_v58 = vld [vmem:[%s10671_s1 + $0x58] sm:$0xff] }
 0x6bd   : > { %6323 = vst [vmem:[%s6763_s30 + $0x18] sm:$0xf] %v2009_v26  ;;  %2330 = vmatpush1.msra.mxu0 %v8189_v34  ;;  %2401 = vmatpush1.msra.mxu1 %v8194_v38  ;;  %v8358_v26 = vld [vmem:[%s10671_s1 + $0x70] sm:$0xff]  ;;  %11106 = vst [vmem:[#allocation16_spill] sm:$0xff] %v8365_v58 }
 0x6be   : > { %2331 = vmatprep.subr.mxu0 %v7984_v29  ;;  %2402 = vmatprep.subr.mxu1 %v8201_v42  ;;  %11105 = vst [vmem:[#allocation8_spill] sm:$0xff] %v8358_v26 }
 0x6bf   : > { %2332 = vmatpush1.msra.mxu0 %v7990_v33  ;;  %2403 = vmatpush1.msra.mxu1 %v8208_v46 }
 0x6c0   : > { %2333 = vmatprep.subr.mxu0 %v7996_v37  ;;  %2404 = vmatprep.subr.mxu1 %v8215_v50 }
 0x6c1   : > { %2334 = vmatpush1.msra.mxu0 %v8002_v41  ;;  %2405 = vmatpush1.msra.mxu1 %v8222_v54 }
 0x6c2   : > { %2335 = vmatprep.subr.mxu0 %v8008_v45  ;;  %2406 = vmatprep.subr.mxu1 %v8229_v39 }
 0x6c3   : > { %2336 = vmatpush1.msra.mxu0 %v8014_v49  ;;  %2407 = vmatpush1.msra.mxu1 %v8236_v24 }
 0x6c4   : > { %2337 = vmatprep.subr.mxu0 %v8020_v55  ;;  %2408 = vmatprep.subr.mxu1 %v8243_v22 }
 0x6c5   : > { %2338 = vmatpush1.msra.mxu0 %v8026_v61  ;;  %2409 = vmatpush1.msra.mxu1 %v8250_v56 }
 0x6c6   : > { %2339 = vmatprep.subr.mxu0 %v8032_v6  ;;  %2410 = vmatprep.subr.mxu1 %v8257_v14 }
 0x6c7   : > { %2340 = vmatpush1.msra.mxu0 %v8038_v9  ;;  %2411 = vmatpush1.msra.mxu1 %v8264_v7 }
 0x6c8   : > { %2341 = vmatprep.subr.mxu0 %v8044_v5  ;;  %2412 = vmatprep.subr.mxu1 %v8271_v31 }
 0x6c9   : > { %2342 = vmatpush1.msra.mxu0 %v8050_v10  ;;  %2413 = vmatpush1.msra.mxu1 %v8278_v19 }
 0x6ca   : > { %2343 = vmatprep.subr.mxu0 %v8056_v1  ;;  %2414 = vmatprep.subr.mxu1 %v8285_v4 }
 0x6cb   : > { %2344 = vmatpush1.msra.mxu0 %v8062_v63  ;;  %2415 = vmatpush1.msra.mxu1 %v8292_v17 }
 0x6cc   : > { %2345 = vmatprep.subr.mxu0 %v8068_v62  ;;  %2416 = vmatprep.subr.mxu1 %v8299_v2 }
 0x6cd   : > { %2346 = vmatpush1.msra.mxu0 %v8073_v59  ;;  %2417 = vmatpush1.msra.mxu1 %v8304_v11 }
 0x6ce   : > { %2347 = vmatprep.subr.mxu0 %v8078_v12  ;;  %2418 = vmatprep.subr.mxu1 %v8309_v48 }
 0x6cf   : > { %2348 = vmatpush1.msra.mxu0 %v8084_v18  ;;  %2419 = vmatpush1.msra.mxu1 %v8316_v52 }
 0x6d0   : > { %2349 = vmatprep.subr.mxu0 %v8090_v43  ;;  %2420 = vmatprep.subr.mxu1 %v8323_v15 }
 0x6d1   : > { %2350 = vmatpush1.msra.mxu0 %v8096_v47  ;;  %2421 = vmatpush1.msra.mxu1 %v8330_v0 }
 0x6d2   : > { %2351 = vmatprep.subr.mxu0 %v8102_v60  ;;  %2422 = vmatprep.subr.mxu1 %v8337_v51  ;;  %v8372_v51 = vld [vmem:[%s10671_s1 + $0x50] sm:$0xff] }
 0x6d3   : > { %2352 = vmatpush1.msra.mxu0 %v8108_v53  ;;  %2423 = vmatpush1.msra.mxu1 %v8344_v20  ;;  %11107 = vst [vmem:[#allocation9_spill] sm:$0xff] %v8372_v51  ;;  %v8379_v20 = vld [vmem:[%s10671_s1 + $0x38] sm:$0xff] }
 0x6d4   : > { %2353 = vmatprep.subr.mxu0 %v8114_v13  ;;  %2424 = vmatprep.subr.mxu1 %v8351_v23  ;;  %11108 = vst [vmem:[#allocation21_spill] sm:$0xff] %v8379_v20  ;;  %v8386_v23 = vld [vmem:[%s10671_s1 + $0x30] sm:$0xff] }
 0x6d5   : > { %2354 = vmatpush1.msra.mxu0 %v8120_v21  ;;  %2425 = vmatpush1.msra.mxu1 %v8358_v26  ;;  %11109 = vst [vmem:[#allocation30_spill] sm:$0xff] %v8386_v23  ;;  %v8393_v26 = vld [vmem:[%s10671_s1 + $0x18] sm:$0xff] }
 0x6d6   : > { %2355 = vmatprep.subr.mxu0 %v8126_v25  ;;  %2426 = vmatprep.subr.mxu1 %v8365_v58  ;;  %11110 = vst [vmem:[#allocation18_spill] sm:$0xff] %v8393_v26  ;;  %v8400_v58 = vld [vmem:[%s10671_s1 + $0x10] sm:$0xff] }
 0x6d7   : > { %2356 = vmatpush1.msra.mxu0 %v8132_v28  ;;  %2427 = vmatpush1.msra.mxu1 %v8372_v51  ;;  %11111 = vst [vmem:[#allocation23_spill] sm:$0xff] %v8400_v58  ;;  %v6325_v28 = vld [vmem:[%s6758_s27 + $0x78] sm:$0xff] }
 0x6d8   : > { %2357 = vmatprep.subr.mxu0 %v8138_v32  ;;  %2428 = vmatprep.subr.mxu1 %v8379_v20  ;;  %v6324_v20 = vld [vmem:[%s6758_s27 + $0x70] sm:$0xff]  ;;  %v2017_v25 = vunpack.c.l.bf16 %v6325_v28 }
 0x6d9   : > { %2358 = vmatpush1.msra.mxu0 %v8144_v36  ;;  %2429 = vmatpush1.msra.mxu1 %v8386_v23  ;;  %v2015_v32 = vunpack.c.l.bf16 %v6324_v20  ;;  %v2016_v51 = vunpack.c.h.bf16 %v6324_v20 }
 0x6da   : > { %2359 = vmatprep.subr.mxu0 %v8150_v40  ;;  %2430 = vmatprep.subr.mxu1 %v8393_v26 }
 0x6db   : > { %2360 = vmatpush1.msra.mxu0 %v8156_v44  ;;  %2431 = vmatpush1.msra.mxu1 %v8400_v58  ;;  %v2019_v36 = vadd.f32 %v2015_v32, %v11087_v3  ;;  %v2020_v23 = vadd.f32 %v2016_v51, %v11088_v8  ;;  %v2021_v44 = vadd.f32 %v2017_v25, %v11013_v57 }
 0x6dc   : > { %2571 = vmatprep.subr.mxu0 %v8177_v27  ;;  %2642 = vmatprep.subr.mxu1 %v8182_v30  ;;  %v2018_v30 = vunpack.c.h.bf16 %v6325_v28 }
 0x6de   : > { %v2022_v20 = vadd.f32 %v2018_v30, %v10987_v16 }
 0x77b   : > { %v2153_v40 = vpop.f32.mrf.mxu0  ;;  %v2224_v53 = vpop.f32.mrf.mxu1 }
 0x77c   : > { %v2229_v21 = vadd.f32 %v2153_v40, %v2019_v36  ;;  %v2231_v60 = vadd.f32 %v2224_v53, %v2021_v44 }
 0x77d   : > { %v2155_v26 = vpop.f32.mrf.mxu0  ;;  %v2226_v0 = vpop.f32.mrf.mxu1 }
 0x77e   : > { %v2233_v13 = vmul.f32 0.5, %v2229_v21  ;;  %v2230_v58 = vadd.f32 %v2155_v26, %v2020_v23  ;;  %v2232_v32 = vadd.f32 %v2226_v0, %v2022_v20  ;;  %v11115_v26 = vld [vmem:[#allocation10_spill] sm:$0xff]  ;;  %v11116_v20 = vld [vmem:[#allocation29_spill] sm:$0xff] }
 0x780   : > { %6507 = vtanh.f32 %v2233_v13  ;;  %v2237_v27 = vmul.f32 0.5, %v2230_v58  ;;  %v2242_v3 = vmul.f32 0.5, %v2232_v32  ;;  %v11117_v32 = vld [vmem:[#allocation25_spill] sm:$0xff] }
 0x782   : > { %6509 = vtanh.f32 %v2237_v27 }
 0x783   : > { %6511 = vtanh.f32 %v2231_v60 }
 0x784   : > { %6513 = vtanh.f32 %v2242_v3  ;;  %v11112_v3 = vld [vmem:[#allocation26_spill] sm:$0xff] }
 0x78d   : > { %v6508_v51 = vpop.eup %6507 }
 0x78e   : > { %v2235_v8 = vmul.f32 0.5, %v6508_v51  ;;  %v11118_v51 = vld [vmem:[#allocation19_spill] sm:$0xff] }
 0x78f   : > { %v6510_v36 = vpop.eup %6509 }
 0x790   : > { %v2236_v40 = vadd.f32 0.5, %v2235_v8  ;;  %v2239_v21 = vmul.f32 0.5, %v6510_v36  ;;  %v6512_v23 = vpop.eup %6511  ;;  %v11113_v8 = vld [vmem:[#allocation20_spill] sm:$0xff]  ;;  %v11119_v36 = vld [vmem:[#allocation13_spill] sm:$0xff] }
 0x791   : > { %v6514_v28 = vpop.eup %6513 }
 0x792   : > { %v2240_v25 = vadd.f32 0.5, %v2239_v21  ;;  %v2246_v13 = vmul.f32 %v6512_v23, %v2236_v40  ;;  %v2244_v60 = vmul.f32 0.5, %v6514_v28  ;;  %v11120_v40 = vld [vmem:[#allocation8_spill] sm:$0xff]  ;;  %v11121_v21 = vld [vmem:[#allocation22_spill] sm:$0xff]  ;;  %v11123_v23 = vld [vmem:[#allocation11_spill] sm:$0xff] }
 0x793   : > { %v11126_v28 = vld [vmem:[#allocation21_spill] sm:$0xff] }
 0x794   : > { %v2247_v58 = vmul.f32 %v2240_v25, %v8168_v35  ;;  %v2245_v44 = vadd.f32 0.5, %v2244_v60  ;;  %v11114_v35 = vld [vmem:[#allocation14_spill] sm:$0xff]  ;;  %v11122_v25 = vld [vmem:[#allocation16_spill] sm:$0xff]  ;;  %v11127_v60 = vld [vmem:[#allocation15_spill] sm:$0xff] }
 0x796   : > { %v8417_v53 = vadd.f32 %v2247_v58, %v2246_v13  ;;  %v11124_v13 = vld [vmem:[#allocation9_spill] sm:$0xff]  ;;  %v11125_v58 = vld [vmem:[#allocation27_spill] sm:$0xff] }
 0x798   : > { %6515 = vtanh.f32 %v8417_v53 }
 0x7a5   : > { %v6516_v27 = vpop.eup %6515 }
 0x7a6   : > { %v2250_v30 = vmul.f32 %v6516_v27, %v2245_v44  ;;  %v11128_v44 = vld [vmem:[#allocation30_spill] sm:$0xff]  ;;  %v11129_v27 = vld [vmem:[#allocation24_spill] sm:$0xff] }
 0x7a8   : > { %v2251_v0 = vpack.c.bf16 %v2250_v30, %v2250_v30  ;;  %2394 = vmatmul.mubr.f32.vlgmr.msra.gmra.mxu0 %v2250_v30  ;;  %2465 = vmatmul.mubr.f32.vlgmr.msra.gmra.mxu1 %v2250_v30  ;;  %v11130_v30 = vld [vmem:[#allocation18_spill] sm:$0xff] }
 0x7a9   : > { %2572 = vmatpush1.msra.mxu0 %v8189_v34  ;;  %2643 = vmatpush1.msra.mxu1 %v8194_v38 }
 0x7aa   : > { %6326 = vst [vmem:[%s6763_s30 + $0x1c] sm:$0xf] %v2251_v0  ;;  %2573 = vmatprep.subr.mxu0 %v7984_v29  ;;  %2644 = vmatprep.subr.mxu1 %v8201_v42  ;;  %v11131_v0 = vld [vmem:[#allocation12_spill] sm:$0xff] }
 0x7ab   : > { %2574 = vmatpush1.msra.mxu0 %v7990_v33  ;;  %2645 = vmatpush1.msra.mxu1 %v8208_v46 }
 0x7ac   : > { %2575 = vmatprep.subr.mxu0 %v7996_v37  ;;  %2646 = vmatprep.subr.mxu1 %v8215_v50 }
 0x7ad   : > { %2576 = vmatpush1.msra.mxu0 %v8002_v41  ;;  %2647 = vmatpush1.msra.mxu1 %v8222_v54 }
 0x7ae   : > { %2577 = vmatprep.subr.mxu0 %v8008_v45  ;;  %2648 = vmatprep.subr.mxu1 %v8229_v39 }
 0x7af   : > { %2578 = vmatpush1.msra.mxu0 %v8014_v49  ;;  %2649 = vmatpush1.msra.mxu1 %v8236_v24 }
 0x7b0   : > { %2579 = vmatprep.subr.mxu0 %v8020_v55  ;;  %2650 = vmatprep.subr.mxu1 %v8243_v22 }
 0x7b1   : > { %2580 = vmatpush1.msra.mxu0 %v8026_v61  ;;  %2651 = vmatpush1.msra.mxu1 %v8250_v56 }
 0x7b2   : > { %2581 = vmatprep.subr.mxu0 %v8032_v6  ;;  %2652 = vmatprep.subr.mxu1 %v8257_v14 }
 0x7b3   : > { %2582 = vmatpush1.msra.mxu0 %v8038_v9  ;;  %2653 = vmatpush1.msra.mxu1 %v8264_v7 }
 0x7b4   : > { %2583 = vmatprep.subr.mxu0 %v8044_v5  ;;  %2654 = vmatprep.subr.mxu1 %v8271_v31 }
 0x7b5   : > { %2584 = vmatpush1.msra.mxu0 %v8050_v10  ;;  %2655 = vmatpush1.msra.mxu1 %v8278_v19 }
 0x7b6   : > { %2585 = vmatprep.subr.mxu0 %v8056_v1  ;;  %2656 = vmatprep.subr.mxu1 %v8285_v4 }
 0x7b7   : > { %2586 = vmatpush1.msra.mxu0 %v8062_v63  ;;  %2657 = vmatpush1.msra.mxu1 %v8292_v17 }
 0x7b8   : > { %2587 = vmatprep.subr.mxu0 %v8068_v62  ;;  %2658 = vmatprep.subr.mxu1 %v8299_v2 }
 0x7b9   : > { %2588 = vmatpush1.msra.mxu0 %v8073_v59  ;;  %2659 = vmatpush1.msra.mxu1 %v8304_v11 }
 0x7ba   : > { %2589 = vmatprep.subr.mxu0 %v8078_v12  ;;  %2660 = vmatprep.subr.mxu1 %v8309_v48 }
 0x7bb   : > { %2590 = vmatpush1.msra.mxu0 %v8084_v18  ;;  %2661 = vmatpush1.msra.mxu1 %v8316_v52 }
 0x7bc   : > { %2591 = vmatprep.subr.mxu0 %v8090_v43  ;;  %2662 = vmatprep.subr.mxu1 %v8323_v15 }
 0x7bd   : > { %2592 = vmatpush1.msra.mxu0 %v8096_v47  ;;  %2663 = vmatpush1.msra.mxu1 %v11112_v3 }
 0x7be   : > { %2593 = vmatprep.subr.mxu0 %v11113_v8  ;;  %2664 = vmatprep.subr.mxu1 %v11114_v35 }
 0x7bf   : > { %2594 = vmatpush1.msra.mxu0 %v11115_v26  ;;  %2665 = vmatpush1.msra.mxu1 %v11116_v20 }
 0x7c0   : > { %2595 = vmatprep.subr.mxu0 %v11117_v32  ;;  %2666 = vmatprep.subr.mxu1 %v11118_v51 }
 0x7c1   : > { %2596 = vmatpush1.msra.mxu0 %v11119_v36  ;;  %2667 = vmatpush1.msra.mxu1 %v11120_v40  ;;  %v11136_v40 = vld [vmem:[#allocation4_spill] sm:$0xff] }
 0x7c2   : > { %2597 = vmatprep.subr.mxu0 %v11121_v21  ;;  %2668 = vmatprep.subr.mxu1 %v11122_v25  ;;  %v11132_v25 = vmov 0.0  }
 0x7c3   : > { %2598 = vmatpush1.msra.mxu0 %v11123_v23  ;;  %2669 = vmatpush1.msra.mxu1 %v11124_v13  ;;  %v11133_v23 = vld [vmem:[#allocation23_spill] sm:$0xff]  ;;  %v11134_v13 = vld [vmem:[#allocation28_spill] sm:$0xff] }
 0x7c4   : > { %2599 = vmatprep.subr.mxu0 %v11125_v58  ;;  %2670 = vmatprep.subr.mxu1 %v11126_v28  ;;  %v11135_v58 = vld [vmem:[#allocation17_spill] sm:$0xff]  ;;  %v6327_v28 = vld [vmem:[%s6758_s27 + $0x80] sm:$0xff] }
 0x7c5   : > { %2600 = vmatpush1.msra.mxu0 %v11127_v60  ;;  %2671 = vmatpush1.msra.mxu1 %v11128_v44  ;;  %v2257_v60 = vunpack.c.l.bf16 %v6327_v28  ;;  %v2258_v21 = vunpack.c.h.bf16 %v6327_v28  ;;  %v6328_v44 = vld [vmem:[%s6758_s27 + $0x88] sm:$0xff] }
 0x7c6   : > { %2601 = vmatprep.subr.mxu0 %v11129_v27  ;;  %2672 = vmatprep.subr.mxu1 %v11130_v30  ;;  %v2259_v36 = vunpack.c.l.bf16 %v6328_v44  ;;  %v11137_v30 = vld [vmem:[#allocation5_spill] sm:$0xff] }
 0x7c7   : > { %2602 = vmatpush1.msra.mxu0 %v11131_v0  ;;  %2635 = vmatprep.mubr.f32.mxu0 %v11132_v25  ;;  %v2261_v27 = vadd.f32 %v2257_v60, %v11136_v40  ;;  %v2262_v51 = vadd.f32 %v2258_v21, %v11137_v30 }
 0x7c8   : > { %2673 = vmatpush1.msra.mxu1 %v11133_v23  ;;  %2706 = vmatprep.mubr.f32.mxu1 %v11132_v25  ;;  %v2263_v23 = vadd.f32 %v2259_v36, %v11013_v57 }
 0x7c9   : > { %2813 = vmatprep.subr.mxu0 %v11134_v13  ;;  %2884 = vmatprep.subr.mxu1 %v11135_v58  ;;  %v2260_v58 = vunpack.c.h.bf16 %v6328_v44  ;;  %v11160_v44 = vld [vmem:[#allocation28_spill] sm:$0xff] }
 0x7cb   : > { %v2264_v28 = vadd.f32 %v2260_v58, %v10987_v16 }
 0x868   : > { %v2395_v0 = vpop.f32.mrf.mxu0  ;;  %v2466_v35 = vpop.f32.mrf.mxu1 }
 0x869   : > { %v2471_v32 = vadd.f32 %v2395_v0, %v2261_v27  ;;  %v2473_v8 = vadd.f32 %v2466_v35, %v2263_v23 }
 0x86a   : > { %v2397_v20 = vpop.f32.mrf.mxu0  ;;  %v2468_v3 = vpop.f32.mrf.mxu1 }
 0x86b   : > { %v2475_v26 = vmul.f32 0.5, %v2471_v32  ;;  %v2472_v25 = vadd.f32 %v2397_v20, %v2262_v51  ;;  %v2474_v60 = vadd.f32 %v2468_v3, %v2264_v28  ;;  %v6330_v28 = vld [vmem:[%s6758_s27 + $0x90] sm:$0xff] }
 0x86d   : > { %6517 = vtanh.f32 %v2475_v26  ;;  %v2479_v13 = vmul.f32 0.5, %v2472_v25  ;;  %v2484_v40 = vmul.f32 0.5, %v2474_v60  ;;  %v2499_v60 = vunpack.c.l.bf16 %v6330_v28 }
 0x86f   : > { %6519 = vtanh.f32 %v2479_v13 }
 0x870   : > { %6521 = vtanh.f32 %v2473_v8 }
 0x871   : > { %6523 = vtanh.f32 %v2484_v40  ;;  %v11159_v40 = vld [vmem:[#allocation23_spill] sm:$0xff] }
 0x87a   : > { %v6518_v21 = vpop.eup %6517 }
 0x87b   : > { %v2477_v30 = vmul.f32 0.5, %v6518_v21  ;;  %v2500_v21 = vunpack.c.h.bf16 %v6330_v28 }
 0x87c   : > { %v6520_v27 = vpop.eup %6519 }
 0x87d   : > { %v2478_v0 = vadd.f32 0.5, %v2477_v30  ;;  %v2481_v32 = vmul.f32 0.5, %v6520_v27  ;;  %v6522_v20 = vpop.eup %6521  ;;  %v11161_v30 = vld [vmem:[#allocation17_spill] sm:$0xff] }
 0x87e   : > { %v6524_v25 = vpop.eup %6523  ;;  %v6331_v27 = vld [vmem:[%s6758_s27 + $0x98] sm:$0xff] }
 0x87f   : > { %v2482_v36 = vadd.f32 0.5, %v2481_v32  ;;  %v2488_v26 = vmul.f32 %v6522_v20, %v2478_v0  ;;  %v2486_v8 = vmul.f32 0.5, %v6524_v25  ;;  %v11162_v0 = vld [vmem:[#allocation4_spill] sm:$0xff]  ;;  %v11163_v20 = vld [vmem:[#allocation5_spill] sm:$0xff] }
 0x880   : > { %v2503_v32 = vadd.f32 %v2499_v60, %v11162_v0 }
 0x881   : > { %v2489_v51 = vmul.f32 %v2482_v36, %v8417_v53  ;;  %v2487_v3 = vadd.f32 0.5, %v2486_v8  ;;  %v11158_v53 = vmov 0.0   ;;  %v2501_v36 = vunpack.c.l.bf16 %v6331_v27 }
 0x883   : > { %v8494_v35 = vadd.f32 %v2489_v51, %v2488_v26  ;;  %v2504_v26 = vadd.f32 %v2500_v21, %v11163_v20 }
 0x885   : > { %6525 = vtanh.f32 %v8494_v35 }
 0x892   : > { %v6526_v23 = vpop.eup %6525 }
 0x893   : > { %v2492_v13 = vmul.f32 %v6526_v23, %v2487_v3  ;;  %v2505_v23 = vadd.f32 %v2501_v36, %v11013_v57 }
 0x895   : > { %v2493_v58 = vpack.c.bf16 %v2492_v13, %v2492_v13  ;;  %2636 = vmatmul.mubr.f32.vlgmr.msra.gmra.mxu0 %v2492_v13  ;;  %2707 = vmatmul.mubr.f32.vlgmr.msra.gmra.mxu1 %v2492_v13 }
 0x896   : > { %2814 = vmatpush1.msra.mxu0 %v8189_v34  ;;  %2885 = vmatpush1.msra.mxu1 %v8194_v38 }
 0x897   : > { %6329 = vst [vmem:[%s6763_s30 + $0x20] sm:$0xf] %v2493_v58  ;;  %2815 = vmatprep.subr.mxu0 %v7984_v29  ;;  %2886 = vmatprep.subr.mxu1 %v8201_v42  ;;  %v11138_v29 = vld [vmem:[#allocation26_spill] sm:$0xff] }
 0x898   : > { %2816 = vmatpush1.msra.mxu0 %v7990_v33  ;;  %2887 = vmatpush1.msra.mxu1 %v8208_v46  ;;  %v11139_v33 = vld [vmem:[#allocation20_spill] sm:$0xff] }
 0x899   : > { %2817 = vmatprep.subr.mxu0 %v7996_v37  ;;  %2888 = vmatprep.subr.mxu1 %v8215_v50  ;;  %v11140_v37 = vld [vmem:[#allocation14_spill] sm:$0xff] }
 0x89a   : > { %2818 = vmatpush1.msra.mxu0 %v8002_v41  ;;  %2889 = vmatpush1.msra.mxu1 %v8222_v54  ;;  %v11141_v41 = vld [vmem:[#allocation10_spill] sm:$0xff] }
 0x89b   : > { %2819 = vmatprep.subr.mxu0 %v8008_v45  ;;  %2890 = vmatprep.subr.mxu1 %v8229_v39  ;;  %v11142_v45 = vld [vmem:[#allocation29_spill] sm:$0xff] }
 0x89c   : > { %2820 = vmatpush1.msra.mxu0 %v8014_v49  ;;  %2891 = vmatpush1.msra.mxu1 %v8236_v24  ;;  %v11143_v49 = vld [vmem:[#allocation25_spill] sm:$0xff] }
 0x89d   : > { %2821 = vmatprep.subr.mxu0 %v8020_v55  ;;  %2892 = vmatprep.subr.mxu1 %v8243_v22  ;;  %v11144_v55 = vld [vmem:[#allocation19_spill] sm:$0xff] }
 0x89e   : > { %2822 = vmatpush1.msra.mxu0 %v8026_v61  ;;  %2893 = vmatpush1.msra.mxu1 %v8250_v56  ;;  %v11145_v61 = vld [vmem:[#allocation13_spill] sm:$0xff] }
 0x89f   : > { %2823 = vmatprep.subr.mxu0 %v8032_v6  ;;  %2894 = vmatprep.subr.mxu1 %v8257_v14  ;;  %v11146_v6 = vld [vmem:[#allocation8_spill] sm:$0xff] }
 0x8a0   : > { %2824 = vmatpush1.msra.mxu0 %v8038_v9  ;;  %2895 = vmatpush1.msra.mxu1 %v8264_v7  ;;  %v11147_v9 = vld [vmem:[#allocation22_spill] sm:$0xff] }
 0x8a1   : > { %2825 = vmatprep.subr.mxu0 %v8044_v5  ;;  %2896 = vmatprep.subr.mxu1 %v8271_v31  ;;  %v11148_v5 = vld [vmem:[#allocation16_spill] sm:$0xff] }
 0x8a2   : > { %2826 = vmatpush1.msra.mxu0 %v8050_v10  ;;  %2897 = vmatpush1.msra.mxu1 %v8278_v19  ;;  %v11149_v10 = vld [vmem:[#allocation11_spill] sm:$0xff] }
 0x8a3   : > { %2827 = vmatprep.subr.mxu0 %v8056_v1  ;;  %2898 = vmatprep.subr.mxu1 %v8285_v4  ;;  %v11150_v1 = vld [vmem:[#allocation9_spill] sm:$0xff] }
 0x8a4   : > { %2828 = vmatpush1.msra.mxu0 %v8062_v63  ;;  %2899 = vmatpush1.msra.mxu1 %v8292_v17  ;;  %v11151_v63 = vld [vmem:[#allocation27_spill] sm:$0xff] }
 0x8a5   : > { %2829 = vmatprep.subr.mxu0 %v8068_v62  ;;  %2900 = vmatprep.subr.mxu1 %v8299_v2  ;;  %v11152_v62 = vld [vmem:[#allocation21_spill] sm:$0xff] }
 0x8a6   : > { %2830 = vmatpush1.msra.mxu0 %v8073_v59  ;;  %2901 = vmatpush1.msra.mxu1 %v8304_v11  ;;  %v11153_v59 = vld [vmem:[#allocation15_spill] sm:$0xff] }
 0x8a7   : > { %2831 = vmatprep.subr.mxu0 %v8078_v12  ;;  %2902 = vmatprep.subr.mxu1 %v8309_v48  ;;  %v11154_v12 = vld [vmem:[#allocation30_spill] sm:$0xff] }
 0x8a8   : > { %2832 = vmatpush1.msra.mxu0 %v8084_v18  ;;  %2903 = vmatpush1.msra.mxu1 %v8316_v52  ;;  %v11155_v18 = vld [vmem:[#allocation24_spill] sm:$0xff] }
 0x8a9   : > { %2833 = vmatprep.subr.mxu0 %v8090_v43  ;;  %2904 = vmatprep.subr.mxu1 %v8323_v15  ;;  %v11156_v43 = vld [vmem:[#allocation18_spill] sm:$0xff] }
 0x8aa   : > { %2834 = vmatpush1.msra.mxu0 %v8096_v47  ;;  %2905 = vmatpush1.msra.mxu1 %v11138_v29  ;;  %v11157_v47 = vld [vmem:[#allocation12_spill] sm:$0xff] }
 0x8ab   : > { %2835 = vmatprep.subr.mxu0 %v11139_v33  ;;  %2906 = vmatprep.subr.mxu1 %v11140_v37 }
 0x8ac   : > { %2836 = vmatpush1.msra.mxu0 %v11141_v41  ;;  %2907 = vmatpush1.msra.mxu1 %v11142_v45  ;;  %v2502_v41 = vunpack.c.h.bf16 %v6331_v27 }
 0x8ad   : > { %2837 = vmatprep.subr.mxu0 %v11143_v49  ;;  %2908 = vmatprep.subr.mxu1 %v11144_v55 }
 0x8ae   : > { %2838 = vmatpush1.msra.mxu0 %v11145_v61  ;;  %2909 = vmatpush1.msra.mxu1 %v11146_v6  ;;  %v2506_v61 = vadd.f32 %v2502_v41, %v10987_v16 }
 0x8af   : > { %2839 = vmatprep.subr.mxu0 %v11147_v9  ;;  %2910 = vmatprep.subr.mxu1 %v11148_v5 }
 0x8b0   : > { %2840 = vmatpush1.msra.mxu0 %v11149_v10  ;;  %2911 = vmatpush1.msra.mxu1 %v11150_v1 }
 0x8b1   : > { %2841 = vmatprep.subr.mxu0 %v11151_v63  ;;  %2912 = vmatprep.subr.mxu1 %v11152_v62 }
 0x8b2   : > { %2842 = vmatpush1.msra.mxu0 %v11153_v59  ;;  %2913 = vmatpush1.msra.mxu1 %v11154_v12 }
 0x8b3   : > { %2843 = vmatprep.subr.mxu0 %v11155_v18  ;;  %2914 = vmatprep.subr.mxu1 %v11156_v43 }
 0x8b4   : > { %2844 = vmatpush1.msra.mxu0 %v11157_v47  ;;  %2877 = vmatprep.mubr.f32.mxu0 %v11158_v53 }
 0x8b5   : > { %2915 = vmatpush1.msra.mxu1 %v11159_v40  ;;  %2948 = vmatprep.mubr.f32.mxu1 %v11158_v53 }
 0x8b6   : > { %3055 = vmatprep.subr.mxu0 %v11160_v44  ;;  %3126 = vmatprep.subr.mxu1 %v11161_v30 }
 0x955   : > { %v2637_v51 = vpop.f32.mrf.mxu0  ;;  %v2708_v58 = vpop.f32.mrf.mxu1 }
 0x956   : > { %v2713_v25 = vadd.f32 %v2637_v51, %v2503_v32  ;;  %v2715_v49 = vadd.f32 %v2708_v58, %v2505_v23  ;;  %v6334_v23 = vld [vmem:[%s6758_s27 + $0xa8] sm:$0xff] }
 0x957   : > { %v2639_v8 = vpop.f32.mrf.mxu0  ;;  %v2710_v9 = vpop.f32.mrf.mxu1  ;;  %v2743_v58 = vunpack.c.l.bf16 %v6334_v23 }
 0x958   : > { %v2717_v3 = vmul.f32 0.5, %v2713_v25  ;;  %v2714_v13 = vadd.f32 %v2639_v8, %v2504_v26  ;;  %v2716_v10 = vadd.f32 %v2710_v9, %v2506_v61 }
 0x95a   : > { %6527 = vtanh.f32 %v2717_v3  ;;  %v2721_v33 = vmul.f32 0.5, %v2714_v13  ;;  %v2726_v63 = vmul.f32 0.5, %v2716_v10  ;;  %v2747_v10 = vadd.f32 %v2743_v58, %v11013_v57 }
 0x95c   : > { %6529 = vtanh.f32 %v2721_v33 }
 0x95d   : > { %6531 = vtanh.f32 %v2715_v49 }
 0x95e   : > { %6533 = vtanh.f32 %v2726_v63 }
 0x967   : > { %v6528_v59 = vpop.eup %6527 }
 0x968   : > { %v2719_v18 = vmul.f32 0.5, %v6528_v59 }
 0x969   : > { %v6530_v47 = vpop.eup %6529 }
 0x96a   : > { %v2720_v44 = vadd.f32 0.5, %v2719_v18  ;;  %v2723_v30 = vmul.f32 0.5, %v6530_v47  ;;  %v6532_v60 = vpop.eup %6531  ;;  %v2744_v47 = vunpack.c.h.bf16 %v6334_v23 }
 0x96b   : > { %v6534_v36 = vpop.eup %6533 }
 0x96c   : > { %v2724_v28 = vadd.f32 0.5, %v2723_v30  ;;  %v2730_v21 = vmul.f32 %v6532_v60, %v2720_v44  ;;  %v2728_v26 = vmul.f32 0.5, %v6534_v36  ;;  %v2748_v30 = vadd.f32 %v2744_v47, %v10987_v16  ;;  %v8850_v47 = vld [vmem:[%s10671_s1 + $0x1b0] sm:$0xff] }
 0x96e   : > { %v2731_v27 = vmul.f32 %v2724_v28, %v8494_v35  ;;  %v2729_v51 = vadd.f32 0.5, %v2728_v26  ;;  %v8736_v35 = vld [vmem:[%s10671_s1 + $0x80] sm:$0xff] }
 0x96f   : > { %11165 = vst [vmem:[#allocation20_spill] sm:$0xff] %v8736_v35 }
 0x970   : > { %v8571_v32 = vadd.f32 %v2731_v27, %v2730_v21 }
 0x972   : > { %6535 = vtanh.f32 %v8571_v32 }
 0x97f   : > { %v6536_v25 = vpop.eup %6535 }
 0x980   : > { %v2734_v8 = vmul.f32 %v6536_v25, %v2729_v51 }
 0x982   : > { %v2735_v3 = vpack.c.bf16 %v2734_v8, %v2734_v8  ;;  %2878 = vmatmul.mubr.f32.vlgmr.msra.gmra.mxu0 %v2734_v8  ;;  %2949 = vmatmul.mubr.f32.vlgmr.msra.gmra.mxu1 %v2734_v8 }
 0x983   : > { %3056 = vmatpush1.msra.mxu0 %v8189_v34  ;;  %3127 = vmatpush1.msra.mxu1 %v8194_v38  ;;  %v8612_v34 = vld [vmem:[%s10671_s1 + $0x1c8] sm:$0xff]  ;;  %v8618_v38 = vld [vmem:[%s10671_s1 + $0x1c0] sm:$0xff] }
 0x984   : > { %6332 = vst [vmem:[%s6763_s30 + $0x24] sm:$0xf] %v2735_v3  ;;  %3128 = vmatprep.subr.mxu1 %v8201_v42  ;;  %3119 = vmatprep.mubr.f32.mxu0 %v11158_v53  ;;  %v8624_v42 = vld [vmem:[%s10671_s1 + $0x1a8] sm:$0xff] }
 0x985   : > { %3129 = vmatpush1.msra.mxu1 %v8208_v46  ;;  %3190 = vmatprep.mubr.f32.mxu1 %v11158_v53  ;;  %v8630_v46 = vld [vmem:[%s10671_s1 + $0x1a0] sm:$0xff] }
 0x986   : > { %3130 = vmatprep.subr.mxu1 %v8215_v50  ;;  %3057 = vmatprep.subr.mxu0 %v8612_v34  ;;  %v8636_v50 = vld [vmem:[%s10671_s1 + $0x188] sm:$0xff] }
 0x987   : > { %3131 = vmatpush1.msra.mxu1 %v8222_v54  ;;  %3058 = vmatpush1.msra.mxu0 %v8618_v38  ;;  %v8642_v54 = vld [vmem:[%s10671_s1 + $0x180] sm:$0xff] }
 0x988   : > { %3132 = vmatprep.subr.mxu1 %v8229_v39  ;;  %3059 = vmatprep.subr.mxu0 %v8624_v42  ;;  %v8648_v39 = vld [vmem:[%s10671_s1 + $0x168] sm:$0xff] }
 0x989   : > { %3133 = vmatpush1.msra.mxu1 %v8236_v24  ;;  %3060 = vmatpush1.msra.mxu0 %v8630_v46  ;;  %v8654_v24 = vld [vmem:[%s10671_s1 + $0x160] sm:$0xff] }
 0x98a   : > { %3134 = vmatprep.subr.mxu1 %v8243_v22  ;;  %3061 = vmatprep.subr.mxu0 %v8636_v50  ;;  %v8660_v22 = vld [vmem:[%s10671_s1 + $0x148] sm:$0xff] }
 0x98b   : > { %3135 = vmatpush1.msra.mxu1 %v8250_v56  ;;  %3062 = vmatpush1.msra.mxu0 %v8642_v54  ;;  %v8666_v56 = vld [vmem:[%s10671_s1 + $0x140] sm:$0xff] }
 0x98c   : > { %3136 = vmatprep.subr.mxu1 %v8257_v14  ;;  %3063 = vmatprep.subr.mxu0 %v8648_v39  ;;  %v8672_v14 = vld [vmem:[%s10671_s1 + $0x128] sm:$0xff] }
 0x98d   : > { %3137 = vmatpush1.msra.mxu1 %v8264_v7  ;;  %3064 = vmatpush1.msra.mxu0 %v8654_v24  ;;  %v8678_v7 = vld [vmem:[%s10671_s1 + $0x120] sm:$0xff] }
 0x98e   : > { %3138 = vmatprep.subr.mxu1 %v8271_v31  ;;  %3065 = vmatprep.subr.mxu0 %v8660_v22  ;;  %v8684_v31 = vld [vmem:[%s10671_s1 + $0x108] sm:$0xff] }
 0x98f   : > { %3139 = vmatpush1.msra.mxu1 %v8278_v19  ;;  %3066 = vmatpush1.msra.mxu0 %v8666_v56  ;;  %v8690_v19 = vld [vmem:[%s10671_s1 + $0x100] sm:$0xff] }
 0x990   : > { %3140 = vmatprep.subr.mxu1 %v8285_v4  ;;  %3067 = vmatprep.subr.mxu0 %v8672_v14  ;;  %v8696_v4 = vld [vmem:[%s10671_s1 + $0xe8] sm:$0xff] }
 0x991   : > { %3141 = vmatpush1.msra.mxu1 %v8292_v17  ;;  %3068 = vmatpush1.msra.mxu0 %v8678_v7  ;;  %v8701_v17 = vld [vmem:[%s10671_s1 + $0xe0] sm:$0xff] }
 0x992   : > { %3142 = vmatprep.subr.mxu1 %v8299_v2  ;;  %3069 = vmatprep.subr.mxu0 %v8684_v31  ;;  %v8706_v2 = vld [vmem:[%s10671_s1 + $0xc8] sm:$0xff] }
 0x993   : > { %3143 = vmatpush1.msra.mxu1 %v8304_v11  ;;  %3070 = vmatpush1.msra.mxu0 %v8690_v19  ;;  %v8712_v11 = vld [vmem:[%s10671_s1 + $0xc0] sm:$0xff] }
 0x994   : > { %3144 = vmatprep.subr.mxu1 %v8309_v48  ;;  %3071 = vmatprep.subr.mxu0 %v8696_v4  ;;  %v8718_v48 = vld [vmem:[%s10671_s1 + $0xa8] sm:$0xff] }
 0x995   : > { %3145 = vmatpush1.msra.mxu1 %v8316_v52  ;;  %3072 = vmatpush1.msra.mxu0 %v8701_v17  ;;  %v8724_v52 = vld [vmem:[%s10671_s1 + $0xa0] sm:$0xff] }
 0x996   : > { %3146 = vmatprep.subr.mxu1 %v8323_v15  ;;  %3073 = vmatprep.subr.mxu0 %v8706_v2  ;;  %v8730_v15 = vld [vmem:[%s10671_s1 + $0x88] sm:$0xff] }
 0x997   : > { %3147 = vmatpush1.msra.mxu1 %v11138_v29  ;;  %3074 = vmatpush1.msra.mxu0 %v8712_v11  ;;  %11164 = vst [vmem:[#allocation26_spill] sm:$0xff] %v8730_v15  ;;  %v8742_v29 = vld [vmem:[%s10671_s1 + $0x68] sm:$0xff] }
 0x998   : > { %3148 = vmatprep.subr.mxu1 %v11140_v37  ;;  %3075 = vmatprep.subr.mxu0 %v8718_v48  ;;  %11166 = vst [vmem:[#allocation14_spill] sm:$0xff] %v8742_v29  ;;  %v8748_v37 = vld [vmem:[%s10671_s1 + $0x60] sm:$0xff] }
 0x999   : > { %3149 = vmatpush1.msra.mxu1 %v11142_v45  ;;  %3076 = vmatpush1.msra.mxu0 %v8724_v52  ;;  %11167 = vst [vmem:[#allocation10_spill] sm:$0xff] %v8748_v37  ;;  %v8754_v45 = vld [vmem:[%s10671_s1 + $0x48] sm:$0xff] }
 0x99a   : > { %3150 = vmatprep.subr.mxu1 %v11144_v55  ;;  %3077 = vmatprep.subr.mxu0 %v8730_v15  ;;  %11168 = vst [vmem:[#allocation29_spill] sm:$0xff] %v8754_v45  ;;  %v8760_v55 = vld [vmem:[%s10671_s1 + $0x40] sm:$0xff] }
 0x99b   : > { %3151 = vmatpush1.msra.mxu1 %v11146_v6  ;;  %3078 = vmatpush1.msra.mxu0 %v8736_v35  ;;  %11169 = vst [vmem:[#allocation25_spill] sm:$0xff] %v8760_v55  ;;  %v8766_v6 = vld [vmem:[%s10671_s1 + $0x28] sm:$0xff] }
 0x99c   : > { %3152 = vmatprep.subr.mxu1 %v11148_v5  ;;  %3079 = vmatprep.subr.mxu0 %v8742_v29  ;;  %11170 = vst [vmem:[#allocation19_spill] sm:$0xff] %v8766_v6  ;;  %v8772_v5 = vld [vmem:[%s10671_s1 + $0x20] sm:$0xff] }
 0x99d   : > { %3153 = vmatpush1.msra.mxu1 %v11150_v1  ;;  %3080 = vmatpush1.msra.mxu0 %v8748_v37  ;;  %11171 = vst [vmem:[#allocation13_spill] sm:$0xff] %v8772_v5  ;;  %v8778_v1 = vld [vmem:[%s10671_s1 + $0x8] sm:$0xff] }
 0x99e   : > { %3154 = vmatprep.subr.mxu1 %v11152_v62  ;;  %3081 = vmatprep.subr.mxu0 %v8754_v45  ;;  %11172 = vst [vmem:[#allocation8_spill] sm:$0xff] %v8778_v1  ;;  %v8784_v62 = vld [vmem:[%s10671_s1] sm:$0xff] }
 0x99f   : > { %3155 = vmatpush1.msra.mxu1 %v11154_v12  ;;  %3082 = vmatpush1.msra.mxu0 %v8760_v55  ;;  %11173 = vst [vmem:[#allocation22_spill] sm:$0xff] %v8784_v62  ;;  %v6333_v12 = vld [vmem:[%s6758_s27 + $0xa0] sm:$0xff] }
 0x9a0   : > { %3156 = vmatprep.subr.mxu1 %v11156_v43  ;;  %3083 = vmatprep.subr.mxu0 %v8766_v6  ;;  %v2741_v43 = vunpack.c.l.bf16 %v6333_v12 }
 0x9a1   : > { %3157 = vmatpush1.msra.mxu1 %v11159_v40  ;;  %3084 = vmatpush1.msra.mxu0 %v8772_v5  ;;  %v2742_v40 = vunpack.c.h.bf16 %v6333_v12 }
 0x9a2   : > { %3085 = vmatprep.subr.mxu0 %v8778_v1  ;;  %v2745_v13 = vadd.f32 %v2741_v43, %v11162_v0 }
 0x9a3   : > { %3086 = vmatpush1.msra.mxu0 %v8784_v62  ;;  %v2746_v33 = vadd.f32 %v2742_v40, %v11163_v20 }
 0xa42   : > { %v2879_v41 = vpop.f32.mrf.mxu0  ;;  %v2950_v59 = vpop.f32.mrf.mxu1 }
 0xa43   : > { %v2955_v49 = vadd.f32 %v2879_v41, %v2745_v13  ;;  %v2957_v44 = vadd.f32 %v2950_v59, %v2747_v10  ;;  %v8822_v10 = vld [vmem:[%s10671_s1 + $0x1f0] sm:$0xff] }
 0xa44   : > { %v2881_v61 = vpop.f32.mrf.mxu0  ;;  %v2952_v28 = vpop.f32.mrf.mxu1  ;;  %v8836_v59 = vld [vmem:[%s10671_s1 + $0x1d0] sm:$0xff] }
 0xa45   : > { %v2959_v9 = vmul.f32 0.5, %v2955_v49  ;;  %v2956_v63 = vadd.f32 %v2881_v61, %v2746_v33  ;;  %v2958_v60 = vadd.f32 %v2952_v28, %v2748_v30  ;;  %v8810_v61 = vld [vmem:[%s10671_s1 + $0x1f8] sm:$0xff]  ;;  %v8864_v30 = vld [vmem:[%s10671_s1 + $0x190] sm:$0xff] }
 0xa46   : > { %11175 = vst [vmem:[#allocation11_spill] sm:$0xff] %v8810_v61  ;;  %3368 = vmatprep.subr.mxu1 %v8810_v61  ;;  %v8871_v28 = vld [vmem:[%s10671_s1 + $0x178] sm:$0xff] }
 0xa47   : > { %6537 = vtanh.f32 %v2959_v9  ;;  %v2963_v18 = vmul.f32 0.5, %v2956_v63  ;;  %v2968_v21 = vmul.f32 0.5, %v2958_v60  ;;  %v8817_v9 = vld [vmem:[%s10671_s1 + $0x1e0] sm:$0xff]  ;;  %v8829_v63 = vld [vmem:[%s10671_s1 + $0x1d8] sm:$0xff]  ;;  %v8878_v60 = vld [vmem:[%s10671_s1 + $0x170] sm:$0xff] }
 0xa49   : > { %6539 = vtanh.f32 %v2963_v18  ;;  %v8843_v18 = vld [vmem:[%s10671_s1 + $0x1b8] sm:$0xff] }
 0xa4a   : > { %6541 = vtanh.f32 %v2957_v44  ;;  %v8857_v44 = vld [vmem:[%s10671_s1 + $0x198] sm:$0xff] }
 0xa4b   : > { %6543 = vtanh.f32 %v2968_v21  ;;  %v8885_v21 = vld [vmem:[%s10671_s1 + $0x158] sm:$0xff] }
 0xa54   : > { %v6538_v27 = vpop.eup %6537 }
 0xa55   : > { %v2961_v36 = vmul.f32 0.5, %v6538_v27  ;;  %v8892_v27 = vld [vmem:[%s10671_s1 + $0x150] sm:$0xff] }
 0xa56   : > { %v6540_v26 = vpop.eup %6539 }
 0xa57   : > { %v2962_v51 = vadd.f32 0.5, %v2961_v36  ;;  %v2965_v25 = vmul.f32 0.5, %v6540_v26  ;;  %v6542_v3 = vpop.eup %6541  ;;  %v8899_v36 = vld [vmem:[%s10671_s1 + $0x138] sm:$0xff]  ;;  %v8906_v26 = vld [vmem:[%s10671_s1 + $0x130] sm:$0xff] }
 0xa58   : > { %v6544_v23 = vpop.eup %6543 }
 0xa59   : > { %v2966_v8 = vadd.f32 0.5, %v2965_v25  ;;  %v2972_v12 = vmul.f32 %v6542_v3, %v2962_v51  ;;  %v2970_v13 = vmul.f32 0.5, %v6544_v23  ;;  %v8913_v51 = vld [vmem:[%s10671_s1 + $0x118] sm:$0xff]  ;;  %v8920_v25 = vld [vmem:[%s10671_s1 + $0x110] sm:$0xff] }
 0xa5a   : > { %v8932_v3 = vld [vmem:[%s10671_s1 + $0xf0] sm:$0xff]  ;;  %v8951_v23 = vld [vmem:[%s10671_s1 + $0xb8] sm:$0xff] }
 0xa5b   : > { %v2973_v43 = vmul.f32 %v2966_v8, %v8571_v32  ;;  %v2971_v58 = vadd.f32 0.5, %v2970_v13  ;;  %v8805_v32 = vld [vmem:[%s10671_s1 + $0x1e8] sm:$0xff]  ;;  %v8927_v8 = vld [vmem:[%s10671_s1 + $0xf8] sm:$0xff]  ;;  %v8958_v13 = vld [vmem:[%s10671_s1 + $0xb0] sm:$0xff] }
 0xa5c   : > { %11174 = vst [vmem:[#allocation16_spill] sm:$0xff] %v8805_v32  ;;  %3297 = vmatprep.subr.mxu0 %v8805_v32  ;;  %11176 = vst [vmem:[#allocation9_spill] sm:$0xff] %v8958_v13 }
 0xa5d   : > { %v8796_v40 = vadd.f32 %v2973_v43, %v2972_v12  ;;  %v8937_v12 = vld [vmem:[%s10671_s1 + $0xd8] sm:$0xff]  ;;  %v8944_v43 = vld [vmem:[%s10671_s1 + $0xd0] sm:$0xff] }
 0xa5f   : > { %6545 = vtanh.f32 %v8796_v40 }
 0xa6c   : > { %v6546_v33 = vpop.eup %6545 }
 0xa6d   : > { %v2976_v41 = vmul.f32 %v6546_v33, %v2971_v58  ;;  %v8965_v58 = vld [vmem:[%s10671_s1 + $0x98] sm:$0xff]  ;;  %v8972_v33 = vld [vmem:[%s10671_s1 + $0x90] sm:$0xff] }
 0xa6e   : > { %11177 = vst [vmem:[#allocation27_spill] sm:$0xff] %v8965_v58  ;;  %11178 = vst [vmem:[#allocation21_spill] sm:$0xff] %v8972_v33 }
 0xa6f   : > { %v2977_v49 = vpack.c.bf16 %v2976_v41, %v2976_v41  ;;  %3120 = vmatmul.mubr.f32.vlgmr.msra.gmra.mxu0 %v2976_v41  ;;  %3191 = vmatmul.mubr.f32.vlgmr.msra.gmra.mxu1 %v2976_v41  ;;  %v8979_v41 = vld [vmem:[%s10671_s1 + $0x78] sm:$0xff] }
 0xa70   : > { %3361 = vmatprep.mubr.f32.mxu0 %v11158_v53  ;;  %3432 = vmatprep.mubr.f32.mxu1 %v11158_v53  ;;  %11179 = vst [vmem:[#allocation15_spill] sm:$0xff] %v8979_v41  ;;  %v8993_v53 = vld [vmem:[%s10671_s1 + $0x58] sm:$0xff] }
 0xa71   : > { %6335 = vst [vmem:[%s6763_s30 + $0x28] sm:$0xf] %v2977_v49  ;;  %3298 = vmatpush1.msra.mxu0 %v8817_v9  ;;  %3369 = vmatpush1.msra.mxu1 %v8822_v10  ;;  %v8986_v49 = vld [vmem:[%s10671_s1 + $0x70] sm:$0xff]  ;;  %11181 = vst [vmem:[#allocation24_spill] sm:$0xff] %v8993_v53 }
 0xa72   : > { %3299 = vmatprep.subr.mxu0 %v8612_v34  ;;  %3370 = vmatprep.subr.mxu1 %v8829_v63  ;;  %11180 = vst [vmem:[#allocation30_spill] sm:$0xff] %v8986_v49 }
 0xa73   : > { %3300 = vmatpush1.msra.mxu0 %v8618_v38  ;;  %3371 = vmatpush1.msra.mxu1 %v8836_v59 }
 0xa74   : > { %3301 = vmatprep.subr.mxu0 %v8624_v42  ;;  %3372 = vmatprep.subr.mxu1 %v8843_v18 }
 0xa75   : > { %3302 = vmatpush1.msra.mxu0 %v8630_v46  ;;  %3373 = vmatpush1.msra.mxu1 %v8850_v47 }
 0xa76   : > { %3303 = vmatprep.subr.mxu0 %v8636_v50  ;;  %3374 = vmatprep.subr.mxu1 %v8857_v44 }
 0xa77   : > { %3304 = vmatpush1.msra.mxu0 %v8642_v54  ;;  %3375 = vmatpush1.msra.mxu1 %v8864_v30 }
 0xa78   : > { %3305 = vmatprep.subr.mxu0 %v8648_v39  ;;  %3376 = vmatprep.subr.mxu1 %v8871_v28 }
 0xa79   : > { %3306 = vmatpush1.msra.mxu0 %v8654_v24  ;;  %3377 = vmatpush1.msra.mxu1 %v8878_v60 }
 0xa7a   : > { %3307 = vmatprep.subr.mxu0 %v8660_v22  ;;  %3378 = vmatprep.subr.mxu1 %v8885_v21 }
 0xa7b   : > { %3308 = vmatpush1.msra.mxu0 %v8666_v56  ;;  %3379 = vmatpush1.msra.mxu1 %v8892_v27 }
 0xa7c   : > { %3309 = vmatprep.subr.mxu0 %v8672_v14  ;;  %3380 = vmatprep.subr.mxu1 %v8899_v36 }
 0xa7d   : > { %3310 = vmatpush1.msra.mxu0 %v8678_v7  ;;  %3381 = vmatpush1.msra.mxu1 %v8906_v26 }
 0xa7e   : > { %3311 = vmatprep.subr.mxu0 %v8684_v31  ;;  %3382 = vmatprep.subr.mxu1 %v8913_v51 }
 0xa7f   : > { %3312 = vmatpush1.msra.mxu0 %v8690_v19  ;;  %3383 = vmatpush1.msra.mxu1 %v8920_v25 }
 0xa80   : > { %3313 = vmatprep.subr.mxu0 %v8696_v4  ;;  %3384 = vmatprep.subr.mxu1 %v8927_v8 }
 0xa81   : > { %3314 = vmatpush1.msra.mxu0 %v8701_v17  ;;  %3385 = vmatpush1.msra.mxu1 %v8932_v3 }
 0xa82   : > { %3315 = vmatprep.subr.mxu0 %v8706_v2  ;;  %3386 = vmatprep.subr.mxu1 %v8937_v12 }
 0xa83   : > { %3316 = vmatpush1.msra.mxu0 %v8712_v11  ;;  %3387 = vmatpush1.msra.mxu1 %v8944_v43 }
 0xa84   : > { %3317 = vmatprep.subr.mxu0 %v8718_v48  ;;  %3388 = vmatprep.subr.mxu1 %v8951_v23 }
 0xa85   : > { %3318 = vmatpush1.msra.mxu0 %v8724_v52  ;;  %3389 = vmatpush1.msra.mxu1 %v8958_v13 }
 0xa86   : > { %3319 = vmatprep.subr.mxu0 %v8730_v15  ;;  %3390 = vmatprep.subr.mxu1 %v8965_v58  ;;  %v9000_v58 = vld [vmem:[%s10671_s1 + $0x50] sm:$0xff] }
 0xa87   : > { %3320 = vmatpush1.msra.mxu0 %v8736_v35  ;;  %3391 = vmatpush1.msra.mxu1 %v8972_v33  ;;  %11182 = vst [vmem:[#allocation18_spill] sm:$0xff] %v9000_v58  ;;  %v9007_v33 = vld [vmem:[%s10671_s1 + $0x38] sm:$0xff] }
 0xa88   : > { %3321 = vmatprep.subr.mxu0 %v8742_v29  ;;  %3392 = vmatprep.subr.mxu1 %v8979_v41  ;;  %11183 = vst [vmem:[#allocation12_spill] sm:$0xff] %v9007_v33  ;;  %v9014_v41 = vld [vmem:[%s10671_s1 + $0x30] sm:$0xff] }
 0xa89   : > { %3322 = vmatpush1.msra.mxu0 %v8748_v37  ;;  %3393 = vmatpush1.msra.mxu1 %v8986_v49  ;;  %11184 = vst [vmem:[#allocation23_spill] sm:$0xff] %v9014_v41  ;;  %v9021_v49 = vld [vmem:[%s10671_s1 + $0x18] sm:$0xff] }
 0xa8a   : > { %3323 = vmatprep.subr.mxu0 %v8754_v45  ;;  %3394 = vmatprep.subr.mxu1 %v8993_v53  ;;  %11185 = vst [vmem:[#allocation28_spill] sm:$0xff] %v9021_v49  ;;  %v9028_v53 = vld [vmem:[%s10671_s1 + $0x10] sm:$0xff] }
 0xa8b   : > { %3324 = vmatpush1.msra.mxu0 %v8760_v55  ;;  %3395 = vmatpush1.msra.mxu1 %v9000_v58  ;;  %11186 = vst [vmem:[#allocation17_spill] sm:$0xff] %v9028_v53  ;;  %v6337_v55 = vld [vmem:[%s6758_s27 + $0xb8] sm:$0xff] }
 0xa8c   : > { %3325 = vmatprep.subr.mxu0 %v8766_v6  ;;  %3396 = vmatprep.subr.mxu1 %v9007_v33  ;;  %v6336_v33 = vld [vmem:[%s6758_s27 + $0xb0] sm:$0xff]  ;;  %v2985_v45 = vunpack.c.l.bf16 %v6337_v55 }
 0xa8d   : > { %3326 = vmatpush1.msra.mxu0 %v8772_v5  ;;  %3397 = vmatpush1.msra.mxu1 %v9014_v41  ;;  %v2983_v6 = vunpack.c.l.bf16 %v6336_v33  ;;  %v2984_v58 = vunpack.c.h.bf16 %v6336_v33 }
 0xa8e   : > { %3327 = vmatprep.subr.mxu0 %v8778_v1  ;;  %3398 = vmatprep.subr.mxu1 %v9021_v49 }
 0xa8f   : > { %3328 = vmatpush1.msra.mxu0 %v8784_v62  ;;  %3399 = vmatpush1.msra.mxu1 %v9028_v53  ;;  %v2987_v5 = vadd.f32 %v2983_v6, %v11162_v0  ;;  %v2988_v41 = vadd.f32 %v2984_v58, %v11163_v20  ;;  %v2989_v62 = vadd.f32 %v2985_v45, %v11013_v57 }
 0xa90   : > { %3539 = vmatprep.subr.mxu0 %v8805_v32  ;;  %3610 = vmatprep.subr.mxu1 %v8810_v61  ;;  %v2986_v61 = vunpack.c.h.bf16 %v6337_v55 }
 0xa92   : > { %v2990_v33 = vadd.f32 %v2986_v61, %v10987_v16 }
 0xb2f   : > { %v3121_v1 = vpop.f32.mrf.mxu0  ;;  %v3192_v35 = vpop.f32.mrf.mxu1 }
 0xb30   : > { %v3197_v37 = vadd.f32 %v3121_v1, %v2987_v5  ;;  %v3199_v15 = vadd.f32 %v3192_v35, %v2989_v62 }
 0xb31   : > { %v3123_v49 = vpop.f32.mrf.mxu0  ;;  %v3194_v13 = vpop.f32.mrf.mxu1 }
 0xb32   : > { %v3201_v29 = vmul.f32 0.5, %v3197_v37  ;;  %v3198_v53 = vadd.f32 %v3123_v49, %v2988_v41  ;;  %v3200_v6 = vadd.f32 %v3194_v13, %v2990_v33  ;;  %v11190_v49 = vld [vmem:[#allocation20_spill] sm:$0xff]  ;;  %v11191_v33 = vld [vmem:[#allocation21_spill] sm:$0xff] }
 0xb34   : > { %6547 = vtanh.f32 %v3201_v29  ;;  %v3205_v32 = vmul.f32 0.5, %v3198_v53  ;;  %v3210_v0 = vmul.f32 0.5, %v3200_v6  ;;  %v11192_v6 = vld [vmem:[#allocation14_spill] sm:$0xff] }
 0xb36   : > { %6549 = vtanh.f32 %v3205_v32 }
 0xb37   : > { %6551 = vtanh.f32 %v3199_v15 }
 0xb38   : > { %6553 = vtanh.f32 %v3210_v0  ;;  %v11187_v0 = vld [vmem:[#allocation9_spill] sm:$0xff] }
 0xb41   : > { %v6548_v58 = vpop.eup %6547 }
 0xb42   : > { %v3203_v20 = vmul.f32 0.5, %v6548_v58  ;;  %v11193_v58 = vld [vmem:[#allocation15_spill] sm:$0xff] }
 0xb43   : > { %v6550_v5 = vpop.eup %6549 }
 0xb44   : > { %v3204_v1 = vadd.f32 0.5, %v3203_v20  ;;  %v3207_v37 = vmul.f32 0.5, %v6550_v5  ;;  %v6552_v41 = vpop.eup %6551  ;;  %v11188_v20 = vld [vmem:[#allocation26_spill] sm:$0xff] }
 0xb45   : > { %v6554_v55 = vpop.eup %6553  ;;  %v11194_v5 = vld [vmem:[#allocation10_spill] sm:$0xff] }
 0xb46   : > { %v3208_v45 = vadd.f32 0.5, %v3207_v37  ;;  %v3214_v29 = vmul.f32 %v6552_v41, %v3204_v1  ;;  %v3212_v15 = vmul.f32 0.5, %v6554_v55  ;;  %v11195_v1 = vld [vmem:[#allocation30_spill] sm:$0xff]  ;;  %v11196_v37 = vld [vmem:[#allocation29_spill] sm:$0xff]  ;;  %v11201_v55 = vld [vmem:[#allocation12_spill] sm:$0xff] }
 0xb47   : > { %v11198_v41 = vld [vmem:[#allocation25_spill] sm:$0xff] }
 0xb48   : > { %v3215_v53 = vmul.f32 %v3208_v45, %v8796_v40  ;;  %v3213_v62 = vadd.f32 0.5, %v3212_v15  ;;  %v11189_v40 = vld [vmem:[#allocation27_spill] sm:$0xff]  ;;  %v11197_v45 = vld [vmem:[#allocation24_spill] sm:$0xff]  ;;  %v11202_v15 = vld [vmem:[#allocation13_spill] sm:$0xff] }
 0xb4a   : > { %v9045_v35 = vadd.f32 %v3215_v53, %v3214_v29  ;;  %v11199_v29 = vld [vmem:[#allocation18_spill] sm:$0xff]  ;;  %v11200_v53 = vld [vmem:[#allocation19_spill] sm:$0xff] }
 0xb4c   : > { %6555 = vtanh.f32 %v9045_v35 }
 0xb59   : > { %v6556_v32 = vpop.eup %6555 }
 0xb5a   : > { %v3218_v61 = vmul.f32 %v6556_v32, %v3213_v62  ;;  %v11203_v62 = vld [vmem:[#allocation23_spill] sm:$0xff]  ;;  %v11204_v32 = vld [vmem:[#allocation8_spill] sm:$0xff] }
 0xb5c   : > { %v3219_v13 = vpack.c.bf16 %v3218_v61, %v3218_v61  ;;  %3362 = vmatmul.mubr.f32.vlgmr.msra.gmra.mxu0 %v3218_v61  ;;  %3433 = vmatmul.mubr.f32.vlgmr.msra.gmra.mxu1 %v3218_v61  ;;  %v11205_v61 = vld [vmem:[#allocation28_spill] sm:$0xff] }
 0xb5d   : > { %3540 = vmatpush1.msra.mxu0 %v8817_v9  ;;  %3611 = vmatpush1.msra.mxu1 %v8822_v10 }
 0xb5e   : > { %6338 = vst [vmem:[%s6763_s30 + $0x2c] sm:$0xf] %v3219_v13  ;;  %3541 = vmatprep.subr.mxu0 %v8612_v34  ;;  %3612 = vmatprep.subr.mxu1 %v8829_v63  ;;  %v11206_v13 = vld [vmem:[#allocation22_spill] sm:$0xff] }
 0xb5f   : > { %3542 = vmatpush1.msra.mxu0 %v8618_v38  ;;  %3613 = vmatpush1.msra.mxu1 %v8836_v59 }
 0xb60   : > { %3543 = vmatprep.subr.mxu0 %v8624_v42  ;;  %3614 = vmatprep.subr.mxu1 %v8843_v18 }
 0xb61   : > { %3544 = vmatpush1.msra.mxu0 %v8630_v46  ;;  %3615 = vmatpush1.msra.mxu1 %v8850_v47 }
 0xb62   : > { %3545 = vmatprep.subr.mxu0 %v8636_v50  ;;  %3616 = vmatprep.subr.mxu1 %v8857_v44 }
 0xb63   : > { %3546 = vmatpush1.msra.mxu0 %v8642_v54  ;;  %3617 = vmatpush1.msra.mxu1 %v8864_v30 }
 0xb64   : > { %3547 = vmatprep.subr.mxu0 %v8648_v39  ;;  %3618 = vmatprep.subr.mxu1 %v8871_v28 }
 0xb65   : > { %3548 = vmatpush1.msra.mxu0 %v8654_v24  ;;  %3619 = vmatpush1.msra.mxu1 %v8878_v60 }
 0xb66   : > { %3549 = vmatprep.subr.mxu0 %v8660_v22  ;;  %3620 = vmatprep.subr.mxu1 %v8885_v21 }
 0xb67   : > { %3550 = vmatpush1.msra.mxu0 %v8666_v56  ;;  %3621 = vmatpush1.msra.mxu1 %v8892_v27 }
 0xb68   : > { %3551 = vmatprep.subr.mxu0 %v8672_v14  ;;  %3622 = vmatprep.subr.mxu1 %v8899_v36 }
 0xb69   : > { %3552 = vmatpush1.msra.mxu0 %v8678_v7  ;;  %3623 = vmatpush1.msra.mxu1 %v8906_v26 }
 0xb6a   : > { %3553 = vmatprep.subr.mxu0 %v8684_v31  ;;  %3624 = vmatprep.subr.mxu1 %v8913_v51 }
 0xb6b   : > { %3554 = vmatpush1.msra.mxu0 %v8690_v19  ;;  %3625 = vmatpush1.msra.mxu1 %v8920_v25 }
 0xb6c   : > { %3555 = vmatprep.subr.mxu0 %v8696_v4  ;;  %3626 = vmatprep.subr.mxu1 %v8927_v8 }
 0xb6d   : > { %3556 = vmatpush1.msra.mxu0 %v8701_v17  ;;  %3627 = vmatpush1.msra.mxu1 %v8932_v3 }
 0xb6e   : > { %3557 = vmatprep.subr.mxu0 %v8706_v2  ;;  %3628 = vmatprep.subr.mxu1 %v8937_v12 }
 0xb6f   : > { %3558 = vmatpush1.msra.mxu0 %v8712_v11  ;;  %3629 = vmatpush1.msra.mxu1 %v8944_v43 }
 0xb70   : > { %3559 = vmatprep.subr.mxu0 %v8718_v48  ;;  %3630 = vmatprep.subr.mxu1 %v8951_v23 }
 0xb71   : > { %3560 = vmatpush1.msra.mxu0 %v8724_v52  ;;  %3631 = vmatpush1.msra.mxu1 %v11187_v0 }
 0xb72   : > { %3561 = vmatprep.subr.mxu0 %v11188_v20  ;;  %3632 = vmatprep.subr.mxu1 %v11189_v40 }
 0xb73   : > { %3562 = vmatpush1.msra.mxu0 %v11190_v49  ;;  %3633 = vmatpush1.msra.mxu1 %v11191_v33 }
 0xb74   : > { %3563 = vmatprep.subr.mxu0 %v11192_v6  ;;  %3634 = vmatprep.subr.mxu1 %v11193_v58 }
 0xb75   : > { %3564 = vmatpush1.msra.mxu0 %v11194_v5  ;;  %3635 = vmatpush1.msra.mxu1 %v11195_v1  ;;  %v11211_v1 = vld [vmem:[#allocation4_spill] sm:$0xff] }
 0xb76   : > { %3565 = vmatprep.subr.mxu0 %v11196_v37  ;;  %3636 = vmatprep.subr.mxu1 %v11197_v45  ;;  %v11207_v45 = vmov 0.0  }
 0xb77   : > { %3566 = vmatpush1.msra.mxu0 %v11198_v41  ;;  %3637 = vmatpush1.msra.mxu1 %v11199_v29  ;;  %v11208_v41 = vld [vmem:[#allocation17_spill] sm:$0xff]  ;;  %v11209_v29 = vld [vmem:[#allocation16_spill] sm:$0xff] }
 0xb78   : > { %3567 = vmatprep.subr.mxu0 %v11200_v53  ;;  %3638 = vmatprep.subr.mxu1 %v11201_v55  ;;  %v11210_v53 = vld [vmem:[#allocation11_spill] sm:$0xff]  ;;  %v6339_v55 = vld [vmem:[%s6758_s27 + $0xc0] sm:$0xff] }
 0xb79   : > { %3568 = vmatpush1.msra.mxu0 %v11202_v15  ;;  %3639 = vmatpush1.msra.mxu1 %v11203_v62  ;;  %v3225_v15 = vunpack.c.l.bf16 %v6339_v55  ;;  %v3226_v37 = vunpack.c.h.bf16 %v6339_v55  ;;  %v6340_v62 = vld [vmem:[%s6758_s27 + $0xc8] sm:$0xff] }
 0xb7a   : > { %3569 = vmatprep.subr.mxu0 %v11204_v32  ;;  %3640 = vmatprep.subr.mxu1 %v11205_v61  ;;  %v3227_v5 = vunpack.c.l.bf16 %v6340_v62  ;;  %v11212_v61 = vld [vmem:[#allocation5_spill] sm:$0xff] }
 0xb7b   : > { %3570 = vmatpush1.msra.mxu0 %v11206_v13  ;;  %3603 = vmatprep.mubr.f32.mxu0 %v11207_v45  ;;  %v3229_v32 = vadd.f32 %v3225_v15, %v11211_v1  ;;  %v3230_v58 = vadd.f32 %v3226_v37, %v11212_v61 }
 0xb7c   : > { %3641 = vmatpush1.msra.mxu1 %v11208_v41  ;;  %3674 = vmatprep.mubr.f32.mxu1 %v11207_v45  ;;  %v3231_v41 = vadd.f32 %v3227_v5, %v11013_v57 }
 0xb7d   : > { %3781 = vmatprep.subr.mxu0 %v11209_v29  ;;  %3852 = vmatprep.subr.mxu1 %v11210_v53  ;;  %v3228_v53 = vunpack.c.h.bf16 %v6340_v62  ;;  %v11235_v62 = vld [vmem:[#allocation16_spill] sm:$0xff] }
 0xb7f   : > { %v3232_v55 = vadd.f32 %v3228_v53, %v10987_v16 }
 0xc1c   : > { %v3363_v13 = vpop.f32.mrf.mxu0  ;;  %v3434_v40 = vpop.f32.mrf.mxu1 }
 0xc1d   : > { %v3439_v6 = vadd.f32 %v3363_v13, %v3229_v32  ;;  %v3441_v20 = vadd.f32 %v3434_v40, %v3231_v41 }
 0xc1e   : > { %v3365_v33 = vpop.f32.mrf.mxu0  ;;  %v3436_v0 = vpop.f32.mrf.mxu1 }
 0xc1f   : > { %v3443_v49 = vmul.f32 0.5, %v3439_v6  ;;  %v3440_v45 = vadd.f32 %v3365_v33, %v3230_v58  ;;  %v3442_v15 = vadd.f32 %v3436_v0, %v3232_v55  ;;  %v6342_v55 = vld [vmem:[%s6758_s27 + $0xd0] sm:$0xff] }
 0xc21   : > { %6557 = vtanh.f32 %v3443_v49  ;;  %v3447_v29 = vmul.f32 0.5, %v3440_v45  ;;  %v3452_v1 = vmul.f32 0.5, %v3442_v15  ;;  %v3467_v15 = vunpack.c.l.bf16 %v6342_v55 }
 0xc23   : > { %6559 = vtanh.f32 %v3447_v29 }
 0xc24   : > { %6561 = vtanh.f32 %v3441_v20 }
 0xc25   : > { %6563 = vtanh.f32 %v3452_v1  ;;  %v11234_v1 = vld [vmem:[#allocation17_spill] sm:$0xff] }
 0xc2e   : > { %v6558_v37 = vpop.eup %6557 }
 0xc2f   : > { %v3445_v61 = vmul.f32 0.5, %v6558_v37  ;;  %v3468_v37 = vunpack.c.h.bf16 %v6342_v55 }
 0xc30   : > { %v6560_v32 = vpop.eup %6559 }
 0xc31   : > { %v3446_v13 = vadd.f32 0.5, %v3445_v61  ;;  %v3449_v6 = vmul.f32 0.5, %v6560_v32  ;;  %v6562_v33 = vpop.eup %6561  ;;  %v11236_v61 = vld [vmem:[#allocation11_spill] sm:$0xff]  ;;  %v6343_v32 = vld [vmem:[%s6758_s27 + $0xd8] sm:$0xff] }
 0xc32   : > { %v6564_v45 = vpop.eup %6563 }
 0xc33   : > { %v3450_v5 = vadd.f32 0.5, %v3449_v6  ;;  %v3456_v49 = vmul.f32 %v6562_v33, %v3446_v13  ;;  %v3454_v20 = vmul.f32 0.5, %v6564_v45  ;;  %v11237_v13 = vld [vmem:[#allocation4_spill] sm:$0xff]  ;;  %v11238_v33 = vld [vmem:[#allocation5_spill] sm:$0xff] }
 0xc34   : > { %v3471_v6 = vadd.f32 %v3467_v15, %v11237_v13 }
 0xc35   : > { %v3457_v58 = vmul.f32 %v3450_v5, %v9045_v35  ;;  %v3455_v0 = vadd.f32 0.5, %v3454_v20  ;;  %v11233_v35 = vmov 0.0   ;;  %v3469_v5 = vunpack.c.l.bf16 %v6343_v32 }
 0xc37   : > { %v9122_v40 = vadd.f32 %v3457_v58, %v3456_v49  ;;  %v3472_v49 = vadd.f32 %v3468_v37, %v11238_v33 }
 0xc39   : > { %6565 = vtanh.f32 %v9122_v40 }
 0xc46   : > { %v6566_v41 = vpop.eup %6565 }
 0xc47   : > { %v3460_v29 = vmul.f32 %v6566_v41, %v3455_v0  ;;  %v3473_v41 = vadd.f32 %v3469_v5, %v11013_v57 }
 0xc49   : > { %v3461_v53 = vpack.c.bf16 %v3460_v29, %v3460_v29  ;;  %3604 = vmatmul.mubr.f32.vlgmr.msra.gmra.mxu0 %v3460_v29  ;;  %3675 = vmatmul.mubr.f32.vlgmr.msra.gmra.mxu1 %v3460_v29 }
 0xc4a   : > { %3782 = vmatpush1.msra.mxu0 %v8817_v9  ;;  %3853 = vmatpush1.msra.mxu1 %v8822_v10 }
 0xc4b   : > { %6341 = vst [vmem:[%s6763_s30 + $0x30] sm:$0xf] %v3461_v53  ;;  %3783 = vmatprep.subr.mxu0 %v8612_v34  ;;  %3854 = vmatprep.subr.mxu1 %v8829_v63  ;;  %v11213_v34 = vld [vmem:[#allocation9_spill] sm:$0xff] }
 0xc4c   : > { %3784 = vmatpush1.msra.mxu0 %v8618_v38  ;;  %3855 = vmatpush1.msra.mxu1 %v8836_v59  ;;  %v11214_v38 = vld [vmem:[#allocation26_spill] sm:$0xff] }
 0xc4d   : > { %3785 = vmatprep.subr.mxu0 %v8624_v42  ;;  %3856 = vmatprep.subr.mxu1 %v8843_v18  ;;  %v11215_v42 = vld [vmem:[#allocation27_spill] sm:$0xff] }
 0xc4e   : > { %3786 = vmatpush1.msra.mxu0 %v8630_v46  ;;  %3857 = vmatpush1.msra.mxu1 %v8850_v47  ;;  %v11216_v46 = vld [vmem:[#allocation20_spill] sm:$0xff] }
 0xc4f   : > { %3787 = vmatprep.subr.mxu0 %v8636_v50  ;;  %3858 = vmatprep.subr.mxu1 %v8857_v44  ;;  %v11217_v50 = vld [vmem:[#allocation21_spill] sm:$0xff] }
 0xc50   : > { %3788 = vmatpush1.msra.mxu0 %v8642_v54  ;;  %3859 = vmatpush1.msra.mxu1 %v8864_v30  ;;  %v11218_v54 = vld [vmem:[#allocation14_spill] sm:$0xff] }
 0xc51   : > { %3789 = vmatprep.subr.mxu0 %v8648_v39  ;;  %3860 = vmatprep.subr.mxu1 %v8871_v28  ;;  %v11219_v39 = vld [vmem:[#allocation15_spill] sm:$0xff] }
 0xc52   : > { %3790 = vmatpush1.msra.mxu0 %v8654_v24  ;;  %3861 = vmatpush1.msra.mxu1 %v8878_v60  ;;  %v11220_v24 = vld [vmem:[#allocation10_spill] sm:$0xff] }
 0xc53   : > { %3791 = vmatprep.subr.mxu0 %v8660_v22  ;;  %3862 = vmatprep.subr.mxu1 %v8885_v21  ;;  %v11221_v22 = vld [vmem:[#allocation30_spill] sm:$0xff] }
 0xc54   : > { %3792 = vmatpush1.msra.mxu0 %v8666_v56  ;;  %3863 = vmatpush1.msra.mxu1 %v8892_v27  ;;  %v11222_v56 = vld [vmem:[#allocation29_spill] sm:$0xff] }
 0xc55   : > { %3793 = vmatprep.subr.mxu0 %v8672_v14  ;;  %3864 = vmatprep.subr.mxu1 %v8899_v36  ;;  %v11223_v14 = vld [vmem:[#allocation24_spill] sm:$0xff] }
 0xc56   : > { %3794 = vmatpush1.msra.mxu0 %v8678_v7  ;;  %3865 = vmatpush1.msra.mxu1 %v8906_v26  ;;  %v11224_v7 = vld [vmem:[#allocation25_spill] sm:$0xff] }
 0xc57   : > { %3795 = vmatprep.subr.mxu0 %v8684_v31  ;;  %3866 = vmatprep.subr.mxu1 %v8913_v51  ;;  %v11225_v31 = vld [vmem:[#allocation18_spill] sm:$0xff] }
 0xc58   : > { %3796 = vmatpush1.msra.mxu0 %v8690_v19  ;;  %3867 = vmatpush1.msra.mxu1 %v8920_v25  ;;  %v11226_v19 = vld [vmem:[#allocation19_spill] sm:$0xff] }
 0xc59   : > { %3797 = vmatprep.subr.mxu0 %v8696_v4  ;;  %3868 = vmatprep.subr.mxu1 %v8927_v8  ;;  %v11227_v4 = vld [vmem:[#allocation12_spill] sm:$0xff] }
 0xc5a   : > { %3798 = vmatpush1.msra.mxu0 %v8701_v17  ;;  %3869 = vmatpush1.msra.mxu1 %v8932_v3  ;;  %v11228_v17 = vld [vmem:[#allocation13_spill] sm:$0xff] }
 0xc5b   : > { %3799 = vmatprep.subr.mxu0 %v8706_v2  ;;  %3870 = vmatprep.subr.mxu1 %v8937_v12  ;;  %v11229_v2 = vld [vmem:[#allocation23_spill] sm:$0xff] }
 0xc5c   : > { %3800 = vmatpush1.msra.mxu0 %v8712_v11  ;;  %3871 = vmatpush1.msra.mxu1 %v8944_v43  ;;  %v11230_v11 = vld [vmem:[#allocation8_spill] sm:$0xff] }
 0xc5d   : > { %3801 = vmatprep.subr.mxu0 %v8718_v48  ;;  %3872 = vmatprep.subr.mxu1 %v8951_v23  ;;  %v11231_v48 = vld [vmem:[#allocation28_spill] sm:$0xff] }
 0xc5e   : > { %3802 = vmatpush1.msra.mxu0 %v8724_v52  ;;  %3873 = vmatpush1.msra.mxu1 %v11213_v34  ;;  %v11232_v52 = vld [vmem:[#allocation22_spill] sm:$0xff] }
 0xc5f   : > { %3803 = vmatprep.subr.mxu0 %v11214_v38  ;;  %3874 = vmatprep.subr.mxu1 %v11215_v42 }
 0xc60   : > { %3804 = vmatpush1.msra.mxu0 %v11216_v46  ;;  %3875 = vmatpush1.msra.mxu1 %v11217_v50  ;;  %v3470_v46 = vunpack.c.h.bf16 %v6343_v32 }
 0xc61   : > { %3805 = vmatprep.subr.mxu0 %v11218_v54  ;;  %3876 = vmatprep.subr.mxu1 %v11219_v39 }
 0xc62   : > { %3806 = vmatpush1.msra.mxu0 %v11220_v24  ;;  %3877 = vmatpush1.msra.mxu1 %v11221_v22  ;;  %v3474_v24 = vadd.f32 %v3470_v46, %v10987_v16 }
 0xc63   : > { %3807 = vmatprep.subr.mxu0 %v11222_v56  ;;  %3878 = vmatprep.subr.mxu1 %v11223_v14 }
 0xc64   : > { %3808 = vmatpush1.msra.mxu0 %v11224_v7  ;;  %3879 = vmatpush1.msra.mxu1 %v11225_v31 }
 0xc65   : > { %3809 = vmatprep.subr.mxu0 %v11226_v19  ;;  %3880 = vmatprep.subr.mxu1 %v11227_v4 }
 0xc66   : > { %3810 = vmatpush1.msra.mxu0 %v11228_v17  ;;  %3881 = vmatpush1.msra.mxu1 %v11229_v2 }
 0xc67   : > { %3811 = vmatprep.subr.mxu0 %v11230_v11  ;;  %3882 = vmatprep.subr.mxu1 %v11231_v48 }
 0xc68   : > { %3812 = vmatpush1.msra.mxu0 %v11232_v52  ;;  %3845 = vmatprep.mubr.f32.mxu0 %v11233_v35 }
 0xc69   : > { %3883 = vmatpush1.msra.mxu1 %v11234_v1  ;;  %3916 = vmatprep.mubr.f32.mxu1 %v11233_v35 }
 0xc6a   : > { %4023 = vmatprep.subr.mxu0 %v11235_v62  ;;  %4094 = vmatprep.subr.mxu1 %v11236_v61 }
 0xd09   : > { %v3605_v58 = vpop.f32.mrf.mxu0  ;;  %v3676_v53 = vpop.f32.mrf.mxu1 }
 0xd0a   : > { %v3681_v45 = vadd.f32 %v3605_v58, %v3471_v6  ;;  %v3683_v54 = vadd.f32 %v3676_v53, %v3473_v41 }
 0xd0b   : > { %v3607_v20 = vpop.f32.mrf.mxu0  ;;  %v3678_v56 = vpop.f32.mrf.mxu1 }
 0xd0c   : > { %v3685_v0 = vmul.f32 0.5, %v3681_v45  ;;  %v3682_v29 = vadd.f32 %v3607_v20, %v3472_v49  ;;  %v3684_v7 = vadd.f32 %v3678_v56, %v3474_v24 }
 0xd0e   : > { %6567 = vtanh.f32 %v3685_v0  ;;  %v3689_v38 = vmul.f32 0.5, %v3682_v29  ;;  %v3694_v19 = vmul.f32 0.5, %v3684_v7 }
 0xd10   : > { %6569 = vtanh.f32 %v3689_v38 }
 0xd11   : > { %6571 = vtanh.f32 %v3683_v54 }
 0xd12   : > { %6573 = vtanh.f32 %v3694_v19 }
 0xd1b   : > { %v6568_v17 = vpop.eup %6567 }
 0xd1c   : > { %v3687_v11 = vmul.f32 0.5, %v6568_v17 }
 0xd1d   : > { %v6570_v52 = vpop.eup %6569 }
 0xd1e   : > { %v3688_v62 = vadd.f32 0.5, %v3687_v11  ;;  %v3691_v61 = vmul.f32 0.5, %v6570_v52  ;;  %v6572_v15 = vpop.eup %6571 }
 0xd1f   : > { %v6574_v5 = vpop.eup %6573 }
 0xd20   : > { %v3692_v55 = vadd.f32 0.5, %v3691_v61  ;;  %v3698_v37 = vmul.f32 %v6572_v15, %v3688_v62  ;;  %v3696_v49 = vmul.f32 0.5, %v6574_v5 }
 0xd22   : > { %v3699_v32 = vmul.f32 %v3692_v55, %v9122_v40  ;;  %v3697_v58 = vadd.f32 0.5, %v3696_v49  ;;  %v3975_v40 = vld [vmem:[%s10671_s1 + $0x80] sm:$0xff] }
 0xd24   : > { %v9199_v6 = vadd.f32 %v3699_v32, %v3698_v37 }
 0xd26   : > { %6575 = vtanh.f32 %v9199_v6 }
 0xd33   : > { %v6576_v45 = vpop.eup %6575 }
 0xd34   : > { %v3702_v20 = vmul.f32 %v6576_v45, %v3697_v58 }
 0xd36   : > { %v3703_v0 = vpack.c.bf16 %v3702_v20, %v3702_v20  ;;  %3846 = vmatmul.mubr.f32.vlgmr.msra.gmra.mxu0 %v3702_v20  ;;  %3917 = vmatmul.mubr.f32.vlgmr.msra.gmra.mxu1 %v3702_v20 }
 0xd37   : > { %4024 = vmatpush1.msra.mxu0 %v8817_v9  ;;  %4095 = vmatpush1.msra.mxu1 %v8822_v10  ;;  %v4016_v9 = vld [vmem:[%s10671_s1 + $0x1c8] sm:$0xff]  ;;  %v4015_v10 = vld [vmem:[%s10671_s1 + $0x1c0] sm:$0xff] }
 0xd38   : > { %6344 = vst [vmem:[%s6763_s30 + $0x34] sm:$0xf] %v3703_v0  ;;  %4096 = vmatprep.subr.mxu1 %v8829_v63  ;;  %4087 = vmatprep.mubr.f32.mxu0 %v11233_v35  ;;  %v4012_v63 = vld [vmem:[%s10671_s1 + $0x1a8] sm:$0xff] }
 0xd39   : > { %4097 = vmatpush1.msra.mxu1 %v8836_v59  ;;  %4158 = vmatprep.mubr.f32.mxu1 %v11233_v35  ;;  %v4011_v59 = vld [vmem:[%s10671_s1 + $0x1a0] sm:$0xff] }
 0xd3a   : > { %4098 = vmatprep.subr.mxu1 %v8843_v18  ;;  %4025 = vmatprep.subr.mxu0 %v4016_v9  ;;  %v4008_v18 = vld [vmem:[%s10671_s1 + $0x188] sm:$0xff] }
 0xd3b   : > { %4099 = vmatpush1.msra.mxu1 %v8850_v47  ;;  %4026 = vmatpush1.msra.mxu0 %v4015_v10  ;;  %v4007_v47 = vld [vmem:[%s10671_s1 + $0x180] sm:$0xff] }
 0xd3c   : > { %4100 = vmatprep.subr.mxu1 %v8857_v44  ;;  %4027 = vmatprep.subr.mxu0 %v4012_v63  ;;  %v4004_v44 = vld [vmem:[%s10671_s1 + $0x168] sm:$0xff] }
 0xd3d   : > { %4101 = vmatpush1.msra.mxu1 %v8864_v30  ;;  %4028 = vmatpush1.msra.mxu0 %v4011_v59  ;;  %v4003_v30 = vld [vmem:[%s10671_s1 + $0x160] sm:$0xff] }
 0xd3e   : > { %4102 = vmatprep.subr.mxu1 %v8871_v28  ;;  %4029 = vmatprep.subr.mxu0 %v4008_v18  ;;  %v4000_v28 = vld [vmem:[%s10671_s1 + $0x148] sm:$0xff] }
 0xd3f   : > { %4103 = vmatpush1.msra.mxu1 %v8878_v60  ;;  %4030 = vmatpush1.msra.mxu0 %v4007_v47  ;;  %v3999_v60 = vld [vmem:[%s10671_s1 + $0x140] sm:$0xff] }
 0xd40   : > { %4104 = vmatprep.subr.mxu1 %v8885_v21  ;;  %4031 = vmatprep.subr.mxu0 %v4004_v44  ;;  %v3996_v21 = vld [vmem:[%s10671_s1 + $0x128] sm:$0xff] }
 0xd41   : > { %4105 = vmatpush1.msra.mxu1 %v8892_v27  ;;  %4032 = vmatpush1.msra.mxu0 %v4003_v30  ;;  %v3995_v27 = vld [vmem:[%s10671_s1 + $0x120] sm:$0xff] }
 0xd42   : > { %4106 = vmatprep.subr.mxu1 %v8899_v36  ;;  %4033 = vmatprep.subr.mxu0 %v4000_v28  ;;  %v3992_v36 = vld [vmem:[%s10671_s1 + $0x108] sm:$0xff]  ;;  %v6348_v28 = vld [vmem:[%s6758_s27 + $0xf0] sm:$0xff] }
 0xd43   : > { %4107 = vmatpush1.msra.mxu1 %v8906_v26  ;;  %4034 = vmatpush1.msra.mxu0 %v3999_v60  ;;  %v3991_v26 = vld [vmem:[%s10671_s1 + $0x100] sm:$0xff]  ;;  %v3951_v60 = vunpack.c.l.bf16 %v6348_v28 }
 0xd44   : > { %4108 = vmatprep.subr.mxu1 %v8913_v51  ;;  %4035 = vmatprep.subr.mxu0 %v3996_v21  ;;  %v3988_v51 = vld [vmem:[%s10671_s1 + $0xe8] sm:$0xff]  ;;  %v3952_v21 = vunpack.c.h.bf16 %v6348_v28 }
 0xd45   : > { %4109 = vmatpush1.msra.mxu1 %v8920_v25  ;;  %4036 = vmatpush1.msra.mxu0 %v3995_v27  ;;  %v3987_v25 = vld [vmem:[%s10671_s1 + $0xe0] sm:$0xff]  ;;  %v6349_v27 = vld [vmem:[%s6758_s27 + $0xf8] sm:$0xff] }
 0xd46   : > { %4110 = vmatprep.subr.mxu1 %v8927_v8  ;;  %4037 = vmatprep.subr.mxu0 %v3992_v36  ;;  %v3984_v8 = vld [vmem:[%s10671_s1 + $0xc8] sm:$0xff]  ;;  %v3955_v36 = vadd.f32 %v3951_v60, %v11237_v13 }
 0xd47   : > { %4111 = vmatpush1.msra.mxu1 %v8932_v3  ;;  %4038 = vmatpush1.msra.mxu0 %v3991_v26  ;;  %v3983_v3 = vld [vmem:[%s10671_s1 + $0xc0] sm:$0xff]  ;;  %v3953_v26 = vunpack.c.l.bf16 %v6349_v27 }
 0xd48   : > { %4112 = vmatprep.subr.mxu1 %v8937_v12  ;;  %4039 = vmatprep.subr.mxu0 %v3988_v51  ;;  %v3980_v12 = vld [vmem:[%s10671_s1 + $0xa8] sm:$0xff] }
 0xd49   : > { %4113 = vmatpush1.msra.mxu1 %v8944_v43  ;;  %4040 = vmatpush1.msra.mxu0 %v3987_v25  ;;  %v3979_v43 = vld [vmem:[%s10671_s1 + $0xa0] sm:$0xff] }
 0xd4a   : > { %4114 = vmatprep.subr.mxu1 %v8951_v23  ;;  %4041 = vmatprep.subr.mxu0 %v3984_v8  ;;  %v3976_v23 = vld [vmem:[%s10671_s1 + $0x88] sm:$0xff] }
 0xd4b   : > { %4115 = vmatpush1.msra.mxu1 %v11213_v34  ;;  %4042 = vmatpush1.msra.mxu0 %v3983_v3  ;;  %v3972_v34 = vld [vmem:[%s10671_s1 + $0x68] sm:$0xff] }
 0xd4c   : > { %4116 = vmatprep.subr.mxu1 %v11215_v42  ;;  %4043 = vmatprep.subr.mxu0 %v3980_v12  ;;  %v3971_v42 = vld [vmem:[%s10671_s1 + $0x60] sm:$0xff]  ;;  %v3957_v12 = vadd.f32 %v3953_v26, %v11013_v57 }
 0xd4d   : > { %4117 = vmatpush1.msra.mxu1 %v11217_v50  ;;  %4044 = vmatpush1.msra.mxu0 %v3979_v43  ;;  %v3968_v50 = vld [vmem:[%s10671_s1 + $0x48] sm:$0xff] }
 0xd4e   : > { %4118 = vmatprep.subr.mxu1 %v11219_v39  ;;  %4045 = vmatprep.subr.mxu0 %v3976_v23  ;;  %v3967_v39 = vld [vmem:[%s10671_s1 + $0x40] sm:$0xff] }
 0xd4f   : > { %4119 = vmatpush1.msra.mxu1 %v11221_v22  ;;  %4046 = vmatpush1.msra.mxu0 %v3975_v40  ;;  %v3964_v22 = vld [vmem:[%s10671_s1 + $0x28] sm:$0xff] }
 0xd50   : > { %4120 = vmatprep.subr.mxu1 %v11223_v14  ;;  %4047 = vmatprep.subr.mxu0 %v3972_v34  ;;  %v3963_v14 = vld [vmem:[%s10671_s1 + $0x20] sm:$0xff]  ;;  %v3954_v34 = vunpack.c.h.bf16 %v6349_v27 }
 0xd51   : > { %4121 = vmatpush1.msra.mxu1 %v11225_v31  ;;  %4048 = vmatpush1.msra.mxu0 %v3971_v42  ;;  %v3960_v31 = vld [vmem:[%s10671_s1 + $0x8] sm:$0xff] }
 0xd52   : > { %4122 = vmatprep.subr.mxu1 %v11227_v4  ;;  %4049 = vmatprep.subr.mxu0 %v3968_v50  ;;  %v3959_v4 = vld [vmem:[%s10671_s1] sm:$0xff]  ;;  %v3958_v50 = vadd.f32 %v3954_v34, %v10987_v16 }
 0xd53   : > { %4123 = vmatpush1.msra.mxu1 %v11229_v2  ;;  %4050 = vmatpush1.msra.mxu0 %v3967_v39  ;;  %v6345_v2 = vld [vmem:[%s6758_s27 + $0xe0] sm:$0xff] }
 0xd54   : > { %4124 = vmatprep.subr.mxu1 %v11231_v48  ;;  %4051 = vmatprep.subr.mxu0 %v3964_v22  ;;  %v3709_v48 = vunpack.c.l.bf16 %v6345_v2  ;;  %v3710_v35 = vunpack.c.h.bf16 %v6345_v2 }
 0xd55   : > { %4125 = vmatpush1.msra.mxu1 %v11234_v1  ;;  %4052 = vmatpush1.msra.mxu0 %v3963_v14  ;;  %v6346_v1 = vld [vmem:[%s6758_s27 + $0xe8] sm:$0xff] }
 0xd56   : > { %4053 = vmatprep.subr.mxu0 %v3960_v31  ;;  %v3713_v41 = vadd.f32 %v3709_v48, %v11237_v13  ;;  %v3711_v29 = vunpack.c.l.bf16 %v6346_v1  ;;  %v3714_v53 = vadd.f32 %v3710_v35, %v11238_v33  ;;  %v3712_v11 = vunpack.c.h.bf16 %v6346_v1 }
 0xd57   : > { %4054 = vmatpush1.msra.mxu0 %v3959_v4 }
 0xd58   : > { %v3715_v56 = vadd.f32 %v3711_v29, %v11013_v57  ;;  %v3716_v62 = vadd.f32 %v3712_v11, %v10987_v16 }
 0xdf6   : > { %v3847_v38 = vpop.f32.mrf.mxu0  ;;  %v3918_v19 = vpop.f32.mrf.mxu1 }
 0xdf7   : > { %v3923_v46 = vadd.f32 %v3847_v38, %v3713_v41  ;;  %v3925_v52 = vadd.f32 %v3918_v19, %v3715_v56 }
 0xdf8   : > { %v3849_v54 = vpop.f32.mrf.mxu0  ;;  %v3920_v61 = vpop.f32.mrf.mxu1 }
 0xdf9   : > { %v3927_v24 = vmul.f32 0.5, %v3923_v46  ;;  %v3924_v7 = vadd.f32 %v3849_v54, %v3714_v53  ;;  %v3926_v55 = vadd.f32 %v3920_v61, %v3716_v62 }
 0xdfb   : > { %6577 = vtanh.f32 %v3927_v24  ;;  %v3931_v17 = vmul.f32 0.5, %v3924_v7  ;;  %v3936_v15 = vmul.f32 0.5, %v3926_v55 }
 0xdfd   : > { %6579 = vtanh.f32 %v3931_v17 }
 0xdfe   : > { %6581 = vtanh.f32 %v3925_v52 }
 0xdff   : > { %6583 = vtanh.f32 %v3936_v15 }
 0xe08   : > { %v6578_v37 = vpop.eup %6577 }
 0xe09   : > { %v3929_v32 = vmul.f32 0.5, %v6578_v37 }
 0xe0a   : > { %v6580_v5 = vpop.eup %6579 }
 0xe0b   : > { %v3930_v49 = vadd.f32 0.5, %v3929_v32  ;;  %v3933_v58 = vmul.f32 0.5, %v6580_v5  ;;  %v6582_v20 = vpop.eup %6581 }
 0xe0c   : > { %v6584_v63 = vpop.eup %6583 }
 0xe0d   : > { %v3934_v45 = vadd.f32 0.5, %v3933_v58  ;;  %v3940_v0 = vmul.f32 %v6582_v20, %v3930_v49  ;;  %v3938_v59 = vmul.f32 0.5, %v6584_v63 }
 0xe0f   : > { %v3941_v9 = vmul.f32 %v3934_v45, %v9199_v6  ;;  %v3939_v18 = vadd.f32 0.5, %v3938_v59  ;;  %v3956_v6 = vadd.f32 %v3952_v21, %v11238_v33 }
 0xe11   : > { %v3942_v10 = vadd.f32 %v3941_v9, %v3940_v0 }
 0xe13   : > { %6585 = vtanh.f32 %v3942_v10 }
 0xe20   : > { %v6586_v47 = vpop.eup %6585 }
 0xe21   : > { %v3944_v44 = vmul.f32 %v6586_v47, %v3939_v18 }
 0xe23   : > { %v3945_v30 = vpack.c.bf16 %v3944_v44, %v3944_v44  ;;  %4088 = vmatmul.mubr.f32.vlgmr.msra.gmra.mxu0 %v3944_v44  ;;  %4159 = vmatmul.mubr.f32.vlgmr.msra.gmra.mxu1 %v3944_v44 }
 0xe25   : > { %6347 = vst [vmem:[%s6763_s30 + $0x38] sm:$0xf] %v3945_v30 }
 0xee3   : > { %v4089_v51 = vpop.f32.mrf.mxu0  ;;  %v4160_v23 = vpop.f32.mrf.mxu1 }
 0xee4   : > { %v4165_v25 = vadd.f32 %v4089_v51, %v3955_v36  ;;  %v4167_v42 = vadd.f32 %v4160_v23, %v3957_v12 }
 0xee5   : > { %v4091_v8 = vpop.f32.mrf.mxu0  ;;  %v4162_v39 = vpop.f32.mrf.mxu1 }
 0xee6   : > { %v4169_v3 = vmul.f32 0.5, %v4165_v25  ;;  %v4166_v43 = vadd.f32 %v4091_v8, %v3956_v6  ;;  %v4168_v13 = vadd.f32 %v4162_v39, %v3958_v50 }
 0xee8   : > { %6587 = vtanh.f32 %v4169_v3  ;;  %v4173_v40 = vmul.f32 0.5, %v4166_v43  ;;  %v4178_v22 = vmul.f32 0.5, %v4168_v13 }
 0xeea   : > { %6589 = vtanh.f32 %v4173_v40 }
 0xeeb   : > { %6591 = vtanh.f32 %v4167_v42 }
 0xeec   : > { %6593 = vtanh.f32 %v4178_v22 }
 0xef5   : > { %v6588_v33 = vpop.eup %6587 }
 0xef6   : > { %v4171_v14 = vmul.f32 0.5, %v6588_v33 }
 0xef7   : > { %v6590_v31 = vpop.eup %6589 }
 0xef8   : > { %v4172_v4 = vadd.f32 0.5, %v4171_v14  ;;  %v4175_v2 = vmul.f32 0.5, %v6590_v31  ;;  %v6592_v48 = vpop.eup %6591 }
 0xef9   : > { %v6594_v29 = vpop.eup %6593 }
 0xefa   : > { %v4176_v57 = vadd.f32 0.5, %v4175_v2  ;;  %v4182_v35 = vmul.f32 %v6592_v48, %v4172_v4  ;;  %v4180_v16 = vmul.f32 0.5, %v6594_v29 }
 0xefc   : > { %v4183_v1 = vmul.f32 %v4176_v57, %v3942_v10  ;;  %v4181_v53 = vadd.f32 0.5, %v4180_v16 }
 0xefe   : > { %v4184_v41 = vadd.f32 %v4183_v1, %v4182_v35 }
 0xf00   : > { %6595 = vtanh.f32 %v4184_v41  ;;  %4191 = vst [vmem:[#allocation3] sm:$0xff] %v4184_v41 }
 0xf0d   : > { %v6596_v38 = vpop.eup %6595 }
 0xf0e   : > { %v4186_v46 = vmul.f32 %v6596_v38, %v4181_v53 }
 0xf10   : > { %v4187_v54 = vpack.c.bf16 %v4186_v46, %v4186_v46  ;;  %4190 = vst [vmem:[#allocation2] sm:$0xff] %v4186_v46 }
 0xf12   : > { %6350 = vst [vmem:[%s6763_s30 + $0x3c] sm:$0xf] %v4187_v54 }
 0xf13 PF: > { %p6351_p7 = scmp.ne.s32.totalorder %s6691_s18, 1 }
 0xf15   : > { %4195 = sbr.rel (%p6351_p7) target bundleno = 5800 (0x16a8), region = 44 }
 0xf1a   : > { %v9346_v24 = vld [vmem:[%s10671_s1 + $0x1e8] sm:$0xff]  ;;  %v9351_v56 = vld [vmem:[%s10671_s1 + $0x1e0] sm:$0xff]  ;;  %v10870_v17 = vmov 0.0   ;;  %v9374_v52 = vld [vmem:[%s10671_s1 + $0x1f8] sm:$0xff] }
 0xf1b   : > { %11239 = vst [vmem:[#allocation31_spill] sm:$0xff] %v9346_v24  ;;  %v9356_v7 = vld [vmem:[%s10671_s1 + $0x1c8] sm:$0xff]  ;;  %4272 = vmatprep.subr.mxu0 %v9346_v24  ;;  %v9362_v19 = vld [vmem:[%s10671_s1 + $0x1c0] sm:$0xff]  ;;  %4336 = vmatprep.mubr.f32.mxu0 %v10870_v17  ;;  %11240 = vst [vmem:[#allocation32_spill] sm:$0xff] %v9374_v52 }
 0xf1c   : > { %4273 = vmatpush1.msra.mxu0 %v9351_v56  ;;  %v9369_v11 = vld [vmem:[%s10671_s1 + $0x1a8] sm:$0xff]  ;;  %4407 = vmatprep.mubr.f32.mxu1 %v10870_v17  ;;  %v9381_v62 = vld [vmem:[%s10671_s1 + $0x1a0] sm:$0xff]  ;;  %v9387_v61 = vld [vmem:[%s10671_s1 + $0x1f0] sm:$0xff] }
 0xf1d   : > { %4274 = vmatprep.subr.mxu0 %v9356_v7  ;;  %4343 = vmatprep.subr.mxu1 %v9374_v52  ;;  %v9392_v55 = vld [vmem:[%s10671_s1 + $0x1d8] sm:$0xff]  ;;  %v9398_v15 = vld [vmem:[%s10671_s1 + $0x188] sm:$0xff]  ;;  %v9404_v37 = vld [vmem:[%s10671_s1 + $0x1d0] sm:$0xff] }
 0xf1e   : > { %4275 = vmatpush1.msra.mxu0 %v9362_v19  ;;  %4344 = vmatpush1.msra.mxu1 %v9387_v61  ;;  %v9410_v32 = vld [vmem:[%s10671_s1 + $0x180] sm:$0xff]  ;;  %v9416_v5 = vld [vmem:[%s10671_s1 + $0x1b8] sm:$0xff]  ;;  %v9421_v49 = vld [vmem:[%s10671_s1 + $0x1b0] sm:$0xff] }
 0xf1f   : > { %4276 = vmatprep.subr.mxu0 %v9369_v11  ;;  %4345 = vmatprep.subr.mxu1 %v9392_v55  ;;  %v9427_v58 = vld [vmem:[%s10671_s1 + $0x168] sm:$0xff]  ;;  %v9433_v45 = vld [vmem:[%s10671_s1 + $0x198] sm:$0xff]  ;;  %v9439_v20 = vld [vmem:[%s10671_s1 + $0x160] sm:$0xff] }
 0xf20   : > { %4277 = vmatpush1.msra.mxu0 %v9381_v62  ;;  %4346 = vmatpush1.msra.mxu1 %v9404_v37  ;;  %v9445_v0 = vld [vmem:[%s10671_s1 + $0x190] sm:$0xff]  ;;  %v9451_v9 = vld [vmem:[%s10671_s1 + $0x148] sm:$0xff]  ;;  %v9457_v10 = vld [vmem:[%s10671_s1 + $0x178] sm:$0xff] }
 0xf21   : > { %4278 = vmatprep.subr.mxu0 %v9398_v15  ;;  %4347 = vmatprep.subr.mxu1 %v9416_v5  ;;  %v9463_v63 = vld [vmem:[%s10671_s1 + $0x140] sm:$0xff]  ;;  %v9469_v59 = vld [vmem:[%s10671_s1 + $0x170] sm:$0xff]  ;;  %v9475_v18 = vld [vmem:[%s10671_s1 + $0x128] sm:$0xff] }
 0xf22   : > { %4279 = vmatpush1.msra.mxu0 %v9410_v32  ;;  %4348 = vmatpush1.msra.mxu1 %v9421_v49  ;;  %v9481_v47 = vld [vmem:[%s10671_s1 + $0x158] sm:$0xff]  ;;  %v9487_v44 = vld [vmem:[%s10671_s1 + $0x120] sm:$0xff]  ;;  %v9493_v30 = vld [vmem:[%s10671_s1 + $0x150] sm:$0xff] }
 0xf23   : > { %4280 = vmatprep.subr.mxu0 %v9427_v58  ;;  %4349 = vmatprep.subr.mxu1 %v9433_v45  ;;  %v9499_v28 = vld [vmem:[%s10671_s1 + $0x108] sm:$0xff]  ;;  %v9505_v60 = vld [vmem:[%s10671_s1 + $0x138] sm:$0xff]  ;;  %v9511_v21 = vld [vmem:[%s10671_s1 + $0x100] sm:$0xff] }
 0xf24   : > { %4281 = vmatpush1.msra.mxu0 %v9439_v20  ;;  %4350 = vmatpush1.msra.mxu1 %v9445_v0  ;;  %v9517_v27 = vld [vmem:[%s10671_s1 + $0x130] sm:$0xff]  ;;  %v9523_v36 = vld [vmem:[%s10671_s1 + $0xe8] sm:$0xff]  ;;  %v9529_v26 = vld [vmem:[%s10671_s1 + $0x118] sm:$0xff] }
 0xf25   : > { %4282 = vmatprep.subr.mxu0 %v9451_v9  ;;  %4351 = vmatprep.subr.mxu1 %v9457_v10  ;;  %v9535_v6 = vld [vmem:[%s10671_s1 + $0xe0] sm:$0xff]  ;;  %v9541_v51 = vld [vmem:[%s10671_s1 + $0x110] sm:$0xff]  ;;  %v9547_v25 = vld [vmem:[%s10671_s1 + $0xc8] sm:$0xff] }
 0xf26   : > { %4283 = vmatpush1.msra.mxu0 %v9463_v63  ;;  %4352 = vmatpush1.msra.mxu1 %v9469_v59  ;;  %v9553_v8 = vld [vmem:[%s10671_s1 + $0xf8] sm:$0xff]  ;;  %v9559_v3 = vld [vmem:[%s10671_s1 + $0xc0] sm:$0xff]  ;;  %v9565_v12 = vld [vmem:[%s10671_s1 + $0xf0] sm:$0xff] }
 0xf27   : > { %4284 = vmatprep.subr.mxu0 %v9475_v18  ;;  %4353 = vmatprep.subr.mxu1 %v9481_v47  ;;  %v9571_v43 = vld [vmem:[%s10671_s1 + $0xa8] sm:$0xff]  ;;  %v9577_v23 = vld [vmem:[%s10671_s1 + $0xd8] sm:$0xff]  ;;  %v9583_v40 = vld [vmem:[%s10671_s1 + $0xa0] sm:$0xff] }
 0xf28   : > { %4285 = vmatpush1.msra.mxu0 %v9487_v44  ;;  %4354 = vmatpush1.msra.mxu1 %v9493_v30  ;;  %v9589_v34 = vld [vmem:[%s10671_s1 + $0xd0] sm:$0xff]  ;;  %v9595_v42 = vld [vmem:[%s10671_s1 + $0x88] sm:$0xff]  ;;  %v9601_v50 = vld [vmem:[%s10671_s1 + $0xb8] sm:$0xff] }
 0xf29   : > { %4286 = vmatprep.subr.mxu0 %v9499_v28  ;;  %4355 = vmatprep.subr.mxu1 %v9505_v60  ;;  %11241 = vst [vmem:[#allocation33_spill] sm:$0xff] %v9595_v42  ;;  %v9607_v39 = vld [vmem:[%s10671_s1 + $0x80] sm:$0xff]  ;;  %v9613_v13 = vld [vmem:[%s10671_s1 + $0xb0] sm:$0xff]  ;;  %v9619_v22 = vld [vmem:[%s10671_s1 + $0x68] sm:$0xff] }
 0xf2a   : > { %4287 = vmatpush1.msra.mxu0 %v9511_v21  ;;  %4356 = vmatpush1.msra.mxu1 %v9517_v27  ;;  %11242 = vst [vmem:[#allocation34_spill] sm:$0xff] %v9607_v39  ;;  %11243 = vst [vmem:[#allocation35_spill] sm:$0xff] %v9619_v22  ;;  %v9625_v33 = vld [vmem:[%s10671_s1 + $0x98] sm:$0xff]  ;;  %v9631_v14 = vld [vmem:[%s10671_s1 + $0x60] sm:$0xff] }
 0xf2b   : > { %4288 = vmatprep.subr.mxu0 %v9523_v36  ;;  %4357 = vmatprep.subr.mxu1 %v9529_v26  ;;  %11244 = vst [vmem:[#allocation36_spill] sm:$0xff] %v9625_v33  ;;  %11245 = vst [vmem:[#allocation37_spill] sm:$0xff] %v9631_v14  ;;  %v9637_v31 = vld [vmem:[%s10671_s1 + $0x90] sm:$0xff]  ;;  %v9643_v4 = vld [vmem:[%s10671_s1 + $0x48] sm:$0xff] }
 0xf2c   : > { %4289 = vmatpush1.msra.mxu0 %v9535_v6  ;;  %4358 = vmatpush1.msra.mxu1 %v9541_v51  ;;  %11246 = vst [vmem:[#allocation38_spill] sm:$0xff] %v9637_v31  ;;  %11247 = vst [vmem:[#allocation39_spill] sm:$0xff] %v9643_v4  ;;  %v9649_v2 = vld [vmem:[%s10671_s1 + $0x78] sm:$0xff]  ;;  %v9655_v57 = vld [vmem:[%s10671_s1 + $0x40] sm:$0xff] }
 0xf2d   : > { %4290 = vmatprep.subr.mxu0 %v9547_v25  ;;  %4359 = vmatprep.subr.mxu1 %v9553_v8  ;;  %11248 = vst [vmem:[#allocation40_spill] sm:$0xff] %v9649_v2  ;;  %11249 = vst [vmem:[#allocation41_spill] sm:$0xff] %v9655_v57  ;;  %v9661_v48 = vld [vmem:[%s10671_s1 + $0x70] sm:$0xff]  ;;  %v9667_v35 = vld [vmem:[%s10671_s1 + $0x28] sm:$0xff] }
 0xf2e   : > { %4291 = vmatpush1.msra.mxu0 %v9559_v3  ;;  %4360 = vmatpush1.msra.mxu1 %v9565_v12  ;;  %11250 = vst [vmem:[#allocation42_spill] sm:$0xff] %v9661_v48  ;;  %11251 = vst [vmem:[#allocation43_spill] sm:$0xff] %v9667_v35  ;;  %v9673_v1 = vld [vmem:[%s10671_s1 + $0x58] sm:$0xff]  ;;  %v9679_v41 = vld [vmem:[%s10671_s1 + $0x20] sm:$0xff] }
 0xf2f   : > { %4292 = vmatprep.subr.mxu0 %v9571_v43  ;;  %4361 = vmatprep.subr.mxu1 %v9577_v23  ;;  %11252 = vst [vmem:[#allocation44_spill] sm:$0xff] %v9673_v1  ;;  %11253 = vst [vmem:[#allocation45_spill] sm:$0xff] %v9679_v41  ;;  %v9685_v29 = vld [vmem:[%s10671_s1 + $0x50] sm:$0xff]  ;;  %v9691_v16 = vld [vmem:[%s10671_s1 + $0x8] sm:$0xff] }
 0xf30   : > { %4293 = vmatpush1.msra.mxu0 %v9583_v40  ;;  %4362 = vmatpush1.msra.mxu1 %v9589_v34  ;;  %11254 = vst [vmem:[#allocation46_spill] sm:$0xff] %v9685_v29  ;;  %11255 = vst [vmem:[#allocation47_spill] sm:$0xff] %v9691_v16  ;;  %v9697_v53 = vld [vmem:[%s10671_s1 + $0x38] sm:$0xff]  ;;  %v9703_v38 = vld [vmem:[%s10671_s1] sm:$0xff] }
 0xf31   : > { %4294 = vmatprep.subr.mxu0 %v9595_v42  ;;  %4363 = vmatprep.subr.mxu1 %v9601_v50  ;;  %11256 = vst [vmem:[#allocation48_spill] sm:$0xff] %v9697_v53  ;;  %11257 = vst [vmem:[#allocation49_spill] sm:$0xff] %v9703_v38  ;;  %v9709_v46 = vld [vmem:[%s10671_s1 + $0x30] sm:$0xff]  ;;  %v4196_v54 = vld [vmem:[#allocation2] sm:$0xff] }
 0xf32   : > { %4295 = vmatpush1.msra.mxu0 %v9607_v39  ;;  %4364 = vmatpush1.msra.mxu1 %v9613_v13  ;;  %11258 = vst [vmem:[#allocation50_spill] sm:$0xff] %v9709_v46  ;;  %v9716_v17 = vld [vmem:[%s10671_s1 + $0x18] sm:$0xff] }
 0xf33   : > { %4296 = vmatprep.subr.mxu0 %v9619_v22  ;;  %4365 = vmatprep.subr.mxu1 %v9625_v33  ;;  %11259 = vst [vmem:[#allocation51_spill] sm:$0xff] %v9716_v17 }
 0xf34   : > { %4297 = vmatpush1.msra.mxu0 %v9631_v14  ;;  %4366 = vmatpush1.msra.mxu1 %v9637_v31 }
 0xf35   : > { %4298 = vmatprep.subr.mxu0 %v9643_v4  ;;  %4367 = vmatprep.subr.mxu1 %v9649_v2 }
 0xf36   : > { %4299 = vmatpush1.msra.mxu0 %v9655_v57  ;;  %4368 = vmatpush1.msra.mxu1 %v9661_v48 }
 0xf37   : > { %4300 = vmatprep.subr.mxu0 %v9667_v35  ;;  %4369 = vmatprep.subr.mxu1 %v9673_v1  ;;  %v9723_v35 = vld [vmem:[%s10671_s1 + $0x10] sm:$0xff] }
 0xf38   : > { %4301 = vmatpush1.msra.mxu0 %v9679_v41  ;;  %4370 = vmatpush1.msra.mxu1 %v9685_v29  ;;  %11260 = vst [vmem:[#allocation52_spill] sm:$0xff] %v9723_v35 }
 0xf39   : > { %4302 = vmatprep.subr.mxu0 %v9691_v16  ;;  %4371 = vmatprep.subr.mxu1 %v9697_v53 }
 0xf3a   : > { %4303 = vmatpush1.msra.mxu0 %v9703_v38  ;;  %4372 = vmatpush1.msra.mxu1 %v9709_v46 }
 0xf3b   : > { %4337 = vmatmul.mubr.f32.vlgmr.msra.gmra.mxu0 %v4196_v54  ;;  %4373 = vmatprep.subr.mxu1 %v9716_v17 }
 0xf3c   : > { %4374 = vmatpush1.msra.mxu1 %v9723_v35  ;;  %4513 = vmatprep.subr.mxu0 %v9346_v24 }
 0xf3d   : > { %4408 = vmatmul.mubr.f32.vlgmr.msra.gmra.mxu1 %v4196_v54  ;;  %4584 = vmatprep.subr.mxu1 %v9374_v52  ;;  %v11261_v54 = vld [vmem:[#allocation43_spill] sm:$0xff] }
 0xf3e   : > { %4514 = vmatpush1.msra.mxu0 %v9351_v56  ;;  %4585 = vmatpush1.msra.mxu1 %v9387_v61 }
 0xf3f   : > { %4515 = vmatprep.subr.mxu0 %v9356_v7  ;;  %4586 = vmatprep.subr.mxu1 %v9392_v55 }
 0xf40   : > { %4516 = vmatpush1.msra.mxu0 %v9362_v19  ;;  %4587 = vmatpush1.msra.mxu1 %v9404_v37 }
 0xf41   : > { %4517 = vmatprep.subr.mxu0 %v9369_v11  ;;  %4588 = vmatprep.subr.mxu1 %v9416_v5 }
 0xf42   : > { %4518 = vmatpush1.msra.mxu0 %v9381_v62  ;;  %4589 = vmatpush1.msra.mxu1 %v9421_v49 }
 0xf43   : > { %4519 = vmatprep.subr.mxu0 %v9398_v15  ;;  %4590 = vmatprep.subr.mxu1 %v9433_v45 }
 0xf44   : > { %4520 = vmatpush1.msra.mxu0 %v9410_v32  ;;  %4591 = vmatpush1.msra.mxu1 %v9445_v0 }
 0xf45   : > { %4521 = vmatprep.subr.mxu0 %v9427_v58  ;;  %4592 = vmatprep.subr.mxu1 %v9457_v10 }
 0xf46   : > { %4522 = vmatpush1.msra.mxu0 %v9439_v20  ;;  %4593 = vmatpush1.msra.mxu1 %v9469_v59 }
 0xf47   : > { %4523 = vmatprep.subr.mxu0 %v9451_v9  ;;  %4594 = vmatprep.subr.mxu1 %v9481_v47 }
 0xf48   : > { %4524 = vmatpush1.msra.mxu0 %v9463_v63  ;;  %4595 = vmatpush1.msra.mxu1 %v9493_v30 }
 0xf49   : > { %4525 = vmatprep.subr.mxu0 %v9475_v18  ;;  %4596 = vmatprep.subr.mxu1 %v9505_v60 }
 0xf4a   : > { %4526 = vmatpush1.msra.mxu0 %v9487_v44  ;;  %4597 = vmatpush1.msra.mxu1 %v9517_v27 }
 0xf4b   : > { %4527 = vmatprep.subr.mxu0 %v9499_v28  ;;  %4598 = vmatprep.subr.mxu1 %v9529_v26 }
 0xf4c   : > { %4528 = vmatpush1.msra.mxu0 %v9511_v21  ;;  %4599 = vmatpush1.msra.mxu1 %v9541_v51 }
 0xf4d   : > { %4529 = vmatprep.subr.mxu0 %v9523_v36  ;;  %4600 = vmatprep.subr.mxu1 %v9553_v8 }
 0xf4e   : > { %4530 = vmatpush1.msra.mxu0 %v9535_v6  ;;  %4601 = vmatpush1.msra.mxu1 %v9565_v12 }
 0xf4f   : > { %4531 = vmatprep.subr.mxu0 %v9547_v25  ;;  %4602 = vmatprep.subr.mxu1 %v9577_v23 }
 0xf50   : > { %4532 = vmatpush1.msra.mxu0 %v9559_v3  ;;  %4603 = vmatpush1.msra.mxu1 %v9589_v34 }
 0xf51   : > { %4533 = vmatprep.subr.mxu0 %v9571_v43  ;;  %4604 = vmatprep.subr.mxu1 %v9601_v50 }
 0xf52   : > { %4534 = vmatpush1.msra.mxu0 %v9583_v40  ;;  %4605 = vmatpush1.msra.mxu1 %v9613_v13 }
 0xf53   : > { %4535 = vmatprep.subr.mxu0 %v9595_v42  ;;  %4606 = vmatprep.subr.mxu1 %v9625_v33 }
 0xf54   : > { %4536 = vmatpush1.msra.mxu0 %v9607_v39  ;;  %4607 = vmatpush1.msra.mxu1 %v9637_v31 }
 0xf55   : > { %4537 = vmatprep.subr.mxu0 %v9619_v22  ;;  %4608 = vmatprep.subr.mxu1 %v9649_v2 }
 0xf56   : > { %4538 = vmatpush1.msra.mxu0 %v9631_v14  ;;  %4609 = vmatpush1.msra.mxu1 %v9661_v48  ;;  %v11265_v14 = vld [vmem:[#allocation6_spill] sm:$0xff] }
 0xf57   : > { %4539 = vmatprep.subr.mxu0 %v9643_v4  ;;  %4610 = vmatprep.subr.mxu1 %v9673_v1  ;;  %v11262_v1 = vmov 0.0  }
 0xf58   : > { %4540 = vmatpush1.msra.mxu0 %v9655_v57  ;;  %4611 = vmatpush1.msra.mxu1 %v9685_v29  ;;  %v11263_v29 = vld [vmem:[#allocation4_spill] sm:$0xff] }
 0xf59   : > { %4541 = vmatprep.subr.mxu0 %v11261_v54  ;;  %4612 = vmatprep.subr.mxu1 %v9697_v53  ;;  %v4198_v53 = vld [vmem:[%s6758_s27] sm:$0xff]  ;;  %v4199_v54 = vld [vmem:[%s6758_s27 + $0x8] sm:$0xff] }
 0xf5a   : > { %4542 = vmatpush1.msra.mxu0 %v9679_v41  ;;  %4613 = vmatpush1.msra.mxu1 %v9709_v46  ;;  %v4200_v41 = vunpack.c.l.bf16 %v4198_v53  ;;  %v4201_v46 = vunpack.c.h.bf16 %v4198_v53  ;;  %v4202_v57 = vunpack.c.l.bf16 %v4199_v54  ;;  %v4203_v39 = vunpack.c.h.bf16 %v4199_v54  ;;  %v11266_v53 = vld [vmem:[#allocation7_spill] sm:$0xff] }
 0xf5b   : > { %4543 = vmatprep.subr.mxu0 %v9691_v16  ;;  %4614 = vmatprep.subr.mxu1 %v9716_v17  ;;  %v11264_v17 = vld [vmem:[#allocation5_spill] sm:$0xff] }
 0xf5c   : > { %4544 = vmatpush1.msra.mxu0 %v9703_v38  ;;  %4577 = vmatprep.mubr.f32.mxu0 %v11262_v1  ;;  %v4204_v16 = vadd.f32 %v4200_v41, %v11263_v29  ;;  %v4205_v4 = vadd.f32 %v4201_v46, %v11264_v17  ;;  %v4206_v2 = vadd.f32 %v4202_v57, %v11265_v14 }
 0xf5d   : > { %4615 = vmatpush1.msra.mxu1 %v9723_v35  ;;  %4648 = vmatprep.mubr.f32.mxu1 %v11262_v1  ;;  %v4207_v33 = vadd.f32 %v4203_v39, %v11266_v53 }
 0xf5e   : > { %4755 = vmatprep.subr.mxu0 %v9346_v24  ;;  %4826 = vmatprep.subr.mxu1 %v9374_v52 }
 0xffb   : > { %v4338_v38 = vpop.f32.mrf.mxu0 }
 0xffc   : > { %v4414_v48 = vadd.f32 %v4338_v38, %v4204_v16 }
 0xffd   : > { %v4340_v35 = vpop.f32.mrf.mxu0  ;;  %v4409_v22 = vpop.f32.mrf.mxu1 }
 0xffe   : > { %v4418_v1 = vmul.f32 0.5, %v4414_v48  ;;  %v4415_v31 = vadd.f32 %v4340_v35, %v4205_v4  ;;  %v4416_v52 = vadd.f32 %v4409_v22, %v4206_v2  ;;  %v4197_v48 = vld [vmem:[#allocation3] sm:$0xff] }
 0xfff   : > { %v4411_v41 = vpop.f32.mrf.mxu1 }
0x1000   : > { %6597 = vtanh.f32 %v4418_v1  ;;  %v4422_v24 = vmul.f32 0.5, %v4415_v31  ;;  %v4417_v29 = vadd.f32 %v4411_v41, %v4207_v33 }
0x1002   : > { %6599 = vtanh.f32 %v4422_v24  ;;  %v4427_v42 = vmul.f32 0.5, %v4417_v29  ;;  %v6352_v29 = vld [vmem:[%s6758_s27 + $0x10] sm:$0xff] }
0x1003   : > { %6601 = vtanh.f32 %v4416_v52  ;;  %v4441_v54 = vunpack.c.l.bf16 %v6352_v29  ;;  %v4442_v41 = vunpack.c.h.bf16 %v6352_v29 }
0x1004   : > { %6603 = vtanh.f32 %v4427_v42  ;;  %v11288_v42 = vld [vmem:[#allocation31_spill] sm:$0xff] }
0x100d   : > { %v6598_v46 = vpop.eup %6597 }
0x100e   : > { %v4420_v17 = vmul.f32 0.5, %v6598_v46  ;;  %v6353_v46 = vld [vmem:[%s6758_s27 + $0x18] sm:$0xff] }
0x100f   : > { %v6600_v16 = vpop.eup %6599 }
0x1010   : > { %v4421_v38 = vadd.f32 0.5, %v4420_v17  ;;  %v4424_v57 = vmul.f32 0.5, %v6600_v16  ;;  %v6602_v14 = vpop.eup %6601  ;;  %v11269_v17 = vld [vmem:[#allocation34_spill] sm:$0xff]  ;;  %v11290_v16 = vld [vmem:[#allocation4_spill] sm:$0xff] }
0x1011   : > { %v6604_v24 = vpop.eup %6603 }
0x1012   : > { %v4425_v4 = vadd.f32 0.5, %v4424_v57  ;;  %v4431_v22 = vmul.f32 %v6602_v14, %v4421_v38  ;;  %v4429_v52 = vmul.f32 0.5, %v6604_v24  ;;  %v11289_v14 = vld [vmem:[#allocation32_spill] sm:$0xff]  ;;  %v4445_v38 = vadd.f32 %v4441_v54, %v11290_v16 }
0x1013   : > { %v4443_v57 = vunpack.c.l.bf16 %v6353_v46 }
0x1014   : > { %v4432_v31 = vmul.f32 %v4425_v4, %v4197_v48  ;;  %v4430_v39 = vadd.f32 0.5, %v4429_v52  ;;  %v11291_v48 = vld [vmem:[#allocation5_spill] sm:$0xff] }
0x1015   : > { %v4446_v4 = vadd.f32 %v4442_v41, %v11291_v48 }
0x1016   : > { %v9803_v2 = vadd.f32 %v4432_v31, %v4431_v22 }
0x1018   : > { %6605 = vtanh.f32 %v9803_v2 }
0x1025   : > { %v6606_v33 = vpop.eup %6605 }
0x1026   : > { %v4435_v35 = vmul.f32 %v6606_v33, %v4430_v39  ;;  %v11292_v39 = vld [vmem:[#allocation6_spill] sm:$0xff] }
0x1027   : > { %v4447_v33 = vadd.f32 %v4443_v57, %v11292_v39 }
0x1028   : > { %v4436_v1 = vpack.c.bf16 %v4435_v35, %v4435_v35  ;;  %4578 = vmatmul.mubr.f32.vlgmr.msra.gmra.mxu0 %v4435_v35  ;;  %4649 = vmatmul.mubr.f32.vlgmr.msra.gmra.mxu1 %v4435_v35 }
0x1029   : > { %4756 = vmatpush1.msra.mxu0 %v9351_v56  ;;  %4827 = vmatpush1.msra.mxu1 %v9387_v61 }
0x102a   : > { %4437 = vst [vmem:[%s6763_s30] sm:$0xf] %v4436_v1  ;;  %4757 = vmatprep.subr.mxu0 %v9356_v7  ;;  %4828 = vmatprep.subr.mxu1 %v9392_v55  ;;  %v11267_v7 = vld [vmem:[#allocation33_spill] sm:$0xff] }
0x102b   : > { %4758 = vmatpush1.msra.mxu0 %v9362_v19  ;;  %4829 = vmatpush1.msra.mxu1 %v9404_v37  ;;  %v11268_v19 = vld [vmem:[#allocation36_spill] sm:$0xff] }
0x102c   : > { %4759 = vmatprep.subr.mxu0 %v9369_v11  ;;  %4830 = vmatprep.subr.mxu1 %v9416_v5  ;;  %v11270_v11 = vld [vmem:[#allocation38_spill] sm:$0xff] }
0x102d   : > { %4760 = vmatpush1.msra.mxu0 %v9381_v62  ;;  %4831 = vmatpush1.msra.mxu1 %v9421_v49  ;;  %v11271_v62 = vld [vmem:[#allocation35_spill] sm:$0xff] }
0x102e   : > { %4761 = vmatprep.subr.mxu0 %v9398_v15  ;;  %4832 = vmatprep.subr.mxu1 %v9433_v45  ;;  %v11272_v15 = vld [vmem:[#allocation40_spill] sm:$0xff] }
0x102f   : > { %4762 = vmatpush1.msra.mxu0 %v9410_v32  ;;  %4833 = vmatpush1.msra.mxu1 %v9445_v0  ;;  %v11273_v32 = vld [vmem:[#allocation37_spill] sm:$0xff] }
0x1030   : > { %4763 = vmatprep.subr.mxu0 %v9427_v58  ;;  %4834 = vmatprep.subr.mxu1 %v9457_v10  ;;  %v11274_v58 = vld [vmem:[#allocation42_spill] sm:$0xff] }
0x1031   : > { %4764 = vmatpush1.msra.mxu0 %v9439_v20  ;;  %4835 = vmatpush1.msra.mxu1 %v9469_v59  ;;  %v11275_v20 = vld [vmem:[#allocation39_spill] sm:$0xff] }
0x1032   : > { %4765 = vmatprep.subr.mxu0 %v9451_v9  ;;  %4836 = vmatprep.subr.mxu1 %v9481_v47  ;;  %v11276_v9 = vld [vmem:[#allocation44_spill] sm:$0xff] }
0x1033   : > { %4766 = vmatpush1.msra.mxu0 %v9463_v63  ;;  %4837 = vmatpush1.msra.mxu1 %v9493_v30  ;;  %v11277_v63 = vld [vmem:[#allocation41_spill] sm:$0xff] }
0x1034   : > { %4767 = vmatprep.subr.mxu0 %v9475_v18  ;;  %4838 = vmatprep.subr.mxu1 %v9505_v60  ;;  %v11278_v18 = vld [vmem:[#allocation46_spill] sm:$0xff] }
0x1035   : > { %4768 = vmatpush1.msra.mxu0 %v9487_v44  ;;  %4839 = vmatpush1.msra.mxu1 %v9517_v27  ;;  %v11279_v44 = vld [vmem:[#allocation43_spill] sm:$0xff] }
0x1036   : > { %4769 = vmatprep.subr.mxu0 %v9499_v28  ;;  %4840 = vmatprep.subr.mxu1 %v9529_v26  ;;  %v11280_v28 = vld [vmem:[#allocation48_spill] sm:$0xff] }
0x1037   : > { %4770 = vmatpush1.msra.mxu0 %v9511_v21  ;;  %4841 = vmatpush1.msra.mxu1 %v9541_v51  ;;  %v11281_v21 = vld [vmem:[#allocation45_spill] sm:$0xff] }
0x1038   : > { %4771 = vmatprep.subr.mxu0 %v9523_v36  ;;  %4842 = vmatprep.subr.mxu1 %v9553_v8  ;;  %v11282_v36 = vld [vmem:[#allocation50_spill] sm:$0xff] }
0x1039   : > { %4772 = vmatpush1.msra.mxu0 %v9535_v6  ;;  %4843 = vmatpush1.msra.mxu1 %v9565_v12  ;;  %v11283_v6 = vld [vmem:[#allocation47_spill] sm:$0xff] }
0x103a   : > { %4773 = vmatprep.subr.mxu0 %v9547_v25  ;;  %4844 = vmatprep.subr.mxu1 %v9577_v23  ;;  %v11284_v25 = vld [vmem:[#allocation51_spill] sm:$0xff] }
0x103b   : > { %4774 = vmatpush1.msra.mxu0 %v9559_v3  ;;  %4845 = vmatpush1.msra.mxu1 %v9589_v34  ;;  %v11285_v3 = vld [vmem:[#allocation49_spill] sm:$0xff] }
0x103c   : > { %4775 = vmatprep.subr.mxu0 %v9571_v43  ;;  %4846 = vmatprep.subr.mxu1 %v9601_v50  ;;  %v11286_v43 = vmov 0.0  }
0x103d   : > { %4776 = vmatpush1.msra.mxu0 %v9583_v40  ;;  %4847 = vmatpush1.msra.mxu1 %v9613_v13  ;;  %v11287_v40 = vld [vmem:[#allocation52_spill] sm:$0xff] }
0x103e   : > { %4777 = vmatprep.subr.mxu0 %v11267_v7  ;;  %4848 = vmatprep.subr.mxu1 %v11268_v19 }
0x103f   : > { %4778 = vmatpush1.msra.mxu0 %v11269_v17  ;;  %4849 = vmatpush1.msra.mxu1 %v11270_v11  ;;  %v4444_v17 = vunpack.c.h.bf16 %v6353_v46 }
0x1040   : > { %4779 = vmatprep.subr.mxu0 %v11271_v62  ;;  %4850 = vmatprep.subr.mxu1 %v11272_v15 }
0x1041   : > { %4780 = vmatpush1.msra.mxu0 %v11273_v32  ;;  %4851 = vmatpush1.msra.mxu1 %v11274_v58  ;;  %v4448_v32 = vadd.f32 %v4444_v17, %v11266_v53 }
0x1042   : > { %4781 = vmatprep.subr.mxu0 %v11275_v20  ;;  %4852 = vmatprep.subr.mxu1 %v11276_v9 }
0x1043   : > { %4782 = vmatpush1.msra.mxu0 %v11277_v63  ;;  %4853 = vmatpush1.msra.mxu1 %v11278_v18 }
0x1044   : > { %4783 = vmatprep.subr.mxu0 %v11279_v44  ;;  %4854 = vmatprep.subr.mxu1 %v11280_v28 }
0x1045   : > { %4784 = vmatpush1.msra.mxu0 %v11281_v21  ;;  %4855 = vmatpush1.msra.mxu1 %v11282_v36 }
0x1046   : > { %4785 = vmatprep.subr.mxu0 %v11283_v6  ;;  %4856 = vmatprep.subr.mxu1 %v11284_v25 }
0x1047   : > { %4786 = vmatpush1.msra.mxu0 %v11285_v3  ;;  %4819 = vmatprep.mubr.f32.mxu0 %v11286_v43 }
0x1048   : > { %4857 = vmatpush1.msra.mxu1 %v11287_v40  ;;  %4890 = vmatprep.mubr.f32.mxu1 %v11286_v43 }
0x1049   : > { %4997 = vmatprep.subr.mxu0 %v11288_v42  ;;  %5068 = vmatprep.subr.mxu1 %v11289_v14 }
0x10e8   : > { %v4579_v31 = vpop.f32.mrf.mxu0  ;;  %v4650_v1 = vpop.f32.mrf.mxu1 }
0x10e9   : > { %v4655_v22 = vadd.f32 %v4579_v31, %v4445_v38  ;;  %v4657_v62 = vadd.f32 %v4650_v1, %v4447_v33  ;;  %v6356_v33 = vld [vmem:[%s6758_s27 + $0x28] sm:$0xff] }
0x10ea   : > { %v4581_v24 = vpop.f32.mrf.mxu0  ;;  %v4652_v20 = vpop.f32.mrf.mxu1  ;;  %v4685_v1 = vunpack.c.l.bf16 %v6356_v33 }
0x10eb   : > { %v4659_v52 = vmul.f32 0.5, %v4655_v22  ;;  %v4656_v35 = vadd.f32 %v4581_v24, %v4446_v4  ;;  %v4658_v63 = vadd.f32 %v4652_v20, %v4448_v32 }
0x10ed   : > { %6607 = vtanh.f32 %v4659_v52  ;;  %v4663_v7 = vmul.f32 0.5, %v4656_v35  ;;  %v4668_v44 = vmul.f32 0.5, %v4658_v63  ;;  %v4689_v63 = vadd.f32 %v4685_v1, %v11292_v39 }
0x10ef   : > { %6609 = vtanh.f32 %v4663_v7 }
0x10f0   : > { %6611 = vtanh.f32 %v4657_v62 }
0x10f1   : > { %6613 = vtanh.f32 %v4668_v44 }
0x10fa   : > { %v6608_v21 = vpop.eup %6607 }
0x10fb   : > { %v4661_v6 = vmul.f32 0.5, %v6608_v21 }
0x10fc   : > { %v6610_v3 = vpop.eup %6609 }
0x10fd   : > { %v4662_v42 = vadd.f32 0.5, %v4661_v6  ;;  %v4665_v14 = vmul.f32 0.5, %v6610_v3  ;;  %v6612_v54 = vpop.eup %6611  ;;  %v4686_v3 = vunpack.c.h.bf16 %v6356_v33 }
0x10fe   : > { %v6614_v57 = vpop.eup %6613 }
0x10ff   : > { %v4666_v29 = vadd.f32 0.5, %v4665_v14  ;;  %v4672_v41 = vmul.f32 %v6612_v54, %v4662_v42  ;;  %v4670_v4 = vmul.f32 0.5, %v6614_v57  ;;  %v4690_v14 = vadd.f32 %v4686_v3, %v11266_v53  ;;  %v10159_v3 = vld [vmem:[%s10671_s1 + $0x1b0] sm:$0xff] }
0x1101   : > { %v4673_v46 = vmul.f32 %v4666_v29, %v9803_v2  ;;  %v4671_v31 = vadd.f32 0.5, %v4670_v4  ;;  %v10051_v2 = vld [vmem:[%s10671_s1 + $0x68] sm:$0xff] }
0x1102   : > { %11295 = vst [vmem:[#allocation34_spill] sm:$0xff] %v10051_v2 }
0x1103   : > { %v9880_v38 = vadd.f32 %v4673_v46, %v4672_v41 }
0x1105   : > { %6615 = vtanh.f32 %v9880_v38 }
0x1112   : > { %v6616_v22 = vpop.eup %6615 }
0x1113   : > { %v4676_v24 = vmul.f32 %v6616_v22, %v4671_v31 }
0x1115   : > { %v4677_v52 = vpack.c.bf16 %v4676_v24, %v4676_v24  ;;  %4820 = vmatmul.mubr.f32.vlgmr.msra.gmra.mxu0 %v4676_v24  ;;  %4891 = vmatmul.mubr.f32.vlgmr.msra.gmra.mxu1 %v4676_v24 }
0x1116   : > { %4998 = vmatpush1.msra.mxu0 %v9351_v56  ;;  %5069 = vmatpush1.msra.mxu1 %v9387_v61  ;;  %v9921_v56 = vld [vmem:[%s10671_s1 + $0x1c8] sm:$0xff]  ;;  %v9927_v61 = vld [vmem:[%s10671_s1 + $0x1c0] sm:$0xff] }
0x1117   : > { %6354 = vst [vmem:[%s6763_s30 + $0x4] sm:$0xf] %v4677_v52  ;;  %5070 = vmatprep.subr.mxu1 %v9392_v55  ;;  %5061 = vmatprep.mubr.f32.mxu0 %v11286_v43  ;;  %v9933_v55 = vld [vmem:[%s10671_s1 + $0x1a8] sm:$0xff] }
0x1118   : > { %5071 = vmatpush1.msra.mxu1 %v9404_v37  ;;  %5132 = vmatprep.mubr.f32.mxu1 %v11286_v43  ;;  %v9939_v37 = vld [vmem:[%s10671_s1 + $0x1a0] sm:$0xff] }
0x1119   : > { %5072 = vmatprep.subr.mxu1 %v9416_v5  ;;  %4999 = vmatprep.subr.mxu0 %v9921_v56  ;;  %v9945_v5 = vld [vmem:[%s10671_s1 + $0x188] sm:$0xff] }
0x111a   : > { %5073 = vmatpush1.msra.mxu1 %v9421_v49  ;;  %5000 = vmatpush1.msra.mxu0 %v9927_v61  ;;  %v9951_v49 = vld [vmem:[%s10671_s1 + $0x180] sm:$0xff] }
0x111b   : > { %5074 = vmatprep.subr.mxu1 %v9433_v45  ;;  %5001 = vmatprep.subr.mxu0 %v9933_v55  ;;  %v9957_v45 = vld [vmem:[%s10671_s1 + $0x168] sm:$0xff] }
0x111c   : > { %5075 = vmatpush1.msra.mxu1 %v9445_v0  ;;  %5002 = vmatpush1.msra.mxu0 %v9939_v37  ;;  %v9963_v0 = vld [vmem:[%s10671_s1 + $0x160] sm:$0xff] }
0x111d   : > { %5076 = vmatprep.subr.mxu1 %v9457_v10  ;;  %5003 = vmatprep.subr.mxu0 %v9945_v5  ;;  %v9969_v10 = vld [vmem:[%s10671_s1 + $0x148] sm:$0xff] }
0x111e   : > { %5077 = vmatpush1.msra.mxu1 %v9469_v59  ;;  %5004 = vmatpush1.msra.mxu0 %v9951_v49  ;;  %v9975_v59 = vld [vmem:[%s10671_s1 + $0x140] sm:$0xff] }
0x111f   : > { %5078 = vmatprep.subr.mxu1 %v9481_v47  ;;  %5005 = vmatprep.subr.mxu0 %v9957_v45  ;;  %v9981_v47 = vld [vmem:[%s10671_s1 + $0x128] sm:$0xff] }
0x1120   : > { %5079 = vmatpush1.msra.mxu1 %v9493_v30  ;;  %5006 = vmatpush1.msra.mxu0 %v9963_v0  ;;  %v9987_v30 = vld [vmem:[%s10671_s1 + $0x120] sm:$0xff] }
0x1121   : > { %5080 = vmatprep.subr.mxu1 %v9505_v60  ;;  %5007 = vmatprep.subr.mxu0 %v9969_v10  ;;  %v9993_v60 = vld [vmem:[%s10671_s1 + $0x108] sm:$0xff] }
0x1122   : > { %5081 = vmatpush1.msra.mxu1 %v9517_v27  ;;  %5008 = vmatpush1.msra.mxu0 %v9975_v59  ;;  %v9999_v27 = vld [vmem:[%s10671_s1 + $0x100] sm:$0xff] }
0x1123   : > { %5082 = vmatprep.subr.mxu1 %v9529_v26  ;;  %5009 = vmatprep.subr.mxu0 %v9981_v47  ;;  %v10005_v26 = vld [vmem:[%s10671_s1 + $0xe8] sm:$0xff] }
0x1124   : > { %5083 = vmatpush1.msra.mxu1 %v9541_v51  ;;  %5010 = vmatpush1.msra.mxu0 %v9987_v30  ;;  %v10010_v51 = vld [vmem:[%s10671_s1 + $0xe0] sm:$0xff] }
0x1125   : > { %5084 = vmatprep.subr.mxu1 %v9553_v8  ;;  %5011 = vmatprep.subr.mxu0 %v9993_v60  ;;  %v10015_v8 = vld [vmem:[%s10671_s1 + $0xc8] sm:$0xff] }
0x1126   : > { %5085 = vmatpush1.msra.mxu1 %v9565_v12  ;;  %5012 = vmatpush1.msra.mxu0 %v9999_v27  ;;  %v10021_v12 = vld [vmem:[%s10671_s1 + $0xc0] sm:$0xff] }
0x1127   : > { %5086 = vmatprep.subr.mxu1 %v9577_v23  ;;  %5013 = vmatprep.subr.mxu0 %v10005_v26  ;;  %v10027_v23 = vld [vmem:[%s10671_s1 + $0xa8] sm:$0xff] }
0x1128   : > { %5087 = vmatpush1.msra.mxu1 %v9589_v34  ;;  %5014 = vmatpush1.msra.mxu0 %v10010_v51  ;;  %v10033_v34 = vld [vmem:[%s10671_s1 + $0xa0] sm:$0xff] }
0x1129   : > { %5088 = vmatprep.subr.mxu1 %v9601_v50  ;;  %5015 = vmatprep.subr.mxu0 %v10015_v8  ;;  %v10039_v50 = vld [vmem:[%s10671_s1 + $0x88] sm:$0xff] }
0x112a   : > { %5089 = vmatpush1.msra.mxu1 %v9613_v13  ;;  %5016 = vmatpush1.msra.mxu0 %v10021_v12  ;;  %11293 = vst [vmem:[#allocation33_spill] sm:$0xff] %v10039_v50  ;;  %v10045_v13 = vld [vmem:[%s10671_s1 + $0x80] sm:$0xff] }
0x112b   : > { %5090 = vmatprep.subr.mxu1 %v11268_v19  ;;  %5017 = vmatprep.subr.mxu0 %v10027_v23  ;;  %11294 = vst [vmem:[#allocation36_spill] sm:$0xff] %v10045_v13  ;;  %v10057_v19 = vld [vmem:[%s10671_s1 + $0x60] sm:$0xff] }
0x112c   : > { %5091 = vmatpush1.msra.mxu1 %v11270_v11  ;;  %5018 = vmatpush1.msra.mxu0 %v10033_v34  ;;  %11296 = vst [vmem:[#allocation38_spill] sm:$0xff] %v10057_v19  ;;  %v10063_v11 = vld [vmem:[%s10671_s1 + $0x48] sm:$0xff] }
0x112d   : > { %5092 = vmatprep.subr.mxu1 %v11272_v15  ;;  %5019 = vmatprep.subr.mxu0 %v10039_v50  ;;  %11297 = vst [vmem:[#allocation35_spill] sm:$0xff] %v10063_v11  ;;  %v10069_v15 = vld [vmem:[%s10671_s1 + $0x40] sm:$0xff] }
0x112e   : > { %5093 = vmatpush1.msra.mxu1 %v11274_v58  ;;  %5020 = vmatpush1.msra.mxu0 %v10045_v13  ;;  %11298 = vst [vmem:[#allocation40_spill] sm:$0xff] %v10069_v15  ;;  %v10075_v58 = vld [vmem:[%s10671_s1 + $0x28] sm:$0xff] }
0x112f   : > { %5094 = vmatprep.subr.mxu1 %v11276_v9  ;;  %5021 = vmatprep.subr.mxu0 %v10051_v2  ;;  %11299 = vst [vmem:[#allocation37_spill] sm:$0xff] %v10075_v58  ;;  %v10081_v9 = vld [vmem:[%s10671_s1 + $0x20] sm:$0xff] }
0x1130   : > { %5095 = vmatpush1.msra.mxu1 %v11278_v18  ;;  %5022 = vmatpush1.msra.mxu0 %v10057_v19  ;;  %11300 = vst [vmem:[#allocation42_spill] sm:$0xff] %v10081_v9  ;;  %v10087_v18 = vld [vmem:[%s10671_s1 + $0x8] sm:$0xff] }
0x1131   : > { %5096 = vmatprep.subr.mxu1 %v11280_v28  ;;  %5023 = vmatprep.subr.mxu0 %v10063_v11  ;;  %11301 = vst [vmem:[#allocation39_spill] sm:$0xff] %v10087_v18  ;;  %v10093_v28 = vld [vmem:[%s10671_s1] sm:$0xff] }
0x1132   : > { %5097 = vmatpush1.msra.mxu1 %v11282_v36  ;;  %5024 = vmatpush1.msra.mxu0 %v10069_v15  ;;  %11302 = vst [vmem:[#allocation44_spill] sm:$0xff] %v10093_v28  ;;  %v6355_v36 = vld [vmem:[%s6758_s27 + $0x20] sm:$0xff] }
0x1133   : > { %5098 = vmatprep.subr.mxu1 %v11284_v25  ;;  %5025 = vmatprep.subr.mxu0 %v10075_v58  ;;  %v4683_v25 = vunpack.c.l.bf16 %v6355_v36 }
0x1134   : > { %5099 = vmatpush1.msra.mxu1 %v11287_v40  ;;  %5026 = vmatpush1.msra.mxu0 %v10081_v9  ;;  %v4684_v40 = vunpack.c.h.bf16 %v6355_v36 }
0x1135   : > { %5027 = vmatprep.subr.mxu0 %v10087_v18  ;;  %v4687_v35 = vadd.f32 %v4683_v25, %v11290_v16 }
0x1136   : > { %5028 = vmatpush1.msra.mxu0 %v10093_v28  ;;  %v4688_v7 = vadd.f32 %v4684_v40, %v11291_v48 }
0x11d5   : > { %v4821_v17 = vpop.f32.mrf.mxu0  ;;  %v4892_v21 = vpop.f32.mrf.mxu1 }
0x11d6   : > { %v4897_v62 = vadd.f32 %v4821_v17, %v4687_v35  ;;  %v4899_v42 = vadd.f32 %v4892_v21, %v4689_v63  ;;  %v10131_v63 = vld [vmem:[%s10671_s1 + $0x1f0] sm:$0xff] }
0x11d7   : > { %v4823_v32 = vpop.f32.mrf.mxu0  ;;  %v4894_v29 = vpop.f32.mrf.mxu1  ;;  %v10145_v21 = vld [vmem:[%s10671_s1 + $0x1d0] sm:$0xff] }
0x11d8   : > { %v4901_v20 = vmul.f32 0.5, %v4897_v62  ;;  %v4898_v44 = vadd.f32 %v4823_v32, %v4688_v7  ;;  %v4900_v54 = vadd.f32 %v4894_v29, %v4690_v14  ;;  %v10119_v32 = vld [vmem:[%s10671_s1 + $0x1f8] sm:$0xff]  ;;  %v10173_v14 = vld [vmem:[%s10671_s1 + $0x190] sm:$0xff] }
0x11d9   : > { %11304 = vst [vmem:[#allocation46_spill] sm:$0xff] %v10119_v32  ;;  %5310 = vmatprep.subr.mxu1 %v10119_v32  ;;  %v10180_v29 = vld [vmem:[%s10671_s1 + $0x178] sm:$0xff] }
0x11da   : > { %6617 = vtanh.f32 %v4901_v20  ;;  %v4905_v6 = vmul.f32 0.5, %v4898_v44  ;;  %v4910_v41 = vmul.f32 0.5, %v4900_v54  ;;  %v10126_v20 = vld [vmem:[%s10671_s1 + $0x1e0] sm:$0xff]  ;;  %v10138_v44 = vld [vmem:[%s10671_s1 + $0x1d8] sm:$0xff]  ;;  %v10187_v54 = vld [vmem:[%s10671_s1 + $0x170] sm:$0xff] }
0x11dc   : > { %6619 = vtanh.f32 %v4905_v6  ;;  %v10152_v6 = vld [vmem:[%s10671_s1 + $0x1b8] sm:$0xff] }
0x11dd   : > { %6621 = vtanh.f32 %v4899_v42  ;;  %v10166_v42 = vld [vmem:[%s10671_s1 + $0x198] sm:$0xff] }
0x11de   : > { %6623 = vtanh.f32 %v4910_v41  ;;  %v10194_v41 = vld [vmem:[%s10671_s1 + $0x158] sm:$0xff] }
0x11e7   : > { %v6618_v46 = vpop.eup %6617 }
0x11e8   : > { %v4903_v57 = vmul.f32 0.5, %v6618_v46  ;;  %v10201_v46 = vld [vmem:[%s10671_s1 + $0x150] sm:$0xff] }
0x11e9   : > { %v6620_v4 = vpop.eup %6619 }
0x11ea   : > { %v4904_v31 = vadd.f32 0.5, %v4903_v57  ;;  %v4907_v22 = vmul.f32 0.5, %v6620_v4  ;;  %v6622_v52 = vpop.eup %6621  ;;  %v10208_v57 = vld [vmem:[%s10671_s1 + $0x138] sm:$0xff]  ;;  %v10215_v4 = vld [vmem:[%s10671_s1 + $0x130] sm:$0xff] }
0x11eb   : > { %v6624_v33 = vpop.eup %6623 }
0x11ec   : > { %v4908_v24 = vadd.f32 0.5, %v4907_v22  ;;  %v4914_v36 = vmul.f32 %v6622_v52, %v4904_v31  ;;  %v4912_v35 = vmul.f32 0.5, %v6624_v33  ;;  %v10222_v31 = vld [vmem:[%s10671_s1 + $0x118] sm:$0xff]  ;;  %v10229_v22 = vld [vmem:[%s10671_s1 + $0x110] sm:$0xff] }
0x11ed   : > { %v10241_v52 = vld [vmem:[%s10671_s1 + $0xf0] sm:$0xff]  ;;  %v10260_v33 = vld [vmem:[%s10671_s1 + $0xb8] sm:$0xff] }
0x11ee   : > { %v4915_v25 = vmul.f32 %v4908_v24, %v9880_v38  ;;  %v4913_v1 = vadd.f32 0.5, %v4912_v35  ;;  %v10114_v38 = vld [vmem:[%s10671_s1 + $0x1e8] sm:$0xff]  ;;  %v10236_v24 = vld [vmem:[%s10671_s1 + $0xf8] sm:$0xff]  ;;  %v10267_v35 = vld [vmem:[%s10671_s1 + $0xb0] sm:$0xff] }
0x11ef   : > { %11303 = vst [vmem:[#allocation41_spill] sm:$0xff] %v10114_v38  ;;  %5239 = vmatprep.subr.mxu0 %v10114_v38  ;;  %11305 = vst [vmem:[#allocation43_spill] sm:$0xff] %v10267_v35 }
0x11f0   : > { %v10105_v40 = vadd.f32 %v4915_v25, %v4914_v36  ;;  %v10246_v36 = vld [vmem:[%s10671_s1 + $0xd8] sm:$0xff]  ;;  %v10253_v25 = vld [vmem:[%s10671_s1 + $0xd0] sm:$0xff] }
0x11f2   : > { %6625 = vtanh.f32 %v10105_v40 }
0x11ff   : > { %v6626_v7 = vpop.eup %6625 }
0x1200   : > { %v4918_v17 = vmul.f32 %v6626_v7, %v4913_v1  ;;  %v10274_v1 = vld [vmem:[%s10671_s1 + $0x98] sm:$0xff]  ;;  %v10281_v7 = vld [vmem:[%s10671_s1 + $0x90] sm:$0xff] }
0x1201   : > { %11306 = vst [vmem:[#allocation48_spill] sm:$0xff] %v10274_v1  ;;  %11307 = vst [vmem:[#allocation45_spill] sm:$0xff] %v10281_v7 }
0x1202   : > { %v4919_v62 = vpack.c.bf16 %v4918_v17, %v4918_v17  ;;  %5062 = vmatmul.mubr.f32.vlgmr.msra.gmra.mxu0 %v4918_v17  ;;  %5133 = vmatmul.mubr.f32.vlgmr.msra.gmra.mxu1 %v4918_v17  ;;  %v10288_v17 = vld [vmem:[%s10671_s1 + $0x78] sm:$0xff] }
0x1203   : > { %5303 = vmatprep.mubr.f32.mxu0 %v11286_v43  ;;  %5374 = vmatprep.mubr.f32.mxu1 %v11286_v43  ;;  %11308 = vst [vmem:[#allocation50_spill] sm:$0xff] %v10288_v17  ;;  %v10302_v43 = vld [vmem:[%s10671_s1 + $0x58] sm:$0xff] }
0x1204   : > { %6357 = vst [vmem:[%s6763_s30 + $0x8] sm:$0xf] %v4919_v62  ;;  %5240 = vmatpush1.msra.mxu0 %v10126_v20  ;;  %5311 = vmatpush1.msra.mxu1 %v10131_v63  ;;  %v10295_v62 = vld [vmem:[%s10671_s1 + $0x70] sm:$0xff]  ;;  %11310 = vst [vmem:[#allocation51_spill] sm:$0xff] %v10302_v43 }
0x1205   : > { %5241 = vmatprep.subr.mxu0 %v9921_v56  ;;  %5312 = vmatprep.subr.mxu1 %v10138_v44  ;;  %11309 = vst [vmem:[#allocation47_spill] sm:$0xff] %v10295_v62 }
0x1206   : > { %5242 = vmatpush1.msra.mxu0 %v9927_v61  ;;  %5313 = vmatpush1.msra.mxu1 %v10145_v21 }
0x1207   : > { %5243 = vmatprep.subr.mxu0 %v9933_v55  ;;  %5314 = vmatprep.subr.mxu1 %v10152_v6 }
0x1208   : > { %5244 = vmatpush1.msra.mxu0 %v9939_v37  ;;  %5315 = vmatpush1.msra.mxu1 %v10159_v3 }
0x1209   : > { %5245 = vmatprep.subr.mxu0 %v9945_v5  ;;  %5316 = vmatprep.subr.mxu1 %v10166_v42 }
0x120a   : > { %5246 = vmatpush1.msra.mxu0 %v9951_v49  ;;  %5317 = vmatpush1.msra.mxu1 %v10173_v14 }
0x120b   : > { %5247 = vmatprep.subr.mxu0 %v9957_v45  ;;  %5318 = vmatprep.subr.mxu1 %v10180_v29 }
0x120c   : > { %5248 = vmatpush1.msra.mxu0 %v9963_v0  ;;  %5319 = vmatpush1.msra.mxu1 %v10187_v54 }
0x120d   : > { %5249 = vmatprep.subr.mxu0 %v9969_v10  ;;  %5320 = vmatprep.subr.mxu1 %v10194_v41 }
0x120e   : > { %5250 = vmatpush1.msra.mxu0 %v9975_v59  ;;  %5321 = vmatpush1.msra.mxu1 %v10201_v46 }
0x120f   : > { %5251 = vmatprep.subr.mxu0 %v9981_v47  ;;  %5322 = vmatprep.subr.mxu1 %v10208_v57 }
0x1210   : > { %5252 = vmatpush1.msra.mxu0 %v9987_v30  ;;  %5323 = vmatpush1.msra.mxu1 %v10215_v4 }
0x1211   : > { %5253 = vmatprep.subr.mxu0 %v9993_v60  ;;  %5324 = vmatprep.subr.mxu1 %v10222_v31 }
0x1212   : > { %5254 = vmatpush1.msra.mxu0 %v9999_v27  ;;  %5325 = vmatpush1.msra.mxu1 %v10229_v22 }
0x1213   : > { %5255 = vmatprep.subr.mxu0 %v10005_v26  ;;  %5326 = vmatprep.subr.mxu1 %v10236_v24 }
0x1214   : > { %5256 = vmatpush1.msra.mxu0 %v10010_v51  ;;  %5327 = vmatpush1.msra.mxu1 %v10241_v52 }
0x1215   : > { %5257 = vmatprep.subr.mxu0 %v10015_v8  ;;  %5328 = vmatprep.subr.mxu1 %v10246_v36 }
0x1216   : > { %5258 = vmatpush1.msra.mxu0 %v10021_v12  ;;  %5329 = vmatpush1.msra.mxu1 %v10253_v25 }
0x1217   : > { %5259 = vmatprep.subr.mxu0 %v10027_v23  ;;  %5330 = vmatprep.subr.mxu1 %v10260_v33 }
0x1218   : > { %5260 = vmatpush1.msra.mxu0 %v10033_v34  ;;  %5331 = vmatpush1.msra.mxu1 %v10267_v35 }
0x1219   : > { %5261 = vmatprep.subr.mxu0 %v10039_v50  ;;  %5332 = vmatprep.subr.mxu1 %v10274_v1  ;;  %v10309_v1 = vld [vmem:[%s10671_s1 + $0x50] sm:$0xff] }
0x121a   : > { %5262 = vmatpush1.msra.mxu0 %v10045_v13  ;;  %5333 = vmatpush1.msra.mxu1 %v10281_v7  ;;  %11311 = vst [vmem:[#allocation49_spill] sm:$0xff] %v10309_v1  ;;  %v10316_v7 = vld [vmem:[%s10671_s1 + $0x38] sm:$0xff] }
0x121b   : > { %5263 = vmatprep.subr.mxu0 %v10051_v2  ;;  %5334 = vmatprep.subr.mxu1 %v10288_v17  ;;  %11312 = vst [vmem:[#allocation52_spill] sm:$0xff] %v10316_v7  ;;  %v10323_v17 = vld [vmem:[%s10671_s1 + $0x30] sm:$0xff] }
0x121c   : > { %5264 = vmatpush1.msra.mxu0 %v10057_v19  ;;  %5335 = vmatpush1.msra.mxu1 %v10295_v62  ;;  %11313 = vst [vmem:[#allocation31_spill] sm:$0xff] %v10323_v17  ;;  %v10330_v62 = vld [vmem:[%s10671_s1 + $0x18] sm:$0xff] }
0x121d   : > { %5265 = vmatprep.subr.mxu0 %v10063_v11  ;;  %5336 = vmatprep.subr.mxu1 %v10302_v43  ;;  %11314 = vst [vmem:[#allocation32_spill] sm:$0xff] %v10330_v62  ;;  %v10337_v43 = vld [vmem:[%s10671_s1 + $0x10] sm:$0xff] }
0x121e   : > { %5266 = vmatpush1.msra.mxu0 %v10069_v15  ;;  %5337 = vmatpush1.msra.mxu1 %v10309_v1  ;;  %11315 = vst [vmem:[#allocation53_spill] sm:$0xff] %v10337_v43  ;;  %v6359_v15 = vld [vmem:[%s6758_s27 + $0x38] sm:$0xff] }
0x121f   : > { %5267 = vmatprep.subr.mxu0 %v10075_v58  ;;  %5338 = vmatprep.subr.mxu1 %v10316_v7  ;;  %v6358_v7 = vld [vmem:[%s6758_s27 + $0x30] sm:$0xff]  ;;  %v4927_v11 = vunpack.c.l.bf16 %v6359_v15 }
0x1220   : > { %5268 = vmatpush1.msra.mxu0 %v10081_v9  ;;  %5339 = vmatpush1.msra.mxu1 %v10323_v17  ;;  %v4925_v58 = vunpack.c.l.bf16 %v6358_v7  ;;  %v4926_v1 = vunpack.c.h.bf16 %v6358_v7 }
0x1221   : > { %5269 = vmatprep.subr.mxu0 %v10087_v18  ;;  %5340 = vmatprep.subr.mxu1 %v10330_v62 }
0x1222   : > { %5270 = vmatpush1.msra.mxu0 %v10093_v28  ;;  %5341 = vmatpush1.msra.mxu1 %v10337_v43  ;;  %v4929_v9 = vadd.f32 %v4925_v58, %v11290_v16  ;;  %v4930_v17 = vadd.f32 %v4926_v1, %v11291_v48  ;;  %v4931_v28 = vadd.f32 %v4927_v11, %v11292_v39 }
0x1223   : > { %5481 = vmatprep.subr.mxu0 %v10114_v38  ;;  %5552 = vmatprep.subr.mxu1 %v10119_v32  ;;  %v4928_v32 = vunpack.c.h.bf16 %v6359_v15 }
0x1225   : > { %v4932_v7 = vadd.f32 %v4928_v32, %v11266_v53 }
0x12c2   : > { %v5063_v18 = vpop.f32.mrf.mxu0  ;;  %v5134_v13 = vpop.f32.mrf.mxu1 }
0x12c3   : > { %v5139_v19 = vadd.f32 %v5063_v18, %v4929_v9  ;;  %v5141_v50 = vadd.f32 %v5134_v13, %v4931_v28 }
0x12c4   : > { %v5065_v62 = vpop.f32.mrf.mxu0  ;;  %v5136_v35 = vpop.f32.mrf.mxu1 }
0x12c5   : > { %v5143_v2 = vmul.f32 0.5, %v5139_v19  ;;  %v5140_v43 = vadd.f32 %v5065_v62, %v4930_v17  ;;  %v5142_v58 = vadd.f32 %v5136_v35, %v4932_v7  ;;  %v11319_v62 = vld [vmem:[#allocation36_spill] sm:$0xff]  ;;  %v11320_v7 = vld [vmem:[#allocation45_spill] sm:$0xff] }
0x12c7   : > { %6627 = vtanh.f32 %v5143_v2  ;;  %v5147_v38 = vmul.f32 0.5, %v5140_v43  ;;  %v5152_v16 = vmul.f32 0.5, %v5142_v58  ;;  %v11321_v58 = vld [vmem:[#allocation34_spill] sm:$0xff] }
0x12c9   : > { %6629 = vtanh.f32 %v5147_v38 }
0x12ca   : > { %6631 = vtanh.f32 %v5141_v50 }
0x12cb   : > { %6633 = vtanh.f32 %v5152_v16  ;;  %v11316_v16 = vld [vmem:[#allocation43_spill] sm:$0xff] }
0x12d4   : > { %v6628_v1 = vpop.eup %6627 }
0x12d5   : > { %v5145_v48 = vmul.f32 0.5, %v6628_v1  ;;  %v11322_v1 = vld [vmem:[#allocation50_spill] sm:$0xff] }
0x12d6   : > { %v6630_v9 = vpop.eup %6629 }
0x12d7   : > { %v5146_v18 = vadd.f32 0.5, %v5145_v48  ;;  %v5149_v19 = vmul.f32 0.5, %v6630_v9  ;;  %v6632_v17 = vpop.eup %6631  ;;  %v11317_v48 = vld [vmem:[#allocation33_spill] sm:$0xff]  ;;  %v11323_v9 = vld [vmem:[#allocation38_spill] sm:$0xff] }
0x12d8   : > { %v6634_v15 = vpop.eup %6633 }
0x12d9   : > { %v5150_v11 = vadd.f32 0.5, %v5149_v19  ;;  %v5156_v2 = vmul.f32 %v6632_v17, %v5146_v18  ;;  %v5154_v50 = vmul.f32 0.5, %v6634_v15  ;;  %v11324_v18 = vld [vmem:[#allocation47_spill] sm:$0xff]  ;;  %v11327_v17 = vld [vmem:[#allocation40_spill] sm:$0xff] }
0x12da   : > { %v11325_v19 = vld [vmem:[#allocation35_spill] sm:$0xff]  ;;  %v11330_v15 = vld [vmem:[#allocation52_spill] sm:$0xff] }
0x12db   : > { %v5157_v43 = vmul.f32 %v5150_v11, %v10105_v40  ;;  %v5155_v28 = vadd.f32 0.5, %v5154_v50  ;;  %v11318_v40 = vld [vmem:[#allocation48_spill] sm:$0xff]  ;;  %v11326_v11 = vld [vmem:[#allocation51_spill] sm:$0xff]  ;;  %v11331_v50 = vld [vmem:[#allocation42_spill] sm:$0xff] }
0x12dd   : > { %v10354_v13 = vadd.f32 %v5157_v43, %v5156_v2  ;;  %v11328_v2 = vld [vmem:[#allocation49_spill] sm:$0xff] }
0x12de   : > { %v11329_v43 = vld [vmem:[#allocation37_spill] sm:$0xff] }
0x12df   : > { %6635 = vtanh.f32 %v10354_v13 }
0x12ec   : > { %v6636_v38 = vpop.eup %6635 }
0x12ed   : > { %v5160_v32 = vmul.f32 %v6636_v38, %v5155_v28  ;;  %v11332_v28 = vld [vmem:[#allocation31_spill] sm:$0xff] }
0x12ee   : > { %v11333_v38 = vld [vmem:[#allocation39_spill] sm:$0xff] }
0x12ef   : > { %v5161_v35 = vpack.c.bf16 %v5160_v32, %v5160_v32  ;;  %5304 = vmatmul.mubr.f32.vlgmr.msra.gmra.mxu0 %v5160_v32  ;;  %5375 = vmatmul.mubr.f32.vlgmr.msra.gmra.mxu1 %v5160_v32  ;;  %v11334_v32 = vld [vmem:[#allocation32_spill] sm:$0xff] }
0x12f0   : > { %5482 = vmatpush1.msra.mxu0 %v10126_v20  ;;  %5553 = vmatpush1.msra.mxu1 %v10131_v63 }
0x12f1   : > { %6360 = vst [vmem:[%s6763_s30 + $0xc] sm:$0xf] %v5161_v35  ;;  %5483 = vmatprep.subr.mxu0 %v9921_v56  ;;  %5554 = vmatprep.subr.mxu1 %v10138_v44  ;;  %v11335_v35 = vld [vmem:[#allocation44_spill] sm:$0xff] }
0x12f2   : > { %5484 = vmatpush1.msra.mxu0 %v9927_v61  ;;  %5555 = vmatpush1.msra.mxu1 %v10145_v21 }
0x12f3   : > { %5485 = vmatprep.subr.mxu0 %v9933_v55  ;;  %5556 = vmatprep.subr.mxu1 %v10152_v6 }
0x12f4   : > { %5486 = vmatpush1.msra.mxu0 %v9939_v37  ;;  %5557 = vmatpush1.msra.mxu1 %v10159_v3 }
0x12f5   : > { %5487 = vmatprep.subr.mxu0 %v9945_v5  ;;  %5558 = vmatprep.subr.mxu1 %v10166_v42 }
0x12f6   : > { %5488 = vmatpush1.msra.mxu0 %v9951_v49  ;;  %5559 = vmatpush1.msra.mxu1 %v10173_v14 }
0x12f7   : > { %5489 = vmatprep.subr.mxu0 %v9957_v45  ;;  %5560 = vmatprep.subr.mxu1 %v10180_v29 }
0x12f8   : > { %5490 = vmatpush1.msra.mxu0 %v9963_v0  ;;  %5561 = vmatpush1.msra.mxu1 %v10187_v54 }
0x12f9   : > { %5491 = vmatprep.subr.mxu0 %v9969_v10  ;;  %5562 = vmatprep.subr.mxu1 %v10194_v41 }
0x12fa   : > { %5492 = vmatpush1.msra.mxu0 %v9975_v59  ;;  %5563 = vmatpush1.msra.mxu1 %v10201_v46 }
0x12fb   : > { %5493 = vmatprep.subr.mxu0 %v9981_v47  ;;  %5564 = vmatprep.subr.mxu1 %v10208_v57 }
0x12fc   : > { %5494 = vmatpush1.msra.mxu0 %v9987_v30  ;;  %5565 = vmatpush1.msra.mxu1 %v10215_v4 }
0x12fd   : > { %5495 = vmatprep.subr.mxu0 %v9993_v60  ;;  %5566 = vmatprep.subr.mxu1 %v10222_v31 }
0x12fe   : > { %5496 = vmatpush1.msra.mxu0 %v9999_v27  ;;  %5567 = vmatpush1.msra.mxu1 %v10229_v22 }
0x12ff   : > { %5497 = vmatprep.subr.mxu0 %v10005_v26  ;;  %5568 = vmatprep.subr.mxu1 %v10236_v24 }
0x1300   : > { %5498 = vmatpush1.msra.mxu0 %v10010_v51  ;;  %5569 = vmatpush1.msra.mxu1 %v10241_v52 }
0x1301   : > { %5499 = vmatprep.subr.mxu0 %v10015_v8  ;;  %5570 = vmatprep.subr.mxu1 %v10246_v36 }
0x1302   : > { %5500 = vmatpush1.msra.mxu0 %v10021_v12  ;;  %5571 = vmatpush1.msra.mxu1 %v10253_v25 }
0x1303   : > { %5501 = vmatprep.subr.mxu0 %v10027_v23  ;;  %5572 = vmatprep.subr.mxu1 %v10260_v33 }
0x1304   : > { %5502 = vmatpush1.msra.mxu0 %v10033_v34  ;;  %5573 = vmatpush1.msra.mxu1 %v11316_v16 }
0x1305   : > { %5503 = vmatprep.subr.mxu0 %v11317_v48  ;;  %5574 = vmatprep.subr.mxu1 %v11318_v40 }
0x1306   : > { %5504 = vmatpush1.msra.mxu0 %v11319_v62  ;;  %5575 = vmatpush1.msra.mxu1 %v11320_v7 }
0x1307   : > { %5505 = vmatprep.subr.mxu0 %v11321_v58  ;;  %5576 = vmatprep.subr.mxu1 %v11322_v1 }
0x1308   : > { %5506 = vmatpush1.msra.mxu0 %v11323_v9  ;;  %5577 = vmatpush1.msra.mxu1 %v11324_v18  ;;  %v11340_v18 = vld [vmem:[#allocation4_spill] sm:$0xff] }
0x1309   : > { %5507 = vmatprep.subr.mxu0 %v11325_v19  ;;  %5578 = vmatprep.subr.mxu1 %v11326_v11  ;;  %v11336_v11 = vmov 0.0  }
0x130a   : > { %5508 = vmatpush1.msra.mxu0 %v11327_v17  ;;  %5579 = vmatpush1.msra.mxu1 %v11328_v2  ;;  %v11337_v17 = vld [vmem:[#allocation53_spill] sm:$0xff] }
0x130b   : > { %5509 = vmatprep.subr.mxu0 %v11329_v43  ;;  %5580 = vmatprep.subr.mxu1 %v11330_v15  ;;  %v11338_v2 = vld [vmem:[#allocation41_spill] sm:$0xff]  ;;  %v11339_v43 = vld [vmem:[#allocation46_spill] sm:$0xff] }
0x130c   : > { %5510 = vmatpush1.msra.mxu0 %v11331_v50  ;;  %5581 = vmatpush1.msra.mxu1 %v11332_v28  ;;  %v6361_v15 = vld [vmem:[%s6758_s27 + $0x40] sm:$0xff]  ;;  %v6362_v28 = vld [vmem:[%s6758_s27 + $0x48] sm:$0xff] }
0x130d   : > { %5511 = vmatprep.subr.mxu0 %v11333_v38  ;;  %5582 = vmatprep.subr.mxu1 %v11334_v32  ;;  %v5167_v50 = vunpack.c.l.bf16 %v6361_v15  ;;  %v5168_v19 = vunpack.c.h.bf16 %v6361_v15  ;;  %v5169_v9 = vunpack.c.l.bf16 %v6362_v28  ;;  %v11341_v32 = vld [vmem:[#allocation5_spill] sm:$0xff] }
0x130e   : > { %5512 = vmatpush1.msra.mxu0 %v11335_v35  ;;  %5545 = vmatprep.mubr.f32.mxu0 %v11336_v11 }
0x130f   : > { %5583 = vmatpush1.msra.mxu1 %v11337_v17  ;;  %5616 = vmatprep.mubr.f32.mxu1 %v11336_v11  ;;  %v5171_v38 = vadd.f32 %v5167_v50, %v11340_v18  ;;  %v5172_v1 = vadd.f32 %v5168_v19, %v11341_v32  ;;  %v5173_v17 = vadd.f32 %v5169_v9, %v11292_v39 }
0x1310   : > { %5723 = vmatprep.subr.mxu0 %v11338_v2  ;;  %5794 = vmatprep.subr.mxu1 %v11339_v43  ;;  %v5170_v43 = vunpack.c.h.bf16 %v6362_v28  ;;  %v11364_v28 = vld [vmem:[#allocation41_spill] sm:$0xff] }
0x1312   : > { %v5174_v15 = vadd.f32 %v5170_v43, %v11266_v53 }
0x13af   : > { %v5305_v35 = vpop.f32.mrf.mxu0  ;;  %v5376_v40 = vpop.f32.mrf.mxu1 }
0x13b0   : > { %v5381_v58 = vadd.f32 %v5305_v35, %v5171_v38  ;;  %v5383_v48 = vadd.f32 %v5376_v40, %v5173_v17 }
0x13b1   : > { %v5307_v7 = vpop.f32.mrf.mxu0  ;;  %v5378_v16 = vpop.f32.mrf.mxu1 }
0x13b2   : > { %v5385_v62 = vmul.f32 0.5, %v5381_v58  ;;  %v5382_v11 = vadd.f32 %v5307_v7, %v5172_v1  ;;  %v5384_v50 = vadd.f32 %v5378_v16, %v5174_v15  ;;  %v6364_v15 = vld [vmem:[%s6758_s27 + $0x50] sm:$0xff] }
0x13b4   : > { %6637 = vtanh.f32 %v5385_v62  ;;  %v5389_v2 = vmul.f32 0.5, %v5382_v11  ;;  %v5394_v18 = vmul.f32 0.5, %v5384_v50  ;;  %v5409_v50 = vunpack.c.l.bf16 %v6364_v15 }
0x13b6   : > { %6639 = vtanh.f32 %v5389_v2 }
0x13b7   : > { %6641 = vtanh.f32 %v5383_v48 }
0x13b8   : > { %6643 = vtanh.f32 %v5394_v18  ;;  %v11363_v18 = vld [vmem:[#allocation53_spill] sm:$0xff] }
0x13c1   : > { %v6638_v19 = vpop.eup %6637 }
0x13c2   : > { %v5387_v32 = vmul.f32 0.5, %v6638_v19  ;;  %v5410_v19 = vunpack.c.h.bf16 %v6364_v15 }
0x13c3   : > { %v6640_v38 = vpop.eup %6639 }
0x13c4   : > { %v5388_v35 = vadd.f32 0.5, %v5387_v32  ;;  %v5391_v58 = vmul.f32 0.5, %v6640_v38  ;;  %v6642_v7 = vpop.eup %6641  ;;  %v11365_v32 = vld [vmem:[#allocation46_spill] sm:$0xff]  ;;  %v6365_v38 = vld [vmem:[%s6758_s27 + $0x58] sm:$0xff] }
0x13c5   : > { %v6644_v11 = vpop.eup %6643 }
0x13c6   : > { %v5392_v9 = vadd.f32 0.5, %v5391_v58  ;;  %v5398_v62 = vmul.f32 %v6642_v7, %v5388_v35  ;;  %v5396_v48 = vmul.f32 0.5, %v6644_v11  ;;  %v11366_v35 = vld [vmem:[#allocation4_spill] sm:$0xff]  ;;  %v11367_v7 = vld [vmem:[#allocation5_spill] sm:$0xff] }
0x13c7   : > { %v5413_v58 = vadd.f32 %v5409_v50, %v11366_v35 }
0x13c8   : > { %v5399_v1 = vmul.f32 %v5392_v9, %v10354_v13  ;;  %v5397_v16 = vadd.f32 0.5, %v5396_v48  ;;  %v11362_v13 = vmov 0.0   ;;  %v5411_v9 = vunpack.c.l.bf16 %v6365_v38 }
0x13ca   : > { %v10431_v40 = vadd.f32 %v5399_v1, %v5398_v62  ;;  %v5414_v62 = vadd.f32 %v5410_v19, %v11367_v7 }
0x13cc   : > { %6645 = vtanh.f32 %v10431_v40 }
0x13d9   : > { %v6646_v17 = vpop.eup %6645 }
0x13da   : > { %v5402_v2 = vmul.f32 %v6646_v17, %v5397_v16  ;;  %v5415_v17 = vadd.f32 %v5411_v9, %v11292_v39 }
0x13dc   : > { %v5403_v43 = vpack.c.bf16 %v5402_v2, %v5402_v2  ;;  %5546 = vmatmul.mubr.f32.vlgmr.msra.gmra.mxu0 %v5402_v2  ;;  %5617 = vmatmul.mubr.f32.vlgmr.msra.gmra.mxu1 %v5402_v2 }
0x13dd   : > { %5724 = vmatpush1.msra.mxu0 %v10126_v20  ;;  %5795 = vmatpush1.msra.mxu1 %v10131_v63 }
0x13de   : > { %6363 = vst [vmem:[%s6763_s30 + $0x10] sm:$0xf] %v5403_v43  ;;  %5725 = vmatprep.subr.mxu0 %v9921_v56  ;;  %5796 = vmatprep.subr.mxu1 %v10138_v44  ;;  %v11342_v56 = vld [vmem:[#allocation43_spill] sm:$0xff] }
0x13df   : > { %5726 = vmatpush1.msra.mxu0 %v9927_v61  ;;  %5797 = vmatpush1.msra.mxu1 %v10145_v21  ;;  %v11343_v61 = vld [vmem:[#allocation33_spill] sm:$0xff] }
0x13e0   : > { %5727 = vmatprep.subr.mxu0 %v9933_v55  ;;  %5798 = vmatprep.subr.mxu1 %v10152_v6  ;;  %v11344_v55 = vld [vmem:[#allocation48_spill] sm:$0xff] }
0x13e1   : > { %5728 = vmatpush1.msra.mxu0 %v9939_v37  ;;  %5799 = vmatpush1.msra.mxu1 %v10159_v3  ;;  %v11345_v37 = vld [vmem:[#allocation36_spill] sm:$0xff] }
0x13e2   : > { %5729 = vmatprep.subr.mxu0 %v9945_v5  ;;  %5800 = vmatprep.subr.mxu1 %v10166_v42  ;;  %v11346_v5 = vld [vmem:[#allocation45_spill] sm:$0xff] }
0x13e3   : > { %5730 = vmatpush1.msra.mxu0 %v9951_v49  ;;  %5801 = vmatpush1.msra.mxu1 %v10173_v14  ;;  %v11347_v49 = vld [vmem:[#allocation34_spill] sm:$0xff] }
0x13e4   : > { %5731 = vmatprep.subr.mxu0 %v9957_v45  ;;  %5802 = vmatprep.subr.mxu1 %v10180_v29  ;;  %v11348_v45 = vld [vmem:[#allocation50_spill] sm:$0xff] }
0x13e5   : > { %5732 = vmatpush1.msra.mxu0 %v9963_v0  ;;  %5803 = vmatpush1.msra.mxu1 %v10187_v54  ;;  %v11349_v0 = vld [vmem:[#allocation38_spill] sm:$0xff] }
0x13e6   : > { %5733 = vmatprep.subr.mxu0 %v9969_v10  ;;  %5804 = vmatprep.subr.mxu1 %v10194_v41  ;;  %v11350_v10 = vld [vmem:[#allocation47_spill] sm:$0xff] }
0x13e7   : > { %5734 = vmatpush1.msra.mxu0 %v9975_v59  ;;  %5805 = vmatpush1.msra.mxu1 %v10201_v46  ;;  %v11351_v59 = vld [vmem:[#allocation35_spill] sm:$0xff] }
0x13e8   : > { %5735 = vmatprep.subr.mxu0 %v9981_v47  ;;  %5806 = vmatprep.subr.mxu1 %v10208_v57  ;;  %v11352_v47 = vld [vmem:[#allocation51_spill] sm:$0xff] }
0x13e9   : > { %5736 = vmatpush1.msra.mxu0 %v9987_v30  ;;  %5807 = vmatpush1.msra.mxu1 %v10215_v4  ;;  %v11353_v30 = vld [vmem:[#allocation40_spill] sm:$0xff] }
0x13ea   : > { %5737 = vmatprep.subr.mxu0 %v9993_v60  ;;  %5808 = vmatprep.subr.mxu1 %v10222_v31  ;;  %v11354_v60 = vld [vmem:[#allocation49_spill] sm:$0xff] }
0x13eb   : > { %5738 = vmatpush1.msra.mxu0 %v9999_v27  ;;  %5809 = vmatpush1.msra.mxu1 %v10229_v22  ;;  %v11355_v27 = vld [vmem:[#allocation37_spill] sm:$0xff] }
0x13ec   : > { %5739 = vmatprep.subr.mxu0 %v10005_v26  ;;  %5810 = vmatprep.subr.mxu1 %v10236_v24  ;;  %v11356_v26 = vld [vmem:[#allocation52_spill] sm:$0xff] }
0x13ed   : > { %5740 = vmatpush1.msra.mxu0 %v10010_v51  ;;  %5811 = vmatpush1.msra.mxu1 %v10241_v52  ;;  %v11357_v51 = vld [vmem:[#allocation42_spill] sm:$0xff] }
0x13ee   : > { %5741 = vmatprep.subr.mxu0 %v10015_v8  ;;  %5812 = vmatprep.subr.mxu1 %v10246_v36  ;;  %v11358_v8 = vld [vmem:[#allocation31_spill] sm:$0xff] }
0x13ef   : > { %5742 = vmatpush1.msra.mxu0 %v10021_v12  ;;  %5813 = vmatpush1.msra.mxu1 %v10253_v25  ;;  %v11359_v12 = vld [vmem:[#allocation39_spill] sm:$0xff] }
0x13f0   : > { %5743 = vmatprep.subr.mxu0 %v10027_v23  ;;  %5814 = vmatprep.subr.mxu1 %v10260_v33  ;;  %v11360_v23 = vld [vmem:[#allocation32_spill] sm:$0xff] }
0x13f1   : > { %5744 = vmatpush1.msra.mxu0 %v10033_v34  ;;  %5815 = vmatpush1.msra.mxu1 %v11342_v56  ;;  %v11361_v34 = vld [vmem:[#allocation44_spill] sm:$0xff] }
0x13f2   : > { %5745 = vmatprep.subr.mxu0 %v11343_v61  ;;  %5816 = vmatprep.subr.mxu1 %v11344_v55 }
0x13f3   : > { %5746 = vmatpush1.msra.mxu0 %v11345_v37  ;;  %5817 = vmatpush1.msra.mxu1 %v11346_v5  ;;  %v5412_v37 = vunpack.c.h.bf16 %v6365_v38 }
0x13f4   : > { %5747 = vmatprep.subr.mxu0 %v11347_v49  ;;  %5818 = vmatprep.subr.mxu1 %v11348_v45 }
0x13f5   : > { %5748 = vmatpush1.msra.mxu0 %v11349_v0  ;;  %5819 = vmatpush1.msra.mxu1 %v11350_v10  ;;  %v5416_v0 = vadd.f32 %v5412_v37, %v11266_v53 }
0x13f6   : > { %5749 = vmatprep.subr.mxu0 %v11351_v59  ;;  %5820 = vmatprep.subr.mxu1 %v11352_v47 }
0x13f7   : > { %5750 = vmatpush1.msra.mxu0 %v11353_v30  ;;  %5821 = vmatpush1.msra.mxu1 %v11354_v60 }
0x13f8   : > { %5751 = vmatprep.subr.mxu0 %v11355_v27  ;;  %5822 = vmatprep.subr.mxu1 %v11356_v26 }
0x13f9   : > { %5752 = vmatpush1.msra.mxu0 %v11357_v51  ;;  %5823 = vmatpush1.msra.mxu1 %v11358_v8 }
0x13fa   : > { %5753 = vmatprep.subr.mxu0 %v11359_v12  ;;  %5824 = vmatprep.subr.mxu1 %v11360_v23 }
0x13fb   : > { %5754 = vmatpush1.msra.mxu0 %v11361_v34  ;;  %5787 = vmatprep.mubr.f32.mxu0 %v11362_v13 }
0x13fc   : > { %5825 = vmatpush1.msra.mxu1 %v11363_v18  ;;  %5858 = vmatprep.mubr.f32.mxu1 %v11362_v13 }
0x13fd   : > { %5965 = vmatprep.subr.mxu0 %v11364_v28  ;;  %6036 = vmatprep.subr.mxu1 %v11365_v32 }
0x149c   : > { %v5547_v1 = vpop.f32.mrf.mxu0  ;;  %v5618_v43 = vpop.f32.mrf.mxu1 }
0x149d   : > { %v5623_v11 = vadd.f32 %v5547_v1, %v5413_v58  ;;  %v5625_v49 = vadd.f32 %v5618_v43, %v5415_v17 }
0x149e   : > { %v5549_v48 = vpop.f32.mrf.mxu0  ;;  %v5620_v59 = vpop.f32.mrf.mxu1 }
0x149f   : > { %v5627_v16 = vmul.f32 0.5, %v5623_v11  ;;  %v5624_v2 = vadd.f32 %v5549_v48, %v5414_v62  ;;  %v5626_v30 = vadd.f32 %v5620_v59, %v5416_v0 }
0x14a1   : > { %6647 = vtanh.f32 %v5627_v16  ;;  %v5631_v61 = vmul.f32 0.5, %v5624_v2  ;;  %v5636_v27 = vmul.f32 0.5, %v5626_v30 }
0x14a3   : > { %6649 = vtanh.f32 %v5631_v61 }
0x14a4   : > { %6651 = vtanh.f32 %v5625_v49 }
0x14a5   : > { %6653 = vtanh.f32 %v5636_v27 }
0x14ae   : > { %v6648_v51 = vpop.eup %6647 }
0x14af   : > { %v5629_v12 = vmul.f32 0.5, %v6648_v51 }
0x14b0   : > { %v6650_v34 = vpop.eup %6649 }
0x14b1   : > { %v5630_v28 = vadd.f32 0.5, %v5629_v12  ;;  %v5633_v32 = vmul.f32 0.5, %v6650_v34  ;;  %v6652_v50 = vpop.eup %6651 }
0x14b2   : > { %v6654_v9 = vpop.eup %6653 }
0x14b3   : > { %v5634_v15 = vadd.f32 0.5, %v5633_v32  ;;  %v5640_v19 = vmul.f32 %v6652_v50, %v5630_v28  ;;  %v5638_v62 = vmul.f32 0.5, %v6654_v9 }
0x14b5   : > { %v5641_v38 = vmul.f32 %v5634_v15, %v10431_v40  ;;  %v5639_v1 = vadd.f32 0.5, %v5638_v62  ;;  %v5917_v40 = vld [vmem:[%s10671_s1 + $0x80] sm:$0xff] }
0x14b7   : > { %v10508_v58 = vadd.f32 %v5641_v38, %v5640_v19 }
0x14b9   : > { %6655 = vtanh.f32 %v10508_v58 }
0x14c6   : > { %v6656_v11 = vpop.eup %6655 }
0x14c7   : > { %v5644_v48 = vmul.f32 %v6656_v11, %v5639_v1 }
0x14c9   : > { %v5645_v16 = vpack.c.bf16 %v5644_v48, %v5644_v48  ;;  %5788 = vmatmul.mubr.f32.vlgmr.msra.gmra.mxu0 %v5644_v48  ;;  %5859 = vmatmul.mubr.f32.vlgmr.msra.gmra.mxu1 %v5644_v48 }
0x14ca   : > { %5966 = vmatpush1.msra.mxu0 %v10126_v20  ;;  %6037 = vmatpush1.msra.mxu1 %v10131_v63  ;;  %v5958_v20 = vld [vmem:[%s10671_s1 + $0x1c8] sm:$0xff]  ;;  %v5957_v63 = vld [vmem:[%s10671_s1 + $0x1c0] sm:$0xff] }
0x14cb   : > { %6366 = vst [vmem:[%s6763_s30 + $0x14] sm:$0xf] %v5645_v16  ;;  %6038 = vmatprep.subr.mxu1 %v10138_v44  ;;  %6029 = vmatprep.mubr.f32.mxu0 %v11362_v13  ;;  %v5954_v44 = vld [vmem:[%s10671_s1 + $0x1a8] sm:$0xff] }
0x14cc   : > { %6039 = vmatpush1.msra.mxu1 %v10145_v21  ;;  %6100 = vmatprep.mubr.f32.mxu1 %v11362_v13  ;;  %v5953_v21 = vld [vmem:[%s10671_s1 + $0x1a0] sm:$0xff] }
0x14cd   : > { %6040 = vmatprep.subr.mxu1 %v10152_v6  ;;  %5967 = vmatprep.subr.mxu0 %v5958_v20  ;;  %v5950_v6 = vld [vmem:[%s10671_s1 + $0x188] sm:$0xff] }
0x14ce   : > { %6041 = vmatpush1.msra.mxu1 %v10159_v3  ;;  %5968 = vmatpush1.msra.mxu0 %v5957_v63  ;;  %v5949_v3 = vld [vmem:[%s10671_s1 + $0x180] sm:$0xff] }
0x14cf   : > { %6042 = vmatprep.subr.mxu1 %v10166_v42  ;;  %5969 = vmatprep.subr.mxu0 %v5954_v44  ;;  %v5946_v42 = vld [vmem:[%s10671_s1 + $0x168] sm:$0xff] }
0x14d0   : > { %6043 = vmatpush1.msra.mxu1 %v10173_v14  ;;  %5970 = vmatpush1.msra.mxu0 %v5953_v21  ;;  %v5945_v14 = vld [vmem:[%s10671_s1 + $0x160] sm:$0xff] }
0x14d1   : > { %6044 = vmatprep.subr.mxu1 %v10180_v29  ;;  %5971 = vmatprep.subr.mxu0 %v5950_v6  ;;  %v5942_v29 = vld [vmem:[%s10671_s1 + $0x148] sm:$0xff] }
0x14d2   : > { %6045 = vmatpush1.msra.mxu1 %v10187_v54  ;;  %5972 = vmatpush1.msra.mxu0 %v5949_v3  ;;  %v5941_v54 = vld [vmem:[%s10671_s1 + $0x140] sm:$0xff] }
0x14d3   : > { %6046 = vmatprep.subr.mxu1 %v10194_v41  ;;  %5973 = vmatprep.subr.mxu0 %v5946_v42  ;;  %v5938_v41 = vld [vmem:[%s10671_s1 + $0x128] sm:$0xff] }
0x14d4   : > { %6047 = vmatpush1.msra.mxu1 %v10201_v46  ;;  %5974 = vmatpush1.msra.mxu0 %v5945_v14  ;;  %v5937_v46 = vld [vmem:[%s10671_s1 + $0x120] sm:$0xff] }
0x14d5   : > { %6048 = vmatprep.subr.mxu1 %v10208_v57  ;;  %5975 = vmatprep.subr.mxu0 %v5942_v29  ;;  %v5934_v57 = vld [vmem:[%s10671_s1 + $0x108] sm:$0xff]  ;;  %v6370_v29 = vld [vmem:[%s6758_s27 + $0x70] sm:$0xff] }
0x14d6   : > { %6049 = vmatpush1.msra.mxu1 %v10215_v4  ;;  %5976 = vmatpush1.msra.mxu0 %v5941_v54  ;;  %v5933_v4 = vld [vmem:[%s10671_s1 + $0x100] sm:$0xff]  ;;  %v5893_v54 = vunpack.c.l.bf16 %v6370_v29 }
0x14d7   : > { %6050 = vmatprep.subr.mxu1 %v10222_v31  ;;  %5977 = vmatprep.subr.mxu0 %v5938_v41  ;;  %v5930_v31 = vld [vmem:[%s10671_s1 + $0xe8] sm:$0xff]  ;;  %v5894_v41 = vunpack.c.h.bf16 %v6370_v29 }
0x14d8   : > { %6051 = vmatpush1.msra.mxu1 %v10229_v22  ;;  %5978 = vmatpush1.msra.mxu0 %v5937_v46  ;;  %v5929_v22 = vld [vmem:[%s10671_s1 + $0xe0] sm:$0xff]  ;;  %v6371_v46 = vld [vmem:[%s6758_s27 + $0x78] sm:$0xff] }
0x14d9   : > { %6052 = vmatprep.subr.mxu1 %v10236_v24  ;;  %5979 = vmatprep.subr.mxu0 %v5934_v57  ;;  %v5926_v24 = vld [vmem:[%s10671_s1 + $0xc8] sm:$0xff]  ;;  %v5897_v57 = vadd.f32 %v5893_v54, %v11366_v35 }
0x14da   : > { %6053 = vmatpush1.msra.mxu1 %v10241_v52  ;;  %5980 = vmatpush1.msra.mxu0 %v5933_v4  ;;  %v5925_v52 = vld [vmem:[%s10671_s1 + $0xc0] sm:$0xff]  ;;  %v5895_v4 = vunpack.c.l.bf16 %v6371_v46 }
0x14db   : > { %6054 = vmatprep.subr.mxu1 %v10246_v36  ;;  %5981 = vmatprep.subr.mxu0 %v5930_v31  ;;  %v5922_v36 = vld [vmem:[%s10671_s1 + $0xa8] sm:$0xff] }
0x14dc   : > { %6055 = vmatpush1.msra.mxu1 %v10253_v25  ;;  %5982 = vmatpush1.msra.mxu0 %v5929_v22  ;;  %v5921_v25 = vld [vmem:[%s10671_s1 + $0xa0] sm:$0xff] }
0x14dd   : > { %6056 = vmatprep.subr.mxu1 %v10260_v33  ;;  %5983 = vmatprep.subr.mxu0 %v5926_v24  ;;  %v5918_v33 = vld [vmem:[%s10671_s1 + $0x88] sm:$0xff] }
0x14de   : > { %6057 = vmatpush1.msra.mxu1 %v11342_v56  ;;  %5984 = vmatpush1.msra.mxu0 %v5925_v52  ;;  %v5914_v56 = vld [vmem:[%s10671_s1 + $0x68] sm:$0xff] }
0x14df   : > { %6058 = vmatprep.subr.mxu1 %v11344_v55  ;;  %5985 = vmatprep.subr.mxu0 %v5922_v36  ;;  %v5913_v55 = vld [vmem:[%s10671_s1 + $0x60] sm:$0xff]  ;;  %v5899_v36 = vadd.f32 %v5895_v4, %v11292_v39 }
0x14e0   : > { %6059 = vmatpush1.msra.mxu1 %v11346_v5  ;;  %5986 = vmatpush1.msra.mxu0 %v5921_v25  ;;  %v5910_v5 = vld [vmem:[%s10671_s1 + $0x48] sm:$0xff] }
0x14e1   : > { %6060 = vmatprep.subr.mxu1 %v11348_v45  ;;  %5987 = vmatprep.subr.mxu0 %v5918_v33  ;;  %v5909_v45 = vld [vmem:[%s10671_s1 + $0x40] sm:$0xff] }
0x14e2   : > { %6061 = vmatpush1.msra.mxu1 %v11350_v10  ;;  %5988 = vmatpush1.msra.mxu0 %v5917_v40  ;;  %v5906_v10 = vld [vmem:[%s10671_s1 + $0x28] sm:$0xff] }
0x14e3   : > { %6062 = vmatprep.subr.mxu1 %v11352_v47  ;;  %5989 = vmatprep.subr.mxu0 %v5914_v56  ;;  %v5905_v47 = vld [vmem:[%s10671_s1 + $0x20] sm:$0xff]  ;;  %v5896_v56 = vunpack.c.h.bf16 %v6371_v46 }
0x14e4   : > { %6063 = vmatpush1.msra.mxu1 %v11354_v60  ;;  %5990 = vmatpush1.msra.mxu0 %v5913_v55  ;;  %v5902_v60 = vld [vmem:[%s10671_s1 + $0x8] sm:$0xff] }
0x14e5   : > { %6064 = vmatprep.subr.mxu1 %v11356_v26  ;;  %5991 = vmatprep.subr.mxu0 %v5910_v5  ;;  %v5901_v26 = vld [vmem:[%s10671_s1] sm:$0xff]  ;;  %v5900_v5 = vadd.f32 %v5896_v56, %v11266_v53 }
0x14e6   : > { %6065 = vmatpush1.msra.mxu1 %v11358_v8  ;;  %5992 = vmatpush1.msra.mxu0 %v5909_v45  ;;  %v6367_v8 = vld [vmem:[%s6758_s27 + $0x60] sm:$0xff] }
0x14e7   : > { %6066 = vmatprep.subr.mxu1 %v11360_v23  ;;  %5993 = vmatprep.subr.mxu0 %v5906_v10  ;;  %v5651_v23 = vunpack.c.l.bf16 %v6367_v8  ;;  %v5652_v13 = vunpack.c.h.bf16 %v6367_v8 }
0x14e8   : > { %6067 = vmatpush1.msra.mxu1 %v11363_v18  ;;  %5994 = vmatpush1.msra.mxu0 %v5905_v47  ;;  %v6368_v18 = vld [vmem:[%s6758_s27 + $0x68] sm:$0xff] }
0x14e9   : > { %5995 = vmatprep.subr.mxu0 %v5902_v60  ;;  %v5655_v17 = vadd.f32 %v5651_v23, %v11366_v35  ;;  %v5653_v2 = vunpack.c.l.bf16 %v6368_v18  ;;  %v5656_v43 = vadd.f32 %v5652_v13, %v11367_v7  ;;  %v5654_v12 = vunpack.c.h.bf16 %v6368_v18 }
0x14ea   : > { %5996 = vmatpush1.msra.mxu0 %v5901_v26 }
0x14eb   : > { %v5657_v59 = vadd.f32 %v5653_v2, %v11292_v39  ;;  %v5658_v28 = vadd.f32 %v5654_v12, %v11266_v53 }
0x1589   : > { %v5789_v61 = vpop.f32.mrf.mxu0  ;;  %v5860_v27 = vpop.f32.mrf.mxu1 }
0x158a   : > { %v5865_v37 = vadd.f32 %v5789_v61, %v5655_v17  ;;  %v5867_v34 = vadd.f32 %v5860_v27, %v5657_v59 }
0x158b   : > { %v5791_v49 = vpop.f32.mrf.mxu0  ;;  %v5862_v32 = vpop.f32.mrf.mxu1 }
0x158c   : > { %v5869_v0 = vmul.f32 0.5, %v5865_v37  ;;  %v5866_v30 = vadd.f32 %v5791_v49, %v5656_v43  ;;  %v5868_v15 = vadd.f32 %v5862_v32, %v5658_v28 }
0x158e   : > { %6657 = vtanh.f32 %v5869_v0  ;;  %v5873_v51 = vmul.f32 0.5, %v5866_v30  ;;  %v5878_v50 = vmul.f32 0.5, %v5868_v15 }
0x1590   : > { %6659 = vtanh.f32 %v5873_v51 }
0x1591   : > { %6661 = vtanh.f32 %v5867_v34 }
0x1592   : > { %6663 = vtanh.f32 %v5878_v50 }
0x159b   : > { %v6658_v19 = vpop.eup %6657 }
0x159c   : > { %v5871_v38 = vmul.f32 0.5, %v6658_v19 }
0x159d   : > { %v6660_v9 = vpop.eup %6659 }
0x159e   : > { %v5872_v62 = vadd.f32 0.5, %v5871_v38  ;;  %v5875_v1 = vmul.f32 0.5, %v6660_v9  ;;  %v6662_v48 = vpop.eup %6661 }
0x159f   : > { %v6664_v44 = vpop.eup %6663 }
0x15a0   : > { %v5876_v11 = vadd.f32 0.5, %v5875_v1  ;;  %v5882_v16 = vmul.f32 %v6662_v48, %v5872_v62  ;;  %v5880_v21 = vmul.f32 0.5, %v6664_v44 }
0x15a2   : > { %v5883_v20 = vmul.f32 %v5876_v11, %v10508_v58  ;;  %v5881_v6 = vadd.f32 0.5, %v5880_v21  ;;  %v5898_v58 = vadd.f32 %v5894_v41, %v11367_v7 }
0x15a4   : > { %v5884_v63 = vadd.f32 %v5883_v20, %v5882_v16 }
0x15a6   : > { %6665 = vtanh.f32 %v5884_v63 }
0x15b3   : > { %v6666_v3 = vpop.eup %6665 }
0x15b4   : > { %v5886_v42 = vmul.f32 %v6666_v3, %v5881_v6 }
0x15b6   : > { %v5887_v14 = vpack.c.bf16 %v5886_v42, %v5886_v42  ;;  %6030 = vmatmul.mubr.f32.vlgmr.msra.gmra.mxu0 %v5886_v42  ;;  %6101 = vmatmul.mubr.f32.vlgmr.msra.gmra.mxu1 %v5886_v42 }
0x15b8   : > { %6369 = vst [vmem:[%s6763_s30 + $0x18] sm:$0xf] %v5887_v14 }
0x1676   : > { %v6031_v31 = vpop.f32.mrf.mxu0  ;;  %v6102_v33 = vpop.f32.mrf.mxu1 }
0x1677   : > { %v6107_v22 = vadd.f32 %v6031_v31, %v5897_v57  ;;  %v6109_v55 = vadd.f32 %v6102_v33, %v5899_v36 }
0x1678   : > { %v6033_v24 = vpop.f32.mrf.mxu0  ;;  %v6104_v45 = vpop.f32.mrf.mxu1 }
0x1679   : > { %v6111_v52 = vmul.f32 0.5, %v6107_v22  ;;  %v6108_v25 = vadd.f32 %v6033_v24, %v5898_v58  ;;  %v6110_v35 = vadd.f32 %v6104_v45, %v5900_v5 }
0x167b   : > { %6667 = vtanh.f32 %v6111_v52  ;;  %v6115_v40 = vmul.f32 0.5, %v6108_v25  ;;  %v6120_v10 = vmul.f32 0.5, %v6110_v35 }
0x167d   : > { %6669 = vtanh.f32 %v6115_v40 }
0x167e   : > { %6671 = vtanh.f32 %v6109_v55 }
0x167f   : > { %6673 = vtanh.f32 %v6120_v10 }
0x1688   : > { %v6668_v7 = vpop.eup %6667 }
0x1689   : > { %v6113_v47 = vmul.f32 0.5, %v6668_v7 }
0x168a   : > { %v6670_v60 = vpop.eup %6669 }
0x168b   : > { %v6114_v26 = vadd.f32 0.5, %v6113_v47  ;;  %v6117_v8 = vmul.f32 0.5, %v6670_v60  ;;  %v6672_v23 = vpop.eup %6671 }
0x168c   : > { %v6674_v53 = vpop.eup %6673 }
0x168d   : > { %v6118_v39 = vadd.f32 0.5, %v6117_v8  ;;  %v6124_v13 = vmul.f32 %v6672_v23, %v6114_v26  ;;  %v6122_v2 = vmul.f32 0.5, %v6674_v53 }
0x168f   : > { %v6125_v18 = vmul.f32 %v6118_v39, %v5884_v63  ;;  %v6123_v43 = vadd.f32 0.5, %v6122_v2 }
0x1691   : > { %v6126_v17 = vadd.f32 %v6125_v18, %v6124_v13 }
0x1693   : > { %6675 = vtanh.f32 %v6126_v17  ;;  %6133 = vst [vmem:[#allocation3] sm:$0xff] %v6126_v17  ;;  %6153 = vst [vmem:[%s10675_s5] sm:$0xff] %v6126_v17 }
0x16a0   : > { %v6676_v61 = vpop.eup %6675 }
0x16a1   : > { %v6128_v37 = vmul.f32 %v6676_v61, %v6123_v43 }
0x16a3   : > { %v6129_v49 = vpack.c.bf16 %v6128_v37, %v6128_v37  ;;  %6132 = vst [vmem:[#allocation2] sm:$0xff] %v6128_v37  ;;  %6151 = vst [vmem:[%s10674_s4] sm:$0xff] %v6128_v37 }
0x16a5   : > { %6372 = vst [vmem:[%s6763_s30 + $0x1c] sm:$0xf] %v6129_v49  ;;  %6406 = vst [vmem:[%s6763_s30 + $0x20] sm:$0xff] %v6129_v49  }
0x16a6   : > { %6407 = vst [vmem:[%s6763_s30 + $0x28] sm:$0xff] %v6129_v49   ;;  %6408 = vst [vmem:[%s6763_s30 + $0x30] sm:$0xff] %v6129_v49  }
0x16a7   : > { %6409 = vst [vmem:[%s6763_s30 + $0x38] sm:$0xff] %v6129_v49  }
0x16a8 PF: > { %s16_s20 = sadd.s32 1, %s6699_s20   ;;  %s11368_s18 = smov %s6695_s19 }
0x16a9   : > { %p13_p8 = scmp.ge.s32.totalorder %s16_s20, 4   ;;  %s11369_s19 = smov %s11371_s21 }
0x16ab   :  { %15 = sbr.rel (!%p13_p8) target bundleno = 2 (0x2), region = 150 }

</bundles_post_ra>
